<compile_context>
chip_gen: v5e
topology: v5e:2x2
jax: 0.10.0
libtpu: 0.0.40
codegen_flags: <defaults>
</compile_context>

<pallas_src>
from functools import partial

import numpy as np
import jax
import jax.numpy as jnp
from jax.experimental import pallas as pl
from jax.experimental.pallas import tpu as pltpu

IMG = 28           # input spatial size (28x28, single channel)
K = 5              # conv kernel size
C1, C1P = 6, 8     # conv1 out channels (padded to 8 sublanes)
C2, C2P = 12, 16   # conv2 out channels (padded to 16 sublanes)


def _shift_left(v, s):
    """v[:, l] <- v[:, (l + s) % n] for a static shift s >= 0 (cyclic)."""
    return v if s == 0 else jnp.roll(v, -s, axis=1)


def _lenet_kernel(x_ref, w1_ref, b1_ref, w2_ref, b2_ref, sel_ref,
                  wf1_ref, bf1_ref, wf2_ref, bf2_ref, wo_ref, bo_ref,
                  out_ref, cols2_ref, f_ref, *, batch):
    n = batch * IMG * IMG            # flattened lane width; lane = b*784 + y*28 + x
    f32 = jnp.float32

    # ---- conv1: 1 -> 6 channels, 5x5 valid, + bias + ReLU (VPU, 25 taps) ------
    x = x_ref[...]                   # (1, n)
    w1 = w1_ref[...]                 # (8, 25)  [c_out(padded), ky*5+kx]
    acc1 = jnp.zeros((C1P, n), f32)
    for ky in range(K):
        for kx in range(K):
            t = ky * K + kx
            acc1 = acc1 + w1[:, t:t + 1] * _shift_left(x, ky * IMG + kx)
    a1 = jnp.maximum(acc1 + b1_ref[...], 0.0)     # (8, n); valid where y,x in [0,24)

    # ---- maxpool 2x2/2: pooled (i,j) value lands at lane b*784 + 56*i + 2*j ---
    m1 = jnp.maximum(a1, _shift_left(a1, 1))
    p1 = jnp.maximum(m1, _shift_left(m1, IMG))

    # ---- conv2: 6 -> 12 channels, 5x5 valid, shifted im2col + one MXU matmul --
    for ky in range(K):
        for kx in range(K):
            t = ky * K + kx
            cols2_ref[t * C1P:(t + 1) * C1P, :] = _shift_left(
                p1, 2 * IMG * ky + 2 * kx)
    a2 = jnp.dot(w2_ref[...], cols2_ref[...], preferred_element_type=f32)
    a2 = jnp.maximum(a2 + b2_ref[...], 0.0)       # (16, n); valid at b*784+56y+2x

    # ---- maxpool 2x2/2: pooled (i,j) value lands at lane b*784 + 112*i + 4*j --
    m2 = jnp.maximum(a2, _shift_left(a2, 2))
    p2 = jnp.maximum(m2, _shift_left(m2, 2 * IMG))

    # ---- flatten in PyTorch NCHW (c, h, w) order into (batch, 192) ------------
    for b in range(batch):
        # gather the 16 pooled positions of image b: (16, n) @ (n, 16) -> (16, 16)
        p2b = jnp.dot(p2, sel_ref[b], preferred_element_type=f32)
        for c in range(C2):
            f_ref[b:b + 1, c * 16:(c + 1) * 16] = p2b[c:c + 1, :]

    # ---- fc1 -> fc2 -> out, fully VMEM-resident --------------------------------
    feats = f_ref[...]                                                 # (batch, 192)
    h = jnp.maximum(jnp.dot(feats, wf1_ref[...], preferred_element_type=f32)
                    + bf1_ref[...], 0.0)                               # (batch, 120)
    h = jnp.maximum(jnp.dot(h, wf2_ref[...], preferred_element_type=f32)
                    + bf2_ref[...], 0.0)                               # (batch, 60)
    out_ref[...] = (jnp.dot(h, wo_ref[...], preferred_element_type=f32)
                    + bo_ref[...])                                     # (batch, 10)


def _full_spec(shape):
    nd = len(shape)
    return pl.BlockSpec(shape, lambda i, _nd=nd: (0,) * _nd)


def _make_pool2_selector(batch):
    """(batch, batch*784, 16) 0/1 matrix; column i*4+j of image b picks the lane
    b*784 + 112*i + 4*j where pool2 leaves the (i, j) value."""
    n = batch * IMG * IMG
    sel = np.zeros((batch, n, 16), np.float32)
    for b in range(batch):
        for i in range(4):
            for j in range(4):
                sel[b, b * IMG * IMG + 4 * IMG * i + 4 * j, i * 4 + j] = 1.0
    return jnp.asarray(sel)


def init_params(key):
    """Deterministic synthetic weights with the PyTorch module's shapes."""
    ks = jax.random.split(key, 10)

    def u(k, shape, fan_in):
        bound = 1.0 / jnp.sqrt(jnp.float32(fan_in))
        return jax.random.uniform(k, shape, jnp.float32, -bound, bound)

    return dict(
        conv1_w=u(ks[0], (6, 1, 5, 5), 25),   conv1_b=u(ks[1], (6,), 25),
        conv2_w=u(ks[2], (12, 6, 5, 5), 150), conv2_b=u(ks[3], (12,), 150),
        fc1_w=u(ks[4], (120, 192), 192),      fc1_b=u(ks[5], (120,), 192),
        fc2_w=u(ks[6], (60, 120), 120),       fc2_b=u(ks[7], (60,), 120),
        out_w=u(ks[8], (10, 60), 60),         out_b=u(ks[9], (10,), 60),
    )


def pack_params(p):
    """Repack PyTorch-layout params into the kernel's padded layouts."""
    w1p = jnp.zeros((C1P, K * K), jnp.float32).at[:C1, :].set(
        p["conv1_w"].reshape(C1, K * K))
    b1p = jnp.zeros((C1P, 1), jnp.float32).at[:C1, 0].set(p["conv1_b"])

    # conv2 weight -> (16, 25*8) with column index t*8 + c_in (c_in padded to 8)
    w2t = jnp.zeros((C2, K * K, C1P), jnp.float32).at[:, :, :C1].set(
        jnp.transpose(p["conv2_w"], (0, 2, 3, 1)).reshape(C2, K * K, C1))
    w2p = jnp.zeros((C2P, K * K * C1P), jnp.float32).at[:C2, :].set(
        w2t.reshape(C2, K * K * C1P))
    b2p = jnp.zeros((C2P, 1), jnp.float32).at[:C2, 0].set(p["conv2_b"])

    return dict(
        w1p=w1p, b1p=b1p, w2p=w2p, b2p=b2p,
        wf1=p["fc1_w"].T, bf1=p["fc1_b"].reshape(1, -1),
        wf2=p["fc2_w"].T, bf2=p["fc2_b"].reshape(1, -1),
        wo=p["out_w"].T,  bo=p["out_b"].reshape(1, -1),
    )


def final_model_forward(x_nchw, packed, sel2):
    """finalModel.forward: NCHW float32 (B,1,28,28) -> (B,10), one pallas_call."""
    B = x_nchw.shape[0]
    n = B * IMG * IMG
    x_flat = x_nchw.reshape(1, n)            # lane index = b*784 + y*28 + x (C=1)

    args = (x_flat, packed["w1p"], packed["b1p"], packed["w2p"], packed["b2p"],
            sel2, packed["wf1"], packed["bf1"], packed["wf2"], packed["bf2"],
            packed["wo"], packed["bo"])

    return pl.pallas_call(
        partial(_lenet_kernel, batch=B),
        out_shape=jax.ShapeDtypeStruct((B, 10), jnp.float32),
        grid=(1,),
        in_specs=[_full_spec(a.shape) for a in args],
        out_specs=_full_spec((B, 10)),
        scratch_shapes=[
            pltpu.VMEM((K * K * C1P, n), jnp.float32),   # conv2 im2col columns
            pltpu.VMEM((B, C2 * 16), jnp.float32),       # flattened fc1 input
        ],
        compiler_params=pltpu.CompilerParams(
            dimension_semantics=("arbitrary",)),
    )(*args)


def reference_forward(x, p):
    """Pure-JAX reference (matches the PyTorch module)."""
    y = jax.lax.conv_general_dilated(
        x, p["conv1_w"], (1, 1), "VALID",
        dimension_numbers=("NCHW", "OIHW", "NCHW"))
    y = jnp.maximum(y + p["conv1_b"].reshape(1, -1, 1, 1), 0.0)
    y = jax.lax.reduce_window(y, -jnp.inf, jax.lax.max,
                              (1, 1, 2, 2), (1, 1, 2, 2), "VALID")
    y = jax.lax.conv_general_dilated(
        y, p["conv2_w"], (1, 1), "VALID",
        dimension_numbers=("NCHW", "OIHW", "NCHW"))
    y = jnp.maximum(y + p["conv2_b"].reshape(1, -1, 1, 1), 0.0)
    y = jax.lax.reduce_window(y, -jnp.inf, jax.lax.max,
                              (1, 1, 2, 2), (1, 1, 2, 2), "VALID")
    y = y.reshape(y.shape[0], -1)
    y = jnp.maximum(y @ p["fc1_w"].T + p["fc1_b"], 0.0)
    y = jnp.maximum(y @ p["fc2_w"].T + p["fc2_b"], 0.0)
    return y @ p["out_w"].T + p["out_b"]


if __name__ == "__main__":
    key = jax.random.PRNGKey(0)
    k_x, k_p = jax.random.split(key)
    # shapes implied by the module: fc1 expects 12*4*4 -> 28x28, 1 channel
    x = jax.random.normal(k_x, (2, 1, 28, 28), jnp.float32)
    params = init_params(k_p)
    packed = pack_params(params)
    sel2 = _make_pool2_selector(2)

    fwd = jax.jit(final_model_forward)
    out = jax.block_until_ready(fwd(x, packed, sel2))
    assert out.shape == (2, 10)

    ref = jax.block_until_ready(jax.jit(reference_forward)(x, params))
    np.testing.assert_allclose(np.asarray(out), np.asarray(ref),
                               rtol=5e-2, atol=5e-2)
    print("KERNEL_OK")
</pallas_src>

<mosaic_0001>
module attributes {stable_mosaic.version = 11 : i64} {
  func.func @_lenet_kernel(%arg0: i32, %arg1: memref<1x1568xf32, #tpu.memory_space<vmem>>, %arg2: memref<8x25xf32, #tpu.memory_space<vmem>>, %arg3: memref<8x1xf32, #tpu.memory_space<vmem>>, %arg4: memref<16x200xf32, #tpu.memory_space<vmem>>, %arg5: memref<16x1xf32, #tpu.memory_space<vmem>>, %arg6: memref<2x1568x16xf32, #tpu.memory_space<vmem>>, %arg7: memref<192x120xf32, #tpu.memory_space<vmem>>, %arg8: memref<1x120xf32, #tpu.memory_space<vmem>>, %arg9: memref<120x60xf32, #tpu.memory_space<vmem>>, %arg10: memref<1x60xf32, #tpu.memory_space<vmem>>, %arg11: memref<60x10xf32, #tpu.memory_space<vmem>>, %arg12: memref<1x10xf32, #tpu.memory_space<vmem>>, %arg13: memref<2x10xf32, #tpu.memory_space<vmem>>, %arg14: memref<200x1568xf32, #tpu.memory_space<vmem>>, %arg15: memref<2x192xf32, #tpu.memory_space<vmem>>) attributes {dimension_semantics = [#tpu.dimension_semantics<arbitrary>], iteration_bounds = array<i64: 1>, scalar_prefetch = 0 : i64, scratch_operands = 2 : i64, tpu.core_type = #tpu.core_type<tc>, window_params = [{pipeline_mode = #tpu.pipeline_mode<synchronous>, transform_indices = @transform_0, window_bounds = array<i64: 1, 1568>}, {pipeline_mode = #tpu.pipeline_mode<synchronous>, transform_indices = @transform_1, window_bounds = array<i64: 8, 25>}, {pipeline_mode = #tpu.pipeline_mode<synchronous>, transform_indices = @transform_2, window_bounds = array<i64: 8, 1>}, {pipeline_mode = #tpu.pipeline_mode<synchronous>, transform_indices = @transform_3, window_bounds = array<i64: 16, 200>}, {pipeline_mode = #tpu.pipeline_mode<synchronous>, transform_indices = @transform_4, window_bounds = array<i64: 16, 1>}, {pipeline_mode = #tpu.pipeline_mode<synchronous>, transform_indices = @transform_5, window_bounds = array<i64: 2, 1568, 16>}, {pipeline_mode = #tpu.pipeline_mode<synchronous>, transform_indices = @transform_6, window_bounds = array<i64: 192, 120>}, {pipeline_mode = #tpu.pipeline_mode<synchronous>, transform_indices = @transform_7, window_bounds = array<i64: 1, 120>}, {pipeline_mode = #tpu.pipeline_mode<synchronous>, transform_indices = @transform_8, window_bounds = array<i64: 120, 60>}, {pipeline_mode = #tpu.pipeline_mode<synchronous>, transform_indices = @transform_9, window_bounds = array<i64: 1, 60>}, {pipeline_mode = #tpu.pipeline_mode<synchronous>, transform_indices = @transform_10, window_bounds = array<i64: 60, 10>}, {pipeline_mode = #tpu.pipeline_mode<synchronous>, transform_indices = @transform_11, window_bounds = array<i64: 1, 10>}, {pipeline_mode = #tpu.pipeline_mode<synchronous>, transform_indices = @transform_12, window_bounds = array<i64: 2, 10>}]} {
    %c0 = arith.constant 0 : index
    %c0_0 = arith.constant 0 : index
    %0 = vector.load %arg1[%c0, %c0_0] : memref<1x1568xf32, #tpu.memory_space<vmem>>, vector<1x1568xf32>
    %c0_1 = arith.constant 0 : index
    %c0_2 = arith.constant 0 : index
    %1 = vector.load %arg2[%c0_1, %c0_2] : memref<8x25xf32, #tpu.memory_space<vmem>>, vector<8x25xf32>
    %cst = arith.constant 0.000000e+00 : f32
    %2 = vector.broadcast %cst : f32 to vector<8x1568xf32>
    %3 = vector.extract_strided_slice %1 {offsets = [0, 0], sizes = [8, 1], strides = [1, 1]} : vector<8x25xf32> to vector<8x1xf32>
    %4 = vector.broadcast %3 : vector<8x1xf32> to vector<8x1568xf32>
    %5 = vector.broadcast %0 : vector<1x1568xf32> to vector<8x1568xf32>
    %6 = arith.mulf %4, %5 : vector<8x1568xf32>
    %7 = arith.addf %2, %6 : vector<8x1568xf32>
    %8 = vector.extract_strided_slice %1 {offsets = [0, 1], sizes = [8, 1], strides = [1, 1]} : vector<8x25xf32> to vector<8x1xf32>
    %9 = vector.extract_strided_slice %0 {offsets = [0, 1], sizes = [1, 1567], strides = [1, 1]} : vector<1x1568xf32> to vector<1x1567xf32>
    %10 = vector.extract_strided_slice %0 {offsets = [0, 0], sizes = [1, 1], strides = [1, 1]} : vector<1x1568xf32> to vector<1x1xf32>
    %11 = tpu.concatenate %9, %10 in 1 : vector<1x1567xf32>, vector<1x1xf32> -> vector<1x1568xf32>
    %12 = vector.broadcast %8 : vector<8x1xf32> to vector<8x1568xf32>
    %13 = vector.broadcast %11 : vector<1x1568xf32> to vector<8x1568xf32>
    %14 = arith.mulf %12, %13 : vector<8x1568xf32>
    %15 = arith.addf %7, %14 : vector<8x1568xf32>
    %16 = vector.extract_strided_slice %1 {offsets = [0, 2], sizes = [8, 1], strides = [1, 1]} : vector<8x25xf32> to vector<8x1xf32>
    %17 = vector.extract_strided_slice %0 {offsets = [0, 2], sizes = [1, 1566], strides = [1, 1]} : vector<1x1568xf32> to vector<1x1566xf32>
    %18 = vector.extract_strided_slice %0 {offsets = [0, 0], sizes = [1, 2], strides = [1, 1]} : vector<1x1568xf32> to vector<1x2xf32>
    %19 = tpu.concatenate %17, %18 in 1 : vector<1x1566xf32>, vector<1x2xf32> -> vector<1x1568xf32>
    %20 = vector.broadcast %16 : vector<8x1xf32> to vector<8x1568xf32>
    %21 = vector.broadcast %19 : vector<1x1568xf32> to vector<8x1568xf32>
    %22 = arith.mulf %20, %21 : vector<8x1568xf32>
    %23 = arith.addf %15, %22 : vector<8x1568xf32>
    %24 = vector.extract_strided_slice %1 {offsets = [0, 3], sizes = [8, 1], strides = [1, 1]} : vector<8x25xf32> to vector<8x1xf32>
    %25 = vector.extract_strided_slice %0 {offsets = [0, 3], sizes = [1, 1565], strides = [1, 1]} : vector<1x1568xf32> to vector<1x1565xf32>
    %26 = vector.extract_strided_slice %0 {offsets = [0, 0], sizes = [1, 3], strides = [1, 1]} : vector<1x1568xf32> to vector<1x3xf32>
    %27 = tpu.concatenate %25, %26 in 1 : vector<1x1565xf32>, vector<1x3xf32> -> vector<1x1568xf32>
    %28 = vector.broadcast %24 : vector<8x1xf32> to vector<8x1568xf32>
    %29 = vector.broadcast %27 : vector<1x1568xf32> to vector<8x1568xf32>
    %30 = arith.mulf %28, %29 : vector<8x1568xf32>
    %31 = arith.addf %23, %30 : vector<8x1568xf32>
    %32 = vector.extract_strided_slice %1 {offsets = [0, 4], sizes = [8, 1], strides = [1, 1]} : vector<8x25xf32> to vector<8x1xf32>
    %33 = vector.extract_strided_slice %0 {offsets = [0, 4], sizes = [1, 1564], strides = [1, 1]} : vector<1x1568xf32> to vector<1x1564xf32>
    %34 = vector.extract_strided_slice %0 {offsets = [0, 0], sizes = [1, 4], strides = [1, 1]} : vector<1x1568xf32> to vector<1x4xf32>
    %35 = tpu.concatenate %33, %34 in 1 : vector<1x1564xf32>, vector<1x4xf32> -> vector<1x1568xf32>
    %36 = vector.broadcast %32 : vector<8x1xf32> to vector<8x1568xf32>
    %37 = vector.broadcast %35 : vector<1x1568xf32> to vector<8x1568xf32>
    %38 = arith.mulf %36, %37 : vector<8x1568xf32>
    %39 = arith.addf %31, %38 : vector<8x1568xf32>
    %40 = vector.extract_strided_slice %1 {offsets = [0, 5], sizes = [8, 1], strides = [1, 1]} : vector<8x25xf32> to vector<8x1xf32>
    %41 = vector.extract_strided_slice %0 {offsets = [0, 28], sizes = [1, 1540], strides = [1, 1]} : vector<1x1568xf32> to vector<1x1540xf32>
    %42 = vector.extract_strided_slice %0 {offsets = [0, 0], sizes = [1, 28], strides = [1, 1]} : vector<1x1568xf32> to vector<1x28xf32>
    %43 = tpu.concatenate %41, %42 in 1 : vector<1x1540xf32>, vector<1x28xf32> -> vector<1x1568xf32>
    %44 = vector.broadcast %40 : vector<8x1xf32> to vector<8x1568xf32>
    %45 = vector.broadcast %43 : vector<1x1568xf32> to vector<8x1568xf32>
    %46 = arith.mulf %44, %45 : vector<8x1568xf32>
    %47 = arith.addf %39, %46 : vector<8x1568xf32>
    %48 = vector.extract_strided_slice %1 {offsets = [0, 6], sizes = [8, 1], strides = [1, 1]} : vector<8x25xf32> to vector<8x1xf32>
    %49 = vector.extract_strided_slice %0 {offsets = [0, 29], sizes = [1, 1539], strides = [1, 1]} : vector<1x1568xf32> to vector<1x1539xf32>
    %50 = vector.extract_strided_slice %0 {offsets = [0, 0], sizes = [1, 29], strides = [1, 1]} : vector<1x1568xf32> to vector<1x29xf32>
    %51 = tpu.concatenate %49, %50 in 1 : vector<1x1539xf32>, vector<1x29xf32> -> vector<1x1568xf32>
    %52 = vector.broadcast %48 : vector<8x1xf32> to vector<8x1568xf32>
    %53 = vector.broadcast %51 : vector<1x1568xf32> to vector<8x1568xf32>
    %54 = arith.mulf %52, %53 : vector<8x1568xf32>
    %55 = arith.addf %47, %54 : vector<8x1568xf32>
    %56 = vector.extract_strided_slice %1 {offsets = [0, 7], sizes = [8, 1], strides = [1, 1]} : vector<8x25xf32> to vector<8x1xf32>
    %57 = vector.extract_strided_slice %0 {offsets = [0, 30], sizes = [1, 1538], strides = [1, 1]} : vector<1x1568xf32> to vector<1x1538xf32>
    %58 = vector.extract_strided_slice %0 {offsets = [0, 0], sizes = [1, 30], strides = [1, 1]} : vector<1x1568xf32> to vector<1x30xf32>
    %59 = tpu.concatenate %57, %58 in 1 : vector<1x1538xf32>, vector<1x30xf32> -> vector<1x1568xf32>
    %60 = vector.broadcast %56 : vector<8x1xf32> to vector<8x1568xf32>
    %61 = vector.broadcast %59 : vector<1x1568xf32> to vector<8x1568xf32>
    %62 = arith.mulf %60, %61 : vector<8x1568xf32>
    %63 = arith.addf %55, %62 : vector<8x1568xf32>
    %64 = vector.extract_strided_slice %1 {offsets = [0, 8], sizes = [8, 1], strides = [1, 1]} : vector<8x25xf32> to vector<8x1xf32>
    %65 = vector.extract_strided_slice %0 {offsets = [0, 31], sizes = [1, 1537], strides = [1, 1]} : vector<1x1568xf32> to vector<1x1537xf32>
    %66 = vector.extract_strided_slice %0 {offsets = [0, 0], sizes = [1, 31], strides = [1, 1]} : vector<1x1568xf32> to vector<1x31xf32>
    %67 = tpu.concatenate %65, %66 in 1 : vector<1x1537xf32>, vector<1x31xf32> -> vector<1x1568xf32>
    %68 = vector.broadcast %64 : vector<8x1xf32> to vector<8x1568xf32>
    %69 = vector.broadcast %67 : vector<1x1568xf32> to vector<8x1568xf32>
    %70 = arith.mulf %68, %69 : vector<8x1568xf32>
    %71 = arith.addf %63, %70 : vector<8x1568xf32>
    %72 = vector.extract_strided_slice %1 {offsets = [0, 9], sizes = [8, 1], strides = [1, 1]} : vector<8x25xf32> to vector<8x1xf32>
    %73 = vector.extract_strided_slice %0 {offsets = [0, 32], sizes = [1, 1536], strides = [1, 1]} : vector<1x1568xf32> to vector<1x1536xf32>
    %74 = vector.extract_strided_slice %0 {offsets = [0, 0], sizes = [1, 32], strides = [1, 1]} : vector<1x1568xf32> to vector<1x32xf32>
    %75 = tpu.concatenate %73, %74 in 1 : vector<1x1536xf32>, vector<1x32xf32> -> vector<1x1568xf32>
    %76 = vector.broadcast %72 : vector<8x1xf32> to vector<8x1568xf32>
    %77 = vector.broadcast %75 : vector<1x1568xf32> to vector<8x1568xf32>
    %78 = arith.mulf %76, %77 : vector<8x1568xf32>
    %79 = arith.addf %71, %78 : vector<8x1568xf32>
    %80 = vector.extract_strided_slice %1 {offsets = [0, 10], sizes = [8, 1], strides = [1, 1]} : vector<8x25xf32> to vector<8x1xf32>
    %81 = vector.extract_strided_slice %0 {offsets = [0, 56], sizes = [1, 1512], strides = [1, 1]} : vector<1x1568xf32> to vector<1x1512xf32>
    %82 = vector.extract_strided_slice %0 {offsets = [0, 0], sizes = [1, 56], strides = [1, 1]} : vector<1x1568xf32> to vector<1x56xf32>
    %83 = tpu.concatenate %81, %82 in 1 : vector<1x1512xf32>, vector<1x56xf32> -> vector<1x1568xf32>
    %84 = vector.broadcast %80 : vector<8x1xf32> to vector<8x1568xf32>
    %85 = vector.broadcast %83 : vector<1x1568xf32> to vector<8x1568xf32>
    %86 = arith.mulf %84, %85 : vector<8x1568xf32>
    %87 = arith.addf %79, %86 : vector<8x1568xf32>
    %88 = vector.extract_strided_slice %1 {offsets = [0, 11], sizes = [8, 1], strides = [1, 1]} : vector<8x25xf32> to vector<8x1xf32>
    %89 = vector.extract_strided_slice %0 {offsets = [0, 57], sizes = [1, 1511], strides = [1, 1]} : vector<1x1568xf32> to vector<1x1511xf32>
    %90 = vector.extract_strided_slice %0 {offsets = [0, 0], sizes = [1, 57], strides = [1, 1]} : vector<1x1568xf32> to vector<1x57xf32>
    %91 = tpu.concatenate %89, %90 in 1 : vector<1x1511xf32>, vector<1x57xf32> -> vector<1x1568xf32>
    %92 = vector.broadcast %88 : vector<8x1xf32> to vector<8x1568xf32>
    %93 = vector.broadcast %91 : vector<1x1568xf32> to vector<8x1568xf32>
    %94 = arith.mulf %92, %93 : vector<8x1568xf32>
    %95 = arith.addf %87, %94 : vector<8x1568xf32>
    %96 = vector.extract_strided_slice %1 {offsets = [0, 12], sizes = [8, 1], strides = [1, 1]} : vector<8x25xf32> to vector<8x1xf32>
    %97 = vector.extract_strided_slice %0 {offsets = [0, 58], sizes = [1, 1510], strides = [1, 1]} : vector<1x1568xf32> to vector<1x1510xf32>
    %98 = vector.extract_strided_slice %0 {offsets = [0, 0], sizes = [1, 58], strides = [1, 1]} : vector<1x1568xf32> to vector<1x58xf32>
    %99 = tpu.concatenate %97, %98 in 1 : vector<1x1510xf32>, vector<1x58xf32> -> vector<1x1568xf32>
    %100 = vector.broadcast %96 : vector<8x1xf32> to vector<8x1568xf32>
    %101 = vector.broadcast %99 : vector<1x1568xf32> to vector<8x1568xf32>
    %102 = arith.mulf %100, %101 : vector<8x1568xf32>
    %103 = arith.addf %95, %102 : vector<8x1568xf32>
    %104 = vector.extract_strided_slice %1 {offsets = [0, 13], sizes = [8, 1], strides = [1, 1]} : vector<8x25xf32> to vector<8x1xf32>
    %105 = vector.extract_strided_slice %0 {offsets = [0, 59], sizes = [1, 1509], strides = [1, 1]} : vector<1x1568xf32> to vector<1x1509xf32>
    %106 = vector.extract_strided_slice %0 {offsets = [0, 0], sizes = [1, 59], strides = [1, 1]} : vector<1x1568xf32> to vector<1x59xf32>
    %107 = tpu.concatenate %105, %106 in 1 : vector<1x1509xf32>, vector<1x59xf32> -> vector<1x1568xf32>
    %108 = vector.broadcast %104 : vector<8x1xf32> to vector<8x1568xf32>
    %109 = vector.broadcast %107 : vector<1x1568xf32> to vector<8x1568xf32>
    %110 = arith.mulf %108, %109 : vector<8x1568xf32>
    %111 = arith.addf %103, %110 : vector<8x1568xf32>
    %112 = vector.extract_strided_slice %1 {offsets = [0, 14], sizes = [8, 1], strides = [1, 1]} : vector<8x25xf32> to vector<8x1xf32>
    %113 = vector.extract_strided_slice %0 {offsets = [0, 60], sizes = [1, 1508], strides = [1, 1]} : vector<1x1568xf32> to vector<1x1508xf32>
    %114 = vector.extract_strided_slice %0 {offsets = [0, 0], sizes = [1, 60], strides = [1, 1]} : vector<1x1568xf32> to vector<1x60xf32>
    %115 = tpu.concatenate %113, %114 in 1 : vector<1x1508xf32>, vector<1x60xf32> -> vector<1x1568xf32>
    %116 = vector.broadcast %112 : vector<8x1xf32> to vector<8x1568xf32>
    %117 = vector.broadcast %115 : vector<1x1568xf32> to vector<8x1568xf32>
    %118 = arith.mulf %116, %117 : vector<8x1568xf32>
    %119 = arith.addf %111, %118 : vector<8x1568xf32>
    %120 = vector.extract_strided_slice %1 {offsets = [0, 15], sizes = [8, 1], strides = [1, 1]} : vector<8x25xf32> to vector<8x1xf32>
    %121 = vector.extract_strided_slice %0 {offsets = [0, 84], sizes = [1, 1484], strides = [1, 1]} : vector<1x1568xf32> to vector<1x1484xf32>
    %122 = vector.extract_strided_slice %0 {offsets = [0, 0], sizes = [1, 84], strides = [1, 1]} : vector<1x1568xf32> to vector<1x84xf32>
    %123 = tpu.concatenate %121, %122 in 1 : vector<1x1484xf32>, vector<1x84xf32> -> vector<1x1568xf32>
    %124 = vector.broadcast %120 : vector<8x1xf32> to vector<8x1568xf32>
    %125 = vector.broadcast %123 : vector<1x1568xf32> to vector<8x1568xf32>
    %126 = arith.mulf %124, %125 : vector<8x1568xf32>
    %127 = arith.addf %119, %126 : vector<8x1568xf32>
    %128 = vector.extract_strided_slice %1 {offsets = [0, 16], sizes = [8, 1], strides = [1, 1]} : vector<8x25xf32> to vector<8x1xf32>
    %129 = vector.extract_strided_slice %0 {offsets = [0, 85], sizes = [1, 1483], strides = [1, 1]} : vector<1x1568xf32> to vector<1x1483xf32>
    %130 = vector.extract_strided_slice %0 {offsets = [0, 0], sizes = [1, 85], strides = [1, 1]} : vector<1x1568xf32> to vector<1x85xf32>
    %131 = tpu.concatenate %129, %130 in 1 : vector<1x1483xf32>, vector<1x85xf32> -> vector<1x1568xf32>
    %132 = vector.broadcast %128 : vector<8x1xf32> to vector<8x1568xf32>
    %133 = vector.broadcast %131 : vector<1x1568xf32> to vector<8x1568xf32>
    %134 = arith.mulf %132, %133 : vector<8x1568xf32>
    %135 = arith.addf %127, %134 : vector<8x1568xf32>
    %136 = vector.extract_strided_slice %1 {offsets = [0, 17], sizes = [8, 1], strides = [1, 1]} : vector<8x25xf32> to vector<8x1xf32>
    %137 = vector.extract_strided_slice %0 {offsets = [0, 86], sizes = [1, 1482], strides = [1, 1]} : vector<1x1568xf32> to vector<1x1482xf32>
    %138 = vector.extract_strided_slice %0 {offsets = [0, 0], sizes = [1, 86], strides = [1, 1]} : vector<1x1568xf32> to vector<1x86xf32>
    %139 = tpu.concatenate %137, %138 in 1 : vector<1x1482xf32>, vector<1x86xf32> -> vector<1x1568xf32>
    %140 = vector.broadcast %136 : vector<8x1xf32> to vector<8x1568xf32>
    %141 = vector.broadcast %139 : vector<1x1568xf32> to vector<8x1568xf32>
    %142 = arith.mulf %140, %141 : vector<8x1568xf32>
    %143 = arith.addf %135, %142 : vector<8x1568xf32>
    %144 = vector.extract_strided_slice %1 {offsets = [0, 18], sizes = [8, 1], strides = [1, 1]} : vector<8x25xf32> to vector<8x1xf32>
    %145 = vector.extract_strided_slice %0 {offsets = [0, 87], sizes = [1, 1481], strides = [1, 1]} : vector<1x1568xf32> to vector<1x1481xf32>
    %146 = vector.extract_strided_slice %0 {offsets = [0, 0], sizes = [1, 87], strides = [1, 1]} : vector<1x1568xf32> to vector<1x87xf32>
    %147 = tpu.concatenate %145, %146 in 1 : vector<1x1481xf32>, vector<1x87xf32> -> vector<1x1568xf32>
    %148 = vector.broadcast %144 : vector<8x1xf32> to vector<8x1568xf32>
    %149 = vector.broadcast %147 : vector<1x1568xf32> to vector<8x1568xf32>
    %150 = arith.mulf %148, %149 : vector<8x1568xf32>
    %151 = arith.addf %143, %150 : vector<8x1568xf32>
    %152 = vector.extract_strided_slice %1 {offsets = [0, 19], sizes = [8, 1], strides = [1, 1]} : vector<8x25xf32> to vector<8x1xf32>
    %153 = vector.extract_strided_slice %0 {offsets = [0, 88], sizes = [1, 1480], strides = [1, 1]} : vector<1x1568xf32> to vector<1x1480xf32>
    %154 = vector.extract_strided_slice %0 {offsets = [0, 0], sizes = [1, 88], strides = [1, 1]} : vector<1x1568xf32> to vector<1x88xf32>
    %155 = tpu.concatenate %153, %154 in 1 : vector<1x1480xf32>, vector<1x88xf32> -> vector<1x1568xf32>
    %156 = vector.broadcast %152 : vector<8x1xf32> to vector<8x1568xf32>
    %157 = vector.broadcast %155 : vector<1x1568xf32> to vector<8x1568xf32>
    %158 = arith.mulf %156, %157 : vector<8x1568xf32>
    %159 = arith.addf %151, %158 : vector<8x1568xf32>
    %160 = vector.extract_strided_slice %1 {offsets = [0, 20], sizes = [8, 1], strides = [1, 1]} : vector<8x25xf32> to vector<8x1xf32>
    %161 = vector.extract_strided_slice %0 {offsets = [0, 112], sizes = [1, 1456], strides = [1, 1]} : vector<1x1568xf32> to vector<1x1456xf32>
    %162 = vector.extract_strided_slice %0 {offsets = [0, 0], sizes = [1, 112], strides = [1, 1]} : vector<1x1568xf32> to vector<1x112xf32>
    %163 = tpu.concatenate %161, %162 in 1 : vector<1x1456xf32>, vector<1x112xf32> -> vector<1x1568xf32>
    %164 = vector.broadcast %160 : vector<8x1xf32> to vector<8x1568xf32>
    %165 = vector.broadcast %163 : vector<1x1568xf32> to vector<8x1568xf32>
    %166 = arith.mulf %164, %165 : vector<8x1568xf32>
    %167 = arith.addf %159, %166 : vector<8x1568xf32>
    %168 = vector.extract_strided_slice %1 {offsets = [0, 21], sizes = [8, 1], strides = [1, 1]} : vector<8x25xf32> to vector<8x1xf32>
    %169 = vector.extract_strided_slice %0 {offsets = [0, 113], sizes = [1, 1455], strides = [1, 1]} : vector<1x1568xf32> to vector<1x1455xf32>
    %170 = vector.extract_strided_slice %0 {offsets = [0, 0], sizes = [1, 113], strides = [1, 1]} : vector<1x1568xf32> to vector<1x113xf32>
    %171 = tpu.concatenate %169, %170 in 1 : vector<1x1455xf32>, vector<1x113xf32> -> vector<1x1568xf32>
    %172 = vector.broadcast %168 : vector<8x1xf32> to vector<8x1568xf32>
    %173 = vector.broadcast %171 : vector<1x1568xf32> to vector<8x1568xf32>
    %174 = arith.mulf %172, %173 : vector<8x1568xf32>
    %175 = arith.addf %167, %174 : vector<8x1568xf32>
    %176 = vector.extract_strided_slice %1 {offsets = [0, 22], sizes = [8, 1], strides = [1, 1]} : vector<8x25xf32> to vector<8x1xf32>
    %177 = vector.extract_strided_slice %0 {offsets = [0, 114], sizes = [1, 1454], strides = [1, 1]} : vector<1x1568xf32> to vector<1x1454xf32>
    %178 = vector.extract_strided_slice %0 {offsets = [0, 0], sizes = [1, 114], strides = [1, 1]} : vector<1x1568xf32> to vector<1x114xf32>
    %179 = tpu.concatenate %177, %178 in 1 : vector<1x1454xf32>, vector<1x114xf32> -> vector<1x1568xf32>
    %180 = vector.broadcast %176 : vector<8x1xf32> to vector<8x1568xf32>
    %181 = vector.broadcast %179 : vector<1x1568xf32> to vector<8x1568xf32>
    %182 = arith.mulf %180, %181 : vector<8x1568xf32>
    %183 = arith.addf %175, %182 : vector<8x1568xf32>
    %184 = vector.extract_strided_slice %1 {offsets = [0, 23], sizes = [8, 1], strides = [1, 1]} : vector<8x25xf32> to vector<8x1xf32>
    %185 = vector.extract_strided_slice %0 {offsets = [0, 115], sizes = [1, 1453], strides = [1, 1]} : vector<1x1568xf32> to vector<1x1453xf32>
    %186 = vector.extract_strided_slice %0 {offsets = [0, 0], sizes = [1, 115], strides = [1, 1]} : vector<1x1568xf32> to vector<1x115xf32>
    %187 = tpu.concatenate %185, %186 in 1 : vector<1x1453xf32>, vector<1x115xf32> -> vector<1x1568xf32>
    %188 = vector.broadcast %184 : vector<8x1xf32> to vector<8x1568xf32>
    %189 = vector.broadcast %187 : vector<1x1568xf32> to vector<8x1568xf32>
    %190 = arith.mulf %188, %189 : vector<8x1568xf32>
    %191 = arith.addf %183, %190 : vector<8x1568xf32>
    %192 = vector.extract_strided_slice %1 {offsets = [0, 24], sizes = [8, 1], strides = [1, 1]} : vector<8x25xf32> to vector<8x1xf32>
    %193 = vector.extract_strided_slice %0 {offsets = [0, 116], sizes = [1, 1452], strides = [1, 1]} : vector<1x1568xf32> to vector<1x1452xf32>
    %194 = vector.extract_strided_slice %0 {offsets = [0, 0], sizes = [1, 116], strides = [1, 1]} : vector<1x1568xf32> to vector<1x116xf32>
    %195 = tpu.concatenate %193, %194 in 1 : vector<1x1452xf32>, vector<1x116xf32> -> vector<1x1568xf32>
    %196 = vector.broadcast %192 : vector<8x1xf32> to vector<8x1568xf32>
    %197 = vector.broadcast %195 : vector<1x1568xf32> to vector<8x1568xf32>
    %198 = arith.mulf %196, %197 : vector<8x1568xf32>
    %199 = arith.addf %191, %198 : vector<8x1568xf32>
    %c0_3 = arith.constant 0 : index
    %c0_4 = arith.constant 0 : index
    %200 = vector.load %arg3[%c0_3, %c0_4] : memref<8x1xf32, #tpu.memory_space<vmem>>, vector<8x1xf32>
    %201 = vector.broadcast %200 : vector<8x1xf32> to vector<8x1568xf32>
    %202 = arith.addf %199, %201 : vector<8x1568xf32>
    %cst_5 = arith.constant 0.000000e+00 : f32
    %203 = vector.broadcast %cst_5 : f32 to vector<8x1568xf32>
    %204 = arith.maximumf %202, %203 : vector<8x1568xf32>
    %205 = vector.extract_strided_slice %204 {offsets = [0, 1], sizes = [8, 1567], strides = [1, 1]} : vector<8x1568xf32> to vector<8x1567xf32>
    %206 = vector.extract_strided_slice %204 {offsets = [0, 0], sizes = [8, 1], strides = [1, 1]} : vector<8x1568xf32> to vector<8x1xf32>
    %207 = tpu.concatenate %205, %206 in 1 : vector<8x1567xf32>, vector<8x1xf32> -> vector<8x1568xf32>
    %208 = arith.maximumf %204, %207 : vector<8x1568xf32>
    %209 = vector.extract_strided_slice %208 {offsets = [0, 28], sizes = [8, 1540], strides = [1, 1]} : vector<8x1568xf32> to vector<8x1540xf32>
    %210 = vector.extract_strided_slice %208 {offsets = [0, 0], sizes = [8, 28], strides = [1, 1]} : vector<8x1568xf32> to vector<8x28xf32>
    %211 = tpu.concatenate %209, %210 in 1 : vector<8x1540xf32>, vector<8x28xf32> -> vector<8x1568xf32>
    %212 = arith.maximumf %208, %211 : vector<8x1568xf32>
    %c0_6 = arith.constant 0 : index
    %c0_7 = arith.constant 0 : index
    %213 = vector.load %arg14[%c0_6, %c0_7] : memref<200x1568xf32, #tpu.memory_space<vmem>>, vector<8x1568xf32>
    tpu.vector_store %arg14[%c0_6, %c0_7], %212 {strides = array<i32>} : memref<200x1568xf32, #tpu.memory_space<vmem>>, vector<8x1568xf32>,
    %214 = vector.extract_strided_slice %212 {offsets = [0, 2], sizes = [8, 1566], strides = [1, 1]} : vector<8x1568xf32> to vector<8x1566xf32>
    %215 = vector.extract_strided_slice %212 {offsets = [0, 0], sizes = [8, 2], strides = [1, 1]} : vector<8x1568xf32> to vector<8x2xf32>
    %216 = tpu.concatenate %214, %215 in 1 : vector<8x1566xf32>, vector<8x2xf32> -> vector<8x1568xf32>
    %c8 = arith.constant 8 : index
    %c0_8 = arith.constant 0 : index
    %217 = vector.load %arg14[%c8, %c0_8] : memref<200x1568xf32, #tpu.memory_space<vmem>>, vector<8x1568xf32>
    tpu.vector_store %arg14[%c8, %c0_8], %216 {strides = array<i32>} : memref<200x1568xf32, #tpu.memory_space<vmem>>, vector<8x1568xf32>,
    %218 = vector.extract_strided_slice %212 {offsets = [0, 4], sizes = [8, 1564], strides = [1, 1]} : vector<8x1568xf32> to vector<8x1564xf32>
    %219 = vector.extract_strided_slice %212 {offsets = [0, 0], sizes = [8, 4], strides = [1, 1]} : vector<8x1568xf32> to vector<8x4xf32>
    %220 = tpu.concatenate %218, %219 in 1 : vector<8x1564xf32>, vector<8x4xf32> -> vector<8x1568xf32>
    %c16 = arith.constant 16 : index
    %c0_9 = arith.constant 0 : index
    %221 = vector.load %arg14[%c16, %c0_9] : memref<200x1568xf32, #tpu.memory_space<vmem>>, vector<8x1568xf32>
    tpu.vector_store %arg14[%c16, %c0_9], %220 {strides = array<i32>} : memref<200x1568xf32, #tpu.memory_space<vmem>>, vector<8x1568xf32>,
    %222 = vector.extract_strided_slice %212 {offsets = [0, 6], sizes = [8, 1562], strides = [1, 1]} : vector<8x1568xf32> to vector<8x1562xf32>
    %223 = vector.extract_strided_slice %212 {offsets = [0, 0], sizes = [8, 6], strides = [1, 1]} : vector<8x1568xf32> to vector<8x6xf32>
    %224 = tpu.concatenate %222, %223 in 1 : vector<8x1562xf32>, vector<8x6xf32> -> vector<8x1568xf32>
    %c24 = arith.constant 24 : index
    %c0_10 = arith.constant 0 : index
    %225 = vector.load %arg14[%c24, %c0_10] : memref<200x1568xf32, #tpu.memory_space<vmem>>, vector<8x1568xf32>
    tpu.vector_store %arg14[%c24, %c0_10], %224 {strides = array<i32>} : memref<200x1568xf32, #tpu.memory_space<vmem>>, vector<8x1568xf32>,
    %226 = vector.extract_strided_slice %212 {offsets = [0, 8], sizes = [8, 1560], strides = [1, 1]} : vector<8x1568xf32> to vector<8x1560xf32>
    %227 = vector.extract_strided_slice %212 {offsets = [0, 0], sizes = [8, 8], strides = [1, 1]} : vector<8x1568xf32> to vector<8x8xf32>
    %228 = tpu.concatenate %226, %227 in 1 : vector<8x1560xf32>, vector<8x8xf32> -> vector<8x1568xf32>
    %c32 = arith.constant 32 : index
    %c0_11 = arith.constant 0 : index
    %229 = vector.load %arg14[%c32, %c0_11] : memref<200x1568xf32, #tpu.memory_space<vmem>>, vector<8x1568xf32>
    tpu.vector_store %arg14[%c32, %c0_11], %228 {strides = array<i32>} : memref<200x1568xf32, #tpu.memory_space<vmem>>, vector<8x1568xf32>,
    %230 = vector.extract_strided_slice %212 {offsets = [0, 56], sizes = [8, 1512], strides = [1, 1]} : vector<8x1568xf32> to vector<8x1512xf32>
    %231 = vector.extract_strided_slice %212 {offsets = [0, 0], sizes = [8, 56], strides = [1, 1]} : vector<8x1568xf32> to vector<8x56xf32>
    %232 = tpu.concatenate %230, %231 in 1 : vector<8x1512xf32>, vector<8x56xf32> -> vector<8x1568xf32>
    %c40 = arith.constant 40 : index
    %c0_12 = arith.constant 0 : index
    %233 = vector.load %arg14[%c40, %c0_12] : memref<200x1568xf32, #tpu.memory_space<vmem>>, vector<8x1568xf32>
    tpu.vector_store %arg14[%c40, %c0_12], %232 {strides = array<i32>} : memref<200x1568xf32, #tpu.memory_space<vmem>>, vector<8x1568xf32>,
    %234 = vector.extract_strided_slice %212 {offsets = [0, 58], sizes = [8, 1510], strides = [1, 1]} : vector<8x1568xf32> to vector<8x1510xf32>
    %235 = vector.extract_strided_slice %212 {offsets = [0, 0], sizes = [8, 58], strides = [1, 1]} : vector<8x1568xf32> to vector<8x58xf32>
    %236 = tpu.concatenate %234, %235 in 1 : vector<8x1510xf32>, vector<8x58xf32> -> vector<8x1568xf32>
    %c48 = arith.constant 48 : index
    %c0_13 = arith.constant 0 : index
    %237 = vector.load %arg14[%c48, %c0_13] : memref<200x1568xf32, #tpu.memory_space<vmem>>, vector<8x1568xf32>
    tpu.vector_store %arg14[%c48, %c0_13], %236 {strides = array<i32>} : memref<200x1568xf32, #tpu.memory_space<vmem>>, vector<8x1568xf32>,
    %238 = vector.extract_strided_slice %212 {offsets = [0, 60], sizes = [8, 1508], strides = [1, 1]} : vector<8x1568xf32> to vector<8x1508xf32>
    %239 = vector.extract_strided_slice %212 {offsets = [0, 0], sizes = [8, 60], strides = [1, 1]} : vector<8x1568xf32> to vector<8x60xf32>
    %240 = tpu.concatenate %238, %239 in 1 : vector<8x1508xf32>, vector<8x60xf32> -> vector<8x1568xf32>
    %c56 = arith.constant 56 : index
    %c0_14 = arith.constant 0 : index
    %241 = vector.load %arg14[%c56, %c0_14] : memref<200x1568xf32, #tpu.memory_space<vmem>>, vector<8x1568xf32>
    tpu.vector_store %arg14[%c56, %c0_14], %240 {strides = array<i32>} : memref<200x1568xf32, #tpu.memory_space<vmem>>, vector<8x1568xf32>,
    %242 = vector.extract_strided_slice %212 {offsets = [0, 62], sizes = [8, 1506], strides = [1, 1]} : vector<8x1568xf32> to vector<8x1506xf32>
    %243 = vector.extract_strided_slice %212 {offsets = [0, 0], sizes = [8, 62], strides = [1, 1]} : vector<8x1568xf32> to vector<8x62xf32>
    %244 = tpu.concatenate %242, %243 in 1 : vector<8x1506xf32>, vector<8x62xf32> -> vector<8x1568xf32>
    %c64 = arith.constant 64 : index
    %c0_15 = arith.constant 0 : index
    %245 = vector.load %arg14[%c64, %c0_15] : memref<200x1568xf32, #tpu.memory_space<vmem>>, vector<8x1568xf32>
    tpu.vector_store %arg14[%c64, %c0_15], %244 {strides = array<i32>} : memref<200x1568xf32, #tpu.memory_space<vmem>>, vector<8x1568xf32>,
    %246 = vector.extract_strided_slice %212 {offsets = [0, 64], sizes = [8, 1504], strides = [1, 1]} : vector<8x1568xf32> to vector<8x1504xf32>
    %247 = vector.extract_strided_slice %212 {offsets = [0, 0], sizes = [8, 64], strides = [1, 1]} : vector<8x1568xf32> to vector<8x64xf32>
    %248 = tpu.concatenate %246, %247 in 1 : vector<8x1504xf32>, vector<8x64xf32> -> vector<8x1568xf32>
    %c72 = arith.constant 72 : index
    %c0_16 = arith.constant 0 : index
    %249 = vector.load %arg14[%c72, %c0_16] : memref<200x1568xf32, #tpu.memory_space<vmem>>, vector<8x1568xf32>
    tpu.vector_store %arg14[%c72, %c0_16], %248 {strides = array<i32>} : memref<200x1568xf32, #tpu.memory_space<vmem>>, vector<8x1568xf32>,
    %250 = vector.extract_strided_slice %212 {offsets = [0, 112], sizes = [8, 1456], strides = [1, 1]} : vector<8x1568xf32> to vector<8x1456xf32>
    %251 = vector.extract_strided_slice %212 {offsets = [0, 0], sizes = [8, 112], strides = [1, 1]} : vector<8x1568xf32> to vector<8x112xf32>
    %252 = tpu.concatenate %250, %251 in 1 : vector<8x1456xf32>, vector<8x112xf32> -> vector<8x1568xf32>
    %c80 = arith.constant 80 : index
    %c0_17 = arith.constant 0 : index
    %253 = vector.load %arg14[%c80, %c0_17] : memref<200x1568xf32, #tpu.memory_space<vmem>>, vector<8x1568xf32>
    tpu.vector_store %arg14[%c80, %c0_17], %252 {strides = array<i32>} : memref<200x1568xf32, #tpu.memory_space<vmem>>, vector<8x1568xf32>,
    %254 = vector.extract_strided_slice %212 {offsets = [0, 114], sizes = [8, 1454], strides = [1, 1]} : vector<8x1568xf32> to vector<8x1454xf32>
    %255 = vector.extract_strided_slice %212 {offsets = [0, 0], sizes = [8, 114], strides = [1, 1]} : vector<8x1568xf32> to vector<8x114xf32>
    %256 = tpu.concatenate %254, %255 in 1 : vector<8x1454xf32>, vector<8x114xf32> -> vector<8x1568xf32>
    %c88 = arith.constant 88 : index
    %c0_18 = arith.constant 0 : index
    %257 = vector.load %arg14[%c88, %c0_18] : memref<200x1568xf32, #tpu.memory_space<vmem>>, vector<8x1568xf32>
    tpu.vector_store %arg14[%c88, %c0_18], %256 {strides = array<i32>} : memref<200x1568xf32, #tpu.memory_space<vmem>>, vector<8x1568xf32>,
    %258 = vector.extract_strided_slice %212 {offsets = [0, 116], sizes = [8, 1452], strides = [1, 1]} : vector<8x1568xf32> to vector<8x1452xf32>
    %259 = vector.extract_strided_slice %212 {offsets = [0, 0], sizes = [8, 116], strides = [1, 1]} : vector<8x1568xf32> to vector<8x116xf32>
    %260 = tpu.concatenate %258, %259 in 1 : vector<8x1452xf32>, vector<8x116xf32> -> vector<8x1568xf32>
    %c96 = arith.constant 96 : index
    %c0_19 = arith.constant 0 : index
    %261 = vector.load %arg14[%c96, %c0_19] : memref<200x1568xf32, #tpu.memory_space<vmem>>, vector<8x1568xf32>
    tpu.vector_store %arg14[%c96, %c0_19], %260 {strides = array<i32>} : memref<200x1568xf32, #tpu.memory_space<vmem>>, vector<8x1568xf32>,
    %262 = vector.extract_strided_slice %212 {offsets = [0, 118], sizes = [8, 1450], strides = [1, 1]} : vector<8x1568xf32> to vector<8x1450xf32>
    %263 = vector.extract_strided_slice %212 {offsets = [0, 0], sizes = [8, 118], strides = [1, 1]} : vector<8x1568xf32> to vector<8x118xf32>
    %264 = tpu.concatenate %262, %263 in 1 : vector<8x1450xf32>, vector<8x118xf32> -> vector<8x1568xf32>
    %c104 = arith.constant 104 : index
    %c0_20 = arith.constant 0 : index
    %265 = vector.load %arg14[%c104, %c0_20] : memref<200x1568xf32, #tpu.memory_space<vmem>>, vector<8x1568xf32>
    tpu.vector_store %arg14[%c104, %c0_20], %264 {strides = array<i32>} : memref<200x1568xf32, #tpu.memory_space<vmem>>, vector<8x1568xf32>,
    %266 = vector.extract_strided_slice %212 {offsets = [0, 120], sizes = [8, 1448], strides = [1, 1]} : vector<8x1568xf32> to vector<8x1448xf32>
    %267 = vector.extract_strided_slice %212 {offsets = [0, 0], sizes = [8, 120], strides = [1, 1]} : vector<8x1568xf32> to vector<8x120xf32>
    %268 = tpu.concatenate %266, %267 in 1 : vector<8x1448xf32>, vector<8x120xf32> -> vector<8x1568xf32>
    %c112 = arith.constant 112 : index
    %c0_21 = arith.constant 0 : index
    %269 = vector.load %arg14[%c112, %c0_21] : memref<200x1568xf32, #tpu.memory_space<vmem>>, vector<8x1568xf32>
    tpu.vector_store %arg14[%c112, %c0_21], %268 {strides = array<i32>} : memref<200x1568xf32, #tpu.memory_space<vmem>>, vector<8x1568xf32>,
    %270 = vector.extract_strided_slice %212 {offsets = [0, 168], sizes = [8, 1400], strides = [1, 1]} : vector<8x1568xf32> to vector<8x1400xf32>
    %271 = vector.extract_strided_slice %212 {offsets = [0, 0], sizes = [8, 168], strides = [1, 1]} : vector<8x1568xf32> to vector<8x168xf32>
    %272 = tpu.concatenate %270, %271 in 1 : vector<8x1400xf32>, vector<8x168xf32> -> vector<8x1568xf32>
    %c120 = arith.constant 120 : index
    %c0_22 = arith.constant 0 : index
    %273 = vector.load %arg14[%c120, %c0_22] : memref<200x1568xf32, #tpu.memory_space<vmem>>, vector<8x1568xf32>
    tpu.vector_store %arg14[%c120, %c0_22], %272 {strides = array<i32>} : memref<200x1568xf32, #tpu.memory_space<vmem>>, vector<8x1568xf32>,
    %274 = vector.extract_strided_slice %212 {offsets = [0, 170], sizes = [8, 1398], strides = [1, 1]} : vector<8x1568xf32> to vector<8x1398xf32>
    %275 = vector.extract_strided_slice %212 {offsets = [0, 0], sizes = [8, 170], strides = [1, 1]} : vector<8x1568xf32> to vector<8x170xf32>
    %276 = tpu.concatenate %274, %275 in 1 : vector<8x1398xf32>, vector<8x170xf32> -> vector<8x1568xf32>
    %c128 = arith.constant 128 : index
    %c0_23 = arith.constant 0 : index
    %277 = vector.load %arg14[%c128, %c0_23] : memref<200x1568xf32, #tpu.memory_space<vmem>>, vector<8x1568xf32>
    tpu.vector_store %arg14[%c128, %c0_23], %276 {strides = array<i32>} : memref<200x1568xf32, #tpu.memory_space<vmem>>, vector<8x1568xf32>,
    %278 = vector.extract_strided_slice %212 {offsets = [0, 172], sizes = [8, 1396], strides = [1, 1]} : vector<8x1568xf32> to vector<8x1396xf32>
    %279 = vector.extract_strided_slice %212 {offsets = [0, 0], sizes = [8, 172], strides = [1, 1]} : vector<8x1568xf32> to vector<8x172xf32>
    %280 = tpu.concatenate %278, %279 in 1 : vector<8x1396xf32>, vector<8x172xf32> -> vector<8x1568xf32>
    %c136 = arith.constant 136 : index
    %c0_24 = arith.constant 0 : index
    %281 = vector.load %arg14[%c136, %c0_24] : memref<200x1568xf32, #tpu.memory_space<vmem>>, vector<8x1568xf32>
    tpu.vector_store %arg14[%c136, %c0_24], %280 {strides = array<i32>} : memref<200x1568xf32, #tpu.memory_space<vmem>>, vector<8x1568xf32>,
    %282 = vector.extract_strided_slice %212 {offsets = [0, 174], sizes = [8, 1394], strides = [1, 1]} : vector<8x1568xf32> to vector<8x1394xf32>
    %283 = vector.extract_strided_slice %212 {offsets = [0, 0], sizes = [8, 174], strides = [1, 1]} : vector<8x1568xf32> to vector<8x174xf32>
    %284 = tpu.concatenate %282, %283 in 1 : vector<8x1394xf32>, vector<8x174xf32> -> vector<8x1568xf32>
    %c144 = arith.constant 144 : index
    %c0_25 = arith.constant 0 : index
    %285 = vector.load %arg14[%c144, %c0_25] : memref<200x1568xf32, #tpu.memory_space<vmem>>, vector<8x1568xf32>
    tpu.vector_store %arg14[%c144, %c0_25], %284 {strides = array<i32>} : memref<200x1568xf32, #tpu.memory_space<vmem>>, vector<8x1568xf32>,
    %286 = vector.extract_strided_slice %212 {offsets = [0, 176], sizes = [8, 1392], strides = [1, 1]} : vector<8x1568xf32> to vector<8x1392xf32>
    %287 = vector.extract_strided_slice %212 {offsets = [0, 0], sizes = [8, 176], strides = [1, 1]} : vector<8x1568xf32> to vector<8x176xf32>
    %288 = tpu.concatenate %286, %287 in 1 : vector<8x1392xf32>, vector<8x176xf32> -> vector<8x1568xf32>
    %c152 = arith.constant 152 : index
    %c0_26 = arith.constant 0 : index
    %289 = vector.load %arg14[%c152, %c0_26] : memref<200x1568xf32, #tpu.memory_space<vmem>>, vector<8x1568xf32>
    tpu.vector_store %arg14[%c152, %c0_26], %288 {strides = array<i32>} : memref<200x1568xf32, #tpu.memory_space<vmem>>, vector<8x1568xf32>,
    %290 = vector.extract_strided_slice %212 {offsets = [0, 224], sizes = [8, 1344], strides = [1, 1]} : vector<8x1568xf32> to vector<8x1344xf32>
    %291 = vector.extract_strided_slice %212 {offsets = [0, 0], sizes = [8, 224], strides = [1, 1]} : vector<8x1568xf32> to vector<8x224xf32>
    %292 = tpu.concatenate %290, %291 in 1 : vector<8x1344xf32>, vector<8x224xf32> -> vector<8x1568xf32>
    %c160 = arith.constant 160 : index
    %c0_27 = arith.constant 0 : index
    %293 = vector.load %arg14[%c160, %c0_27] : memref<200x1568xf32, #tpu.memory_space<vmem>>, vector<8x1568xf32>
    tpu.vector_store %arg14[%c160, %c0_27], %292 {strides = array<i32>} : memref<200x1568xf32, #tpu.memory_space<vmem>>, vector<8x1568xf32>,
    %294 = vector.extract_strided_slice %212 {offsets = [0, 226], sizes = [8, 1342], strides = [1, 1]} : vector<8x1568xf32> to vector<8x1342xf32>
    %295 = vector.extract_strided_slice %212 {offsets = [0, 0], sizes = [8, 226], strides = [1, 1]} : vector<8x1568xf32> to vector<8x226xf32>
    %296 = tpu.concatenate %294, %295 in 1 : vector<8x1342xf32>, vector<8x226xf32> -> vector<8x1568xf32>
    %c168 = arith.constant 168 : index
    %c0_28 = arith.constant 0 : index
    %297 = vector.load %arg14[%c168, %c0_28] : memref<200x1568xf32, #tpu.memory_space<vmem>>, vector<8x1568xf32>
    tpu.vector_store %arg14[%c168, %c0_28], %296 {strides = array<i32>} : memref<200x1568xf32, #tpu.memory_space<vmem>>, vector<8x1568xf32>,
    %298 = vector.extract_strided_slice %212 {offsets = [0, 228], sizes = [8, 1340], strides = [1, 1]} : vector<8x1568xf32> to vector<8x1340xf32>
    %299 = vector.extract_strided_slice %212 {offsets = [0, 0], sizes = [8, 228], strides = [1, 1]} : vector<8x1568xf32> to vector<8x228xf32>
    %300 = tpu.concatenate %298, %299 in 1 : vector<8x1340xf32>, vector<8x228xf32> -> vector<8x1568xf32>
    %c176 = arith.constant 176 : index
    %c0_29 = arith.constant 0 : index
    %301 = vector.load %arg14[%c176, %c0_29] : memref<200x1568xf32, #tpu.memory_space<vmem>>, vector<8x1568xf32>
    tpu.vector_store %arg14[%c176, %c0_29], %300 {strides = array<i32>} : memref<200x1568xf32, #tpu.memory_space<vmem>>, vector<8x1568xf32>,
    %302 = vector.extract_strided_slice %212 {offsets = [0, 230], sizes = [8, 1338], strides = [1, 1]} : vector<8x1568xf32> to vector<8x1338xf32>
    %303 = vector.extract_strided_slice %212 {offsets = [0, 0], sizes = [8, 230], strides = [1, 1]} : vector<8x1568xf32> to vector<8x230xf32>
    %304 = tpu.concatenate %302, %303 in 1 : vector<8x1338xf32>, vector<8x230xf32> -> vector<8x1568xf32>
    %c184 = arith.constant 184 : index
    %c0_30 = arith.constant 0 : index
    %305 = vector.load %arg14[%c184, %c0_30] : memref<200x1568xf32, #tpu.memory_space<vmem>>, vector<8x1568xf32>
    tpu.vector_store %arg14[%c184, %c0_30], %304 {strides = array<i32>} : memref<200x1568xf32, #tpu.memory_space<vmem>>, vector<8x1568xf32>,
    %306 = vector.extract_strided_slice %212 {offsets = [0, 232], sizes = [8, 1336], strides = [1, 1]} : vector<8x1568xf32> to vector<8x1336xf32>
    %307 = vector.extract_strided_slice %212 {offsets = [0, 0], sizes = [8, 232], strides = [1, 1]} : vector<8x1568xf32> to vector<8x232xf32>
    %308 = tpu.concatenate %306, %307 in 1 : vector<8x1336xf32>, vector<8x232xf32> -> vector<8x1568xf32>
    %c192 = arith.constant 192 : index
    %c0_31 = arith.constant 0 : index
    %309 = vector.load %arg14[%c192, %c0_31] : memref<200x1568xf32, #tpu.memory_space<vmem>>, vector<8x1568xf32>
    tpu.vector_store %arg14[%c192, %c0_31], %308 {strides = array<i32>} : memref<200x1568xf32, #tpu.memory_space<vmem>>, vector<8x1568xf32>,
    %c0_32 = arith.constant 0 : index
    %c0_33 = arith.constant 0 : index
    %310 = vector.load %arg4[%c0_32, %c0_33] : memref<16x200xf32, #tpu.memory_space<vmem>>, vector<16x200xf32>
    %c0_34 = arith.constant 0 : index
    %c0_35 = arith.constant 0 : index
    %311 = vector.load %arg14[%c0_34, %c0_35] : memref<200x1568xf32, #tpu.memory_space<vmem>>, vector<200x1568xf32>
    %cst_36 = arith.constant dense<0.000000e+00> : vector<16x1568xf32>
    %312 = tpu.matmul %310, %311, %cst_36 {dimension_numbers = #tpu.dot_dimension_numbers<[1], [0], [0], [1], [0, 0, 1, 1], [], []>} : vector<16x200xf32>, vector<200x1568xf32>, vector<16x1568xf32> -> vector<16x1568xf32>
    %c0_37 = arith.constant 0 : index
    %c0_38 = arith.constant 0 : index
    %313 = vector.load %arg5[%c0_37, %c0_38] : memref<16x1xf32, #tpu.memory_space<vmem>>, vector<16x1xf32>
    %314 = vector.broadcast %313 : vector<16x1xf32> to vector<16x1568xf32>
    %315 = arith.addf %312, %314 : vector<16x1568xf32>
    %cst_39 = arith.constant 0.000000e+00 : f32
    %316 = vector.broadcast %cst_39 : f32 to vector<16x1568xf32>
    %317 = arith.maximumf %315, %316 : vector<16x1568xf32>
    %318 = vector.extract_strided_slice %317 {offsets = [0, 2], sizes = [16, 1566], strides = [1, 1]} : vector<16x1568xf32> to vector<16x1566xf32>
    %319 = vector.extract_strided_slice %317 {offsets = [0, 0], sizes = [16, 2], strides = [1, 1]} : vector<16x1568xf32> to vector<16x2xf32>
    %320 = tpu.concatenate %318, %319 in 1 : vector<16x1566xf32>, vector<16x2xf32> -> vector<16x1568xf32>
    %321 = arith.maximumf %317, %320 : vector<16x1568xf32>
    %322 = vector.extract_strided_slice %321 {offsets = [0, 56], sizes = [16, 1512], strides = [1, 1]} : vector<16x1568xf32> to vector<16x1512xf32>
    %323 = vector.extract_strided_slice %321 {offsets = [0, 0], sizes = [16, 56], strides = [1, 1]} : vector<16x1568xf32> to vector<16x56xf32>
    %324 = tpu.concatenate %322, %323 in 1 : vector<16x1512xf32>, vector<16x56xf32> -> vector<16x1568xf32>
    %325 = arith.maximumf %321, %324 : vector<16x1568xf32>
    %c0_40 = arith.constant 0 : index
    %c0_41 = arith.constant 0 : index
    %c0_42 = arith.constant 0 : index
    %326 = vector.load %arg6[%c0_40, %c0_41, %c0_42] : memref<2x1568x16xf32, #tpu.memory_space<vmem>>, vector<1x1568x16xf32>
    %327 = vector.shape_cast %326 : vector<1x1568x16xf32> to vector<1568x16xf32>
    %cst_43 = arith.constant dense<0.000000e+00> : vector<16x16xf32>
    %328 = tpu.matmul %325, %327, %cst_43 {dimension_numbers = #tpu.dot_dimension_numbers<[1], [0], [0], [1], [0, 0, 1, 1], [], []>} : vector<16x1568xf32>, vector<1568x16xf32>, vector<16x16xf32> -> vector<16x16xf32>
    %329 = vector.extract_strided_slice %328 {offsets = [0, 0], sizes = [1, 16], strides = [1, 1]} : vector<16x16xf32> to vector<1x16xf32>
    %c0_44 = arith.constant 0 : index
    %c0_45 = arith.constant 0 : index
    %330 = vector.load %arg15[%c0_44, %c0_45] : memref<2x192xf32, #tpu.memory_space<vmem>>, vector<1x16xf32>
    tpu.vector_store %arg15[%c0_44, %c0_45], %329 {strides = array<i32>} : memref<2x192xf32, #tpu.memory_space<vmem>>, vector<1x16xf32>,
    %331 = vector.extract_strided_slice %328 {offsets = [1, 0], sizes = [1, 16], strides = [1, 1]} : vector<16x16xf32> to vector<1x16xf32>
    %c0_46 = arith.constant 0 : index
    %c16_47 = arith.constant 16 : index
    %332 = vector.load %arg15[%c0_46, %c16_47] : memref<2x192xf32, #tpu.memory_space<vmem>>, vector<1x16xf32>
    tpu.vector_store %arg15[%c0_46, %c16_47], %331 {strides = array<i32>} : memref<2x192xf32, #tpu.memory_space<vmem>>, vector<1x16xf32>,
    %333 = vector.extract_strided_slice %328 {offsets = [2, 0], sizes = [1, 16], strides = [1, 1]} : vector<16x16xf32> to vector<1x16xf32>
    %c0_48 = arith.constant 0 : index
    %c32_49 = arith.constant 32 : index
    %334 = vector.load %arg15[%c0_48, %c32_49] : memref<2x192xf32, #tpu.memory_space<vmem>>, vector<1x16xf32>
    tpu.vector_store %arg15[%c0_48, %c32_49], %333 {strides = array<i32>} : memref<2x192xf32, #tpu.memory_space<vmem>>, vector<1x16xf32>,
    %335 = vector.extract_strided_slice %328 {offsets = [3, 0], sizes = [1, 16], strides = [1, 1]} : vector<16x16xf32> to vector<1x16xf32>
    %c0_50 = arith.constant 0 : index
    %c48_51 = arith.constant 48 : index
    %336 = vector.load %arg15[%c0_50, %c48_51] : memref<2x192xf32, #tpu.memory_space<vmem>>, vector<1x16xf32>
    tpu.vector_store %arg15[%c0_50, %c48_51], %335 {strides = array<i32>} : memref<2x192xf32, #tpu.memory_space<vmem>>, vector<1x16xf32>,
    %337 = vector.extract_strided_slice %328 {offsets = [4, 0], sizes = [1, 16], strides = [1, 1]} : vector<16x16xf32> to vector<1x16xf32>
    %c0_52 = arith.constant 0 : index
    %c64_53 = arith.constant 64 : index
    %338 = vector.load %arg15[%c0_52, %c64_53] : memref<2x192xf32, #tpu.memory_space<vmem>>, vector<1x16xf32>
    tpu.vector_store %arg15[%c0_52, %c64_53], %337 {strides = array<i32>} : memref<2x192xf32, #tpu.memory_space<vmem>>, vector<1x16xf32>,
    %339 = vector.extract_strided_slice %328 {offsets = [5, 0], sizes = [1, 16], strides = [1, 1]} : vector<16x16xf32> to vector<1x16xf32>
    %c0_54 = arith.constant 0 : index
    %c80_55 = arith.constant 80 : index
    %340 = vector.load %arg15[%c0_54, %c80_55] : memref<2x192xf32, #tpu.memory_space<vmem>>, vector<1x16xf32>
    tpu.vector_store %arg15[%c0_54, %c80_55], %339 {strides = array<i32>} : memref<2x192xf32, #tpu.memory_space<vmem>>, vector<1x16xf32>,
    %341 = vector.extract_strided_slice %328 {offsets = [6, 0], sizes = [1, 16], strides = [1, 1]} : vector<16x16xf32> to vector<1x16xf32>
    %c0_56 = arith.constant 0 : index
    %c96_57 = arith.constant 96 : index
    %342 = vector.load %arg15[%c0_56, %c96_57] : memref<2x192xf32, #tpu.memory_space<vmem>>, vector<1x16xf32>
    tpu.vector_store %arg15[%c0_56, %c96_57], %341 {strides = array<i32>} : memref<2x192xf32, #tpu.memory_space<vmem>>, vector<1x16xf32>,
    %343 = vector.extract_strided_slice %328 {offsets = [7, 0], sizes = [1, 16], strides = [1, 1]} : vector<16x16xf32> to vector<1x16xf32>
    %c0_58 = arith.constant 0 : index
    %c112_59 = arith.constant 112 : index
    %344 = vector.load %arg15[%c0_58, %c112_59] : memref<2x192xf32, #tpu.memory_space<vmem>>, vector<1x16xf32>
    tpu.vector_store %arg15[%c0_58, %c112_59], %343 {strides = array<i32>} : memref<2x192xf32, #tpu.memory_space<vmem>>, vector<1x16xf32>,
    %345 = vector.extract_strided_slice %328 {offsets = [8, 0], sizes = [1, 16], strides = [1, 1]} : vector<16x16xf32> to vector<1x16xf32>
    %c0_60 = arith.constant 0 : index
    %c128_61 = arith.constant 128 : index
    %346 = vector.load %arg15[%c0_60, %c128_61] : memref<2x192xf32, #tpu.memory_space<vmem>>, vector<1x16xf32>
    tpu.vector_store %arg15[%c0_60, %c128_61], %345 {strides = array<i32>} : memref<2x192xf32, #tpu.memory_space<vmem>>, vector<1x16xf32>,
    %347 = vector.extract_strided_slice %328 {offsets = [9, 0], sizes = [1, 16], strides = [1, 1]} : vector<16x16xf32> to vector<1x16xf32>
    %c0_62 = arith.constant 0 : index
    %c144_63 = arith.constant 144 : index
    %348 = vector.load %arg15[%c0_62, %c144_63] : memref<2x192xf32, #tpu.memory_space<vmem>>, vector<1x16xf32>
    tpu.vector_store %arg15[%c0_62, %c144_63], %347 {strides = array<i32>} : memref<2x192xf32, #tpu.memory_space<vmem>>, vector<1x16xf32>,
    %349 = vector.extract_strided_slice %328 {offsets = [10, 0], sizes = [1, 16], strides = [1, 1]} : vector<16x16xf32> to vector<1x16xf32>
    %c0_64 = arith.constant 0 : index
    %c160_65 = arith.constant 160 : index
    %350 = vector.load %arg15[%c0_64, %c160_65] : memref<2x192xf32, #tpu.memory_space<vmem>>, vector<1x16xf32>
    tpu.vector_store %arg15[%c0_64, %c160_65], %349 {strides = array<i32>} : memref<2x192xf32, #tpu.memory_space<vmem>>, vector<1x16xf32>,
    %351 = vector.extract_strided_slice %328 {offsets = [11, 0], sizes = [1, 16], strides = [1, 1]} : vector<16x16xf32> to vector<1x16xf32>
    %c0_66 = arith.constant 0 : index
    %c176_67 = arith.constant 176 : index
    %352 = vector.load %arg15[%c0_66, %c176_67] : memref<2x192xf32, #tpu.memory_space<vmem>>, vector<1x16xf32>
    tpu.vector_store %arg15[%c0_66, %c176_67], %351 {strides = array<i32>} : memref<2x192xf32, #tpu.memory_space<vmem>>, vector<1x16xf32>,
    %c1 = arith.constant 1 : index
    %c0_68 = arith.constant 0 : index
    %c0_69 = arith.constant 0 : index
    %353 = vector.load %arg6[%c1, %c0_68, %c0_69] : memref<2x1568x16xf32, #tpu.memory_space<vmem>>, vector<1x1568x16xf32>
    %354 = vector.shape_cast %353 : vector<1x1568x16xf32> to vector<1568x16xf32>
    %cst_70 = arith.constant dense<0.000000e+00> : vector<16x16xf32>
    %355 = tpu.matmul %325, %354, %cst_70 {dimension_numbers = #tpu.dot_dimension_numbers<[1], [0], [0], [1], [0, 0, 1, 1], [], []>} : vector<16x1568xf32>, vector<1568x16xf32>, vector<16x16xf32> -> vector<16x16xf32>
    %356 = vector.extract_strided_slice %355 {offsets = [0, 0], sizes = [1, 16], strides = [1, 1]} : vector<16x16xf32> to vector<1x16xf32>
    %c1_71 = arith.constant 1 : index
    %c0_72 = arith.constant 0 : index
    %357 = vector.load %arg15[%c1_71, %c0_72] : memref<2x192xf32, #tpu.memory_space<vmem>>, vector<1x16xf32>
    tpu.vector_store %arg15[%c1_71, %c0_72], %356 {strides = array<i32>} : memref<2x192xf32, #tpu.memory_space<vmem>>, vector<1x16xf32>,
    %358 = vector.extract_strided_slice %355 {offsets = [1, 0], sizes = [1, 16], strides = [1, 1]} : vector<16x16xf32> to vector<1x16xf32>
    %c1_73 = arith.constant 1 : index
    %c16_74 = arith.constant 16 : index
    %359 = vector.load %arg15[%c1_73, %c16_74] : memref<2x192xf32, #tpu.memory_space<vmem>>, vector<1x16xf32>
    tpu.vector_store %arg15[%c1_73, %c16_74], %358 {strides = array<i32>} : memref<2x192xf32, #tpu.memory_space<vmem>>, vector<1x16xf32>,
    %360 = vector.extract_strided_slice %355 {offsets = [2, 0], sizes = [1, 16], strides = [1, 1]} : vector<16x16xf32> to vector<1x16xf32>
    %c1_75 = arith.constant 1 : index
    %c32_76 = arith.constant 32 : index
    %361 = vector.load %arg15[%c1_75, %c32_76] : memref<2x192xf32, #tpu.memory_space<vmem>>, vector<1x16xf32>
    tpu.vector_store %arg15[%c1_75, %c32_76], %360 {strides = array<i32>} : memref<2x192xf32, #tpu.memory_space<vmem>>, vector<1x16xf32>,
    %362 = vector.extract_strided_slice %355 {offsets = [3, 0], sizes = [1, 16], strides = [1, 1]} : vector<16x16xf32> to vector<1x16xf32>
    %c1_77 = arith.constant 1 : index
    %c48_78 = arith.constant 48 : index
    %363 = vector.load %arg15[%c1_77, %c48_78] : memref<2x192xf32, #tpu.memory_space<vmem>>, vector<1x16xf32>
    tpu.vector_store %arg15[%c1_77, %c48_78], %362 {strides = array<i32>} : memref<2x192xf32, #tpu.memory_space<vmem>>, vector<1x16xf32>,
    %364 = vector.extract_strided_slice %355 {offsets = [4, 0], sizes = [1, 16], strides = [1, 1]} : vector<16x16xf32> to vector<1x16xf32>
    %c1_79 = arith.constant 1 : index
    %c64_80 = arith.constant 64 : index
    %365 = vector.load %arg15[%c1_79, %c64_80] : memref<2x192xf32, #tpu.memory_space<vmem>>, vector<1x16xf32>
    tpu.vector_store %arg15[%c1_79, %c64_80], %364 {strides = array<i32>} : memref<2x192xf32, #tpu.memory_space<vmem>>, vector<1x16xf32>,
    %366 = vector.extract_strided_slice %355 {offsets = [5, 0], sizes = [1, 16], strides = [1, 1]} : vector<16x16xf32> to vector<1x16xf32>
    %c1_81 = arith.constant 1 : index
    %c80_82 = arith.constant 80 : index
    %367 = vector.load %arg15[%c1_81, %c80_82] : memref<2x192xf32, #tpu.memory_space<vmem>>, vector<1x16xf32>
    tpu.vector_store %arg15[%c1_81, %c80_82], %366 {strides = array<i32>} : memref<2x192xf32, #tpu.memory_space<vmem>>, vector<1x16xf32>,
    %368 = vector.extract_strided_slice %355 {offsets = [6, 0], sizes = [1, 16], strides = [1, 1]} : vector<16x16xf32> to vector<1x16xf32>
    %c1_83 = arith.constant 1 : index
    %c96_84 = arith.constant 96 : index
    %369 = vector.load %arg15[%c1_83, %c96_84] : memref<2x192xf32, #tpu.memory_space<vmem>>, vector<1x16xf32>
    tpu.vector_store %arg15[%c1_83, %c96_84], %368 {strides = array<i32>} : memref<2x192xf32, #tpu.memory_space<vmem>>, vector<1x16xf32>,
    %370 = vector.extract_strided_slice %355 {offsets = [7, 0], sizes = [1, 16], strides = [1, 1]} : vector<16x16xf32> to vector<1x16xf32>
    %c1_85 = arith.constant 1 : index
    %c112_86 = arith.constant 112 : index
    %371 = vector.load %arg15[%c1_85, %c112_86] : memref<2x192xf32, #tpu.memory_space<vmem>>, vector<1x16xf32>
    tpu.vector_store %arg15[%c1_85, %c112_86], %370 {strides = array<i32>} : memref<2x192xf32, #tpu.memory_space<vmem>>, vector<1x16xf32>,
    %372 = vector.extract_strided_slice %355 {offsets = [8, 0], sizes = [1, 16], strides = [1, 1]} : vector<16x16xf32> to vector<1x16xf32>
    %c1_87 = arith.constant 1 : index
    %c128_88 = arith.constant 128 : index
    %373 = vector.load %arg15[%c1_87, %c128_88] : memref<2x192xf32, #tpu.memory_space<vmem>>, vector<1x16xf32>
    tpu.vector_store %arg15[%c1_87, %c128_88], %372 {strides = array<i32>} : memref<2x192xf32, #tpu.memory_space<vmem>>, vector<1x16xf32>,
    %374 = vector.extract_strided_slice %355 {offsets = [9, 0], sizes = [1, 16], strides = [1, 1]} : vector<16x16xf32> to vector<1x16xf32>
    %c1_89 = arith.constant 1 : index
    %c144_90 = arith.constant 144 : index
    %375 = vector.load %arg15[%c1_89, %c144_90] : memref<2x192xf32, #tpu.memory_space<vmem>>, vector<1x16xf32>
    tpu.vector_store %arg15[%c1_89, %c144_90], %374 {strides = array<i32>} : memref<2x192xf32, #tpu.memory_space<vmem>>, vector<1x16xf32>,
    %376 = vector.extract_strided_slice %355 {offsets = [10, 0], sizes = [1, 16], strides = [1, 1]} : vector<16x16xf32> to vector<1x16xf32>
    %c1_91 = arith.constant 1 : index
    %c160_92 = arith.constant 160 : index
    %377 = vector.load %arg15[%c1_91, %c160_92] : memref<2x192xf32, #tpu.memory_space<vmem>>, vector<1x16xf32>
    tpu.vector_store %arg15[%c1_91, %c160_92], %376 {strides = array<i32>} : memref<2x192xf32, #tpu.memory_space<vmem>>, vector<1x16xf32>,
    %378 = vector.extract_strided_slice %355 {offsets = [11, 0], sizes = [1, 16], strides = [1, 1]} : vector<16x16xf32> to vector<1x16xf32>
    %c1_93 = arith.constant 1 : index
    %c176_94 = arith.constant 176 : index
    %379 = vector.load %arg15[%c1_93, %c176_94] : memref<2x192xf32, #tpu.memory_space<vmem>>, vector<1x16xf32>
    tpu.vector_store %arg15[%c1_93, %c176_94], %378 {strides = array<i32>} : memref<2x192xf32, #tpu.memory_space<vmem>>, vector<1x16xf32>,
    %c0_95 = arith.constant 0 : index
    %c0_96 = arith.constant 0 : index
    %380 = vector.load %arg15[%c0_95, %c0_96] : memref<2x192xf32, #tpu.memory_space<vmem>>, vector<2x192xf32>
    %c0_97 = arith.constant 0 : index
    %c0_98 = arith.constant 0 : index
    %381 = vector.load %arg7[%c0_97, %c0_98] : memref<192x120xf32, #tpu.memory_space<vmem>>, vector<192x120xf32>
    %cst_99 = arith.constant dense<0.000000e+00> : vector<2x120xf32>
    %382 = tpu.matmul %380, %381, %cst_99 {dimension_numbers = #tpu.dot_dimension_numbers<[1], [0], [0], [1], [0, 0, 1, 1], [], []>} : vector<2x192xf32>, vector<192x120xf32>, vector<2x120xf32> -> vector<2x120xf32>
    %c0_100 = arith.constant 0 : index
    %c0_101 = arith.constant 0 : index
    %383 = vector.load %arg8[%c0_100, %c0_101] : memref<1x120xf32, #tpu.memory_space<vmem>>, vector<1x120xf32>
    %384 = vector.broadcast %383 : vector<1x120xf32> to vector<2x120xf32>
    %385 = arith.addf %382, %384 : vector<2x120xf32>
    %cst_102 = arith.constant 0.000000e+00 : f32
    %386 = vector.broadcast %cst_102 : f32 to vector<2x120xf32>
    %387 = arith.maximumf %385, %386 : vector<2x120xf32>
    %c0_103 = arith.constant 0 : index
    %c0_104 = arith.constant 0 : index
    %388 = vector.load %arg9[%c0_103, %c0_104] : memref<120x60xf32, #tpu.memory_space<vmem>>, vector<120x60xf32>
    %cst_105 = arith.constant dense<0.000000e+00> : vector<2x60xf32>
    %389 = tpu.matmul %387, %388, %cst_105 {dimension_numbers = #tpu.dot_dimension_numbers<[1], [0], [0], [1], [0, 0, 1, 1], [], []>} : vector<2x120xf32>, vector<120x60xf32>, vector<2x60xf32> -> vector<2x60xf32>
    %c0_106 = arith.constant 0 : index
    %c0_107 = arith.constant 0 : index
    %390 = vector.load %arg10[%c0_106, %c0_107] : memref<1x60xf32, #tpu.memory_space<vmem>>, vector<1x60xf32>
    %391 = vector.broadcast %390 : vector<1x60xf32> to vector<2x60xf32>
    %392 = arith.addf %389, %391 : vector<2x60xf32>
    %cst_108 = arith.constant 0.000000e+00 : f32
    %393 = vector.broadcast %cst_108 : f32 to vector<2x60xf32>
    %394 = arith.maximumf %392, %393 : vector<2x60xf32>
    %c0_109 = arith.constant 0 : index
    %c0_110 = arith.constant 0 : index
    %395 = vector.load %arg11[%c0_109, %c0_110] : memref<60x10xf32, #tpu.memory_space<vmem>>, vector<60x10xf32>
    %cst_111 = arith.constant dense<0.000000e+00> : vector<2x10xf32>
    %396 = tpu.matmul %394, %395, %cst_111 {dimension_numbers = #tpu.dot_dimension_numbers<[1], [0], [0], [1], [0, 0, 1, 1], [], []>} : vector<2x60xf32>, vector<60x10xf32>, vector<2x10xf32> -> vector<2x10xf32>
    %c0_112 = arith.constant 0 : index
    %c0_113 = arith.constant 0 : index
    %397 = vector.load %arg12[%c0_112, %c0_113] : memref<1x10xf32, #tpu.memory_space<vmem>>, vector<1x10xf32>
    %398 = vector.broadcast %397 : vector<1x10xf32> to vector<2x10xf32>
    %399 = arith.addf %396, %398 : vector<2x10xf32>
    %c0_114 = arith.constant 0 : index
    %c0_115 = arith.constant 0 : index
    %400 = vector.load %arg13[%c0_114, %c0_115] : memref<2x10xf32, #tpu.memory_space<vmem>>, vector<2x10xf32>
    tpu.vector_store %arg13[%c0_114, %c0_115], %399 {strides = array<i32>} : memref<2x10xf32, #tpu.memory_space<vmem>>, vector<2x10xf32>,
    return
  }
  func.func @transform_0(%arg0: i32) -> (i32, i32) {
    %c0_i32 = arith.constant 0 : i32
    %c0_i32_0 = arith.constant 0 : i32
    %c0_i32_1 = arith.constant 0 : i32
    return %c0_i32, %c0_i32_0 : i32, i32
  }
  func.func @transform_1(%arg0: i32) -> (i32, i32) {
    %c0_i32 = arith.constant 0 : i32
    %c0_i32_0 = arith.constant 0 : i32
    %c0_i32_1 = arith.constant 0 : i32
    return %c0_i32, %c0_i32_0 : i32, i32
  }
  func.func @transform_2(%arg0: i32) -> (i32, i32) {
    %c0_i32 = arith.constant 0 : i32
    %c0_i32_0 = arith.constant 0 : i32
    %c0_i32_1 = arith.constant 0 : i32
    return %c0_i32, %c0_i32_0 : i32, i32
  }
  func.func @transform_3(%arg0: i32) -> (i32, i32) {
    %c0_i32 = arith.constant 0 : i32
    %c0_i32_0 = arith.constant 0 : i32
    %c0_i32_1 = arith.constant 0 : i32
    return %c0_i32, %c0_i32_0 : i32, i32
  }
  func.func @transform_4(%arg0: i32) -> (i32, i32) {
    %c0_i32 = arith.constant 0 : i32
    %c0_i32_0 = arith.constant 0 : i32
    %c0_i32_1 = arith.constant 0 : i32
    return %c0_i32, %c0_i32_0 : i32, i32
  }
  func.func @transform_5(%arg0: i32) -> (i32, i32, i32) {
    %c0_i32 = arith.constant 0 : i32
    %c0_i32_0 = arith.constant 0 : i32
    %c0_i32_1 = arith.constant 0 : i32
    %c0_i32_2 = arith.constant 0 : i32
    return %c0_i32, %c0_i32_0, %c0_i32_1 : i32, i32, i32
  }
  func.func @transform_6(%arg0: i32) -> (i32, i32) {
    %c0_i32 = arith.constant 0 : i32
    %c0_i32_0 = arith.constant 0 : i32
    %c0_i32_1 = arith.constant 0 : i32
    return %c0_i32, %c0_i32_0 : i32, i32
  }
  func.func @transform_7(%arg0: i32) -> (i32, i32) {
    %c0_i32 = arith.constant 0 : i32
    %c0_i32_0 = arith.constant 0 : i32
    %c0_i32_1 = arith.constant 0 : i32
    return %c0_i32, %c0_i32_0 : i32, i32
  }
  func.func @transform_8(%arg0: i32) -> (i32, i32) {
    %c0_i32 = arith.constant 0 : i32
    %c0_i32_0 = arith.constant 0 : i32
    %c0_i32_1 = arith.constant 0 : i32
    return %c0_i32, %c0_i32_0 : i32, i32
  }
  func.func @transform_9(%arg0: i32) -> (i32, i32) {
    %c0_i32 = arith.constant 0 : i32
    %c0_i32_0 = arith.constant 0 : i32
    %c0_i32_1 = arith.constant 0 : i32
    return %c0_i32, %c0_i32_0 : i32, i32
  }
  func.func @transform_10(%arg0: i32) -> (i32, i32) {
    %c0_i32 = arith.constant 0 : i32
    %c0_i32_0 = arith.constant 0 : i32
    %c0_i32_1 = arith.constant 0 : i32
    return %c0_i32, %c0_i32_0 : i32, i32
  }
  func.func @transform_11(%arg0: i32) -> (i32, i32) {
    %c0_i32 = arith.constant 0 : i32
    %c0_i32_0 = arith.constant 0 : i32
    %c0_i32_1 = arith.constant 0 : i32
    return %c0_i32, %c0_i32_0 : i32, i32
  }
  func.func @transform_12(%arg0: i32) -> (i32, i32) {
    %c0_i32 = arith.constant 0 : i32
    %c0_i32_0 = arith.constant 0 : i32
    %c0_i32_1 = arith.constant 0 : i32
    return %c0_i32, %c0_i32_0 : i32, i32
  }
}

</mosaic_0001>

<bundles_post_ra>
// kernel: final_model_forward.1
= control target key start
LH: loop header
LB: loop body
LE: loop exit
PB: predicated region body
PF: predicated region fallthrough
CT: control target
= control target key end

     0   :  { %v7478_v4 = vmov 1   ;;  %s7479_s23 = smov 127   ;;  %s16029_s0 = inlined_call_operand.vmem [shape: f32[1,1568], index: 0, kind: input, shape index: {}]   ;;  %s16030_s1 = inlined_call_operand.vmem [shape: f32[8,25], index: 1, kind: input, shape index: {}]   ;;  %s16031_s2 = inlined_call_operand.vmem [shape: f32[8,1], index: 2, kind: input, shape index: {}]   ;;  %s16032_s3 = inlined_call_operand.vmem [shape: f32[16,200], index: 3, kind: input, shape index: {}]   ;;  %s16033_s4 = inlined_call_operand.vmem [shape: f32[16,1], index: 4, kind: input, shape index: {}]   ;;  %s16034_s5 = inlined_call_operand.vmem [shape: f32[2,1568,16], index: 5, kind: input, shape index: {}]   ;;  %s16035_s6 = inlined_call_operand.vmem [shape: f32[192,120], index: 6, kind: input, shape index: {}]   ;;  %s16036_s7 = inlined_call_operand.vmem [shape: f32[1,120], index: 7, kind: input, shape index: {}]   ;;  %s16037_s8 = inlined_call_operand.vmem [shape: f32[120,60], index: 8, kind: input, shape index: {}]   ;;  %s16038_s9 = inlined_call_operand.vmem [shape: f32[1,60], index: 9, kind: input, shape index: {}]   ;;  %s16039_s10 = inlined_call_operand.vmem [shape: f32[60,10], index: 10, kind: input, shape index: {}]   ;;  %s16040_s11 = inlined_call_operand.vmem [shape: f32[1,10], index: 11, kind: input, shape index: {}]   ;;  %s16041_s12 = inlined_call_operand.hbm [shape: f32[2,10], index: 12, kind: output, shape index: {}]  }
   0x1   :  { %v42_v0 = vld [vmem:[%s16029_s0] sm:$0xff]  ;;  %7295 = vset.pattern.permute.xlu0 %v7478_v4 }
   0x2   :  { %v7638_v1 = vperm.slane %v42_v0, 3  ;;  %v7640_v2 = vperm.slane %v42_v0, 0  ;;  %v7642_v3 = vperm.slane %v42_v0, 1 }
   0x4   :  { %16362 = vst [vmem:[#allocation7_spill] sm:$0xff] %v7638_v1  ;;  %110 = vrot.lane.b32.xlu2 %v7638_v1, %s7479_s23  ;;  %106 = vrot.lane.b32.xlu1 %v7642_v3, %s7479_s23 }
   0x5   :  { %16363 = vst [vmem:[#allocation8_spill] sm:$0xff] %v7640_v2  ;;  %104 = vrot.lane.b32.xlu0 %v7640_v2, %s7479_s23 }
   0x6   :  { %16364 = vst [vmem:[#allocation9_spill] sm:$0xff] %v7642_v3 }
   0x7   :  { %17 = vsyncpa [#allocation5], 0  ;;  %v7650_v5 = vperm.slane %v42_v0, 4  ;;  %v7652_v6 = vperm.slane %v42_v0, 2  ;;  %v7654_v7 = vperm.slane %v42_v0, 5  ;;  %v7665_v9 = vperm.slane %v42_v0, 7 }
   0x8   :  { %v43_v8 = vld [vmem:[%s16029_s0 + $0x8] sm:$0x1f]  ;;  %v7667_v10 = vperm.slane %v42_v0, 6  ;;  %v7694_v16 = vld [vmem:[%s16030_s1] sm:$0xff]  ;;  %s7480_s27 = smov 31   ;;  %s16331_s28 = smov 126  }
   0x9   :  { %16365 = vst [vmem:[#allocation10_spill] sm:$0xff] %v7650_v5  ;;  %v7669_v11 = vperm.slane %v43_v8, 0  ;;  %v7677_v12 = vperm.slane %v43_v8, 2  ;;  %v7679_v13 = vperm.slane %v43_v8, 1  ;;  %v7681_v14 = vperm.slane %v43_v8, 3  ;;  %s7483_s29 = smov 30  }
   0xa   :  { %16366 = vst [vmem:[#allocation11_spill] sm:$0xff] %v7652_v6  ;;  %v7689_v15 = vperm.slane %v43_v8, 4  ;;  %v7482_v17 = vmov 2   ;;  %s7484_s30 = smov 125   ;;  %v7485_v18 = vmov 3   ;;  %s7486_s13 = smov 29  }
   0xb   :  { %16367 = vst [vmem:[#allocation12_spill] sm:$0xff] %v7654_v7  ;;  %7296 = vset.pattern.permute.xlu1 %v7482_v17  ;;  %s7487_s14 = smov 124   ;;  %v7488_v28 = vmov 4   ;;  %s7489_s15 = smov 28   ;;  %v7491_v44 = vmov 5   ;;  %v7494_v60 = vmov 6  }
   0xc   :  { %112 = vrot.lane.b32.xlu2 %v7650_v5, %s7479_s23  ;;  %108 = vrot.lane.b32.xlu1 %v7652_v6, %s7479_s23  ;;  %16368 = vst [vmem:[#allocation13_spill] sm:$0xff] %v7665_v9  ;;  %s16333_s16 = smov 100   ;;  %s7492_s17 = smov 4   ;;  %vm130_vm0 = vcmask 1039360   ;;  %vm159_vm1 = vcmask 252928   ;;  %vm16337_vm2 = vcmask 1031168  }
   0xd   :  { %114 = vrot.lane.b32.xlu0 %v7654_v7, %s7479_s23  ;;  %16369 = vst [vmem:[#allocation14_spill] sm:$0xff] %v7667_v10  ;;  %s7493_s18 = smov 99   ;;  %s7495_s19 = smov 3   ;;  %vm16340_vm3 = vcmask 244736   ;;  %vm330_vm4 = vcmask 1022976   ;;  %vm359_vm5 = vcmask 236544  }
   0xe   :  { %16370 = vst [vmem:[#allocation15_spill] sm:$0xff] %v7669_v11  ;;  %s16230_s20 = smov 98   ;;  %s7498_s21 = smov 2   ;;  %vm430_vm6 = vcmask 1014784   ;;  %vm16345_vm7 = vcmask 228352   ;;  %vm16338_vm8 = vcmask 818176  }
   0xf   :  { %16371 = vst [vmem:[#allocation16_spill] sm:$0xff] %v7677_v12  ;;  %s7499_s22 = smov 97   ;;  %s7501_s24 = smov 1   ;;  %vm559_vm9 = vcmask 31744   ;;  %vm630_vm10 = vcmask 809984   ;;  %vm659_vm11 = vcmask 23552  }
  0x10   :  { %16372 = vst [vmem:[#allocation17_spill] sm:$0xff] %v7679_v13  ;;  %s16234_s25 = smov 96   ;;  %s7504_s0 = smov 72   ;;  %vm16300_vm12 = vcmask 801792   ;;  %vm759_vm13 = vcmask 15360   ;;  %vm830_vm14 = vcmask 793600  }
  0x11   :  { %16373 = vst [vmem:[#allocation18_spill] sm:$0xff] %v7681_v14  ;;  %s16187_s26 = smov 104   ;;  %vm859_vm15 = vcmask 7168  }
  0x12   :  { %16374 = vst [vmem:[#allocation19_spill] sm:$0xff] %v7689_v15 }
  0x14   :  { %118 = vrot.lane.b32.xlu2 %v7665_v9, %s7479_s23  ;;  %116 = vrot.lane.b32.xlu1 %v7667_v10, %s7479_s23 }
  0x15   :  { %120 = vrot.lane.b32.xlu0 %v7669_v11, %s7479_s23 }
  0x1c   :  { %124 = vrot.lane.b32.xlu2 %v7677_v12, %s7479_s23  ;;  %122 = vrot.lane.b32.xlu1 %v7679_v13, %s7479_s23 }
  0x1d   :  { %126 = vrot.lane.b32.xlu0 %v7681_v14, %s7479_s23 }
  0x24   :  { %128 = vrot.lane.b32.xlu1 %v7689_v15, %s7479_s23  ;;  %156 = vrot.lane.b32.xlu2 %v7640_v2, %s7480_s27 }
  0x25   :  { %162 = vperm.xlu0 %7295, %v7694_v16  }
  0x2c   :  { %204 = vrot.lane.b32.xlu1 %v7640_v2, %s16331_s28  ;;  %206 = vrot.lane.b32.xlu2 %v7642_v3, %s16331_s28 }
  0x2d   :  { %212 = vrot.lane.b32.xlu0 %v7650_v5, %s16331_s28 }
  0x34   :  { %208 = vrot.lane.b32.xlu1 %v7652_v6, %s16331_s28  ;;  %210 = vrot.lane.b32.xlu2 %v7638_v1, %s16331_s28 }
  0x35   :  { %218 = vrot.lane.b32.xlu0 %v7665_v9, %s16331_s28 }
  0x3c   :  { %214 = vrot.lane.b32.xlu1 %v7654_v7, %s16331_s28  ;;  %216 = vrot.lane.b32.xlu2 %v7667_v10, %s16331_s28 }
  0x3d   :  { %224 = vrot.lane.b32.xlu0 %v7677_v12, %s16331_s28 }
  0x44   :  { %220 = vrot.lane.b32.xlu1 %v7669_v11, %s16331_s28  ;;  %222 = vrot.lane.b32.xlu2 %v7679_v13, %s16331_s28 }
  0x45   :  { %256 = vrot.lane.b32.xlu0 %v7640_v2, %s7483_s29 }
  0x4c   :  { %226 = vrot.lane.b32.xlu1 %v7681_v14, %s16331_s28  ;;  %228 = vrot.lane.b32.xlu2 %v7689_v15, %s16331_s28 }
  0x4d   :  { %306 = vrot.lane.b32.xlu0 %v7642_v3, %s7484_s30 }
  0x54   :  { %262 = vperm.xlu1 %7296, %v7694_v16   ;;  %304 = vrot.lane.b32.xlu2 %v7640_v2, %s7484_s30 }
  0x55   :  { %312 = vrot.lane.b32.xlu0 %v7650_v5, %s7484_s30 }
  0x5c   :  { %308 = vrot.lane.b32.xlu1 %v7652_v6, %s7484_s30  ;;  %310 = vrot.lane.b32.xlu2 %v7638_v1, %s7484_s30 }
  0x5d   :  { %318 = vrot.lane.b32.xlu0 %v7665_v9, %s7484_s30  ;;  %7297 = vset.pattern.permute.xlu1 %v7485_v18 }
  0x5e   :  { %v7736_v19 = vpop.permute.xlu2 %110 }
  0x64   :  { %314 = vrot.lane.b32.xlu1 %v7654_v7, %s7484_s30  ;;  %316 = vrot.lane.b32.xlu2 %v7667_v10, %s7484_s30 }
  0x65   :  { %324 = vrot.lane.b32.xlu0 %v7677_v12, %s7484_s30 }
  0x66   :  { %v7741_v20 = vpop.permute.xlu2 %112 }
  0x6c   :  { %320 = vrot.lane.b32.xlu1 %v7669_v11, %s7484_s30  ;;  %322 = vrot.lane.b32.xlu2 %v7679_v13, %s7484_s30 }
  0x6d   :  { %356 = vrot.lane.b32.xlu0 %v7640_v2, %s7486_s13  ;;  %s7509_s13 = smov 103  }
  0x6e   :  { %v7746_v21 = vpop.permute.xlu2 %118 }
  0x74   :  { %326 = vrot.lane.b32.xlu1 %v7681_v14, %s7484_s30  ;;  %328 = vrot.lane.b32.xlu2 %v7689_v15, %s7484_s30  ;;  %s7507_s30 = smov 71  }
  0x75   :  { %406 = vrot.lane.b32.xlu0 %v7642_v3, %s7487_s14 }
  0x76   :  { %v7752_v22 = vpop.permute.xlu2 %124  ;;  %v7754_v23 = vpop.permute.xlu1 %106 }
  0x77   :  { %v7756_v24 = vpop.permute.xlu0 %104 }
  0x7c   :  { %362 = vperm.xlu1 %7297, %v7694_v16   ;;  %404 = vrot.lane.b32.xlu2 %v7640_v2, %s7487_s14 }
  0x7d   :  { %412 = vrot.lane.b32.xlu0 %v7650_v5, %s7487_s14 }
  0x7e   :  { %v7763_v25 = vpop.permute.xlu1 %108  ;;  %v7765_v26 = vpop.permute.xlu2 %156 }
  0x7f   :  { %v7767_v27 = vpop.permute.xlu0 %114 }
  0x84   :  { %408 = vrot.lane.b32.xlu1 %v7652_v6, %s7487_s14  ;;  %410 = vrot.lane.b32.xlu2 %v7638_v1, %s7487_s14 }
  0x85   :  { %418 = vrot.lane.b32.xlu0 %v7665_v9, %s7487_s14  ;;  %7298 = vset.pattern.permute.xlu1 %v7488_v28 }
  0x86   :  { %v7775_v29 = vpop.permute.xlu1 %116  ;;  %v7777_v30 = vpop.permute.xlu2 %206 }
  0x87   :  { %v7779_v31 = vpop.permute.xlu0 %120 }
  0x8c   :  { %414 = vrot.lane.b32.xlu1 %v7654_v7, %s7487_s14  ;;  %416 = vrot.lane.b32.xlu2 %v7667_v10, %s7487_s14 }
  0x8d   :  { %424 = vrot.lane.b32.xlu0 %v7677_v12, %s7487_s14 }
  0x8e   :  { %v7787_v32 = vpop.permute.xlu1 %122  ;;  %v7789_v33 = vpop.permute.xlu2 %210 }
  0x8f   :  { %v7791_v34 = vpop.permute.xlu0 %126 }
  0x94   :  { %420 = vrot.lane.b32.xlu1 %v7669_v11, %s7487_s14  ;;  %422 = vrot.lane.b32.xlu2 %v7679_v13, %s7487_s14 }
  0x95   :  { %456 = vrot.lane.b32.xlu0 %v7640_v2, %s7489_s15 }
  0x96   :  { %v7799_v35 = vpop.permute.xlu1 %128  ;;  %v7801_v36 = vpop.permute.xlu2 %216 }
  0x97   :  { %v7803_v37 = vpop.permute.xlu0 %162 }
  0x9c   :  { %426 = vrot.lane.b32.xlu1 %v7681_v14, %s7487_s14  ;;  %428 = vrot.lane.b32.xlu2 %v7689_v15, %s7487_s14 }
  0x9d   :  { %506 = vrot.lane.b32.xlu0 %v7642_v3, %s16333_s16 }
  0x9e   :  { %v7811_v38 = vpop.permute.xlu1 %204  ;;  %v7813_v39 = vpop.permute.xlu2 %222 }
  0x9f   :  { %v7815_v40 = vpop.permute.xlu0 %212 }
  0xa4   :  { %462 = vperm.xlu1 %7298, %v7694_v16   ;;  %504 = vrot.lane.b32.xlu2 %v7640_v2, %s16333_s16 }
  0xa5   :  { %512 = vrot.lane.b32.xlu0 %v7650_v5, %s16333_s16 }
  0xa6   :  { %v7822_v41 = vpop.permute.xlu1 %208  ;;  %v7824_v42 = vpop.permute.xlu2 %228 }
  0xa7   :  { %v7826_v43 = vpop.permute.xlu0 %218 }
  0xac   :  { %508 = vrot.lane.b32.xlu1 %v7652_v6, %s16333_s16  ;;  %510 = vrot.lane.b32.xlu2 %v7638_v1, %s16333_s16 }
  0xad   :  { %518 = vrot.lane.b32.xlu0 %v7665_v9, %s16333_s16  ;;  %7299 = vset.pattern.permute.xlu1 %v7491_v44 }
  0xae   :  { %v7834_v45 = vpop.permute.xlu1 %214  ;;  %v7836_v46 = vpop.permute.xlu2 %304 }
  0xaf   :  { %v7838_v47 = vpop.permute.xlu0 %224 }
  0xb4   :  { %514 = vrot.lane.b32.xlu1 %v7654_v7, %s16333_s16  ;;  %516 = vrot.lane.b32.xlu2 %v7667_v10, %s16333_s16 }
  0xb5   :  { %524 = vrot.lane.b32.xlu0 %v7677_v12, %s16333_s16 }
  0xb6   :  { %v7846_v48 = vpop.permute.xlu1 %220  ;;  %v7848_v49 = vpop.permute.xlu2 %310 }
  0xb7   :  { %v7850_v50 = vpop.permute.xlu0 %256 }
  0xbc   :  { %520 = vrot.lane.b32.xlu1 %v7669_v11, %s16333_s16  ;;  %522 = vrot.lane.b32.xlu2 %v7679_v13, %s16333_s16 }
  0xbd   :  { %556 = vrot.lane.b32.xlu0 %v7640_v2, %s7492_s17 }
  0xbe   :  { %v7858_v51 = vpop.permute.xlu1 %226  ;;  %v7860_v52 = vpop.permute.xlu2 %316 }
  0xbf   :  { %v7862_v53 = vpop.permute.xlu0 %306 }
  0xc4   :  { %526 = vrot.lane.b32.xlu1 %v7681_v14, %s16333_s16  ;;  %528 = vrot.lane.b32.xlu2 %v7689_v15, %s16333_s16 }
  0xc5   :  { %606 = vrot.lane.b32.xlu0 %v7642_v3, %s7493_s18 }
  0xc6   :  { %v7870_v54 = vpop.permute.xlu1 %262  ;;  %v7872_v55 = vpop.permute.xlu2 %322 }
  0xc7   :  { %v7874_v56 = vpop.permute.xlu0 %312 }
  0xcc   :  { %562 = vperm.xlu1 %7299, %v7694_v16   ;;  %604 = vrot.lane.b32.xlu2 %v7640_v2, %s7493_s18 }
  0xcd   :  { %612 = vrot.lane.b32.xlu0 %v7650_v5, %s7493_s18 }
  0xce   :  { %v7881_v57 = vpop.permute.xlu1 %308  ;;  %v7883_v58 = vpop.permute.xlu2 %328 }
  0xcf   :  { %v7885_v59 = vpop.permute.xlu0 %318 }
  0xd4   :  { %608 = vrot.lane.b32.xlu1 %v7652_v6, %s7493_s18  ;;  %610 = vrot.lane.b32.xlu2 %v7638_v1, %s7493_s18 }
  0xd5   :  { %618 = vrot.lane.b32.xlu0 %v7665_v9, %s7493_s18  ;;  %7300 = vset.pattern.permute.xlu1 %v7494_v60 }
  0xd6   :  { %v7893_v61 = vpop.permute.xlu1 %314  ;;  %v7895_v62 = vpop.permute.xlu2 %404 }
  0xd7   :  { %16375 = vst [vmem:[#allocation20_spill] sm:$0xff] %v7895_v62  ;;  %v7897_v63 = vpop.permute.xlu0 %324 }
  0xdc   :  { %614 = vrot.lane.b32.xlu1 %v7654_v7, %s7493_s18  ;;  %616 = vrot.lane.b32.xlu2 %v7667_v10, %s7493_s18 }
  0xdd   :  { %624 = vrot.lane.b32.xlu0 %v7677_v12, %s7493_s18 }
  0xde   :  { %v7905_v0 = vpop.permute.xlu1 %320  ;;  %v7907_v4 = vpop.permute.xlu2 %410 }
  0xdf   :  { %16376 = vst [vmem:[#allocation21_spill] sm:$0xff] %v7907_v4  ;;  %v7909_v8 = vpop.permute.xlu0 %356 }
  0xe0   :  { %16377 = vst [vmem:[#allocation22_spill] sm:$0xff] %v7909_v8 }
  0xe4   :  { %620 = vrot.lane.b32.xlu1 %v7669_v11, %s7493_s18  ;;  %622 = vrot.lane.b32.xlu2 %v7679_v13, %s7493_s18 }
  0xe5   :  { %656 = vrot.lane.b32.xlu0 %v7640_v2, %s7495_s19  ;;  %s16220_s19 = smov 102  }
  0xe6   :  { %v7916_v17 = vpop.permute.xlu1 %326  ;;  %v7918_v18 = vpop.permute.xlu2 %416 }
  0xe7   :  { %16378 = vst [vmem:[#allocation23_spill] sm:$0xff] %v7918_v18  ;;  %v7920_v28 = vpop.permute.xlu0 %406 }
  0xe8   :  { %16379 = vst [vmem:[#allocation24_spill] sm:$0xff] %v7920_v28 }
  0xec   :  { %626 = vrot.lane.b32.xlu1 %v7681_v14, %s7493_s18  ;;  %628 = vrot.lane.b32.xlu2 %v7689_v15, %s7493_s18  ;;  %s7510_s18 = smov 70  }
  0xed   :  { %706 = vrot.lane.b32.xlu0 %v7642_v3, %s16230_s20 }
  0xee   :  { %v7928_v44 = vpop.permute.xlu1 %362  ;;  %v7930_v60 = vpop.permute.xlu2 %422 }
  0xef   :  { %16380 = vst [vmem:[#allocation25_spill] sm:$0xff] %v7928_v44  ;;  %v7932_v4 = vpop.permute.xlu0 %412 }
  0xf0   :  { %16381 = vst [vmem:[#allocation26_spill] sm:$0xff] %v7930_v60  ;;  %v7497_v60 = vmov 7  }
  0xf1   :  { %16382 = vst [vmem:[#allocation27_spill] sm:$0xff] %v7932_v4 }
  0xf4   :  { %662 = vperm.xlu1 %7300, %v7694_v16   ;;  %704 = vrot.lane.b32.xlu2 %v7640_v2, %s16230_s20 }
  0xf5   :  { %712 = vrot.lane.b32.xlu0 %v7650_v5, %s16230_s20 }
  0xf6   :  { %v7939_v18 = vpop.permute.xlu1 %408  ;;  %v7941_v62 = vpop.permute.xlu2 %428 }
  0xf7   :  { %16383 = vst [vmem:[#allocation28_spill] sm:$0xff] %v7939_v18  ;;  %v7943_v28 = vpop.permute.xlu0 %418 }
  0xf8   :  { %16384 = vst [vmem:[#allocation29_spill] sm:$0xff] %v7941_v62 }
  0xf9   :  { %16385 = vst [vmem:[#allocation30_spill] sm:$0xff] %v7943_v28 }
  0xfc   :  { %708 = vrot.lane.b32.xlu1 %v7652_v6, %s16230_s20  ;;  %710 = vrot.lane.b32.xlu2 %v7638_v1, %s16230_s20 }
  0xfd   :  { %718 = vrot.lane.b32.xlu0 %v7665_v9, %s16230_s20  ;;  %7301 = vset.pattern.permute.xlu1 %v7497_v60 }
  0xfe   :  { %v7951_v44 = vpop.permute.xlu1 %414  ;;  %v7953_v4 = vpop.permute.xlu2 %504 }
  0xff   :  { %16386 = vst [vmem:[#allocation31_spill] sm:$0xff] %v7951_v44  ;;  %v7955_v18 = vpop.permute.xlu0 %424 }
 0x100   :  { %16387 = vst [vmem:[#allocation32_spill] sm:$0xff] %v7953_v4 }
 0x101   :  { %16388 = vst [vmem:[#allocation33_spill] sm:$0xff] %v7955_v18 }
 0x104   :  { %714 = vrot.lane.b32.xlu1 %v7654_v7, %s16230_s20  ;;  %716 = vrot.lane.b32.xlu2 %v7667_v10, %s16230_s20 }
 0x105   :  { %724 = vrot.lane.b32.xlu0 %v7677_v12, %s16230_s20 }
 0x106   :  { %v7963_v62 = vpop.permute.xlu1 %420  ;;  %v7965_v28 = vpop.permute.xlu2 %510 }
 0x107   :  { %16389 = vst [vmem:[#allocation34_spill] sm:$0xff] %v7963_v62  ;;  %v7967_v60 = vpop.permute.xlu0 %456 }
 0x108   :  { %16390 = vst [vmem:[#allocation35_spill] sm:$0xff] %v7965_v28 }
 0x109   :  { %16391 = vst [vmem:[#allocation36_spill] sm:$0xff] %v7967_v60 }
 0x10c   :  { %720 = vrot.lane.b32.xlu1 %v7669_v11, %s16230_s20  ;;  %722 = vrot.lane.b32.xlu2 %v7679_v13, %s16230_s20 }
 0x10d   :  { %756 = vrot.lane.b32.xlu0 %v7640_v2, %s7498_s21  ;;  %s7513_s21 = smov 69  }
 0x10e   :  { %v7974_v4 = vpop.permute.xlu1 %426  ;;  %v7976_v18 = vpop.permute.xlu2 %516 }
 0x10f   :  { %16392 = vst [vmem:[#allocation37_spill] sm:$0xff] %v7974_v4  ;;  %v7978_v44 = vpop.permute.xlu0 %506 }
 0x110   :  { %16393 = vst [vmem:[#allocation38_spill] sm:$0xff] %v7976_v18 }
 0x111   :  { %16394 = vst [vmem:[#allocation39_spill] sm:$0xff] %v7978_v44 }
 0x114   :  { %726 = vrot.lane.b32.xlu1 %v7681_v14, %s16230_s20  ;;  %728 = vrot.lane.b32.xlu2 %v7689_v15, %s16230_s20  ;;  %s7536_s20 = smov 47  }
 0x115   :  { %806 = vrot.lane.b32.xlu0 %v7642_v3, %s7499_s22 }
 0x116   :  { %v7986_v28 = vpop.permute.xlu1 %462  ;;  %v7988_v60 = vpop.permute.xlu2 %522 }
 0x117   :  { %16395 = vst [vmem:[#allocation40_spill] sm:$0xff] %v7986_v28  ;;  %v7990_v62 = vpop.permute.xlu0 %512 }
 0x118   :  { %16396 = vst [vmem:[#allocation41_spill] sm:$0xff] %v7988_v60  ;;  %v7500_v60 = vmov 8  }
 0x119   :  { %16397 = vst [vmem:[#allocation42_spill] sm:$0xff] %v7990_v62 }
 0x11c   :  { %762 = vperm.xlu1 %7301, %v7694_v16   ;;  %804 = vrot.lane.b32.xlu2 %v7640_v2, %s7499_s22 }
 0x11d   :  { %812 = vrot.lane.b32.xlu0 %v7650_v5, %s7499_s22 }
 0x11e   :  { %v7997_v18 = vpop.permute.xlu1 %508  ;;  %v7999_v44 = vpop.permute.xlu2 %528 }
 0x11f   :  { %16398 = vst [vmem:[#allocation43_spill] sm:$0xff] %v7997_v18  ;;  %v8001_v4 = vpop.permute.xlu0 %518 }
 0x120   :  { %16399 = vst [vmem:[#allocation44_spill] sm:$0xff] %v7999_v44 }
 0x121   :  { %16400 = vst [vmem:[#allocation45_spill] sm:$0xff] %v8001_v4 }
 0x124   :  { %808 = vrot.lane.b32.xlu1 %v7652_v6, %s7499_s22  ;;  %810 = vrot.lane.b32.xlu2 %v7638_v1, %s7499_s22 }
 0x125   :  { %818 = vrot.lane.b32.xlu0 %v7665_v9, %s7499_s22  ;;  %7302 = vset.pattern.permute.xlu1 %v7500_v60 }
 0x126   :  { %v8009_v28 = vpop.permute.xlu1 %514  ;;  %v8011_v62 = vpop.permute.xlu2 %604 }
 0x127   :  { %16401 = vst [vmem:[#allocation46_spill] sm:$0xff] %v8009_v28  ;;  %v8013_v18 = vpop.permute.xlu0 %524 }
 0x128   :  { %16402 = vst [vmem:[#allocation47_spill] sm:$0xff] %v8011_v62 }
 0x129   :  { %16403 = vst [vmem:[#allocation48_spill] sm:$0xff] %v8013_v18 }
 0x12c   :  { %814 = vrot.lane.b32.xlu1 %v7654_v7, %s7499_s22  ;;  %816 = vrot.lane.b32.xlu2 %v7667_v10, %s7499_s22 }
 0x12d   :  { %824 = vrot.lane.b32.xlu0 %v7677_v12, %s7499_s22 }
 0x12e   :  { %v8021_v44 = vpop.permute.xlu1 %520  ;;  %v8023_v4 = vpop.permute.xlu2 %610 }
 0x12f   :  { %16404 = vst [vmem:[#allocation49_spill] sm:$0xff] %v8021_v44  ;;  %v8025_v60 = vpop.permute.xlu0 %556  ;;  %v7502_v44 = vmov 9  }
 0x130   :  { %16405 = vst [vmem:[#allocation50_spill] sm:$0xff] %v8023_v4  ;;  %7303 = vset.pattern.permute.xlu0 %v7502_v44 }
 0x131   :  { %16406 = vst [vmem:[#allocation51_spill] sm:$0xff] %v8025_v60 }
 0x134   :  { %820 = vrot.lane.b32.xlu1 %v7669_v11, %s7499_s22  ;;  %822 = vrot.lane.b32.xlu2 %v7679_v13, %s7499_s22 }
 0x135   :  { %856 = vrot.lane.b32.xlu0 %v7640_v2, %s7501_s24  ;;  %s7517_s24 = smov 68  }
 0x136   :  { %v8032_v62 = vpop.permute.xlu1 %526  ;;  %v8034_v18 = vpop.permute.xlu2 %616 }
 0x137   :  { %16407 = vst [vmem:[#allocation52_spill] sm:$0xff] %v8032_v62  ;;  %v8036_v28 = vpop.permute.xlu0 %606 }
 0x138   :  { %16408 = vst [vmem:[#allocation53_spill] sm:$0xff] %v8034_v18 }
 0x139   :  { %16409 = vst [vmem:[#allocation54_spill] sm:$0xff] %v8036_v28 }
 0x13c   :  { %826 = vrot.lane.b32.xlu1 %v7681_v14, %s7499_s22  ;;  %828 = vrot.lane.b32.xlu2 %v7689_v15, %s7499_s22  ;;  %s7515_s22 = smov 101  }
 0x13d   :  { %906 = vrot.lane.b32.xlu0 %v7642_v3, %s16234_s25 }
 0x13e   :  { %v8044_v4 = vpop.permute.xlu1 %562  ;;  %v8046_v60 = vpop.permute.xlu2 %622 }
 0x13f   :  { %16410 = vst [vmem:[#allocation55_spill] sm:$0xff] %v8044_v4  ;;  %v8048_v62 = vpop.permute.xlu0 %612 }
 0x140   :  { %16411 = vst [vmem:[#allocation56_spill] sm:$0xff] %v8046_v60 }
 0x141   :  { %16412 = vst [vmem:[#allocation57_spill] sm:$0xff] %v8048_v62 }
 0x144   :  { %862 = vperm.xlu1 %7302, %v7694_v16   ;;  %904 = vrot.lane.b32.xlu2 %v7640_v2, %s16234_s25 }
 0x145   :  { %912 = vrot.lane.b32.xlu0 %v7650_v5, %s16234_s25 }
 0x146   :  { %v8055_v44 = vpop.permute.xlu1 %608  ;;  %v8057_v18 = vpop.permute.xlu2 %628 }
 0x147   :  { %16413 = vst [vmem:[#allocation58_spill] sm:$0xff] %v8055_v44  ;;  %v8059_v28 = vpop.permute.xlu0 %618 }
 0x148   :  { %16414 = vst [vmem:[#allocation59_spill] sm:$0xff] %v8057_v18 }
 0x149   :  { %16415 = vst [vmem:[#allocation60_spill] sm:$0xff] %v8059_v28 }
 0x14c   :  { %908 = vrot.lane.b32.xlu1 %v7652_v6, %s16234_s25  ;;  %910 = vrot.lane.b32.xlu2 %v7638_v1, %s16234_s25 }
 0x14d   :  { %918 = vrot.lane.b32.xlu0 %v7665_v9, %s16234_s25 }
 0x14e   :  { %v8067_v60 = vpop.permute.xlu1 %614  ;;  %v8069_v4 = vpop.permute.xlu2 %704 }
 0x14f   :  { %16416 = vst [vmem:[#allocation61_spill] sm:$0xff] %v8067_v60  ;;  %v8071_v62 = vpop.permute.xlu0 %624 }
 0x150   :  { %16417 = vst [vmem:[#allocation62_spill] sm:$0xff] %v8069_v4 }
 0x151   :  { %16418 = vst [vmem:[#allocation63_spill] sm:$0xff] %v8071_v62 }
 0x154   :  { %914 = vrot.lane.b32.xlu1 %v7654_v7, %s16234_s25  ;;  %916 = vrot.lane.b32.xlu2 %v7667_v10, %s16234_s25 }
 0x155   :  { %924 = vrot.lane.b32.xlu0 %v7677_v12, %s16234_s25 }
 0x156   :  { %v8079_v18 = vpop.permute.xlu1 %620  ;;  %v8081_v28 = vpop.permute.xlu2 %710 }
 0x157   :  { %16419 = vst [vmem:[#allocation64_spill] sm:$0xff] %v8079_v18  ;;  %v8083_v44 = vpop.permute.xlu0 %656 }
 0x158   :  { %16420 = vst [vmem:[#allocation65_spill] sm:$0xff] %v8081_v28 }
 0x159   :  { %16421 = vst [vmem:[#allocation66_spill] sm:$0xff] %v8083_v44 }
 0x15c   :  { %920 = vrot.lane.b32.xlu1 %v7669_v11, %s16234_s25  ;;  %922 = vrot.lane.b32.xlu2 %v7679_v13, %s16234_s25 }
 0x15d   :  { %956 = vperm.xlu0 %7303, %v7694_v16  }
 0x15e   :  { %v8090_v4 = vpop.permute.xlu1 %626  ;;  %v8092_v62 = vpop.permute.xlu2 %716 }
 0x15f   :  { %16422 = vst [vmem:[#allocation67_spill] sm:$0xff] %v8090_v4  ;;  %v8094_v60 = vpop.permute.xlu0 %706 }
 0x160   :  { %16423 = vst [vmem:[#allocation68_spill] sm:$0xff] %v8092_v62 }
 0x161   :  { %16424 = vst [vmem:[#allocation69_spill] sm:$0xff] %v8094_v60 }
 0x164   :  { %926 = vrot.lane.b32.xlu1 %v7681_v14, %s16234_s25  ;;  %928 = vrot.lane.b32.xlu2 %v7689_v15, %s16234_s25  ;;  %s7537_s25 = smov 14  }
 0x165   :  { %1006 = vrot.lane.b32.xlu0 %v7650_v5, %s7504_s0 }
 0x166   :  { %v8102_v28 = vpop.permute.xlu1 %662  ;;  %v8104_v44 = vpop.permute.xlu2 %722 }
 0x167   :  { %16425 = vst [vmem:[#allocation70_spill] sm:$0xff] %v8102_v28  ;;  %v8106_v18 = vpop.permute.xlu0 %712  ;;  %v7505_v28 = vmov 10  }
 0x168   :  { %16426 = vst [vmem:[#allocation71_spill] sm:$0xff] %v8104_v44  ;;  %7304 = vset.pattern.permute.xlu1 %v7505_v28 }
 0x169   :  { %16427 = vst [vmem:[#allocation72_spill] sm:$0xff] %v8106_v18 }
 0x16c   :  { %998 = vrot.lane.b32.xlu1 %v7640_v2, %s7504_s0  ;;  %1000 = vrot.lane.b32.xlu2 %v7642_v3, %s7504_s0 }
 0x16d   :  { %1012 = vrot.lane.b32.xlu0 %v7665_v9, %s7504_s0 }
 0x16e   :  { %v8114_v62 = vpop.permute.xlu1 %708  ;;  %v8116_v60 = vpop.permute.xlu2 %728 }
 0x16f   :  { %16428 = vst [vmem:[#allocation73_spill] sm:$0xff] %v8114_v62  ;;  %v8118_v4 = vpop.permute.xlu0 %718 }
 0x170   :  { %16429 = vst [vmem:[#allocation74_spill] sm:$0xff] %v8116_v60 }
 0x171   :  { %16430 = vst [vmem:[#allocation75_spill] sm:$0xff] %v8118_v4 }
 0x174   :  { %1002 = vrot.lane.b32.xlu1 %v7652_v6, %s7504_s0  ;;  %1004 = vrot.lane.b32.xlu2 %v7638_v1, %s7504_s0 }
 0x175   :  { %1018 = vrot.lane.b32.xlu0 %v7677_v12, %s7504_s0 }
 0x176   :  { %v8126_v44 = vpop.permute.xlu1 %714  ;;  %v8128_v18 = vpop.permute.xlu2 %804 }
 0x177   :  { %16431 = vst [vmem:[#allocation76_spill] sm:$0xff] %v8126_v44  ;;  %v8130_v62 = vpop.permute.xlu0 %724 }
 0x178   :  { %16432 = vst [vmem:[#allocation77_spill] sm:$0xff] %v8128_v18 }
 0x179   :  { %16433 = vst [vmem:[#allocation78_spill] sm:$0xff] %v8130_v62 }
 0x17c   :  { %1008 = vrot.lane.b32.xlu1 %v7654_v7, %s7504_s0  ;;  %1010 = vrot.lane.b32.xlu2 %v7667_v10, %s7504_s0 }
 0x17d   :  { %1049 = vrot.lane.b32.xlu0 %v7640_v2, %s16187_s26  ;;  %s7528_s26 = smov 73  }
 0x17e   :  { %v8138_v28 = vpop.permute.xlu1 %720  ;;  %v8140_v60 = vpop.permute.xlu2 %810 }
 0x17f   :  { %16434 = vst [vmem:[#allocation79_spill] sm:$0xff] %v8138_v28  ;;  %v8142_v4 = vpop.permute.xlu0 %756 }
 0x180   :  { %16435 = vst [vmem:[#allocation80_spill] sm:$0xff] %v8140_v60 }
 0x181   :  { %16436 = vst [vmem:[#allocation81_spill] sm:$0xff] %v8142_v4 }
 0x184   :  { %1014 = vrot.lane.b32.xlu1 %v7669_v11, %s7504_s0  ;;  %1016 = vrot.lane.b32.xlu2 %v7679_v13, %s7504_s0 }
 0x185   :  { %1099 = vrot.lane.b32.xlu0 %v7642_v3, %s7507_s30 }
 0x186   :  { %v8150_v18 = vpop.permute.xlu1 %726  ;;  %v8152_v62 = vpop.permute.xlu2 %816 }
 0x187   :  { %16437 = vst [vmem:[#allocation82_spill] sm:$0xff] %v8150_v18  ;;  %v8154_v44 = vpop.permute.xlu0 %806 }
 0x188   :  { %16438 = vst [vmem:[#allocation83_spill] sm:$0xff] %v8152_v62 }
 0x189   :  { %16439 = vst [vmem:[#allocation84_spill] sm:$0xff] %v8154_v44 }
 0x18c   :  { %1020 = vrot.lane.b32.xlu1 %v7681_v14, %s7504_s0  ;;  %1022 = vrot.lane.b32.xlu2 %v7689_v15, %s7504_s0 }
 0x18d   :  { %1105 = vrot.lane.b32.xlu0 %v7650_v5, %s7507_s30 }
 0x18e   :  { %v8162_v60 = vpop.permute.xlu1 %762  ;;  %v8164_v4 = vpop.permute.xlu2 %822 }
 0x18f   :  { %16440 = vst [vmem:[#allocation85_spill] sm:$0xff] %v8162_v60  ;;  %v8166_v28 = vpop.permute.xlu0 %812 }
 0x190   :  { %16441 = vst [vmem:[#allocation86_spill] sm:$0xff] %v8164_v4  ;;  %v7508_v4 = vmov 11  }
 0x191   :  { %16442 = vst [vmem:[#allocation87_spill] sm:$0xff] %v8166_v28 }
 0x194   :  { %1055 = vperm.xlu1 %7304, %v7694_v16   ;;  %1097 = vrot.lane.b32.xlu2 %v7640_v2, %s7507_s30 }
 0x195   :  { %1111 = vrot.lane.b32.xlu0 %v7665_v9, %s7507_s30 }
 0x196   :  { %v8173_v62 = vpop.permute.xlu1 %808  ;;  %v8175_v44 = vpop.permute.xlu2 %828 }
 0x197   :  { %16443 = vst [vmem:[#allocation88_spill] sm:$0xff] %v8173_v62  ;;  %v8177_v18 = vpop.permute.xlu0 %818 }
 0x198   :  { %16444 = vst [vmem:[#allocation89_spill] sm:$0xff] %v8175_v44 }
 0x199   :  { %16445 = vst [vmem:[#allocation90_spill] sm:$0xff] %v8177_v18 }
 0x19c   :  { %1101 = vrot.lane.b32.xlu1 %v7652_v6, %s7507_s30  ;;  %1103 = vrot.lane.b32.xlu2 %v7638_v1, %s7507_s30 }
 0x19d   :  { %1117 = vrot.lane.b32.xlu0 %v7677_v12, %s7507_s30  ;;  %7305 = vset.pattern.permute.xlu1 %v7508_v4 }
 0x19e   :  { %v8185_v60 = vpop.permute.xlu1 %814  ;;  %v8187_v28 = vpop.permute.xlu2 %904 }
 0x19f   :  { %16446 = vst [vmem:[#allocation91_spill] sm:$0xff] %v8185_v60  ;;  %v8189_v62 = vpop.permute.xlu0 %824 }
 0x1a0   :  { %16447 = vst [vmem:[#allocation92_spill] sm:$0xff] %v8187_v28 }
 0x1a1   :  { %16448 = vst [vmem:[#allocation93_spill] sm:$0xff] %v8189_v62 }
 0x1a4   :  { %1107 = vrot.lane.b32.xlu1 %v7654_v7, %s7507_s30  ;;  %1109 = vrot.lane.b32.xlu2 %v7667_v10, %s7507_s30 }
 0x1a5   :  { %1148 = vrot.lane.b32.xlu0 %v7640_v2, %s7509_s13  ;;  %s7520_s13 = smov 76  }
 0x1a6   :  { %v8196_v44 = vpop.permute.xlu1 %820  ;;  %v8198_v18 = vpop.permute.xlu2 %910 }
 0x1a7   :  { %16449 = vst [vmem:[#allocation94_spill] sm:$0xff] %v8196_v44  ;;  %v8200_v4 = vpop.permute.xlu0 %856 }
 0x1a8   :  { %16450 = vst [vmem:[#allocation95_spill] sm:$0xff] %v8198_v18 }
 0x1a9   :  { %16451 = vst [vmem:[#allocation96_spill] sm:$0xff] %v8200_v4 }
 0x1ac   :  { %1113 = vrot.lane.b32.xlu1 %v7669_v11, %s7507_s30  ;;  %1115 = vrot.lane.b32.xlu2 %v7679_v13, %s7507_s30 }
 0x1ad   :  { %1198 = vrot.lane.b32.xlu0 %v7642_v3, %s7510_s18 }
 0x1ae   :  { %v8208_v28 = vpop.permute.xlu1 %826  ;;  %v8210_v62 = vpop.permute.xlu2 %916 }
 0x1af   :  { %16452 = vst [vmem:[#allocation97_spill] sm:$0xff] %v8208_v28  ;;  %v8212_v60 = vpop.permute.xlu0 %906 }
 0x1b0   :  { %16453 = vst [vmem:[#allocation98_spill] sm:$0xff] %v8210_v62 }
 0x1b1   :  { %16454 = vst [vmem:[#allocation99_spill] sm:$0xff] %v8212_v60 }
 0x1b4   :  { %1119 = vrot.lane.b32.xlu1 %v7681_v14, %s7507_s30  ;;  %1121 = vrot.lane.b32.xlu2 %v7689_v15, %s7507_s30  ;;  %s16334_s30 = smov 44  }
 0x1b5   :  { %1204 = vrot.lane.b32.xlu0 %v7650_v5, %s7510_s18 }
 0x1b6   :  { %v8220_v18 = vpop.permute.xlu1 %862  ;;  %v8222_v4 = vpop.permute.xlu2 %922 }
 0x1b7   :  { %16455 = vst [vmem:[#allocation100_spill] sm:$0xff] %v8220_v18  ;;  %v8224_v44 = vpop.permute.xlu0 %912 }
 0x1b8   :  { %16456 = vst [vmem:[#allocation101_spill] sm:$0xff] %v8222_v4  ;;  %v7511_v4 = vmov 12  }
 0x1b9   :  { %16457 = vst [vmem:[#allocation102_spill] sm:$0xff] %v8224_v44 }
 0x1bc   :  { %1154 = vperm.xlu1 %7305, %v7694_v16   ;;  %1196 = vrot.lane.b32.xlu2 %v7640_v2, %s7510_s18 }
 0x1bd   :  { %1210 = vrot.lane.b32.xlu0 %v7665_v9, %s7510_s18 }
 0x1be   :  { %v8231_v62 = vpop.permute.xlu1 %908  ;;  %v8233_v60 = vpop.permute.xlu2 %928 }
 0x1bf   :  { %16458 = vst [vmem:[#allocation103_spill] sm:$0xff] %v8231_v62  ;;  %v8235_v28 = vpop.permute.xlu0 %918 }
 0x1c0   :  { %16459 = vst [vmem:[#allocation104_spill] sm:$0xff] %v8233_v60 }
 0x1c1   :  { %16460 = vst [vmem:[#allocation105_spill] sm:$0xff] %v8235_v28 }
 0x1c4   :  { %1200 = vrot.lane.b32.xlu1 %v7652_v6, %s7510_s18  ;;  %1202 = vrot.lane.b32.xlu2 %v7638_v1, %s7510_s18 }
 0x1c5   :  { %1216 = vrot.lane.b32.xlu0 %v7677_v12, %s7510_s18  ;;  %7306 = vset.pattern.permute.xlu1 %v7511_v4 }
 0x1c6   :  { %v8243_v18 = vpop.permute.xlu1 %914  ;;  %v8245_v44 = vpop.permute.xlu2 %1000 }
 0x1c7   :  { %16461 = vst [vmem:[#allocation106_spill] sm:$0xff] %v8243_v18  ;;  %v8247_v62 = vpop.permute.xlu0 %924 }
 0x1c8   :  { %16462 = vst [vmem:[#allocation107_spill] sm:$0xff] %v8245_v44 }
 0x1c9   :  { %16463 = vst [vmem:[#allocation108_spill] sm:$0xff] %v8247_v62 }
 0x1cc   :  { %1206 = vrot.lane.b32.xlu1 %v7654_v7, %s7510_s18  ;;  %1208 = vrot.lane.b32.xlu2 %v7667_v10, %s7510_s18 }
 0x1cd   :  { %1247 = vrot.lane.b32.xlu0 %v7640_v2, %s16220_s19  ;;  %s7535_s19 = smov 15  }
 0x1ce   :  { %v8255_v60 = vpop.permute.xlu1 %920  ;;  %v8257_v28 = vpop.permute.xlu2 %1004 }
 0x1cf   :  { %16464 = vst [vmem:[#allocation109_spill] sm:$0xff] %v8255_v60  ;;  %v8259_v4 = vpop.permute.xlu0 %956 }
 0x1d0   :  { %16465 = vst [vmem:[#allocation110_spill] sm:$0xff] %v8257_v28 }
 0x1d1   :  { %16466 = vst [vmem:[#allocation111_spill] sm:$0xff] %v8259_v4 }
 0x1d4   :  { %1212 = vrot.lane.b32.xlu1 %v7669_v11, %s7510_s18  ;;  %1214 = vrot.lane.b32.xlu2 %v7679_v13, %s7510_s18 }
 0x1d5   :  { %1297 = vrot.lane.b32.xlu0 %v7642_v3, %s7513_s21 }
 0x1d6   :  { %v8267_v44 = vpop.permute.xlu1 %926  ;;  %v8269_v62 = vpop.permute.xlu2 %1010 }
 0x1d7   :  { %16467 = vst [vmem:[#allocation112_spill] sm:$0xff] %v8267_v44  ;;  %v8271_v18 = vpop.permute.xlu0 %1006 }
 0x1d8   :  { %16468 = vst [vmem:[#allocation113_spill] sm:$0xff] %v8269_v62 }
 0x1d9   :  { %16469 = vst [vmem:[#allocation114_spill] sm:$0xff] %v8271_v18 }
 0x1dc   :  { %1218 = vrot.lane.b32.xlu1 %v7681_v14, %s7510_s18  ;;  %1220 = vrot.lane.b32.xlu2 %v7689_v15, %s7510_s18 }
 0x1dd   :  { %1303 = vrot.lane.b32.xlu0 %v7650_v5, %s7513_s21 }
 0x1de   :  { %v8279_v4 = vpop.permute.xlu1 %998  ;;  %v8281_v28 = vpop.permute.xlu2 %1016 }
 0x1df   :  { %16470 = vst [vmem:[#allocation115_spill] sm:$0xff] %v8279_v4  ;;  %v8283_v60 = vpop.permute.xlu0 %1012 }
 0x1e0   :  { %16471 = vst [vmem:[#allocation116_spill] sm:$0xff] %v8281_v28  ;;  %v7514_v28 = vmov 13  }
 0x1e1   :  { %16472 = vst [vmem:[#allocation117_spill] sm:$0xff] %v8283_v60 }
 0x1e4   :  { %1253 = vperm.xlu1 %7306, %v7694_v16   ;;  %1295 = vrot.lane.b32.xlu2 %v7640_v2, %s7513_s21 }
 0x1e5   :  { %1309 = vrot.lane.b32.xlu0 %v7665_v9, %s7513_s21 }
 0x1e6   :  { %v8290_v62 = vpop.permute.xlu1 %1002  ;;  %v8292_v18 = vpop.permute.xlu2 %1022 }
 0x1e7   :  { %16473 = vst [vmem:[#allocation118_spill] sm:$0xff] %v8290_v62  ;;  %v8294_v44 = vpop.permute.xlu0 %1018 }
 0x1e8   :  { %16474 = vst [vmem:[#allocation119_spill] sm:$0xff] %v8292_v18 }
 0x1e9   :  { %16475 = vst [vmem:[#allocation120_spill] sm:$0xff] %v8294_v44 }
 0x1ec   :  { %1299 = vrot.lane.b32.xlu1 %v7652_v6, %s7513_s21  ;;  %1301 = vrot.lane.b32.xlu2 %v7638_v1, %s7513_s21 }
 0x1ed   :  { %1315 = vrot.lane.b32.xlu0 %v7677_v12, %s7513_s21  ;;  %7307 = vset.pattern.permute.xlu1 %v7514_v28 }
 0x1ee   :  { %v8302_v60 = vpop.permute.xlu1 %1008  ;;  %v8304_v4 = vpop.permute.xlu2 %1097 }
 0x1ef   :  { %16476 = vst [vmem:[#allocation121_spill] sm:$0xff] %v8302_v60  ;;  %v8306_v62 = vpop.permute.xlu0 %1049  ;;  %v7516_v60 = vmov 14  }
 0x1f0   :  { %16477 = vst [vmem:[#allocation122_spill] sm:$0xff] %v8304_v4  ;;  %7308 = vset.pattern.permute.xlu0 %v7516_v60 }
 0x1f1   :  { %16478 = vst [vmem:[#allocation123_spill] sm:$0xff] %v8306_v62 }
 0x1f4   :  { %1305 = vrot.lane.b32.xlu1 %v7654_v7, %s7513_s21  ;;  %1307 = vrot.lane.b32.xlu2 %v7667_v10, %s7513_s21 }
 0x1f5   :  { %1346 = vrot.lane.b32.xlu0 %v7640_v2, %s7515_s22  ;;  %s7522_s22 = smov 75  }
 0x1f6   :  { %v8313_v18 = vpop.permute.xlu1 %1014  ;;  %v8315_v44 = vpop.permute.xlu2 %1103 }
 0x1f7   :  { %16479 = vst [vmem:[#allocation124_spill] sm:$0xff] %v8313_v18  ;;  %v8317_v28 = vpop.permute.xlu0 %1099 }
 0x1f8   :  { %16480 = vst [vmem:[#allocation125_spill] sm:$0xff] %v8315_v44 }
 0x1f9   :  { %16481 = vst [vmem:[#allocation126_spill] sm:$0xff] %v8317_v28 }
 0x1fc   :  { %1311 = vrot.lane.b32.xlu1 %v7669_v11, %s7513_s21  ;;  %1313 = vrot.lane.b32.xlu2 %v7679_v13, %s7513_s21 }
 0x1fd   :  { %1396 = vrot.lane.b32.xlu0 %v7642_v3, %s7517_s24 }
 0x1fe   :  { %v8325_v62 = vpop.permute.xlu1 %1020  ;;  %v8327_v4 = vpop.permute.xlu2 %1109 }
 0x1ff   :  { %16482 = vst [vmem:[#allocation127_spill] sm:$0xff] %v8325_v62  ;;  %v8329_v18 = vpop.permute.xlu0 %1105 }
 0x200   :  { %16483 = vst [vmem:[#allocation128_spill] sm:$0xff] %v8327_v4 }
 0x201   :  { %16484 = vst [vmem:[#allocation129_spill] sm:$0xff] %v8329_v18 }
 0x204   :  { %1317 = vrot.lane.b32.xlu1 %v7681_v14, %s7513_s21  ;;  %1319 = vrot.lane.b32.xlu2 %v7689_v15, %s7513_s21  ;;  %s7521_s21 = smov 43  }
 0x205   :  { %1402 = vrot.lane.b32.xlu0 %v7650_v5, %s7517_s24 }
 0x206   :  { %v8337_v60 = vpop.permute.xlu1 %1055  ;;  %v8339_v44 = vpop.permute.xlu2 %1115 }
 0x207   :  { %16485 = vst [vmem:[#allocation130_spill] sm:$0xff] %v8337_v60  ;;  %v8341_v28 = vpop.permute.xlu0 %1111 }
 0x208   :  { %16486 = vst [vmem:[#allocation131_spill] sm:$0xff] %v8339_v44 }
 0x209   :  { %16487 = vst [vmem:[#allocation132_spill] sm:$0xff] %v8341_v28 }
 0x20c   :  { %1352 = vperm.xlu1 %7307, %v7694_v16   ;;  %1394 = vrot.lane.b32.xlu2 %v7640_v2, %s7517_s24 }
 0x20d   :  { %1408 = vrot.lane.b32.xlu0 %v7665_v9, %s7517_s24 }
 0x20e   :  { %v8348_v4 = vpop.permute.xlu1 %1101  ;;  %v8350_v18 = vpop.permute.xlu2 %1121 }
 0x20f   :  { %16488 = vst [vmem:[#allocation133_spill] sm:$0xff] %v8348_v4  ;;  %v8352_v62 = vpop.permute.xlu0 %1117 }
 0x210   :  { %16489 = vst [vmem:[#allocation134_spill] sm:$0xff] %v8350_v18 }
 0x211   :  { %16490 = vst [vmem:[#allocation135_spill] sm:$0xff] %v8352_v62 }
 0x214   :  { %1398 = vrot.lane.b32.xlu1 %v7652_v6, %s7517_s24  ;;  %1400 = vrot.lane.b32.xlu2 %v7638_v1, %s7517_s24 }
 0x215   :  { %1414 = vrot.lane.b32.xlu0 %v7677_v12, %s7517_s24 }
 0x216   :  { %v8360_v44 = vpop.permute.xlu1 %1107  ;;  %v8362_v28 = vpop.permute.xlu2 %1196 }
 0x217   :  { %16491 = vst [vmem:[#allocation136_spill] sm:$0xff] %v8360_v44  ;;  %v8364_v60 = vpop.permute.xlu0 %1148 }
 0x218   :  { %16492 = vst [vmem:[#allocation137_spill] sm:$0xff] %v8362_v28 }
 0x219   :  { %16493 = vst [vmem:[#allocation138_spill] sm:$0xff] %v8364_v60 }
 0x21c   :  { %1404 = vrot.lane.b32.xlu1 %v7654_v7, %s7517_s24  ;;  %1406 = vrot.lane.b32.xlu2 %v7667_v10, %s7517_s24 }
 0x21d   :  { %1448 = vperm.xlu0 %7308, %v7694_v16  }
 0x21e   :  { %v8371_v18 = vpop.permute.xlu1 %1113  ;;  %v8373_v62 = vpop.permute.xlu2 %1202 }
 0x21f   :  { %16494 = vst [vmem:[#allocation139_spill] sm:$0xff] %v8371_v18  ;;  %v8375_v4 = vpop.permute.xlu0 %1198 }
 0x220   :  { %16495 = vst [vmem:[#allocation140_spill] sm:$0xff] %v8373_v62 }
 0x221   :  { %16496 = vst [vmem:[#allocation141_spill] sm:$0xff] %v8375_v4 }
 0x224   :  { %1410 = vrot.lane.b32.xlu1 %v7669_v11, %s7517_s24  ;;  %1412 = vrot.lane.b32.xlu2 %v7679_v13, %s7517_s24 }
 0x225   :  { %1498 = vrot.lane.b32.xlu0 %v7650_v5, %s16334_s30 }
 0x226   :  { %v8383_v60 = vpop.permute.xlu1 %1119  ;;  %v8385_v28 = vpop.permute.xlu2 %1208 }
 0x227   :  { %16497 = vst [vmem:[#allocation142_spill] sm:$0xff] %v8383_v60  ;;  %v8387_v44 = vpop.permute.xlu0 %1204 }
 0x228   :  { %16498 = vst [vmem:[#allocation143_spill] sm:$0xff] %v8385_v28 }
 0x229   :  { %16499 = vst [vmem:[#allocation144_spill] sm:$0xff] %v8387_v44 }
 0x22c   :  { %1416 = vrot.lane.b32.xlu1 %v7681_v14, %s7517_s24  ;;  %1418 = vrot.lane.b32.xlu2 %v7689_v15, %s7517_s24 }
 0x22d   :  { %1504 = vrot.lane.b32.xlu0 %v7665_v9, %s16334_s30 }
 0x22e   :  { %v8395_v62 = vpop.permute.xlu1 %1154  ;;  %v8397_v4 = vpop.permute.xlu2 %1214 }
 0x22f   :  { %16500 = vst [vmem:[#allocation145_spill] sm:$0xff] %v8395_v62  ;;  %v8399_v18 = vpop.permute.xlu0 %1210  ;;  %v7519_v62 = vmov 15  }
 0x230   :  { %16501 = vst [vmem:[#allocation146_spill] sm:$0xff] %v8397_v4  ;;  %7309 = vset.pattern.permute.xlu1 %v7519_v62 }
 0x231   :  { %16502 = vst [vmem:[#allocation147_spill] sm:$0xff] %v8399_v18 }
 0x234   :  { %1490 = vrot.lane.b32.xlu1 %v7640_v2, %s16334_s30  ;;  %1492 = vrot.lane.b32.xlu2 %v7642_v3, %s16334_s30 }
 0x235   :  { %1510 = vrot.lane.b32.xlu0 %v7677_v12, %s16334_s30 }
 0x236   :  { %v8407_v28 = vpop.permute.xlu1 %1200  ;;  %v8409_v44 = vpop.permute.xlu2 %1220 }
 0x237   :  { %16503 = vst [vmem:[#allocation148_spill] sm:$0xff] %v8407_v28  ;;  %v8411_v60 = vpop.permute.xlu0 %1216 }
 0x238   :  { %16504 = vst [vmem:[#allocation149_spill] sm:$0xff] %v8409_v44 }
 0x239   :  { %16505 = vst [vmem:[#allocation150_spill] sm:$0xff] %v8411_v60 }
 0x23c   :  { %1494 = vrot.lane.b32.xlu1 %v7652_v6, %s16334_s30  ;;  %1496 = vrot.lane.b32.xlu2 %v7638_v1, %s16334_s30 }
 0x23d   :  { %1541 = vrot.lane.b32.xlu0 %v7640_v2, %s7520_s13  ;;  %s16335_s13 = smov 42  }
 0x23e   :  { %v8418_v4 = vpop.permute.xlu1 %1206  ;;  %v8420_v18 = vpop.permute.xlu2 %1295 }
 0x23f   :  { %16506 = vst [vmem:[#allocation151_spill] sm:$0xff] %v8418_v4  ;;  %v8422_v28 = vpop.permute.xlu0 %1247 }
 0x240   :  { %16507 = vst [vmem:[#allocation152_spill] sm:$0xff] %v8420_v18 }
 0x241   :  { %16508 = vst [vmem:[#allocation153_spill] sm:$0xff] %v8422_v28 }
 0x244   :  { %1500 = vrot.lane.b32.xlu1 %v7654_v7, %s16334_s30  ;;  %1502 = vrot.lane.b32.xlu2 %v7667_v10, %s16334_s30 }
 0x245   :  { %1591 = vrot.lane.b32.xlu0 %v7642_v3, %s7521_s21 }
 0x246   :  { %v8430_v62 = vpop.permute.xlu1 %1212  ;;  %v8432_v44 = vpop.permute.xlu2 %1301 }
 0x247   :  { %16509 = vst [vmem:[#allocation154_spill] sm:$0xff] %v8430_v62  ;;  %v8434_v60 = vpop.permute.xlu0 %1297 }
 0x248   :  { %16510 = vst [vmem:[#allocation155_spill] sm:$0xff] %v8432_v44 }
 0x249   :  { %16511 = vst [vmem:[#allocation156_spill] sm:$0xff] %v8434_v60 }
 0x24c   :  { %1506 = vrot.lane.b32.xlu1 %v7669_v11, %s16334_s30  ;;  %1508 = vrot.lane.b32.xlu2 %v7679_v13, %s16334_s30 }
 0x24d   :  { %1597 = vrot.lane.b32.xlu0 %v7650_v5, %s7521_s21 }
 0x24e   :  { %v8442_v28 = vpop.permute.xlu1 %1218  ;;  %v8444_v18 = vpop.permute.xlu2 %1307 }
 0x24f   :  { %16512 = vst [vmem:[#allocation157_spill] sm:$0xff] %v8442_v28  ;;  %v8446_v4 = vpop.permute.xlu0 %1303 }
 0x250   :  { %16513 = vst [vmem:[#allocation158_spill] sm:$0xff] %v8444_v18 }
 0x251   :  { %16514 = vst [vmem:[#allocation159_spill] sm:$0xff] %v8446_v4 }
 0x254   :  { %1512 = vrot.lane.b32.xlu1 %v7681_v14, %s16334_s30  ;;  %1514 = vrot.lane.b32.xlu2 %v7689_v15, %s16334_s30  ;;  %s7558_s30 = smov 64  }
 0x255   :  { %1603 = vrot.lane.b32.xlu0 %v7665_v9, %s7521_s21 }
 0x256   :  { %v8454_v44 = vpop.permute.xlu1 %1253  ;;  %v8456_v60 = vpop.permute.xlu2 %1313 }
 0x257   :  { %16515 = vst [vmem:[#allocation160_spill] sm:$0xff] %v8454_v44  ;;  %v8458_v62 = vpop.permute.xlu0 %1309 }
 0x258   :  { %16516 = vst [vmem:[#allocation161_spill] sm:$0xff] %v8456_v60  ;;  %v7523_v60 = vmov 16  }
 0x259   :  { %16517 = vst [vmem:[#allocation162_spill] sm:$0xff] %v8458_v62 }
 0x25c   :  { %1547 = vperm.xlu1 %7309, %v7694_v16   ;;  %1589 = vrot.lane.b32.xlu2 %v7640_v2, %s7521_s21 }
 0x25d   :  { %1609 = vrot.lane.b32.xlu0 %v7677_v12, %s7521_s21 }
 0x25e   :  { %v8465_v18 = vpop.permute.xlu1 %1299  ;;  %v8467_v4 = vpop.permute.xlu2 %1319 }
 0x25f   :  { %16518 = vst [vmem:[#allocation163_spill] sm:$0xff] %v8465_v18  ;;  %v8469_v28 = vpop.permute.xlu0 %1315 }
 0x260   :  { %16519 = vst [vmem:[#allocation164_spill] sm:$0xff] %v8467_v4 }
 0x261   :  { %16520 = vst [vmem:[#allocation165_spill] sm:$0xff] %v8469_v28 }
 0x264   :  { %1593 = vrot.lane.b32.xlu1 %v7652_v6, %s7521_s21  ;;  %1595 = vrot.lane.b32.xlu2 %v7638_v1, %s7521_s21 }
 0x265   :  { %1640 = vrot.lane.b32.xlu0 %v7640_v2, %s7522_s22  ;;  %7310 = vset.pattern.permute.xlu1 %v7523_v60  ;;  %s7527_s22 = smov 41  }
 0x266   :  { %v8476_v44 = vpop.permute.xlu1 %1305  ;;  %v8478_v62 = vpop.permute.xlu2 %1394 }
 0x267   :  { %16521 = vst [vmem:[#allocation166_spill] sm:$0xff] %v8476_v44  ;;  %v8480_v18 = vpop.permute.xlu0 %1346 }
 0x268   :  { %16522 = vst [vmem:[#allocation167_spill] sm:$0xff] %v8478_v62 }
 0x269   :  { %16523 = vst [vmem:[#allocation168_spill] sm:$0xff] %v8480_v18 }
 0x26c   :  { %1599 = vrot.lane.b32.xlu1 %v7654_v7, %s7521_s21  ;;  %1601 = vrot.lane.b32.xlu2 %v7667_v10, %s7521_s21 }
 0x26d   :  { %1690 = vrot.lane.b32.xlu0 %v7642_v3, %s16335_s13 }
 0x26e   :  { %v8488_v4 = vpop.permute.xlu1 %1311  ;;  %v8490_v28 = vpop.permute.xlu2 %1400 }
 0x26f   :  { %16524 = vst [vmem:[#allocation169_spill] sm:$0xff] %v8488_v4  ;;  %v8492_v60 = vpop.permute.xlu0 %1396 }
 0x270   :  { %16525 = vst [vmem:[#allocation170_spill] sm:$0xff] %v8490_v28 }
 0x271   :  { %16526 = vst [vmem:[#allocation171_spill] sm:$0xff] %v8492_v60 }
 0x274   :  { %1605 = vrot.lane.b32.xlu1 %v7669_v11, %s7521_s21  ;;  %1607 = vrot.lane.b32.xlu2 %v7679_v13, %s7521_s21 }
 0x275   :  { %1696 = vrot.lane.b32.xlu0 %v7650_v5, %s16335_s13 }
 0x276   :  { %v8500_v18 = vpop.permute.xlu1 %1317  ;;  %v8502_v62 = vpop.permute.xlu2 %1406 }
 0x277   :  { %16527 = vst [vmem:[#allocation172_spill] sm:$0xff] %v8500_v18  ;;  %v8504_v44 = vpop.permute.xlu0 %1402 }
 0x278   :  { %16528 = vst [vmem:[#allocation173_spill] sm:$0xff] %v8502_v62 }
 0x279   :  { %16529 = vst [vmem:[#allocation174_spill] sm:$0xff] %v8504_v44 }
 0x27c   :  { %1611 = vrot.lane.b32.xlu1 %v7681_v14, %s7521_s21  ;;  %1613 = vrot.lane.b32.xlu2 %v7689_v15, %s7521_s21  ;;  %s7525_s21 = smov 74  }
 0x27d   :  { %1702 = vrot.lane.b32.xlu0 %v7665_v9, %s16335_s13 }
 0x27e   :  { %v8512_v28 = vpop.permute.xlu1 %1352  ;;  %v8514_v60 = vpop.permute.xlu2 %1412 }
 0x27f   :  { %16530 = vst [vmem:[#allocation175_spill] sm:$0xff] %v8512_v28  ;;  %v8516_v4 = vpop.permute.xlu0 %1408 }
 0x280   :  { %16531 = vst [vmem:[#allocation176_spill] sm:$0xff] %v8514_v60 }
 0x281   :  { %16532 = vst [vmem:[#allocation177_spill] sm:$0xff] %v8516_v4 }
 0x284   :  { %1646 = vperm.xlu1 %7310, %v7694_v16   ;;  %1688 = vrot.lane.b32.xlu2 %v7640_v2, %s16335_s13  ;;  %v7526_v16 = vmov 17  }
 0x285   :  { %1708 = vrot.lane.b32.xlu0 %v7677_v12, %s16335_s13 }
 0x286   :  { %v8523_v62 = vpop.permute.xlu1 %1398  ;;  %v8525_v44 = vpop.permute.xlu2 %1418 }
 0x287   :  { %16533 = vst [vmem:[#allocation178_spill] sm:$0xff] %v8523_v62  ;;  %v8527_v18 = vpop.permute.xlu0 %1414 }
 0x288   :  { %16534 = vst [vmem:[#allocation179_spill] sm:$0xff] %v8525_v44 }
 0x289   :  { %16535 = vst [vmem:[#allocation180_spill] sm:$0xff] %v8527_v18 }
 0x28c   :  { %1692 = vrot.lane.b32.xlu1 %v7652_v6, %s16335_s13  ;;  %1694 = vrot.lane.b32.xlu2 %v7638_v1, %s16335_s13 }
 0x28d   :  { %1739 = vrot.lane.b32.xlu0 %v7640_v2, %s7525_s21  ;;  %7311 = vset.pattern.permute.xlu1 %v7526_v16  ;;  %s16336_s21 = smov 40  }
 0x28e   :  { %v8534_v60 = vpop.permute.xlu1 %1404  ;;  %v8536_v4 = vpop.permute.xlu2 %1492 }
 0x28f   :  { %16536 = vst [vmem:[#allocation181_spill] sm:$0xff] %v8534_v60  ;;  %v8538_v62 = vpop.permute.xlu0 %1448 }
 0x290   :  { %16537 = vst [vmem:[#allocation182_spill] sm:$0xff] %v8536_v4 }
 0x291   :  { %16538 = vst [vmem:[#allocation183_spill] sm:$0xff] %v8538_v62 }
 0x294   :  { %1698 = vrot.lane.b32.xlu1 %v7654_v7, %s16335_s13  ;;  %1700 = vrot.lane.b32.xlu2 %v7667_v10, %s16335_s13 }
 0x295   :  { %1789 = vrot.lane.b32.xlu0 %v7642_v3, %s7527_s22 }
 0x296   :  { %v8546_v18 = vpop.permute.xlu1 %1410  ;;  %v8548_v44 = vpop.permute.xlu2 %1496 }
 0x297   :  { %16539 = vst [vmem:[#allocation184_spill] sm:$0xff] %v8546_v18  ;;  %v8550_v16 = vpop.permute.xlu0 %1498 }
 0x298   :  { %16540 = vst [vmem:[#allocation185_spill] sm:$0xff] %v8548_v44 }
 0x299   :  { %16541 = vst [vmem:[#allocation186_spill] sm:$0xff] %v8550_v16 }
 0x29c   :  { %1704 = vrot.lane.b32.xlu1 %v7669_v11, %s16335_s13  ;;  %1706 = vrot.lane.b32.xlu2 %v7679_v13, %s16335_s13 }
 0x29d   :  { %1795 = vrot.lane.b32.xlu0 %v7650_v5, %s7527_s22 }
 0x29e   :  { %v8558_v4 = vpop.permute.xlu1 %1416  ;;  %v8560_v62 = vpop.permute.xlu2 %1502 }
 0x29f   :  { %16542 = vst [vmem:[#allocation187_spill] sm:$0xff] %v8558_v4  ;;  %v8562_v60 = vpop.permute.xlu0 %1504 }
 0x2a0   :  { %16543 = vst [vmem:[#allocation188_spill] sm:$0xff] %v8560_v62  ;;  %v8579_v62 = vld [vmem:[%s16030_s1] sm:$0xff] }
 0x2a1   :  { %16544 = vst [vmem:[#allocation189_spill] sm:$0xff] %v8562_v60 }
 0x2a4   :  { %1710 = vrot.lane.b32.xlu1 %v7681_v14, %s16335_s13  ;;  %1712 = vrot.lane.b32.xlu2 %v7689_v15, %s16335_s13  ;;  %s7559_s13 = smov 86  }
 0x2a5   :  { %1801 = vrot.lane.b32.xlu0 %v7665_v9, %s7527_s22 }
 0x2a6   :  { %v8570_v44 = vpop.permute.xlu1 %1490  ;;  %v8572_v16 = vpop.permute.xlu2 %1508 }
 0x2a7   :  { %16545 = vst [vmem:[#allocation190_spill] sm:$0xff] %v8570_v44  ;;  %v8574_v18 = vpop.permute.xlu0 %1510 }
 0x2a8   :  { %16546 = vst [vmem:[#allocation191_spill] sm:$0xff] %v8572_v16 }
 0x2a9   :  { %16547 = vst [vmem:[#allocation192_spill] sm:$0xff] %v8574_v18  ;;  %v7529_v18 = vmov 18  }
 0x2ac   :  { %1745 = vperm.xlu1 %7311, %v8579_v62   ;;  %1787 = vrot.lane.b32.xlu2 %v7640_v2, %s7527_s22 }
 0x2ad   :  { %1807 = vrot.lane.b32.xlu0 %v7677_v12, %s7527_s22 }
 0x2ae   :  { %v8586_v60 = vpop.permute.xlu1 %1494  ;;  %v8588_v44 = vpop.permute.xlu2 %1514 }
 0x2af   :  { %16548 = vst [vmem:[#allocation193_spill] sm:$0xff] %v8586_v60  ;;  %v8590_v16 = vpop.permute.xlu0 %1541 }
 0x2b0   :  { %16549 = vst [vmem:[#allocation194_spill] sm:$0xff] %v8588_v44  ;;  %v7530_v44 = vmov 19  }
 0x2b1   :  { %16550 = vst [vmem:[#allocation195_spill] sm:$0xff] %v8590_v16  ;;  %7313 = vset.pattern.permute.xlu0 %v7530_v44 }
 0x2b4   :  { %1791 = vrot.lane.b32.xlu1 %v7652_v6, %s7527_s22  ;;  %1793 = vrot.lane.b32.xlu2 %v7638_v1, %s7527_s22 }
 0x2b5   :  { %1838 = vrot.lane.b32.xlu0 %v7640_v2, %s7528_s26  ;;  %7312 = vset.pattern.permute.xlu1 %v7529_v18  ;;  %s16261_s26 = smov 48  }
 0x2b6   :  { %v8597_v4 = vpop.permute.xlu1 %1500  ;;  %v8599_v28 = vpop.permute.xlu2 %1589 }
 0x2b7   :  { %16551 = vst [vmem:[#allocation196_spill] sm:$0xff] %v8597_v4  ;;  %v8601_v60 = vpop.permute.xlu0 %1591 }
 0x2b8   :  { %16552 = vst [vmem:[#allocation197_spill] sm:$0xff] %v8599_v28 }
 0x2b9   :  { %16553 = vst [vmem:[#allocation198_spill] sm:$0xff] %v8601_v60 }
 0x2bc   :  { %1797 = vrot.lane.b32.xlu1 %v7654_v7, %s7527_s22  ;;  %1799 = vrot.lane.b32.xlu2 %v7667_v10, %s7527_s22 }
 0x2bd   :  { %1888 = vrot.lane.b32.xlu0 %v7642_v3, %s16336_s21 }
 0x2be   :  { %v8609_v16 = vpop.permute.xlu1 %1506  ;;  %v8611_v18 = vpop.permute.xlu2 %1595 }
 0x2bf   :  { %16554 = vst [vmem:[#allocation199_spill] sm:$0xff] %v8609_v16  ;;  %v8613_v4 = vpop.permute.xlu0 %1597 }
 0x2c0   :  { %16555 = vst [vmem:[#allocation200_spill] sm:$0xff] %v8611_v18 }
 0x2c1   :  { %16556 = vst [vmem:[#allocation201_spill] sm:$0xff] %v8613_v4 }
 0x2c4   :  { %1803 = vrot.lane.b32.xlu1 %v7669_v11, %s7527_s22  ;;  %1805 = vrot.lane.b32.xlu2 %v7679_v13, %s7527_s22 }
 0x2c5   :  { %1894 = vrot.lane.b32.xlu0 %v7650_v5, %s16336_s21 }
 0x2c6   :  { %v8621_v44 = vpop.permute.xlu1 %1512  ;;  %v8623_v28 = vpop.permute.xlu2 %1601 }
 0x2c7   :  { %16557 = vst [vmem:[#allocation202_spill] sm:$0xff] %v8621_v44  ;;  %v8625_v60 = vpop.permute.xlu0 %1603 }
 0x2c8   :  { %16558 = vst [vmem:[#allocation203_spill] sm:$0xff] %v8623_v28 }
 0x2c9   :  { %16559 = vst [vmem:[#allocation204_spill] sm:$0xff] %v8625_v60 }
 0x2cc   :  { %1809 = vrot.lane.b32.xlu1 %v7681_v14, %s7527_s22  ;;  %1811 = vrot.lane.b32.xlu2 %v7689_v15, %s7527_s22  ;;  %s7532_s22 = smov 16  }
 0x2cd   :  { %1900 = vrot.lane.b32.xlu0 %v7665_v9, %s16336_s21 }
 0x2ce   :  { %v8633_v18 = vpop.permute.xlu1 %1547  ;;  %v8635_v4 = vpop.permute.xlu2 %1607 }
 0x2cf   :  { %16560 = vst [vmem:[#allocation205_spill] sm:$0xff] %v8633_v18  ;;  %v8637_v16 = vpop.permute.xlu0 %1609 }
 0x2d0   :  { %16561 = vst [vmem:[#allocation206_spill] sm:$0xff] %v8635_v4 }
 0x2d1   :  { %16562 = vst [vmem:[#allocation207_spill] sm:$0xff] %v8637_v16 }
 0x2d4   :  { %1844 = vperm.xlu1 %7312, %v8579_v62   ;;  %1886 = vrot.lane.b32.xlu2 %v7640_v2, %s16336_s21 }
 0x2d5   :  { %1906 = vrot.lane.b32.xlu0 %v7677_v12, %s16336_s21 }
 0x2d6   :  { %v8644_v28 = vpop.permute.xlu1 %1593  ;;  %v8646_v60 = vpop.permute.xlu2 %1613 }
 0x2d7   :  { %16563 = vst [vmem:[#allocation208_spill] sm:$0xff] %v8644_v28  ;;  %v8648_v44 = vpop.permute.xlu0 %1640 }
 0x2d8   :  { %16564 = vst [vmem:[#allocation209_spill] sm:$0xff] %v8646_v60 }
 0x2d9   :  { %16565 = vst [vmem:[#allocation210_spill] sm:$0xff] %v8648_v44 }
 0x2dc   :  { %1890 = vrot.lane.b32.xlu1 %v7652_v6, %s16336_s21  ;;  %1892 = vrot.lane.b32.xlu2 %v7638_v1, %s16336_s21 }
 0x2dd   :  { %1940 = vperm.xlu0 %7313, %v8579_v62  }
 0x2de   :  { %v8655_v18 = vpop.permute.xlu1 %1599  ;;  %v8657_v4 = vpop.permute.xlu2 %1688 }
 0x2df   :  { %16566 = vst [vmem:[#allocation211_spill] sm:$0xff] %v8655_v18  ;;  %v8659_v16 = vpop.permute.xlu0 %1690 }
 0x2e0   :  { %16567 = vst [vmem:[#allocation212_spill] sm:$0xff] %v8657_v4 }
 0x2e1   :  { %16568 = vst [vmem:[#allocation213_spill] sm:$0xff] %v8659_v16 }
 0x2e4   :  { %1896 = vrot.lane.b32.xlu1 %v7654_v7, %s16336_s21  ;;  %1898 = vrot.lane.b32.xlu2 %v7667_v10, %s16336_s21 }
 0x2e5   :  { %1990 = vrot.lane.b32.xlu0 %v7650_v5, %s7532_s22 }
 0x2e6   :  { %v8667_v44 = vpop.permute.xlu1 %1605  ;;  %v8669_v60 = vpop.permute.xlu2 %1694 }
 0x2e7   :  { %16569 = vst [vmem:[#allocation214_spill] sm:$0xff] %v8667_v44  ;;  %v8671_v28 = vpop.permute.xlu0 %1696 }
 0x2e8   :  { %16570 = vst [vmem:[#allocation215_spill] sm:$0xff] %v8669_v60 }
 0x2e9   :  { %16571 = vst [vmem:[#allocation216_spill] sm:$0xff] %v8671_v28 }
 0x2ec   :  { %1902 = vrot.lane.b32.xlu1 %v7669_v11, %s16336_s21  ;;  %1904 = vrot.lane.b32.xlu2 %v7679_v13, %s16336_s21 }
 0x2ed   :  { %1996 = vrot.lane.b32.xlu0 %v7665_v9, %s7532_s22 }
 0x2ee   :  { %v8679_v4 = vpop.permute.xlu1 %1611  ;;  %v8681_v16 = vpop.permute.xlu2 %1700 }
 0x2ef   :  { %16572 = vst [vmem:[#allocation217_spill] sm:$0xff] %v8679_v4  ;;  %v8683_v18 = vpop.permute.xlu0 %1702 }
 0x2f0   :  { %16573 = vst [vmem:[#allocation218_spill] sm:$0xff] %v8681_v16 }
 0x2f1   :  { %16574 = vst [vmem:[#allocation219_spill] sm:$0xff] %v8683_v18 }
 0x2f4   :  { %1908 = vrot.lane.b32.xlu1 %v7681_v14, %s16336_s21  ;;  %1910 = vrot.lane.b32.xlu2 %v7689_v15, %s16336_s21  ;;  %s7560_s21 = smov 66  }
 0x2f5   :  { %2002 = vrot.lane.b32.xlu0 %v7677_v12, %s7532_s22 }
 0x2f6   :  { %v8691_v60 = vpop.permute.xlu1 %1646  ;;  %v8693_v28 = vpop.permute.xlu2 %1706 }
 0x2f7   :  { %16575 = vst [vmem:[#allocation220_spill] sm:$0xff] %v8691_v60  ;;  %v8695_v44 = vpop.permute.xlu0 %1708  ;;  %v7534_v60 = vmov 20  }
 0x2f8   :  { %16576 = vst [vmem:[#allocation221_spill] sm:$0xff] %v8693_v28  ;;  %7314 = vset.pattern.permute.xlu1 %v7534_v60 }
 0x2f9   :  { %16577 = vst [vmem:[#allocation222_spill] sm:$0xff] %v8695_v44 }
 0x2fc   :  { %1982 = vrot.lane.b32.xlu1 %v7640_v2, %s7532_s22  ;;  %1984 = vrot.lane.b32.xlu2 %v7642_v3, %s7532_s22 }
 0x2fd   :  { %2033 = vrot.lane.b32.xlu0 %v7640_v2, %s16261_s26  ;;  %s7542_s26 = smov 45  }
 0x2fe   :  { %v8703_v16 = vpop.permute.xlu1 %1692  ;;  %v8705_v18 = vpop.permute.xlu2 %1712 }
 0x2ff   :  { %16578 = vst [vmem:[#allocation223_spill] sm:$0xff] %v8703_v16  ;;  %v8707_v4 = vpop.permute.xlu0 %1739 }
 0x300   :  { %16579 = vst [vmem:[#allocation224_spill] sm:$0xff] %v8705_v18 }
 0x301   :  { %16580 = vst [vmem:[#allocation225_spill] sm:$0xff] %v8707_v4 }
 0x304   :  { %1986 = vrot.lane.b32.xlu1 %v7652_v6, %s7532_s22  ;;  %1988 = vrot.lane.b32.xlu2 %v7638_v1, %s7532_s22 }
 0x305   :  { %2083 = vrot.lane.b32.xlu0 %v7642_v3, %s7535_s19 }
 0x306   :  { %v8715_v28 = vpop.permute.xlu1 %1698  ;;  %v8717_v44 = vpop.permute.xlu2 %1787 }
 0x307   :  { %16581 = vst [vmem:[#allocation226_spill] sm:$0xff] %v8715_v28  ;;  %v8719_v16 = vpop.permute.xlu0 %1789 }
 0x308   :  { %16582 = vst [vmem:[#allocation227_spill] sm:$0xff] %v8717_v44 }
 0x309   :  { %16583 = vst [vmem:[#allocation228_spill] sm:$0xff] %v8719_v16 }
 0x30c   :  { %1992 = vrot.lane.b32.xlu1 %v7654_v7, %s7532_s22  ;;  %1994 = vrot.lane.b32.xlu2 %v7667_v10, %s7532_s22 }
 0x30d   :  { %2089 = vrot.lane.b32.xlu0 %v7650_v5, %s7535_s19 }
 0x30e   :  { %v8727_v60 = vpop.permute.xlu1 %1704  ;;  %v8729_v4 = vpop.permute.xlu2 %1793 }
 0x30f   :  { %16584 = vst [vmem:[#allocation229_spill] sm:$0xff] %v8727_v60  ;;  %v8731_v18 = vpop.permute.xlu0 %1795 }
 0x310   :  { %16585 = vst [vmem:[#allocation230_spill] sm:$0xff] %v8729_v4 }
 0x311   :  { %16586 = vst [vmem:[#allocation231_spill] sm:$0xff] %v8731_v18 }
 0x314   :  { %1998 = vrot.lane.b32.xlu1 %v7669_v11, %s7532_s22  ;;  %2000 = vrot.lane.b32.xlu2 %v7679_v13, %s7532_s22 }
 0x315   :  { %2095 = vrot.lane.b32.xlu0 %v7665_v9, %s7535_s19 }
 0x316   :  { %v8739_v44 = vpop.permute.xlu1 %1710  ;;  %v8741_v16 = vpop.permute.xlu2 %1799 }
 0x317   :  { %16587 = vst [vmem:[#allocation232_spill] sm:$0xff] %v8739_v44  ;;  %v8743_v28 = vpop.permute.xlu0 %1801 }
 0x318   :  { %16588 = vst [vmem:[#allocation233_spill] sm:$0xff] %v8741_v16 }
 0x319   :  { %16589 = vst [vmem:[#allocation234_spill] sm:$0xff] %v8743_v28 }
 0x31c   :  { %2004 = vrot.lane.b32.xlu1 %v7681_v14, %s7532_s22  ;;  %2006 = vrot.lane.b32.xlu2 %v7689_v15, %s7532_s22 }
 0x31d   :  { %2101 = vrot.lane.b32.xlu0 %v7677_v12, %s7535_s19 }
 0x31e   :  { %v8751_v4 = vpop.permute.xlu1 %1745  ;;  %v8753_v18 = vpop.permute.xlu2 %1805 }
 0x31f   :  { %16590 = vst [vmem:[#allocation235_spill] sm:$0xff] %v8751_v4  ;;  %v8755_v60 = vpop.permute.xlu0 %1807  ;;  %v7538_v4 = vmov 21  }
 0x320   :  { %16591 = vst [vmem:[#allocation236_spill] sm:$0xff] %v8753_v18 }
 0x321   :  { %16592 = vst [vmem:[#allocation237_spill] sm:$0xff] %v8755_v60 }
 0x324   :  { %2039 = vperm.xlu1 %7314, %v8579_v62   ;;  %2081 = vrot.lane.b32.xlu2 %v7640_v2, %s7535_s19 }
 0x325   :  { %2132 = vrot.lane.b32.xlu0 %v7640_v2, %s7536_s20  ;;  %s16273_s20 = smov 46  }
 0x326   :  { %v8761_v16 = vpop.permute.xlu1 %1791  ;;  %v8763_v28 = vpop.permute.xlu2 %1811 }
 0x327   :  { %16593 = vst [vmem:[#allocation238_spill] sm:$0xff] %v8761_v16  ;;  %v8765_v44 = vpop.permute.xlu0 %1838 }
 0x328   :  { %16594 = vst [vmem:[#allocation239_spill] sm:$0xff] %v8763_v28 }
 0x329   :  { %16595 = vst [vmem:[#allocation240_spill] sm:$0xff] %v8765_v44 }
 0x32c   :  { %2085 = vrot.lane.b32.xlu1 %v7652_v6, %s7535_s19  ;;  %2087 = vrot.lane.b32.xlu2 %v7638_v1, %s7535_s19 }
 0x32d   :  { %2182 = vrot.lane.b32.xlu0 %v7642_v3, %s7537_s25  ;;  %7315 = vset.pattern.permute.xlu1 %v7538_v4 }
 0x32e   :  { %v8773_v18 = vpop.permute.xlu1 %1797  ;;  %v8775_v60 = vpop.permute.xlu2 %1886 }
 0x32f   :  { %16596 = vst [vmem:[#allocation241_spill] sm:$0xff] %v8773_v18  ;;  %v8777_v16 = vpop.permute.xlu0 %1888 }
 0x330   :  { %16597 = vst [vmem:[#allocation242_spill] sm:$0xff] %v8775_v60  ;;  %v134_v60 = vsel %vm130_vm0, %v7736_v19, %v7741_v20 }
 0x331   :  { %16598 = vst [vmem:[#allocation243_spill] sm:$0xff] %v8777_v16  ;;  %v131_v16 = vsel %vm130_vm0, %v7756_v24, %v7754_v23  ;;  %v137_v24 = vsel %vm130_vm0, %v7775_v29, %v7746_v21 }
 0x332   :  { %v165_v18 = vperm.slane %v131_v16, 0  ;;  %v160_v16 = vsel %vm159_vm1, %v7799_v35, %v7765_v26  ;;  %v139_v26 = vsel %vm130_vm0, %v7779_v31, %v7787_v32 }
 0x334   :  { %2091 = vrot.lane.b32.xlu1 %v7654_v7, %s7535_s19  ;;  %2093 = vrot.lane.b32.xlu2 %v7667_v10, %s7535_s19  ;;  %v177_v10 = vperm.slane %v160_v16, 0 }
 0x335   :  { %2188 = vrot.lane.b32.xlu0 %v7650_v5, %s7537_s25 }
 0x336   :  { %v8785_v44 = vpop.permute.xlu1 %1803  ;;  %v8787_v28 = vpop.permute.xlu2 %1892 }
 0x337   :  { %16599 = vst [vmem:[#allocation244_spill] sm:$0xff] %v8785_v44  ;;  %v8789_v4 = vpop.permute.xlu0 %1894  ;;  %v168_v44 = vperm.slane %v134_v60, 0  ;;  %v133_v60 = vsel %vm130_vm0, %v7763_v25, %v7736_v19  ;;  %v141_v19 = vsel %vm130_vm0, %v7752_v22, %v7791_v34 }
 0x338   :  { %16600 = vst [vmem:[#allocation245_spill] sm:$0xff] %v8787_v28  ;;  %v167_v7 = vperm.slane %v133_v60, 0 }
 0x339   :  { %16601 = vst [vmem:[#allocation246_spill] sm:$0xff] %v8789_v4 }
 0x33c   :  { %2097 = vrot.lane.b32.xlu1 %v7669_v11, %s7535_s19  ;;  %2099 = vrot.lane.b32.xlu2 %v7679_v13, %s7535_s19  ;;  %v132_v13 = vsel %vm130_vm0, %v7754_v23, %v7763_v25  ;;  %v135_v23 = vsel %vm130_vm0, %v7741_v20, %v7767_v27  ;;  %v171_v11 = vperm.slane %v137_v24, 0 }
 0x33d   :  { %2194 = vrot.lane.b32.xlu0 %v7665_v9, %s7537_s25  ;;  %v140_v9 = vsel %vm130_vm0, %v7787_v32, %v7752_v22  ;;  %v166_v25 = vperm.slane %v132_v13, 0  ;;  %v8847_v32 = vmul.f32 %v165_v18, %v7803_v37 }
 0x33e   :  { %v8803_v28 = vpop.permute.xlu1 %1809  ;;  %v8805_v4 = vpop.permute.xlu2 %1898  ;;  %v174_v20 = vperm.slane %v140_v9, 0  ;;  %v8858_v9 = vmul.f32 %v168_v44, %v7803_v37  ;;  %v8861_v22 = vmul.f32 %v171_v11, %v7803_v37 }
 0x33f   :  { %16602 = vst [vmem:[#allocation247_spill] sm:$0xff] %v8803_v28  ;;  %v8810_v5 = vpop.permute.xlu0 %1900  ;;  %v138_v28 = vsel %vm130_vm0, %v7746_v21, %v7779_v31  ;;  %v173_v21 = vperm.slane %v139_v26, 0  ;;  %v175_v31 = vperm.slane %v141_v19, 0  ;;  %v8850_v13 = vmul.f32 %v166_v25, %v7803_v37 }
 0x340   :  { %16603 = vst [vmem:[#allocation248_spill] sm:$0xff] %v8805_v4  ;;  %v142_v4 = vsel %vm130_vm0, %v7791_v34, %v7799_v35  ;;  %v172_v8 = vperm.slane %v138_v28, 0  ;;  %v231_v34 = vsel %vm16337_vm2, %v7811_v38, %v7777_v30  ;;  %v8869_v18 = vmul.f32 %v174_v20, %v7803_v37 }
 0x341   :  { %16604 = vst [vmem:[#allocation249_spill] sm:$0xff] %v8810_v5  ;;  %v136_v5 = vsel %vm130_vm0, %v7767_v27, %v7775_v29  ;;  %v176_v35 = vperm.slane %v142_v4, 0  ;;  %v169_v27 = vperm.slane %v135_v23, 0  ;;  %v8891_v60 = vmul.f32 %v173_v21, %v7803_v37 }
 0x342   :  { %v170_v29 = vperm.slane %v136_v5, 0  ;;  %16605 = vst [vmem:[#allocation250_spill] sm:$0xff] %v8847_v32  ;;  %v8855_v5 = vmul.f32 %v167_v7, %v7803_v37  ;;  %v8875_v7 = vmul.f32 %v177_v10, %v7803_v37  ;;  %v8888_v16 = vmul.f32 %v172_v8, %v7803_v37 }
 0x343   :  { %16606 = vst [vmem:[#allocation251_spill] sm:$0xff] %v8850_v13  ;;  %v8872_v4 = vmul.f32 %v176_v35, %v7803_v37  ;;  %v8882_v24 = vmul.f32 %v169_v27, %v7803_v37  ;;  %v265_v23 = vperm.slane %v231_v34, 0  ;;  %v234_v10 = vsel %vm16337_vm2, %v7789_v33, %v7815_v40 }
 0x344   :  { %2103 = vrot.lane.b32.xlu1 %v7681_v14, %s7535_s19  ;;  %2105 = vrot.lane.b32.xlu2 %v7689_v15, %s7535_s19  ;;  %16607 = vst [vmem:[#allocation252_spill] sm:$0xff] %v8855_v5  ;;  %v8885_v38 = vmul.f32 %v170_v29, %v7803_v37  ;;  %v8897_v26 = vmul.f32 %v175_v31, %v7803_v37  ;;  %v268_v35 = vperm.slane %v234_v10, 0  ;;  %s7540_s19 = smov 13  }
 0x345   :  { %2200 = vrot.lane.b32.xlu0 %v7677_v12, %s7537_s25  ;;  %16608 = vst [vmem:[#allocation253_spill] sm:$0xff] %v8858_v9  ;;  %v232_v19 = vsel %vm16337_vm2, %v7777_v30, %v7822_v41  ;;  %v233_v8 = vsel %vm16337_vm2, %v7822_v41, %v7789_v33  ;;  %v237_v25 = vsel %vm16337_vm2, %v7801_v36, %v7826_v43 }
 0x346   :  { %16609 = vst [vmem:[#allocation254_spill] sm:$0xff] %v8861_v22  ;;  %v8866_v28 = vpop.permute.xlu1 %1844  ;;  %v8877_v44 = vpop.permute.xlu2 %1904  ;;  %v235_v20 = vsel %vm16337_vm2, %v7815_v40, %v7834_v45  ;;  %v236_v37 = vsel %vm16337_vm2, %v7834_v45, %v7801_v36  ;;  %v240_v30 = vsel %vm16337_vm2, %v7813_v39, %v7838_v47  ;;  %v238_v33 = vsel %vm16337_vm2, %v7826_v43, %v7846_v48 }
 0x347   :  { %16610 = vst [vmem:[#allocation255_spill] sm:$0xff] %v8869_v18  ;;  %v8879_v11 = vpop.permute.xlu0 %1906  ;;  %v239_v41 = vsel %vm16337_vm2, %v7846_v48, %v7813_v39  ;;  %v260_v40 = vsel %vm16340_vm3, %v7824_v42, %v7850_v50  ;;  %v241_v36 = vsel %vm16337_vm2, %v7838_v47, %v7858_v51  ;;  %v242_v45 = vsel %vm16337_vm2, %v7858_v51, %v7824_v42 }
 0x348   :  { %16611 = vst [vmem:[#allocation256_spill] sm:$0xff] %v8872_v4  ;;  %v266_v43 = vperm.slane %v232_v19, 0  ;;  %v267_v39 = vperm.slane %v233_v8, 0  ;;  %v271_v48 = vperm.slane %v237_v25, 0  ;;  %v8938_v50 = vsel %vm330_vm4, %v7836_v46, %v7862_v53 }
 0x349   :  { %16612 = vst [vmem:[#allocation257_spill] sm:$0xff] %v8875_v7  ;;  %v269_v47 = vperm.slane %v235_v20, 0  ;;  %v270_v27 = vperm.slane %v236_v37, 0  ;;  %v274_v42 = vperm.slane %v240_v30, 0  ;;  %v272_v51 = vperm.slane %v238_v33, 0  ;;  %v16633_v7 = vld [vmem:[#allocation20_spill] sm:$0xff] }
 0x34a   :  { %16613 = vst [vmem:[#allocation258_spill] sm:$0xff] %v8882_v24  ;;  %v273_v21 = vperm.slane %v239_v41, 0  ;;  %v277_v31 = vperm.slane %v260_v40, 0  ;;  %v275_v34 = vperm.slane %v241_v36, 0  ;;  %v276_v10 = vperm.slane %v242_v45, 0  ;;  %v16737_v24 = vld [vmem:[#allocation70_spill] sm:$0xff] }
 0x34b   :  { %16614 = vst [vmem:[#allocation259_spill] sm:$0xff] %v8885_v38  ;;  %v8948_v46 = vmul.f32 %v265_v23, %v7870_v54  ;;  %v8951_v25 = vmul.f32 %v266_v43, %v7870_v54  ;;  %v8954_v20 = vmul.f32 %v267_v39, %v7870_v54  ;;  %v8957_v37 = vmul.f32 %v268_v35, %v7870_v54 }
 0x34c   :  { %16615 = vst [vmem:[#allocation260_spill] sm:$0xff] %v8888_v16  ;;  %2138 = vperm.xlu1 %7315, %v8579_v62   ;;  %2180 = vrot.lane.b32.xlu2 %v7640_v2, %s7537_s25  ;;  %v8960_v30 = vmul.f32 %v271_v48, %v7870_v54  ;;  %v8965_v33 = vsel %vm330_vm4, %v7848_v49, %v7874_v56 }
 0x34d   :  { %16616 = vst [vmem:[#allocation261_spill] sm:$0xff] %v8891_v60  ;;  %2231 = vrot.lane.b32.xlu0 %v7640_v2, %s16273_s20  ;;  %v8970_v41 = vmul.f32 %v274_v42, %v7870_v54  ;;  %v8973_v40 = vmul.f32 %v277_v31, %v7870_v54  ;;  %v8976_v36 = vmul.f32 %v269_v47, %v7870_v54  ;;  %v368_v48 = vperm.slane %v8965_v33, 0  ;;  %s16351_s20 = smov 32  }
 0x34e   :  { %16617 = vst [vmem:[#allocation262_spill] sm:$0xff] %v8897_v26  ;;  %v8942_v29 = vpop.permute.xlu1 %1890  ;;  %v8967_v23 = vpop.permute.xlu2 %1910  ;;  %v8979_v35 = vmul.f32 %v270_v27, %v7870_v54  ;;  %v8982_v45 = vmul.f32 %v272_v51, %v7870_v54  ;;  %v8985_v43 = vmul.f32 %v273_v21, %v7870_v54  ;;  %v8988_v39 = vmul.f32 %v275_v34, %v7870_v54 }
 0x34f   :  { %v8944_v19 = vpop.permute.xlu0 %1940  ;;  %16618 = vst [vmem:[#allocation263_spill] sm:$0xff] %v8948_v46  ;;  %v332_v42 = vsel %vm330_vm4, %v7862_v53, %v7881_v57  ;;  %v8997_v47 = vsel %vm330_vm4, %v7881_v57, %v7848_v49  ;;  %v9004_v27 = vmul.f32 %v276_v10, %v7870_v54  ;;  %v9009_v51 = vsel %vm330_vm4, %v7860_v52, %v7885_v59 }
 0x350   :  { %16619 = vst [vmem:[#allocation264_spill] sm:$0xff] %v8951_v25  ;;  %v335_v53 = vsel %vm330_vm4, %v7874_v56, %v7893_v61  ;;  %v339_v49 = vsel %vm330_vm4, %v7905_v0, %v7872_v55  ;;  %v7541_v54 = vmov 22   ;;  %v336_v57 = vsel %vm330_vm4, %v7893_v61, %v7860_v52 }
 0x351   :  { %16620 = vst [vmem:[#allocation265_spill] sm:$0xff] %v8954_v20  ;;  %v9025_v21 = vsel %vm330_vm4, %v7872_v55, %v7897_v63  ;;  %v338_v56 = vsel %vm330_vm4, %v7885_v59, %v7905_v0  ;;  %v342_v31 = vsel %vm330_vm4, %v7916_v17, %v7883_v58  ;;  %v366_v10 = vperm.slane %v332_v42, 0 }
 0x352   :  { %16621 = vst [vmem:[#allocation266_spill] sm:$0xff] %v8957_v37  ;;  %v341_v55 = vsel %vm330_vm4, %v7897_v63, %v7916_v17  ;;  %v371_v59 = vperm.slane %v9009_v51, 0  ;;  %v369_v0 = vperm.slane %v335_v53, 0  ;;  %v373_v8 = vperm.slane %v339_v49, 0  ;;  %v16634_v63 = vld [vmem:[#allocation27_spill] sm:$0xff]  ;;  %v16635_v17 = vld [vmem:[#allocation21_spill] sm:$0xff] }
 0x353   :  { %16622 = vst [vmem:[#allocation267_spill] sm:$0xff] %v8960_v30  ;;  %v370_v33 = vperm.slane %v336_v57, 0  ;;  %v375_v18 = vperm.slane %v341_v55, 0  ;;  %v9057_v5 = vsel %vm430_vm6, %v16635_v17, %v16634_v63  ;;  %v16636_v53 = vld [vmem:[#allocation28_spill] sm:$0xff]  ;;  %v16637_v57 = vld [vmem:[#allocation25_spill] sm:$0xff]  ;;  %v16644_v51 = vld [vmem:[#allocation30_spill] sm:$0xff] }
 0x354   :  { %16623 = vst [vmem:[#allocation268_spill] sm:$0xff] %v8970_v41  ;;  %2184 = vrot.lane.b32.xlu1 %v7652_v6, %s7537_s25  ;;  %2186 = vrot.lane.b32.xlu2 %v7638_v1, %s7537_s25  ;;  %v374_v41 = vperm.slane %v9025_v21, 0  ;;  %v9068_v21 = vmul.f32 %v369_v0, %v16637_v57  ;;  %v9086_v0 = vmul.f32 %v373_v8, %v16637_v57  ;;  %v16645_v30 = vld [vmem:[#allocation23_spill] sm:$0xff]  ;;  %vm16310_vm4 = vcmask 785408  }
 0x355   :  { %16624 = vst [vmem:[#allocation269_spill] sm:$0xff] %v8973_v40  ;;  %2281 = vrot.lane.b32.xlu0 %v7642_v3, %s7540_s19  ;;  %7316 = vset.pattern.permute.xlu1 %v7541_v54  ;;  %v16631_v54 = vld [vmem:[#allocation22_spill] sm:$0xff]  ;;  %v16632_v40 = vld [vmem:[#allocation24_spill] sm:$0xff]  ;;  %v9097_v46 = vmul.f32 %v375_v18, %v16637_v57  ;;  %v16649_v8 = vld [vmem:[#allocation31_spill] sm:$0xff]  ;;  %v9109_v25 = vmul.f32 %v368_v48, %v16637_v57 }
 0x356   :  { %16625 = vst [vmem:[#allocation270_spill] sm:$0xff] %v8976_v36  ;;  %v9033_v34 = vpop.permute.xlu1 %1896  ;;  %v9039_v52 = vsel %vm359_vm5, %v7883_v58, %v16631_v54  ;;  %v9050_v42 = vsel %vm430_vm6, %v16633_v7, %v16632_v40  ;;  %v372_v58 = vperm.slane %v338_v56, 0  ;;  %v376_v54 = vperm.slane %v342_v31, 0  ;;  %v9065_v49 = vpop.permute.xlu2 %1984  ;;  %v16692_v36 = vld [vmem:[#allocation47_spill] sm:$0xff] }
 0x357   :  { %16626 = vst [vmem:[#allocation271_spill] sm:$0xff] %v8979_v35  ;;  %v9044_v61 = vpop.permute.xlu0 %1990  ;;  %v377_v20 = vperm.slane %v9039_v52, 0  ;;  %v9063_v7 = vsel %vm430_vm6, %v16632_v40, %v16636_v53  ;;  %v9071_v56 = vmul.f32 %v370_v33, %v16637_v57  ;;  %v9076_v31 = vsel %vm430_vm6, %v16636_v53, %v16635_v17  ;;  %v16640_v52 = vld [vmem:[#allocation12_spill] sm:$0xff]  ;;  %v16641_v40 = vld [vmem:[#allocation14_spill] sm:$0xff] }
 0x358   :  { %16627 = vst [vmem:[#allocation272_spill] sm:$0xff] %v8982_v45  ;;  %v9083_v55 = vmul.f32 %v372_v58, %v16637_v57  ;;  %v468_v33 = vperm.slane %v9057_v5, 0  ;;  %v9092_v17 = vsel %vm430_vm6, %v16645_v30, %v16644_v51  ;;  %v16646_v53 = vld [vmem:[#allocation10_spill] sm:$0xff]  ;;  %v9100_v22 = vmul.f32 %v376_v54, %v16637_v57  ;;  %v16658_v35 = vld [vmem:[#allocation32_spill] sm:$0xff] }
 0x359   :  { %16628 = vst [vmem:[#allocation273_spill] sm:$0xff] %v8985_v43  ;;  %v466_v58 = vperm.slane %v9063_v7, 0  ;;  %v435_v5 = vsel %vm430_vm6, %v16634_v63, %v16649_v8  ;;  %v436_v54 = vsel %vm430_vm6, %v16649_v8, %v16645_v30  ;;  %v16653_v7 = vld [vmem:[#allocation26_spill] sm:$0xff]  ;;  %v16657_v8 = vld [vmem:[#allocation37_spill] sm:$0xff]  ;;  %vm16326_vm5 = vcmask 588800  }
 0x35a   :  { %16629 = vst [vmem:[#allocation274_spill] sm:$0xff] %v8988_v39  ;;  %v16654_v63 = vld [vmem:[#allocation34_spill] sm:$0xff] }
 0x35b   :  { %16630 = vst [vmem:[#allocation275_spill] sm:$0xff] %v9004_v27  ;;  %v439_v43 = vsel %vm430_vm6, %v16654_v63, %v16653_v7  ;;  %v438_v18 = vsel %vm430_vm6, %v16644_v51, %v16654_v63  ;;  %v470_v63 = vperm.slane %v436_v54, 0  ;;  %v16660_v27 = vperm.slane %v8938_v50, 0  ;;  %v16663_v45 = vld [vmem:[#allocation42_spill] sm:$0xff]  ;;  %v16664_v54 = vld [vmem:[#allocation35_spill] sm:$0xff] }
 0x35c   :  { %16638 = vst [vmem:[#allocation22_spill] sm:$0xff] %v9068_v21  ;;  %2190 = vrot.lane.b32.xlu1 %v16640_v52, %s7537_s25  ;;  %2192 = vrot.lane.b32.xlu2 %v16641_v40, %s7537_s25  ;;  %v473_v37 = vperm.slane %v439_v43, 0  ;;  %v16665_v50 = vld [vmem:[#allocation15_spill] sm:$0xff]  ;;  %v16666_v43 = vld [vmem:[#allocation17_spill] sm:$0xff]  ;;  %v9182_v21 = vmul.f32 %v374_v41, %v16637_v57 }
 0x35d   :  { %16639 = vst [vmem:[#allocation24_spill] sm:$0xff] %v9071_v56  ;;  %2287 = vrot.lane.b32.xlu0 %v16646_v53, %s7540_s19  ;;  %v16652_v56 = vld [vmem:[#allocation33_spill] sm:$0xff] }
 0x35e   :  { %16642 = vst [vmem:[#allocation20_spill] sm:$0xff] %v9083_v55  ;;  %v9106_v32 = vpop.permute.xlu1 %1902  ;;  %v9121_v13 = vsel %vm430_vm6, %v16653_v7, %v16652_v56  ;;  %v16659_v55 = vld [vmem:[#allocation39_spill] sm:$0xff] }
 0x35f   :  { %16643 = vst [vmem:[#allocation27_spill] sm:$0xff] %v9086_v0  ;;  %v9112_v0 = vmul.f32 %v366_v10, %v16637_v57  ;;  %v9126_v48 = vpop.permute.xlu0 %1996  ;;  %v441_v10 = vsel %vm430_vm6, %v16652_v56, %v16657_v8  ;;  %v9147_v51 = vsel %vm16338_vm8, %v16658_v35, %v16659_v55  ;;  %v9157_v56 = vmul.f32 %v371_v59, %v16637_v57  ;;  %v16668_v59 = vld [vmem:[#allocation40_spill] sm:$0xff] }
 0x360   :  { %16647 = vst [vmem:[#allocation21_spill] sm:$0xff] %v9097_v46  ;;  %v469_v46 = vperm.slane %v435_v5, 0  ;;  %v472_v5 = vperm.slane %v438_v18, 0  ;;  %v9190_v60 = vmul.f32 %v470_v63, %v16668_v59 }
 0x361   :  { %16648 = vst [vmem:[#allocation28_spill] sm:$0xff] %v9100_v22 }
 0x362   :  { %16650 = vst [vmem:[#allocation25_spill] sm:$0xff] %v9109_v25  ;;  %v16656_v25 = vld [vmem:[#allocation29_spill] sm:$0xff]  ;;  %v9174_v18 = vmul.f32 %v469_v46, %v16668_v59  ;;  %v9193_v46 = vmul.f32 %v472_v5, %v16668_v59 }
 0x363   :  { %16651 = vst [vmem:[#allocation30_spill] sm:$0xff] %v9112_v0  ;;  %v16655_v0 = vld [vmem:[#allocation36_spill] sm:$0xff]  ;;  %v442_v22 = vsel %vm430_vm6, %v16657_v8, %v16656_v25  ;;  %v475_v8 = vperm.slane %v441_v10, 0  ;;  %v16670_v10 = vperm.slane %v8997_v47, 0 }
 0x364   :  { %v9135_v30 = vsel %vm16345_vm7, %v16656_v25, %v16655_v0  ;;  %v9153_v25 = vmul.f32 %v16660_v27, %v16637_v57  ;;  %v476_v39 = vperm.slane %v442_v22, 0  ;;  %16662 = vst [vmem:[#allocation31_spill] sm:$0xff] %v9157_v56  ;;  %v9163_v0 = vsel %vm16338_vm8, %v16664_v54, %v16663_v45  ;;  %2196 = vrot.lane.b32.xlu1 %v16665_v50, %s7537_s25  ;;  %v9169_v27 = vpop.permute.xlu2 %1988  ;;  %v16667_v22 = vld [vmem:[#allocation13_spill] sm:$0xff] }
 0x365   :  { %v477_v7 = vperm.slane %v9135_v30, 0  ;;  %2198 = vrot.lane.b32.xlu2 %v16666_v43, %s7537_s25  ;;  %2293 = vrot.lane.b32.xlu0 %v16667_v22, %s7540_s19  ;;  %16669 = vst [vmem:[#allocation33_spill] sm:$0xff] %v9174_v18  ;;  %v9179_v30 = vmul.f32 %v16670_v10, %v16637_v57  ;;  %v9185_v56 = vmul.f32 %v377_v20, %v16637_v57  ;;  %v568_v47 = vperm.slane %v9163_v0, 0  ;;  %v16677_v10 = vld [vmem:[#allocation43_spill] sm:$0xff] }
 0x366   :  { %16661 = vst [vmem:[#allocation23_spill] sm:$0xff] %v9153_v25  ;;  %v9187_v25 = vpop.permute.xlu1 %1908  ;;  %v9196_v18 = vmul.f32 %v473_v37, %v16668_v59  ;;  %v532_v41 = vsel %vm16338_vm8, %v16659_v55, %v16677_v10  ;;  %v9205_v57 = vmul.f32 %v475_v8, %v16668_v59  ;;  %v9208_v63 = vmul.f32 %v476_v39, %v16668_v59  ;;  %v16680_v37 = vld [vmem:[#allocation45_spill] sm:$0xff]  ;;  %v16684_v8 = vld [vmem:[#allocation46_spill] sm:$0xff] }
 0x367   :  { %16671 = vst [vmem:[#allocation26_spill] sm:$0xff] %v9179_v30  ;;  %v9202_v20 = vpop.permute.xlu0 %2002  ;;  %v9213_v5 = vsel %vm16338_vm8, %v16677_v10, %v16664_v54  ;;  %v9221_v55 = vmul.f32 %v468_v33, %v16668_v59  ;;  %v535_v39 = vsel %vm16338_vm8, %v16663_v45, %v16684_v8  ;;  %v16685_v10 = vld [vmem:[#allocation48_spill] sm:$0xff]  ;;  %v16686_v30 = vld [vmem:[#allocation41_spill] sm:$0xff] }
 0x368   :  { %16672 = vst [vmem:[#allocation34_spill] sm:$0xff] %v9182_v21  ;;  %v9224_v21 = vmul.f32 %v466_v58, %v16668_v59  ;;  %v16689_v45 = vld [vmem:[#allocation44_spill] sm:$0xff] }
 0x369   :  { %16673 = vst [vmem:[#allocation36_spill] sm:$0xff] %v9185_v56  ;;  %v16681_v56 = vld [vmem:[#allocation38_spill] sm:$0xff] }
 0x36a   :  { %16674 = vst [vmem:[#allocation29_spill] sm:$0xff] %v9190_v60  ;;  %v9218_v0 = vsel %vm16338_vm8, %v16681_v56, %v16680_v37  ;;  %v536_v54 = vsel %vm16338_vm8, %v16684_v8, %v16681_v56  ;;  %v16687_v60 = vld [vmem:[#allocation49_spill] sm:$0xff]  ;;  %v16690_v56 = vld [vmem:[#allocation52_spill] sm:$0xff] }
 0x36b   :  { %16675 = vst [vmem:[#allocation37_spill] sm:$0xff] %v9193_v46  ;;  %v539_v33 = vsel %vm16338_vm8, %v16687_v60, %v16686_v30  ;;  %v538_v58 = vsel %vm16338_vm8, %v16680_v37, %v16687_v60  ;;  %v542_v8 = vsel %vm16338_vm8, %v16690_v56, %v16689_v45  ;;  %v569_v37 = vperm.slane %v535_v39, 0 }
 0x36c   :  { %16676 = vst [vmem:[#allocation32_spill] sm:$0xff] %v9196_v18  ;;  %v9235_v18 = vsel %vm16338_vm8, %v16686_v30, %v16685_v10  ;;  %v541_v30 = vsel %vm16338_vm8, %v16685_v10, %v16690_v56  ;;  %v573_v26 = vperm.slane %v539_v33, 0  ;;  %2202 = vrot.lane.b32.xlu1 %v7681_v14, %s7537_s25  ;;  %v576_v10 = vperm.slane %v542_v8, 0  ;;  %v16697_v8 = vld [vmem:[#allocation57_spill] sm:$0xff]  ;;  %v9287_v16 = vpop.permute.xlu2 %1994 }
 0x36d   :  { %16678 = vst [vmem:[#allocation39_spill] sm:$0xff] %v9205_v57  ;;  %2204 = vrot.lane.b32.xlu2 %v7689_v15, %s7537_s25  ;;  %2299 = vrot.lane.b32.xlu0 %v7677_v12, %s7540_s19  ;;  %v16698_v57 = vld [vmem:[#allocation50_spill] sm:$0xff]  ;;  %v16701_v33 = vperm.slane %v9121_v13, 0 }
 0x36e   :  { %16679 = vst [vmem:[#allocation42_spill] sm:$0xff] %v9208_v63  ;;  %v9275_v56 = vpop.permute.xlu1 %1982  ;;  %v9285_v46 = vsel %vm630_vm10, %v16698_v57, %v16697_v8 }
 0x36f   :  { %16682 = vst [vmem:[#allocation35_spill] sm:$0xff] %v9221_v55  ;;  %v566_v55 = vperm.slane %v532_v41, 0  ;;  %v16691_v41 = vld [vmem:[#allocation54_spill] sm:$0xff] }
 0x370   :  { %16683 = vst [vmem:[#allocation40_spill] sm:$0xff] %v9224_v21  ;;  %v16688_v21 = vld [vmem:[#allocation51_spill] sm:$0xff]  ;;  %v9259_v60 = vsel %vm630_vm10, %v16692_v36, %v16691_v41  ;;  %v16693_v36 = vperm.slane %v9050_v42, 0  ;;  %v9289_v42 = vpop.permute.xlu0 %2033 }
 0x371   :  { %v9246_v63 = vsel %vm559_vm9, %v16689_v45, %v16688_v21  ;;  %v570_v21 = vperm.slane %v536_v54, 0  ;;  %v572_v45 = vperm.slane %v538_v58, 0  ;;  %v575_v54 = vperm.slane %v541_v30, 0 }
 0x372   :  { %v9272_v39 = vmul.f32 %v16693_v36, %v16668_v59  ;;  %v16695_v58 = vperm.slane %v9092_v17, 0  ;;  %v16699_v30 = vperm.slane %v9076_v31, 0  ;;  %v9299_v17 = vmul.f32 %v16701_v33, %v16668_v59 }
 0x374   :  { %16694 = vst [vmem:[#allocation43_spill] sm:$0xff] %v9272_v39  ;;  %v9280_v38 = vmul.f32 %v16695_v58, %v16668_v59  ;;  %v9294_v36 = vmul.f32 %v16699_v30, %v16668_v59  ;;  %v9302_v58 = vmul.f32 %v477_v7, %v16668_v59  ;;  %v16709_v30 = vld [vmem:[#allocation58_spill] sm:$0xff]  ;;  %2237 = vperm.xlu1 %7316, %v8579_v62  }
 0x375   :  { %16702 = vst [vmem:[#allocation46_spill] sm:$0xff] %v9299_v17  ;;  %v9319_v13 = vsel %vm630_vm10, %v16691_v41, %v16709_v30  ;;  %v16717_v17 = vld [vmem:[#allocation56_spill] sm:$0xff]  ;;  %2279 = vrot.lane.b32.xlu2 %v7640_v2, %s7540_s19  ;;  %2330 = vrot.lane.b32.xlu0 %v7640_v2, %s7542_s26  ;;  %s7544_s26 = smov 12  }
 0x376   :  { %16696 = vst [vmem:[#allocation45_spill] sm:$0xff] %v9280_v38  ;;  %v16704_v38 = vld [vmem:[#allocation55_spill] sm:$0xff] }
 0x377   :  { %16700 = vst [vmem:[#allocation38_spill] sm:$0xff] %v9294_v36  ;;  %v9305_v39 = vmul.f32 %v569_v37, %v16704_v38  ;;  %v9308_v9 = vmul.f32 %v570_v21, %v16704_v38  ;;  %v9311_v4 = vmul.f32 %v572_v45, %v16704_v38  ;;  %v9314_v31 = vmul.f32 %v573_v26, %v16704_v38  ;;  %v16712_v26 = vld [vmem:[#allocation60_spill] sm:$0xff]  ;;  %v16713_v45 = vld [vmem:[#allocation53_spill] sm:$0xff] }
 0x378   :  { %16703 = vst [vmem:[#allocation48_spill] sm:$0xff] %v9302_v58  ;;  %v9322_v7 = vmul.f32 %v575_v54, %v16704_v38  ;;  %v9325_v59 = vmul.f32 %v576_v10, %v16704_v38  ;;  %v668_v37 = vperm.slane %v9285_v46, 0  ;;  %v9331_v21 = vsel %vm630_vm10, %v16709_v30, %v16698_v57  ;;  %v16715_v54 = vld [vmem:[#allocation61_spill] sm:$0xff]  ;;  %v16716_v58 = vld [vmem:[#allocation63_spill] sm:$0xff] }
 0x379   :  { %16705 = vst [vmem:[#allocation41_spill] sm:$0xff] %v9305_v39  ;;  %v9336_v33 = vsel %vm630_vm10, %v16713_v45, %v16712_v26  ;;  %v9339_v41 = vmul.f32 %v568_v47, %v16704_v38  ;;  %v635_v10 = vsel %vm630_vm10, %v16697_v8, %v16715_v54  ;;  %v636_v46 = vsel %vm630_vm10, %v16715_v54, %v16713_v45  ;;  %v16719_v47 = vld [vmem:[#allocation64_spill] sm:$0xff]  ;;  %v16721_v45 = vld [vmem:[#allocation59_spill] sm:$0xff]  ;;  %v9388_v39 = vpop.permute.xlu0 %2083 }
 0x37a   :  { %16706 = vst [vmem:[#allocation49_spill] sm:$0xff] %v9308_v9  ;;  %v9350_v57 = vsel %vm630_vm10, %v16717_v17, %v16716_v58  ;;  %v9353_v30 = vmul.f32 %v566_v55, %v16704_v38  ;;  %v666_v36 = vperm.slane %v9319_v13, 0  ;;  %v639_v8 = vsel %vm630_vm10, %v16719_v47, %v16717_v17  ;;  %v16720_v9 = vld [vmem:[#allocation66_spill] sm:$0xff]  ;;  %v9385_v13 = vpop.permute.xlu1 %1986 }
 0x37b   :  { %16707 = vst [vmem:[#allocation51_spill] sm:$0xff] %v9311_v4  ;;  %v9365_v54 = vsel %vm659_vm11, %v16721_v45, %v16720_v9  ;;  %v669_v9 = vperm.slane %v635_v10, 0  ;;  %v670_v62 = vperm.slane %v636_v46, 0  ;;  %v16731_v4 = vperm.slane %v9213_v5, 0 }
 0x37c   :  { %16708 = vst [vmem:[#allocation44_spill] sm:$0xff] %v9314_v31  ;;  %v638_v31 = vsel %vm630_vm10, %v16712_v26, %v16719_v47  ;;  %v16729_v47 = vperm.slane %v9218_v0, 0  ;;  %v16735_v0 = vld [vmem:[#allocation72_spill] sm:$0xff]  ;;  %2283 = vrot.lane.b32.xlu1 %v7652_v6, %s7540_s19  ;;  %vm16294_vm11 = vcmask 850944  }
 0x37d   :  { %16710 = vst [vmem:[#allocation52_spill] sm:$0xff] %v9322_v7  ;;  %v672_v7 = vperm.slane %v638_v31, 0  ;;  %v9401_v31 = vpop.permute.xlu2 %2000  ;;  %2285 = vrot.lane.b32.xlu2 %v7638_v1, %s7540_s19  ;;  %2380 = vrot.lane.b32.xlu0 %v7642_v3, %s7544_s26  ;;  %v16760_v3 = vld [vmem:[#allocation84_spill] sm:$0xff] }
 0x37e   :  { %16711 = vst [vmem:[#allocation54_spill] sm:$0xff] %v9325_v59  ;;  %v16724_v59 = vld [vmem:[#allocation62_spill] sm:$0xff] }
 0x37f   :  { %16714 = vst [vmem:[#allocation47_spill] sm:$0xff] %v9339_v41  ;;  %v16723_v41 = vld [vmem:[#allocation69_spill] sm:$0xff] }
 0x380   :  { %16718 = vst [vmem:[#allocation57_spill] sm:$0xff] %v9353_v30  ;;  %v16722_v30 = vld [vmem:[#allocation67_spill] sm:$0xff]  ;;  %v9383_v55 = vsel %vm16300_vm12, %v16724_v59, %v16723_v41  ;;  %v9398_v59 = vmul.f32 %v16729_v47, %v16704_v38  ;;  %v16736_v47 = vld [vmem:[#allocation65_spill] sm:$0xff] }
 0x381   :  { %v641_v26 = vsel %vm630_vm10, %v16716_v58, %v16722_v30  ;;  %v642_v17 = vsel %vm630_vm10, %v16722_v30, %v16721_v45  ;;  %16725 = vst [vmem:[#allocation50_spill] sm:$0xff] %v9385_v13  ;;  %v673_v58 = vperm.slane %v639_v8, 0  ;;  %v16727_v30 = vperm.slane %v9147_v51, 0 }
 0x382   :  { %16726 = vst [vmem:[#allocation55_spill] sm:$0xff] %v9388_v39  ;;  %v675_v46 = vperm.slane %v641_v26, 0  ;;  %v676_v45 = vperm.slane %v642_v17, 0  ;;  %v7543_v8 = vmov 24   ;;  %v9406_v51 = vmul.f32 %v16731_v4, %v16704_v38  ;;  %v16761_v39 = vld [vmem:[#allocation77_spill] sm:$0xff] }
 0x383   :  { %v9393_v10 = vmul.f32 %v16727_v30, %v16704_v38  ;;  %16730 = vst [vmem:[#allocation60_spill] sm:$0xff] %v9398_v59  ;;  %7318 = vset.pattern.permute.xlu0 %v7543_v8  ;;  %v16733_v26 = vperm.slane %v9235_v18, 0  ;;  %v9416_v30 = vsel %vm16300_vm12, %v16736_v47, %v16735_v0  ;;  %v9419_v59 = vmul.f32 %v669_v9, %v16737_v24 }
 0x384   :  { %16732 = vst [vmem:[#allocation53_spill] sm:$0xff] %v9406_v51  ;;  %v16739_v8 = vperm.slane %v9246_v63, 0  ;;  %v9427_v4 = vmul.f32 %v670_v62, %v16737_v24  ;;  %v9430_v18 = vmul.f32 %v672_v7, %v16737_v24  ;;  %v9433_v5 = vmul.f32 %v673_v58, %v16737_v24  ;;  %v16748_v62 = vld [vmem:[#allocation75_spill] sm:$0xff]  ;;  %v16749_v58 = vld [vmem:[#allocation68_spill] sm:$0xff]  ;;  %2289 = vrot.lane.b32.xlu1 %v16640_v52, %s7540_s19 }
 0x385   :  { %16728 = vst [vmem:[#allocation58_spill] sm:$0xff] %v9393_v10  ;;  %v9411_v17 = vmul.f32 %v16733_v26, %v16704_v38  ;;  %v9436_v26 = vmul.f32 %v675_v46, %v16737_v24  ;;  %v9451_v63 = vmul.f32 %v668_v37, %v16737_v24  ;;  %v768_v7 = vperm.slane %v9416_v30, 0  ;;  %v16752_v30 = vld [vmem:[#allocation71_spill] sm:$0xff]  ;;  %2291 = vrot.lane.b32.xlu2 %v16641_v40, %s7540_s19 }
 0x386   :  { %16738 = vst [vmem:[#allocation63_spill] sm:$0xff] %v9419_v59  ;;  %v9424_v10 = vmul.f32 %v16739_v8, %v16704_v38  ;;  %v9448_v38 = vmul.f32 %v676_v45, %v16737_v24  ;;  %v9462_v46 = vsel %vm16300_vm12, %v16749_v58, %v16748_v62  ;;  %v16750_v8 = vld [vmem:[#allocation76_spill] sm:$0xff]  ;;  %v7545_v37 = vmov 23   ;;  %v16753_v51 = vld [vmem:[#allocation79_spill] sm:$0xff]  ;;  %2386 = vrot.lane.b32.xlu0 %v16646_v53, %s7544_s26 }
 0x387   :  { %16734 = vst [vmem:[#allocation61_spill] sm:$0xff] %v9411_v17  ;;  %v16745_v17 = vld [vmem:[#allocation73_spill] sm:$0xff]  ;;  %v735_v45 = vsel %vm16300_vm12, %v16735_v0, %v16750_v8  ;;  %7317 = vset.pattern.permute.xlu1 %v7545_v37  ;;  %v9480_v0 = vpop.permute.xlu1 %1992  ;;  %vm1123_vm10 = vcmask 580608  }
 0x388   :  { %16740 = vst [vmem:[#allocation56_spill] sm:$0xff] %v9424_v10  ;;  %v9441_v9 = vsel %vm16300_vm12, %v16723_v41, %v16745_v17  ;;  %v9457_v41 = vsel %vm16300_vm12, %v16745_v17, %v16736_v47  ;;  %v736_v17 = vsel %vm16300_vm12, %v16750_v8, %v16749_v58  ;;  %v16751_v47 = vld [vmem:[#allocation78_spill] sm:$0xff]  ;;  %v738_v58 = vsel %vm16300_vm12, %v16748_v62, %v16753_v51  ;;  %v16756_v8 = vld [vmem:[#allocation81_spill] sm:$0xff] }
 0x389   :  { %16741 = vst [vmem:[#allocation64_spill] sm:$0xff] %v9427_v4  ;;  %v9475_v10 = vsel %vm16300_vm12, %v16752_v30, %v16751_v47  ;;  %v9483_v4 = vmul.f32 %v666_v36, %v16737_v24  ;;  %v766_v37 = vperm.slane %v9441_v9, 0  ;;  %v769_v9 = vperm.slane %v735_v45, 0 }
 0x38a   :  { %16742 = vst [vmem:[#allocation66_spill] sm:$0xff] %v9430_v18  ;;  %v9497_v18 = vpop.permute.xlu0 %2089  ;;  %v770_v62 = vperm.slane %v736_v17, 0  ;;  %v16762_v45 = vperm.slane %v9259_v60, 0  ;;  %v16769_v60 = vld [vmem:[#allocation80_spill] sm:$0xff] }
 0x38b   :  { %16743 = vst [vmem:[#allocation59_spill] sm:$0xff] %v9433_v5  ;;  %v739_v5 = vsel %vm16300_vm12, %v16753_v51, %v16752_v30 }
 0x38c   :  { %16744 = vst [vmem:[#allocation67_spill] sm:$0xff] %v9436_v26  ;;  %v16758_v26 = vld [vmem:[#allocation82_spill] sm:$0xff]  ;;  %2295 = vrot.lane.b32.xlu1 %v16665_v50, %s7540_s19 }
 0x38d   :  { %16746 = vst [vmem:[#allocation69_spill] sm:$0xff] %v9448_v38  ;;  %v741_v51 = vsel %vm16300_vm12, %v16751_v47, %v16758_v26  ;;  %2297 = vrot.lane.b32.xlu2 %v16666_v43, %s7540_s19 }
 0x38e   :  { %16747 = vst [vmem:[#allocation62_spill] sm:$0xff] %v9451_v63  ;;  %v16757_v63 = vld [vmem:[#allocation74_spill] sm:$0xff]  ;;  %v775_v13 = vperm.slane %v741_v51, 0  ;;  %2392 = vrot.lane.b32.xlu0 %v16667_v22, %s7544_s26 }
 0x38f   :  { %16754 = vst [vmem:[#allocation72_spill] sm:$0xff] %v9480_v0  ;;  %v9492_v38 = vsel %vm759_vm13, %v16757_v63, %v16756_v8  ;;  %v742_v30 = vsel %vm16300_vm12, %v16758_v26, %v16757_v63  ;;  %v773_v8 = vperm.slane %v739_v5, 0  ;;  %v9508_v0 = vsel %vm830_vm14, %v16761_v39, %v16760_v3  ;;  %v9516_v26 = vpop.permute.xlu2 %2006 }
 0x390   :  { %16755 = vst [vmem:[#allocation65_spill] sm:$0xff] %v9483_v4  ;;  %v772_v63 = vperm.slane %v738_v58, 0  ;;  %v776_v36 = vperm.slane %v742_v30, 0  ;;  %v9514_v4 = vmul.f32 %v16762_v45, %v16737_v24  ;;  %v16764_v5 = vperm.slane %v9336_v33, 0  ;;  %v16768_v58 = vld [vmem:[#allocation87_spill] sm:$0xff] }
 0x391   :  { %16759 = vst [vmem:[#allocation70_spill] sm:$0xff] %v9497_v18  ;;  %v777_v18 = vperm.slane %v9492_v38, 0  ;;  %v16766_v39 = vperm.slane %v9331_v21, 0  ;;  %v9532_v30 = vsel %vm830_vm14, %v16769_v60, %v16768_v58  ;;  %v16770_v33 = vperm.slane %v9350_v57, 0 }
 0x392   :  { %16763 = vst [vmem:[#allocation73_spill] sm:$0xff] %v9514_v4  ;;  %v9521_v17 = vmul.f32 %v16764_v5, %v16737_v24  ;;  %v16772_v21 = vperm.slane %v9365_v54, 0  ;;  %v16774_v5 = vld [vmem:[#allocation85_spill] sm:$0xff]  ;;  %v9567_v54 = vpop.permute.xlu1 %1998  ;;  %vm16353_vm13 = vcmask 572416   ;;  %vm1643_vm12 = vcmask 613376  }
 0x393   :  { %v9526_v47 = vmul.f32 %v16766_v39, %v16737_v24  ;;  %v9541_v51 = vmul.f32 %v16770_v33, %v16737_v24  ;;  %v9551_v39 = vmul.f32 %v769_v9, %v16774_v5  ;;  %v9554_v38 = vmul.f32 %v770_v62, %v16774_v5  ;;  %v16779_v33 = vld [vmem:[#allocation88_spill] sm:$0xff] }
 0x394   :  { %16765 = vst [vmem:[#allocation75_spill] sm:$0xff] %v9521_v17  ;;  %v9546_v45 = vmul.f32 %v16772_v21, %v16737_v24  ;;  %v9557_v59 = vmul.f32 %v772_v63, %v16774_v5  ;;  %v9560_v57 = vmul.f32 %v773_v8, %v16774_v5  ;;  %v9565_v24 = vsel %vm830_vm14, %v16760_v3, %v16779_v33  ;;  %v16782_v21 = vld [vmem:[#allocation90_spill] sm:$0xff] }
 0x395   :  { %16767 = vst [vmem:[#allocation68_spill] sm:$0xff] %v9526_v47  ;;  %v9570_v9 = vmul.f32 %v775_v13, %v16774_v5  ;;  %v9573_v62 = vmul.f32 %v776_v36, %v16774_v5  ;;  %v868_v63 = vperm.slane %v9532_v30, 0  ;;  %v9579_v8 = vsel %vm830_vm14, %v16779_v33, %v16769_v60  ;;  %v16786_v47 = vld [vmem:[#allocation91_spill] sm:$0xff]  ;;  %v16787_v60 = vld [vmem:[#allocation86_spill] sm:$0xff]  ;;  %2301 = vrot.lane.b32.xlu1 %v7681_v14, %s7540_s19 }
 0x396   :  { %16771 = vst [vmem:[#allocation76_spill] sm:$0xff] %v9541_v51  ;;  %v9586_v51 = vpop.permute.xlu0 %2095  ;;  %v9589_v13 = vmul.f32 %v768_v7, %v16774_v5  ;;  %v835_v36 = vsel %vm830_vm14, %v16768_v58, %v16786_v47  ;;  %v16788_v33 = vld [vmem:[#allocation94_spill] sm:$0xff]  ;;  %v9601_v4 = vmul.f32 %v766_v37, %v16774_v5  ;;  %2303 = vrot.lane.b32.xlu2 %v7689_v15, %s7540_s19  ;;  %s16354_s19 = smov 8  }
 0x397   :  { %16773 = vst [vmem:[#allocation78_spill] sm:$0xff] %v9546_v45  ;;  %v16783_v45 = vld [vmem:[#allocation83_spill] sm:$0xff]  ;;  %v839_v17 = vsel %vm830_vm14, %v16788_v33, %v16787_v60  ;;  %v838_v58 = vsel %vm830_vm14, %v16782_v21, %v16788_v33  ;;  %2398 = vrot.lane.b32.xlu0 %v7677_v12, %s7544_s26 }
 0x398   :  { %16775 = vst [vmem:[#allocation71_spill] sm:$0xff] %v9551_v39  ;;  %v9584_v3 = vsel %vm830_vm14, %v16783_v45, %v16782_v21  ;;  %v836_v30 = vsel %vm830_vm14, %v16786_v47, %v16783_v45  ;;  %v16792_v47 = vld [vmem:[#allocation97_spill] sm:$0xff]  ;;  %v873_v21 = vperm.slane %v839_v17, 0  ;;  %v16794_v33 = vld [vmem:[#allocation99_spill] sm:$0xff]  ;;  %v16795_v39 = vld [vmem:[#allocation92_spill] sm:$0xff]  ;;  %v872_v37 = vperm.slane %v838_v58, 0 }
 0x399   :  { %16776 = vst [vmem:[#allocation79_spill] sm:$0xff] %v9554_v38  ;;  %v16790_v38 = vld [vmem:[#allocation93_spill] sm:$0xff]  ;;  %v9628_v53 = vsel %vm16310_vm4, %v16795_v39, %v16794_v33  ;;  %v9641_v39 = vpop.permute.xlu2 %2081  ;;  %v16801_v58 = vperm.slane %v9457_v41, 0  ;;  %v16809_v41 = vld [vmem:[#allocation100_spill] sm:$0xff] }
 0x39a   :  { %16777 = vst [vmem:[#allocation81_spill] sm:$0xff] %v9557_v59  ;;  %v9607_v7 = vsel %vm830_vm14, %v16787_v60, %v16790_v38  ;;  %v841_v60 = vsel %vm830_vm14, %v16790_v38, %v16792_v47  ;;  %v870_v59 = vperm.slane %v836_v30, 0  ;;  %v9659_v17 = vpop.permute.xlu1 %2004 }
 0x39b   :  { %16778 = vst [vmem:[#allocation74_spill] sm:$0xff] %v9560_v57  ;;  %v866_v57 = vperm.slane %v9565_v24, 0 }
 0x39c   :  { %16780 = vst [vmem:[#allocation82_spill] sm:$0xff] %v9570_v9  ;;  %v869_v9 = vperm.slane %v835_v36, 0  ;;  %v16799_v36 = vperm.slane %v9462_v46, 0  ;;  %v9667_v46 = vmul.f32 %v777_v18, %v16774_v5 }
 0x39d   :  { %16781 = vst [vmem:[#allocation84_spill] sm:$0xff] %v9573_v62  ;;  %v16805_v62 = vperm.slane %v9475_v10, 0  ;;  %v16814_v10 = vld [vmem:[#allocation98_spill] sm:$0xff] }
 0x39e   :  { %16784 = vst [vmem:[#allocation77_spill] sm:$0xff] %v9586_v51  ;;  %v9648_v30 = vmul.f32 %v16799_v36, %v16774_v5  ;;  %v9669_v36 = vpop.permute.xlu0 %2101  ;;  %2378 = vrot.lane.b32.xlu2 %v7640_v2, %s7544_s26 }
 0x39f   :  { %16785 = vst [vmem:[#allocation87_spill] sm:$0xff] %v9589_v13  ;;  %v16791_v13 = vld [vmem:[#allocation89_spill] sm:$0xff] }
 0x3a0   :  { %16789 = vst [vmem:[#allocation80_spill] sm:$0xff] %v9601_v4  ;;  %v842_v45 = vsel %vm830_vm14, %v16792_v47, %v16791_v13  ;;  %v16793_v4 = vld [vmem:[#allocation96_spill] sm:$0xff]  ;;  %v9653_v47 = vmul.f32 %v16801_v58, %v16774_v5  ;;  %v9672_v58 = vmul.f32 %v869_v9, %v16809_v41  ;;  %vm1151_vm14 = vcmask 842752  }
 0x3a1   :  { %v9620_v24 = vsel %vm859_vm15, %v16791_v13, %v16793_v4  ;;  %v876_v51 = vperm.slane %v842_v45, 0  ;;  %v16796_v4 = vperm.slane %v9383_v55, 0  ;;  %v875_v13 = vperm.slane %v841_v60, 0  ;;  %16798 = vst [vmem:[#allocation88_spill] sm:$0xff] %v9641_v39  ;;  %v16803_v45 = vld [vmem:[#allocation102_spill] sm:$0xff] }
 0x3a2   :  { %16800 = vst [vmem:[#allocation90_spill] sm:$0xff] %v9648_v30  ;;  %v9675_v55 = vmul.f32 %v870_v59, %v16809_v41  ;;  %v9681_v30 = vmul.f32 %v873_v21, %v16809_v41  ;;  %v16818_v59 = vld [vmem:[#allocation103_spill] sm:$0xff]  ;;  %vm1321_vm15 = vcmask 564224  }
 0x3a3   :  { %v9638_v38 = vmul.f32 %v16796_v4, %v16774_v5  ;;  %16802 = vst [vmem:[#allocation83_spill] sm:$0xff] %v9653_v47  ;;  %v16804_v4 = vld [vmem:[#allocation95_spill] sm:$0xff]  ;;  %v9678_v47 = vmul.f32 %v872_v37, %v16809_v41  ;;  %v9687_v18 = vmul.f32 %v875_v13, %v16809_v41  ;;  %v932_v37 = vsel %vm16310_vm4, %v16794_v33, %v16818_v59 }
 0x3a4   :  { %v934_v60 = vsel %vm16310_vm4, %v16804_v4, %v16803_v45  ;;  %16807 = vst [vmem:[#allocation86_spill] sm:$0xff] %v9667_v46  ;;  %v16819_v46 = vld [vmem:[#allocation109_spill] sm:$0xff]  ;;  %v9704_v13 = vsel %vm16310_vm4, %v16818_v59, %v16804_v4  ;;  %v16824_v4 = vld [vmem:[#allocation104_spill] sm:$0xff] }
 0x3a5   :  { %16797 = vst [vmem:[#allocation85_spill] sm:$0xff] %v9638_v38  ;;  %v9664_v38 = vmul.f32 %v16805_v62, %v16774_v5  ;;  %v16815_v62 = vld [vmem:[#allocation106_spill] sm:$0xff]  ;;  %v9690_v5 = vmul.f32 %v876_v51, %v16809_v41  ;;  %v962_v9 = vperm.slane %v934_v60, 0  ;;  %v16822_v60 = vld [vmem:[#allocation108_spill] sm:$0xff] }
 0x3a6   :  { %16808 = vst [vmem:[#allocation94_spill] sm:$0xff] %v9669_v36  ;;  %v935_v33 = vsel %vm16310_vm4, %v16803_v45, %v16815_v62  ;;  %v16866_v36 = vld [vmem:[#allocation126_spill] sm:$0xff]  ;;  %2384 = vrot.lane.b32.xlu2 %v7638_v1, %s7544_s26 }
 0x3a7   :  { %16806 = vst [vmem:[#allocation91_spill] sm:$0xff] %v9664_v38  ;;  %v936_v38 = vsel %vm16310_vm4, %v16815_v62, %v16814_v10 }
 0x3a8   :  { %16810 = vst [vmem:[#allocation93_spill] sm:$0xff] %v9672_v58 }
 0x3a9   :  { %16811 = vst [vmem:[#allocation89_spill] sm:$0xff] %v9675_v55  ;;  %v16820_v55 = vld [vmem:[#allocation105_spill] sm:$0xff] }
 0x3aa   :  { %16812 = vst [vmem:[#allocation97_spill] sm:$0xff] %v9678_v47  ;;  %v938_v21 = vsel %vm16310_vm4, %v16820_v55, %v16819_v46  ;;  %v937_v51 = vsel %vm16310_vm4, %v16814_v10, %v16820_v55  ;;  %v9724_v55 = vmul.f32 %v868_v63, %v16809_v41  ;;  %v960_v10 = vperm.slane %v932_v37, 0  ;;  %v16827_v37 = vld [vmem:[#allocation114_spill] sm:$0xff] }
 0x3ab   :  { %16813 = vst [vmem:[#allocation96_spill] sm:$0xff] %v9681_v30  ;;  %v16821_v30 = vld [vmem:[#allocation101_spill] sm:$0xff]  ;;  %v966_v22 = vperm.slane %v938_v21, 0  ;;  %v965_v62 = vperm.slane %v937_v51, 0  ;;  %v16828_v21 = vld [vmem:[#allocation110_spill] sm:$0xff]  ;;  %v9749_v51 = vpop.permute.xlu2 %2087 }
 0x3ac   :  { %16816 = vst [vmem:[#allocation99_spill] sm:$0xff] %v9687_v18  ;;  %v939_v47 = vsel %vm16310_vm4, %v16819_v46, %v16821_v30  ;;  %v964_v18 = vperm.slane %v936_v38, 0  ;;  %v16823_v46 = vld [vmem:[#allocation112_spill] sm:$0xff]  ;;  %v9731_v38 = vmul.f32 %v866_v57, %v16809_v41  ;;  %v16830_v57 = vperm.slane %v9508_v0, 0 }
 0x3ad   :  { %16817 = vst [vmem:[#allocation92_spill] sm:$0xff] %v9690_v5  ;;  %v9715_v5 = vsel %vm16310_vm4, %v16821_v30, %v16822_v60  ;;  %v941_v58 = vsel %vm16310_vm4, %v16822_v60, %v16823_v46  ;;  %v942_v59 = vsel %vm16310_vm4, %v16823_v46, %v16824_v4  ;;  %v967_v45 = vperm.slane %v939_v47, 0 }
 0x3ae   :  { %16825 = vst [vmem:[#allocation102_spill] sm:$0xff] %v9724_v55  ;;  %v961_v30 = vperm.slane %v9704_v13, 0  ;;  %v963_v60 = vperm.slane %v935_v33, 0  ;;  %v968_v46 = vperm.slane %v9715_v5, 0  ;;  %v969_v63 = vperm.slane %v941_v58, 0  ;;  %v9742_v55 = vpop.permute.xlu1 %2039  ;;  %v9751_v5 = vpop.permute.xlu0 %2132  ;;  %v16834_v33 = vld [vmem:[#allocation111_spill] sm:$0xff]  ;;  %2390 = vrot.lane.b32.xlu2 %v16641_v40, %s7544_s26 }
 0x3af   :  { %16826 = vst [vmem:[#allocation95_spill] sm:$0xff] %v9731_v38  ;;  %v970_v47 = vperm.slane %v942_v59, 0  ;;  %v9740_v4 = vsel %vm16326_vm5, %v16828_v21, %v16827_v37  ;;  %v9747_v13 = vmul.f32 %v16830_v57, %v16809_v41  ;;  %v9757_v58 = vmul.f32 %v964_v18, %v16834_v33  ;;  %v16927_v40 = vld [vmem:[#allocation151_spill] sm:$0xff] }
 0x3b0   :  { %16829 = vst [vmem:[#allocation100_spill] sm:$0xff] %v9742_v55  ;;  %v9754_v38 = vmul.f32 %v963_v60, %v16834_v33  ;;  %v9760_v59 = vmul.f32 %v962_v9, %v16834_v33  ;;  %v9763_v12 = vmul.f32 %v960_v10, %v16834_v33  ;;  %v9766_v0 = vmul.f32 %v966_v22, %v16834_v33  ;;  %v16844_v9 = vld [vmem:[#allocation115_spill] sm:$0xff]  ;;  %v16845_v10 = vld [vmem:[#allocation117_spill] sm:$0xff] }
 0x3b1   :  { %16831 = vst [vmem:[#allocation98_spill] sm:$0xff] %v9747_v13  ;;  %v9769_v57 = vmul.f32 %v967_v45, %v16834_v33  ;;  %v16841_v60 = vperm.slane %v9584_v3, 0  ;;  %v16847_v45 = vperm.slane %v9579_v8, 0  ;;  %v9793_v3 = vmul.f32 %v969_v63, %v16834_v33 }
 0x3b2   :  { %16832 = vst [vmem:[#allocation106_spill] sm:$0xff] %v9749_v51  ;;  %v16851_v18 = vperm.slane %v9607_v7, 0  ;;  %v9880_v51 = vmul.f32 %v961_v30, %v16834_v33  ;;  %v16887_v30 = vld [vmem:[#allocation131_spill] sm:$0xff]  ;;  %vm1841_vm4 = vcmask 596992  }
 0x3b3   :  { %16833 = vst [vmem:[#allocation103_spill] sm:$0xff] %v9751_v5  ;;  %v9774_v13 = vmul.f32 %v16841_v60, %v16809_v41  ;;  %v9796_v60 = vmul.f32 %v970_v47, %v16834_v33  ;;  %v16855_v5 = vld [vmem:[#allocation118_spill] sm:$0xff]  ;;  %v16856_v47 = vld [vmem:[#allocation120_spill] sm:$0xff] }
 0x3b4   :  { %16835 = vst [vmem:[#allocation109_spill] sm:$0xff] %v9754_v38  ;;  %v9816_v63 = vsel %vm16326_vm5, %v16855_v5, %v16828_v21  ;;  %v7435_v21 = vld [vmem:[%s16030_s1] sm:$0xff]  ;;  %s7553_s1 = smov 10  }
 0x3b5   :  { %16836 = vst [vmem:[#allocation105_spill] sm:$0xff] %v9757_v58  ;;  %v16843_v58 = vld [vmem:[#allocation107_spill] sm:$0xff]  ;;  %2336 = vperm.xlu1 %7317, %v7435_v21   ;;  %2432 = vperm.xlu0 %7318, %v7435_v21  }
 0x3b6   :  { %16837 = vst [vmem:[#allocation101_spill] sm:$0xff] %v9760_v59  ;;  %v9780_v59 = vsel %vm16326_vm5, %v16844_v9, %v16843_v58  ;;  %v9811_v8 = vsel %vm16326_vm5, %v16843_v58, %v16855_v5  ;;  %2396 = vrot.lane.b32.xlu2 %v16666_v43, %s7544_s26 }
 0x3b7   :  { %16838 = vst [vmem:[#allocation108_spill] sm:$0xff] %v9763_v12  ;;  %v16846_v12 = vld [vmem:[#allocation113_spill] sm:$0xff] }
 0x3b8   :  { %16839 = vst [vmem:[#allocation112_spill] sm:$0xff] %v9766_v0  ;;  %v9785_v22 = vsel %vm16326_vm5, %v16846_v12, %v16845_v10  ;;  %v16853_v0 = vperm.slane %v9620_v24, 0  ;;  %v16860_v24 = vld [vmem:[#allocation119_spill] sm:$0xff] }
 0x3b9   :  { %16840 = vst [vmem:[#allocation104_spill] sm:$0xff] %v9769_v57  ;;  %v9790_v57 = vmul.f32 %v16847_v45, %v16809_v41  ;;  %v16857_v45 = vld [vmem:[#allocation116_spill] sm:$0xff] }
 0x3ba   :  { %16842 = vst [vmem:[#allocation114_spill] sm:$0xff] %v9774_v13  ;;  %v9801_v13 = vmul.f32 %v16851_v18, %v16809_v41  ;;  %v9806_v38 = vmul.f32 %v16853_v0, %v16809_v41  ;;  %v9821_v7 = vsel %vm16326_vm5, %v16857_v45, %v16856_v47  ;;  %v16858_v18 = vld [vmem:[#allocation121_spill] sm:$0xff]  ;;  %v16859_v41 = vld [vmem:[#allocation124_spill] sm:$0xff] }
 0x3bb   :  { %16848 = vst [vmem:[#allocation110_spill] sm:$0xff] %v9790_v57  ;;  %v1029_v58 = vsel %vm16326_vm5, %v16827_v37, %v16858_v18  ;;  %v1030_v5 = vsel %vm16326_vm5, %v16858_v18, %v16846_v12  ;;  %v1033_v0 = vsel %vm16326_vm5, %v16859_v41, %v16857_v45  ;;  %v9851_v18 = vpop.permute.xlu1 %2085  ;;  %v9854_v45 = vmul.f32 %v965_v62, %v16834_v33  ;;  %v9867_v12 = vpop.permute.xlu0 %2182 }
 0x3bc   :  { %16849 = vst [vmem:[#allocation111_spill] sm:$0xff] %v9793_v3  ;;  %v1062_v55 = vperm.slane %v1029_v58, 0  ;;  %v1063_v3 = vperm.slane %v1030_v5, 0 }
 0x3bd   :  { %16850 = vst [vmem:[#allocation107_spill] sm:$0xff] %v9796_v60  ;;  %v1059_v60 = vperm.slane %v9811_v8, 0  ;;  %2382 = vrot.lane.b32.xlu1 %v7652_v6, %s7544_s26  ;;  %v16889_v6 = vld [vmem:[#allocation142_spill] sm:$0xff] }
 0x3be   :  { %16852 = vst [vmem:[#allocation115_spill] sm:$0xff] %v9801_v13  ;;  %v16862_v13 = vperm.slane %v9628_v53, 0  ;;  %v16867_v53 = vld [vmem:[#allocation122_spill] sm:$0xff]  ;;  %2402 = vrot.lane.b32.xlu2 %v7689_v15, %s7544_s26 }
 0x3bf   :  { %16854 = vst [vmem:[#allocation117_spill] sm:$0xff] %v9806_v38  ;;  %v16861_v38 = vld [vmem:[#allocation127_spill] sm:$0xff] }
 0x3c0   :  { %v1036_v37 = vsel %vm16326_vm5, %v16861_v38, %v16860_v24  ;;  %v9846_v57 = vmul.f32 %v16862_v13, %v16834_v33  ;;  %16864 = vst [vmem:[#allocation118_spill] sm:$0xff] %v9851_v18  ;;  %v1032_v24 = vsel %vm16326_vm5, %v16845_v10, %v16859_v41  ;;  %v9862_v13 = vsel %vm1123_vm10, %v16867_v53, %v16866_v36  ;;  %v16870_v18 = vld [vmem:[#allocation129_spill] sm:$0xff]  ;;  %v9877_v53 = vpop.permute.xlu2 %2093 }
 0x3c1   :  { %16865 = vst [vmem:[#allocation120_spill] sm:$0xff] %v9854_v45  ;;  %v1035_v8 = vsel %vm16326_vm5, %v16856_v47, %v16861_v38  ;;  %v1066_v45 = vperm.slane %v1033_v0, 0  ;;  %v16871_v10 = vld [vmem:[#allocation125_spill] sm:$0xff]  ;;  %v9883_v38 = vmul.f32 %v968_v46, %v16834_v33  ;;  %v9887_v47 = vmul.f32 %v16834_v33, %v7640_v2  ;;  %v16879_v46 = vld [vmem:[#allocation132_spill] sm:$0xff] }
 0x3c2   :  { %16863 = vst [vmem:[#allocation113_spill] sm:$0xff] %v9846_v57  ;;  %v16869_v57 = vld [vmem:[#allocation123_spill] sm:$0xff]  ;;  %v9875_v41 = vsel %vm1123_vm10, %v16871_v10, %v16870_v18  ;;  %v1065_v0 = vperm.slane %v1032_v24, 0 }
 0x3c3   :  { %16868 = vst [vmem:[#allocation116_spill] sm:$0xff] %v9867_v12  ;;  %v1053_v58 = vsel %vm16294_vm11, %v1036_v37, %v16869_v57  ;;  %v1068_v37 = vperm.slane %v1035_v8, 0  ;;  %v16876_v12 = vld [vmem:[#allocation130_spill] sm:$0xff]  ;;  %v7546_v8 = vmov 0   ;;  %vm1544_vm11 = vcmask 621568  }
 0x3c4   :  { %16872 = vst [vmem:[#allocation121_spill] sm:$0xff] %v9877_v53  ;;  %v1069_v62 = vperm.slane %v1053_v58, 0  ;;  %v9891_v39 = vmul.f32 %v1062_v55, %v16876_v12  ;;  %v9894_v53 = vmul.f32 %v1063_v3, %v16876_v12  ;;  %v9907_v33 = vmul.f32 %v1065_v0, %v16876_v12  ;;  %v16883_v3 = vld [vmem:[#allocation133_spill] sm:$0xff]  ;;  %7319 = vset.pattern.permute.xlu0 %v7546_v8  ;;  %v16886_v0 = vld [vmem:[#allocation135_spill] sm:$0xff] }
 0x3c5   :  { %16873 = vst [vmem:[#allocation124_spill] sm:$0xff] %v9880_v51  ;;  %v9910_v55 = vmul.f32 %v1066_v45, %v16876_v12  ;;  %v9915_v24 = vsel %vm1123_vm10, %v16866_v36, %v16883_v3  ;;  %7320 = vset.pattern.permute.xlu1 %v7546_v8  ;;  %v9918_v58 = vmul.f32 %v1068_v37, %v16876_v12  ;;  %v9936_v37 = vpop.permute.xlu1 %2091 }
 0x3c6   :  { %16874 = vst [vmem:[#allocation119_spill] sm:$0xff] %v9883_v38  ;;  %v16880_v38 = vld [vmem:[#allocation128_spill] sm:$0xff]  ;;  %v9921_v5 = vmul.f32 %v1069_v62, %v16876_v12  ;;  %v9926_v45 = vsel %vm1123_vm10, %v16883_v3, %v16871_v10  ;;  %v9931_v36 = vsel %vm1123_vm10, %v16887_v30, %v16886_v0  ;;  %47 = vperm.xlu0 %7319, %v7435_v21   ;;  %v16890_v62 = vperm.slane %v9740_v4, 0  ;;  %v16895_v4 = vld [vmem:[#allocation139_spill] sm:$0xff] }
 0x3c7   :  { %16875 = vst [vmem:[#allocation127_spill] sm:$0xff] %v9887_v47  ;;  %v9900_v51 = vsel %vm1123_vm10, %v16880_v38, %v16879_v46  ;;  %v16888_v47 = vld [vmem:[#allocation134_spill] sm:$0xff]  ;;  %v16892_v3 = vld [vmem:[#allocation136_spill] sm:$0xff]  ;;  %v9953_v21 = vmul.f32 %v1059_v60, %v16876_v12  ;;  %v1132_v10 = vsel %vm1123_vm10, %v16895_v4, %v16887_v30  ;;  %2388 = vrot.lane.b32.xlu1 %v16640_v52, %s7544_s26  ;;  %v16909_v60 = vperm.slane %v16869_v57, 0 }
 0x3c8   :  { %16877 = vst [vmem:[#allocation126_spill] sm:$0xff] %v9891_v39  ;;  %v1135_v8 = vsel %vm1123_vm10, %v16889_v6, %v16888_v47  ;;  %v9941_v2 = vmul.f32 %v16890_v62, %v16876_v12  ;;  %v1158_v47 = vperm.slane %v9915_v24, 0  ;;  %v1131_v62 = vsel %vm1123_vm10, %v16879_v46, %v16895_v4  ;;  %v16899_v4 = vld [vmem:[#allocation144_spill] sm:$0xff] }
 0x3c9   :  { %16878 = vst [vmem:[#allocation122_spill] sm:$0xff] %v9894_v53  ;;  %v1129_v53 = vsel %vm1123_vm10, %v16892_v3, %v16880_v38  ;;  %v1134_v24 = vsel %vm1123_vm10, %v16886_v0, %v16889_v6  ;;  %v16900_v39 = vld [vmem:[#allocation140_spill] sm:$0xff]  ;;  %v1164_v1 = vperm.slane %v1131_v62, 0  ;;  %v1165_v38 = vperm.slane %v1132_v10, 0 }
 0x3ca   :  { %16881 = vst [vmem:[#allocation123_spill] sm:$0xff] %v9907_v33  ;;  %v1162_v33 = vperm.slane %v1129_v53, 0  ;;  %v16901_v6 = vperm.slane %v9780_v59, 0  ;;  %v16905_v59 = vperm.slane %v9816_v63, 0  ;;  %v10011_v30 = vmul.f32 %v16909_v60, %v16876_v12  ;;  %v16914_v63 = vld [vmem:[#allocation145_spill] sm:$0xff] }
 0x3cb   :  { %16882 = vst [vmem:[#allocation129_spill] sm:$0xff] %v9910_v55  ;;  %v1128_v55 = vsel %vm1123_vm10, %v16870_v18, %v16892_v3  ;;  %v16896_v18 = vld [vmem:[#allocation141_spill] sm:$0xff]  ;;  %v16898_v3 = vld [vmem:[#allocation138_spill] sm:$0xff]  ;;  %vm16288_vm10 = vcmask 834560   ;;  %v10034_v60 = vmul.f32 %v1164_v1, %v16914_v63  ;;  %v16925_v1 = vperm.slane %v9875_v41, 0 }
 0x3cc   :  { %16884 = vst [vmem:[#allocation125_spill] sm:$0xff] %v9918_v58  ;;  %v1152_v46 = vsel %vm1151_vm14, %v1135_v8, %v16898_v3  ;;  %v9986_v0 = vmul.f32 %v16901_v6, %v16876_v12  ;;  %v16903_v8 = vperm.slane %v9785_v22, 0  ;;  %v10001_v6 = vmul.f32 %v16905_v59, %v16876_v12  ;;  %v16911_v22 = vld [vmem:[#allocation147_spill] sm:$0xff] }
 0x3cd   :  { %16885 = vst [vmem:[#allocation130_spill] sm:$0xff] %v9921_v5  ;;  %v9950_v5 = vpop.permute.xlu0 %2188  ;;  %v1168_v53 = vperm.slane %v1152_v46, 0  ;;  %vm1420_vm14 = vcmask 556032  }
 0x3ce   :  { %16891 = vst [vmem:[#allocation132_spill] sm:$0xff] %v9941_v2  ;;  %v16897_v2 = vld [vmem:[#allocation137_spill] sm:$0xff]  ;;  %v9995_v10 = vmul.f32 %v16903_v8, %v16876_v12  ;;  %v16912_v8 = vld [vmem:[#allocation143_spill] sm:$0xff] }
 0x3cf   :  { %16893 = vst [vmem:[#allocation128_spill] sm:$0xff] %v9950_v5  ;;  %v9965_v58 = vsel %vm16353_vm13, %v16897_v2, %v16896_v18  ;;  %v9978_v2 = vsel %vm16353_vm13, %v16900_v39, %v16899_v4  ;;  %v9981_v5 = vpop.permute.xlu2 %2099  ;;  %2394 = vrot.lane.b32.xlu1 %v16665_v50, %s7544_s26  ;;  %v16940_v50 = vperm.slane %v9900_v51, 0 }
 0x3d0   :  { %16894 = vst [vmem:[#allocation133_spill] sm:$0xff] %v9953_v21  ;;  %v1161_v21 = vperm.slane %v1128_v55, 0  ;;  %v1167_v55 = vperm.slane %v1134_v24, 0  ;;  %v1259_v62 = vperm.slane %v9978_v2, 0  ;;  %v16907_v24 = vperm.slane %v9821_v7, 0  ;;  %v10018_v2 = vpop.permute.xlu1 %2097 }
 0x3d1   :  { %16902 = vst [vmem:[#allocation135_spill] sm:$0xff] %v9986_v0  ;;  %v10024_v7 = vmul.f32 %v1162_v33, %v16914_v63  ;;  %v10053_v0 = vmul.f32 %v1168_v53, %v16914_v63  ;;  %v10113_v52 = vmul.f32 %v16940_v50, %v16914_v63 }
 0x3d2   :  { %16904 = vst [vmem:[#allocation131_spill] sm:$0xff] %v9995_v10  ;;  %v10006_v46 = vmul.f32 %v16907_v24, %v16876_v12  ;;  %v10016_v10 = vsel %vm16353_vm13, %v16912_v8, %v16911_v22  ;;  %v10021_v59 = vmul.f32 %v1161_v21, %v16914_v63  ;;  %v16917_v24 = vld [vmem:[#allocation148_spill] sm:$0xff]  ;;  %v16922_v21 = vld [vmem:[#allocation150_spill] sm:$0xff] }
 0x3d3   :  { %16906 = vst [vmem:[#allocation134_spill] sm:$0xff] %v10001_v6  ;;  %v10029_v57 = vsel %vm16353_vm13, %v16896_v18, %v16917_v24  ;;  %v10045_v33 = vsel %vm16353_vm13, %v16917_v24, %v16900_v39  ;;  %v16923_v6 = vld [vmem:[#allocation146_spill] sm:$0xff]  ;;  %v1227_v39 = vsel %vm16353_vm13, %v16899_v4, %v16927_v40  ;;  %v1228_v24 = vsel %vm16353_vm13, %v16927_v40, %v16912_v8  ;;  %v16932_v8 = vld [vmem:[#allocation156_spill] sm:$0xff] }
 0x3d4   :  { %16908 = vst [vmem:[#allocation142_spill] sm:$0xff] %v10006_v46  ;;  %v10040_v46 = vmul.f32 %v1167_v55, %v16914_v63  ;;  %v10050_v18 = vsel %vm16353_vm13, %v16923_v6, %v16922_v21  ;;  %v10078_v4 = vmul.f32 %v1158_v47, %v16914_v63  ;;  %v16935_v47 = vld [vmem:[#allocation159_spill] sm:$0xff] }
 0x3d5   :  { %16910 = vst [vmem:[#allocation136_spill] sm:$0xff] %v10011_v30  ;;  %v10031_v12 = vpop.permute.xlu0 %2194  ;;  %v10037_v30 = vmul.f32 %v1165_v38, %v16914_v63  ;;  %v10058_v38 = vmul.f32 %v16925_v1, %v16914_v63 }
 0x3d6   :  { %16913 = vst [vmem:[#allocation139_spill] sm:$0xff] %v10018_v2 }
 0x3d7   :  { %16915 = vst [vmem:[#allocation141_spill] sm:$0xff] %v10021_v59  ;;  %v16934_v59 = vld [vmem:[#allocation153_spill] sm:$0xff]  ;;  %2400 = vrot.lane.b32.xlu1 %v7681_v14, %s7544_s26 }
 0x3d8   :  { %16916 = vst [vmem:[#allocation137_spill] sm:$0xff] %v10024_v7  ;;  %v16929_v7 = vld [vmem:[#allocation157_spill] sm:$0xff]  ;;  %v10133_v51 = vpop.permute.xlu1 %2103 }
 0x3d9   :  { %16918 = vst [vmem:[#allocation138_spill] sm:$0xff] %v10031_v12 }
 0x3da   :  { %16919 = vst [vmem:[#allocation144_spill] sm:$0xff] %v10034_v60  ;;  %v1261_v60 = vperm.slane %v1228_v24, 0 }
 0x3db   :  { %16920 = vst [vmem:[#allocation140_spill] sm:$0xff] %v10037_v30  ;;  %v16928_v30 = vld [vmem:[#allocation149_spill] sm:$0xff] }
 0x3dc   :  { %16921 = vst [vmem:[#allocation147_spill] sm:$0xff] %v10040_v46  ;;  %v1234_v53 = vsel %vm16353_vm13, %v16929_v7, %v16928_v30  ;;  %v16930_v46 = vld [vmem:[#allocation154_spill] sm:$0xff] }
 0x3dd   :  { %16924 = vst [vmem:[#allocation143_spill] sm:$0xff] %v10053_v0  ;;  %v1257_v0 = vperm.slane %v10029_v57, 0  ;;  %v1230_v41 = vsel %vm16353_vm13, %v16911_v22, %v16930_v46  ;;  %v1231_v1 = vsel %vm16353_vm13, %v16930_v46, %v16923_v6  ;;  %v1233_v22 = vsel %vm16353_vm13, %v16922_v21, %v16929_v7  ;;  %v16936_v46 = vld [vmem:[#allocation155_spill] sm:$0xff]  ;;  %v10102_v21 = vpop.permute.xlu2 %2105 }
 0x3de   :  { %16926 = vst [vmem:[#allocation145_spill] sm:$0xff] %v10058_v38  ;;  %v16933_v38 = vld [vmem:[#allocation152_spill] sm:$0xff]  ;;  %v1260_v57 = vperm.slane %v1227_v39, 0  ;;  %v1251_v6 = vsel %vm16288_vm10, %v1234_v53, %v16934_v59  ;;  %v10095_v55 = vsel %vm1321_vm15, %v16936_v46, %v16935_v47  ;;  %v1263_v40 = vperm.slane %v1230_v41, 0  ;;  %v16947_v53 = vld [vmem:[#allocation162_spill] sm:$0xff] }
 0x3df   :  { %16931 = vst [vmem:[#allocation148_spill] sm:$0xff] %v10078_v4  ;;  %v10085_v30 = vsel %vm1321_vm15, %v16933_v38, %v16932_v8  ;;  %v1264_v7 = vperm.slane %v1231_v1, 0  ;;  %v16938_v39 = vperm.slane %v9862_v13, 0  ;;  %v1266_v4 = vperm.slane %v1233_v22, 0  ;;  %v10116_v1 = vpop.permute.xlu0 %2200 }
 0x3e0   :  { %16937 = vst [vmem:[#allocation150_spill] sm:$0xff] %v10102_v21  ;;  %v1267_v43 = vperm.slane %v1251_v6, 0  ;;  %v16943_v38 = vperm.slane %v9926_v45, 0  ;;  %vm1349_vm10 = vcmask 826368   ;;  %v16950_v6 = vld [vmem:[#allocation160_spill] sm:$0xff]  ;;  %v16952_v45 = vperm.slane %v16898_v3, 0 }
 0x3e1   :  { %v10107_v24 = vmul.f32 %v16938_v39, %v16914_v63  ;;  %16941 = vst [vmem:[#allocation151_spill] sm:$0xff] %v10113_v52  ;;  %v16945_v39 = vperm.slane %v9931_v36, 0  ;;  %v10136_v41 = vmul.f32 %v1260_v57, %v16950_v6  ;;  %v10155_v52 = vmul.f32 %v1264_v7, %v16950_v6  ;;  %v16961_v57 = vld [vmem:[#allocation165_spill] sm:$0xff] }
 0x3e2   :  { %16942 = vst [vmem:[#allocation149_spill] sm:$0xff] %v10116_v1  ;;  %v10121_v13 = vmul.f32 %v16943_v38, %v16914_v63  ;;  %v10141_v38 = vmul.f32 %v16952_v45, %v16914_v63  ;;  %v16962_v45 = vld [vmem:[#allocation161_spill] sm:$0xff]  ;;  %v16977_v1 = vperm.slane %v10016_v10, 0 }
 0x3e3   :  { %16939 = vst [vmem:[#allocation146_spill] sm:$0xff] %v10107_v24  ;;  %v10126_v22 = vmul.f32 %v16945_v39, %v16914_v63  ;;  %v16948_v24 = vld [vmem:[#allocation158_spill] sm:$0xff]  ;;  %v10149_v39 = vmul.f32 %v1261_v60, %v16950_v6  ;;  %v10163_v63 = vmul.f32 %v1266_v4, %v16950_v6  ;;  %v10169_v60 = vmul.f32 %v1259_v62, %v16950_v6  ;;  %v16965_v4 = vld [vmem:[#allocation172_spill] sm:$0xff] }
 0x3e4   :  { %16944 = vst [vmem:[#allocation157_spill] sm:$0xff] %v10121_v13  ;;  %v10131_v50 = vsel %vm1321_vm15, %v16948_v24, %v16947_v53  ;;  %v16954_v13 = vld [vmem:[#allocation163_spill] sm:$0xff]  ;;  %v10175_v7 = vsel %vm1321_vm15, %v16962_v45, %v16961_v57 }
 0x3e5   :  { %16946 = vst [vmem:[#allocation154_spill] sm:$0xff] %v10126_v22  ;;  %v10146_v36 = vsel %vm1321_vm15, %v16932_v8, %v16954_v13  ;;  %v10152_v22 = vmul.f32 %v1263_v40, %v16950_v6  ;;  %v10160_v3 = vsel %vm1321_vm15, %v16954_v13, %v16936_v46  ;;  %v10166_v8 = vmul.f32 %v1267_v43, %v16950_v6  ;;  %v16964_v13 = vld [vmem:[#allocation164_spill] sm:$0xff]  ;;  %v16966_v40 = vld [vmem:[#allocation169_spill] sm:$0xff] }
 0x3e6   :  { %16949 = vst [vmem:[#allocation156_spill] sm:$0xff] %v10133_v51  ;;  %v1356_v43 = vperm.slane %v10146_v36, 0  ;;  %v1329_v36 = vsel %vm1321_vm15, %v16947_v53, %v16966_v40 }
 0x3e7   :  { %16951 = vst [vmem:[#allocation152_spill] sm:$0xff] %v10136_v41  ;;  %v10218_v14 = vpop.permute.xlu0 %2231 }
 0x3e8   :  { %16953 = vst [vmem:[#allocation153_spill] sm:$0xff] %v10141_v38  ;;  %v16963_v38 = vld [vmem:[#allocation166_spill] sm:$0xff] }
 0x3e9   :  { %16955 = vst [vmem:[#allocation159_spill] sm:$0xff] %v10149_v39  ;;  %v1326_v46 = vsel %vm1321_vm15, %v16935_v47, %v16963_v38  ;;  %v1327_v62 = vsel %vm1321_vm15, %v16963_v38, %v16948_v24  ;;  %v1330_v39 = vsel %vm1321_vm15, %v16966_v40, %v16962_v45  ;;  %v10195_v47 = vmul.f32 %v1257_v0, %v16950_v6  ;;  %v16968_v24 = vld [vmem:[#allocation171_spill] sm:$0xff]  ;;  %v16970_v0 = vld [vmem:[#allocation168_spill] sm:$0xff] }
 0x3ea   :  { %16956 = vst [vmem:[#allocation155_spill] sm:$0xff] %v10152_v22  ;;  %v16969_v38 = vld [vmem:[#allocation167_spill] sm:$0xff]  ;;  %v1332_v45 = vsel %vm1321_vm15, %v16961_v57, %v16965_v4  ;;  %v1360_v53 = vperm.slane %v1327_v62, 0  ;;  %v1363_v41 = vperm.slane %v1330_v39, 0  ;;  %v16975_v57 = vperm.slane %v9965_v58, 0 }
 0x3eb   :  { %16957 = vst [vmem:[#allocation162_spill] sm:$0xff] %v10155_v52  ;;  %v1333_v52 = vsel %vm1321_vm15, %v16965_v4, %v16964_v13  ;;  %v16971_v13 = vld [vmem:[#allocation174_spill] sm:$0xff]  ;;  %v1365_v15 = vperm.slane %v1332_v45, 0  ;;  %v10229_v62 = vmul.f32 %v16977_v1, %v16950_v6  ;;  %vm16339_vm15 = vcmask 359424   ;;  %v16982_v45 = vld [vmem:[#allocation175_spill] sm:$0xff] }
 0x3ec   :  { %16958 = vst [vmem:[#allocation158_spill] sm:$0xff] %v10163_v63  ;;  %v1359_v63 = vperm.slane %v1326_v46, 0  ;;  %v10223_v4 = vmul.f32 %v16975_v57, %v16950_v6  ;;  %v1362_v46 = vperm.slane %v1329_v36, 0  ;;  %v16979_v58 = vperm.slane %v10045_v33, 0  ;;  %v10239_v36 = vpop.permute.xlu1 %2138  ;;  %v16989_v33 = vld [vmem:[#allocation181_spill] sm:$0xff] }
 0x3ed   :  { %16959 = vst [vmem:[#allocation160_spill] sm:$0xff] %v10166_v8  ;;  %v16972_v8 = vld [vmem:[#allocation170_spill] sm:$0xff]  ;;  %v10245_v10 = vmul.f32 %v1360_v53, %v16982_v45  ;;  %v16985_v1 = vperm.slane %v10050_v18, 0  ;;  %v10267_v18 = vmul.f32 %v1363_v41, %v16982_v45 }
 0x3ee   :  { %16960 = vst [vmem:[#allocation163_spill] sm:$0xff] %v10169_v60  ;;  %v10204_v60 = vsel %vm1420_vm14, %v16969_v38, %v16968_v24  ;;  %v1424_v22 = vsel %vm1420_vm14, %v16972_v8, %v16971_v13  ;;  %v10216_v38 = vpop.permute.xlu2 %2180  ;;  %v10237_v57 = vmul.f32 %v16979_v58, %v16950_v6  ;;  %v1425_v58 = vsel %vm1420_vm14, %v16971_v13, %v16989_v33 }
 0x3ef   :  { %16967 = vst [vmem:[#allocation165_spill] sm:$0xff] %v10195_v47  ;;  %v1350_v47 = vsel %vm1349_vm10, %v1333_v52, %v16970_v0  ;;  %v1454_v39 = vperm.slane %v1424_v22, 0  ;;  %v10242_v52 = vmul.f32 %v1359_v63, %v16982_v45  ;;  %v10250_v22 = vmul.f32 %v16985_v1, %v16950_v6  ;;  %v16993_v1 = vld [vmem:[#allocation177_spill] sm:$0xff] }
 0x3f0   :  { %16973 = vst [vmem:[#allocation161_spill] sm:$0xff] %v10216_v38  ;;  %v1366_v40 = vperm.slane %v1350_v47, 0  ;;  %v16987_v47 = vperm.slane %v16934_v59, 0  ;;  %v10264_v53 = vmul.f32 %v1362_v46, %v16982_v45  ;;  %v10276_v13 = vmul.f32 %v1365_v15, %v16982_v45  ;;  %v16997_v46 = vld [vmem:[#allocation184_spill] sm:$0xff] }
 0x3f1   :  { %16974 = vst [vmem:[#allocation166_spill] sm:$0xff] %v10218_v14  ;;  %v2474_v14 = vld [vmem:[%s16031_s2] sm:$0xff]  ;;  %v1428_v41 = vsel %vm1420_vm14, %v16993_v1, %v16997_v46  ;;  %vm1615_vm10 = vcmask 351232   ;;  %s7547_s2 = smov 122  }
 0x3f2   :  { %16976 = vst [vmem:[#allocation164_spill] sm:$0xff] %v10223_v4  ;;  %2477 = vperm.xlu1 %7320, %v2474_v14   ;;  %v17000_v4 = vld [vmem:[#allocation187_spill] sm:$0xff]  ;;  %v17001_v14 = vperm.slane %v10095_v55, 0  ;;  %v10307_v55 = vmul.f32 %v1356_v43, %v16982_v45 }
 0x3f3   :  { %16978 = vst [vmem:[#allocation172_spill] sm:$0xff] %v10229_v62  ;;  %v10255_v62 = vmul.f32 %v16987_v47, %v16950_v6  ;;  %v16994_v6 = vld [vmem:[#allocation178_spill] sm:$0xff] }
 0x3f4   :  { %16980 = vst [vmem:[#allocation169_spill] sm:$0xff] %v10237_v57  ;;  %v16990_v57 = vld [vmem:[#allocation173_spill] sm:$0xff]  ;;  %v1422_v47 = vsel %vm1420_vm14, %v16968_v24, %v16994_v6  ;;  %v10293_v15 = vmul.f32 %v17001_v14, %v16982_v45  ;;  %v1423_v24 = vsel %vm1420_vm14, %v16994_v6, %v16972_v8  ;;  %v1458_v14 = vperm.slane %v1428_v41, 0  ;;  %v17006_v8 = vld [vmem:[#allocation186_spill] sm:$0xff] }
 0x3f5   :  { %16981 = vst [vmem:[#allocation171_spill] sm:$0xff] %v10239_v36  ;;  %v1426_v63 = vsel %vm1420_vm14, %v16989_v33, %v16990_v57  ;;  %v1427_v59 = vsel %vm1420_vm14, %v16990_v57, %v16993_v1  ;;  %v10279_v33 = vmul.f32 %v1366_v40, %v16982_v45  ;;  %v16999_v57 = vld [vmem:[#allocation179_spill] sm:$0xff]  ;;  %v17003_v40 = vld [vmem:[#allocation180_spill] sm:$0xff]  ;;  %v17007_v6 = vld [vmem:[#allocation185_spill] sm:$0xff] }
 0x3f6   :  { %16983 = vst [vmem:[#allocation167_spill] sm:$0xff] %v10242_v52  ;;  %v10312_v52 = vsel %vm16339_vm15, %v17007_v6, %v17006_v8  ;;  %v17057_v36 = vld [vmem:[#allocation206_spill] sm:$0xff] }
 0x3f7   :  { %16984 = vst [vmem:[#allocation168_spill] sm:$0xff] %v10245_v10  ;;  %v1455_v10 = vperm.slane %v1425_v58, 0  ;;  %v1453_v58 = vperm.slane %v1423_v24, 0 }
 0x3f8   :  { %16986 = vst [vmem:[#allocation174_spill] sm:$0xff] %v10250_v22 }
 0x3f9   :  { %16988 = vst [vmem:[#allocation170_spill] sm:$0xff] %v10255_v62  ;;  %v16998_v62 = vld [vmem:[#allocation176_spill] sm:$0xff] }
 0x3fa   :  { %16991 = vst [vmem:[#allocation175_spill] sm:$0xff] %v10264_v53  ;;  %v1429_v22 = vsel %vm1420_vm14, %v16997_v46, %v16998_v62  ;;  %v1430_v1 = vsel %vm1420_vm14, %v16998_v62, %v17003_v40  ;;  %v1457_v46 = vperm.slane %v1427_v59, 0  ;;  %v10304_v53 = vpop.permute.xlu0 %2281  ;;  %v10316_v59 = vpop.permute.xlu2 %2186 }
 0x3fb   :  { %16992 = vst [vmem:[#allocation181_spill] sm:$0xff] %v10267_v18  ;;  %v1432_v18 = vsel %vm1420_vm14, %v17000_v4, %v16999_v57  ;;  %v1431_v57 = vsel %vm1420_vm14, %v17003_v40, %v17000_v4  ;;  %v17009_v4 = vld [vmem:[#allocation183_spill] sm:$0xff]  ;;  %v17013_v40 = vld [vmem:[#allocation188_spill] sm:$0xff] }
 0x3fc   :  { %16995 = vst [vmem:[#allocation173_spill] sm:$0xff] %v10276_v13  ;;  %v1456_v13 = vperm.slane %v1426_v63, 0  ;;  %v1446_v62 = vsel %vm16338_vm8, %v1432_v18, %v16658_v35  ;;  %v1460_v63 = vperm.slane %v1430_v1, 0  ;;  %v1461_v41 = vperm.slane %v1431_v57, 0 }
 0x3fd   :  { %16996 = vst [vmem:[#allocation177_spill] sm:$0xff] %v10279_v33  ;;  %v1452_v33 = vperm.slane %v1422_v47, 0  ;;  %v10319_v47 = vmul.f32 %v1454_v39, %v17009_v4  ;;  %v1462_v1 = vperm.slane %v1446_v62, 0  ;;  %v17016_v39 = vperm.slane %v10085_v30, 0 }
 0x3fe   :  { %17002 = vst [vmem:[#allocation178_spill] sm:$0xff] %v10293_v15  ;;  %v1459_v15 = vperm.slane %v1429_v22, 0  ;;  %v17012_v22 = vld [vmem:[#allocation189_spill] sm:$0xff]  ;;  %v10333_v18 = vmul.f32 %v1456_v13, %v17009_v4  ;;  %v10342_v57 = vmul.f32 %v1458_v14, %v17009_v4  ;;  %v17023_v62 = vperm.slane %v10131_v50, 0  ;;  %v17026_v14 = vld [vmem:[#allocation191_spill] sm:$0xff] }
 0x3ff   :  { %17004 = vst [vmem:[#allocation184_spill] sm:$0xff] %v10304_v53  ;;  %v10322_v43 = vmul.f32 %v1452_v33, %v17009_v4  ;;  %v10330_v53 = vmul.f32 %v1455_v10, %v17009_v4  ;;  %v10339_v33 = vmul.f32 %v17016_v39, %v16982_v45  ;;  %v17020_v10 = vld [vmem:[#allocation182_spill] sm:$0xff]  ;;  %v17025_v39 = vld [vmem:[#allocation192_spill] sm:$0xff]  ;;  %v10374_v50 = vmul.f32 %v1461_v41, %v17009_v4 }
 0x400   :  { %17005 = vst [vmem:[#allocation176_spill] sm:$0xff] %v10307_v55  ;;  %v10327_v55 = vsel %vm16339_vm15, %v17013_v40, %v17012_v22  ;;  %v10357_v24 = vmul.f32 %v17023_v62, %v16982_v45  ;;  %v17031_v30 = vperm.slane %v10204_v60, 0  ;;  %v17046_v60 = vld [vmem:[#allocation197_spill] sm:$0xff] }
 0x401   :  { %17008 = vst [vmem:[#allocation179_spill] sm:$0xff] %v10316_v59 }
 0x402   :  { %17010 = vst [vmem:[#allocation187_spill] sm:$0xff] %v10319_v47  ;;  %v17021_v47 = vld [vmem:[#allocation190_spill] sm:$0xff]  ;;  %v10395_v41 = vpop.permute.xlu0 %2287 }
 0x403   :  { %17011 = vst [vmem:[#allocation180_spill] sm:$0xff] %v10322_v43  ;;  %v10345_v43 = vmul.f32 %v1459_v15, %v17009_v4  ;;  %v10350_v13 = vsel %vm16339_vm15, %v17021_v47, %v17020_v10  ;;  %v17027_v15 = vld [vmem:[#allocation193_spill] sm:$0xff]  ;;  %v17028_v47 = vperm.slane %v10160_v3, 0  ;;  %v10392_v3 = vmul.f32 %v1462_v1, %v17009_v4 }
 0x404   :  { %17014 = vst [vmem:[#allocation186_spill] sm:$0xff] %v10330_v53  ;;  %v10379_v62 = vsel %vm16339_vm15, %v17027_v15, %v17007_v6  ;;  %v17037_v6 = vperm.slane %v16970_v0, 0  ;;  %v10407_v1 = vmul.f32 %v1457_v46, %v17009_v4  ;;  %v17083_v2 = vperm.slane %v10350_v13, 0 }
 0x405   :  { %17015 = vst [vmem:[#allocation185_spill] sm:$0xff] %v10333_v18  ;;  %v10352_v18 = vpop.permute.xlu1 %2184 }
 0x406   :  { %17017 = vst [vmem:[#allocation183_spill] sm:$0xff] %v10339_v33  ;;  %v10363_v33 = vsel %vm16339_vm15, %v17026_v14, %v17025_v39 }
 0x407   :  { %17018 = vst [vmem:[#allocation189_spill] sm:$0xff] %v10342_v57  ;;  %v10371_v57 = vmul.f32 %v17028_v47, %v16982_v45  ;;  %v10429_v47 = vmul.f32 %v1453_v58, %v17009_v4 }
 0x408   :  { %17019 = vst [vmem:[#allocation188_spill] sm:$0xff] %v10345_v43  ;;  %v1518_v43 = vsel %vm16339_vm15, %v17020_v10, %v17027_v15  ;;  %v17033_v10 = vperm.slane %v10175_v7, 0  ;;  %v10400_v15 = vmul.f32 %v17037_v6, %v16982_v45  ;;  %v17040_v7 = vld [vmem:[#allocation202_spill] sm:$0xff] }
 0x409   :  { %17022 = vst [vmem:[#allocation182_spill] sm:$0xff] %v10352_v18 }
 0x40a   :  { %17024 = vst [vmem:[#allocation276_spill] sm:$0xff] %v10357_v24  ;;  %v10384_v24 = vmul.f32 %v17031_v30, %v17009_v4  ;;  %v10389_v53 = vmul.f32 %v17033_v10, %v16982_v45  ;;  %v1551_v30 = vperm.slane %v1518_v43, 0  ;;  %v17044_v45 = vld [vmem:[#allocation199_spill] sm:$0xff] }
 0x40b   :  { %17029 = vst [vmem:[#allocation192_spill] sm:$0xff] %v10371_v57  ;;  %v17039_v57 = vld [vmem:[#allocation194_spill] sm:$0xff]  ;;  %v1525_v6 = vsel %vm16339_vm15, %v17044_v45, %v17026_v14 }
 0x40c   :  { %17030 = vst [vmem:[#allocation191_spill] sm:$0xff] %v10374_v50  ;;  %v1528_v10 = vsel %vm16339_vm15, %v17040_v7, %v17039_v57  ;;  %v17043_v50 = vld [vmem:[#allocation196_spill] sm:$0xff]  ;;  %v17045_v57 = vld [vmem:[#allocation198_spill] sm:$0xff]  ;;  %v1558_v58 = vperm.slane %v1525_v6, 0  ;;  %v17056_v6 = vld [vmem:[#allocation207_spill] sm:$0xff] }
 0x40d   :  { %17032 = vst [vmem:[#allocation193_spill] sm:$0xff] %v10384_v24  ;;  %v1521_v0 = vsel %vm16339_vm15, %v17006_v8, %v17043_v50  ;;  %v1522_v43 = vsel %vm16339_vm15, %v17043_v50, %v17013_v40  ;;  %v10423_v46 = vsel %vm1615_vm10, %v17046_v60, %v17045_v57  ;;  %v1524_v24 = vsel %vm16339_vm15, %v17012_v22, %v17044_v45  ;;  %v17048_v8 = vld [vmem:[#allocation201_spill] sm:$0xff]  ;;  %v10441_v60 = vpop.permute.xlu2 %2192  ;;  %v17052_v45 = vld [vmem:[#allocation204_spill] sm:$0xff]  ;;  %v10463_v12 = vpop.permute.xlu1 %2190 }
 0x40e   :  { %17034 = vst [vmem:[#allocation277_spill] sm:$0xff] %v10389_v53  ;;  %v17042_v53 = vld [vmem:[#allocation195_spill] sm:$0xff]  ;;  %v1527_v40 = vsel %vm16339_vm15, %v17025_v39, %v17040_v7  ;;  %v1554_v22 = vperm.slane %v1521_v0, 0  ;;  %v1555_v39 = vperm.slane %v1522_v43, 0 }
 0x40f   :  { %17035 = vst [vmem:[#allocation278_spill] sm:$0xff] %v10392_v3  ;;  %v1545_v50 = vsel %vm1544_vm11, %v1528_v10, %v17042_v53  ;;  %v1557_v10 = vperm.slane %v1524_v24, 0  ;;  %vm16313_vm11 = vcmask 343040  }
 0x410   :  { %17036 = vst [vmem:[#allocation279_spill] sm:$0xff] %v10395_v41  ;;  %v17054_v41 = vperm.slane %v16658_v35, 0  ;;  %v1561_v0 = vperm.slane %v1545_v50, 0 }
 0x411   :  { %17038 = vst [vmem:[#allocation280_spill] sm:$0xff] %v10400_v15  ;;  %v17049_v15 = vld [vmem:[#allocation200_spill] sm:$0xff] }
 0x412   :  { %17041 = vst [vmem:[#allocation194_spill] sm:$0xff] %v10407_v1  ;;  %v10434_v14 = vsel %vm1615_vm10, %v17049_v15, %v17048_v8  ;;  %v10444_v1 = vmul.f32 %v1460_v63, %v17009_v4  ;;  %v10454_v18 = vmul.f32 %v17054_v41, %v17009_v4  ;;  %v10466_v4 = vpop.permute.xlu0 %2293  ;;  %v17060_v41 = vld [vmem:[#allocation205_spill] sm:$0xff] }
 0x413   :  { %17047 = vst [vmem:[#allocation202_spill] sm:$0xff] %v10429_v47  ;;  %v17053_v47 = vld [vmem:[#allocation203_spill] sm:$0xff]  ;;  %v1652_v63 = vperm.slane %v10434_v14, 0  ;;  %v10469_v43 = vmul.f32 %v1554_v22, %v17060_v41  ;;  %v10472_v24 = vmul.f32 %v1555_v39, %v17060_v41  ;;  %v17063_v14 = vld [vmem:[#allocation208_spill] sm:$0xff]  ;;  %v10478_v50 = vmul.f32 %v1557_v10, %v17060_v41 }
 0x414   :  { %17050 = vst [vmem:[#allocation195_spill] sm:$0xff] %v10441_v60  ;;  %v10449_v3 = vsel %vm1615_vm10, %v17053_v47, %v17052_v45  ;;  %v10461_v60 = vsel %vm1615_vm10, %v17057_v36, %v17056_v6  ;;  %v10481_v7 = vmul.f32 %v1558_v58, %v17060_v41  ;;  %v10490_v22 = vsel %vm1615_vm10, %v17063_v14, %v17049_v15  ;;  %v17070_v58 = vld [vmem:[#allocation211_spill] sm:$0xff] }
 0x415   :  { %17051 = vst [vmem:[#allocation196_spill] sm:$0xff] %v10444_v1  ;;  %v1560_v1 = vperm.slane %v1527_v40, 0  ;;  %v1617_v40 = vsel %vm1615_vm10, %v17045_v57, %v17063_v14  ;;  %v10493_v39 = vmul.f32 %v1561_v0, %v17060_v41  ;;  %v17068_v57 = vperm.slane %v10312_v52, 0  ;;  %v17075_v52 = vld [vmem:[#allocation212_spill] sm:$0xff] }
 0x416   :  { %17055 = vst [vmem:[#allocation199_spill] sm:$0xff] %v10454_v18  ;;  %v1621_v18 = vsel %vm1615_vm10, %v17070_v58, %v17053_v47  ;;  %v10510_v0 = vmul.f32 %v1551_v30, %v17060_v41  ;;  %v1650_v14 = vperm.slane %v1617_v40, 0  ;;  %v17078_v30 = vld [vmem:[#allocation216_spill] sm:$0xff] }
 0x417   :  { %17058 = vst [vmem:[#allocation198_spill] sm:$0xff] %v10463_v12  ;;  %v10484_v35 = vmul.f32 %v1560_v1, %v17060_v41  ;;  %v10498_v10 = vmul.f32 %v17068_v57, %v17060_v41  ;;  %v1620_v1 = vsel %vm1615_vm10, %v17048_v8, %v17070_v58 }
 0x418   :  { %17059 = vst [vmem:[#allocation197_spill] sm:$0xff] %v10466_v4  ;;  %v17080_v4 = vld [vmem:[#allocation219_spill] sm:$0xff] }
 0x419   :  { %17061 = vst [vmem:[#allocation201_spill] sm:$0xff] %v10469_v43  ;;  %v1654_v43 = vperm.slane %v1621_v18, 0  ;;  %v17093_v18 = vld [vmem:[#allocation222_spill] sm:$0xff] }
 0x41a   :  { %17062 = vst [vmem:[#allocation200_spill] sm:$0xff] %v10472_v24  ;;  %v17072_v24 = vld [vmem:[#allocation217_spill] sm:$0xff] }
 0x41b   :  { %17064 = vst [vmem:[#allocation204_spill] sm:$0xff] %v10478_v50  ;;  %v1653_v50 = vperm.slane %v1620_v1, 0  ;;  %v10549_v1 = vpop.permute.xlu0 %2299 }
 0x41c   :  { %17065 = vst [vmem:[#allocation203_spill] sm:$0xff] %v10481_v7  ;;  %v17071_v7 = vld [vmem:[#allocation209_spill] sm:$0xff] }
 0x41d   :  { %17066 = vst [vmem:[#allocation207_spill] sm:$0xff] %v10484_v35  ;;  %v1627_v15 = vsel %vm1615_vm10, %v17072_v24, %v17071_v7  ;;  %v17074_v35 = vld [vmem:[#allocation213_spill] sm:$0xff]  ;;  %v17077_v7 = vld [vmem:[#allocation210_spill] sm:$0xff] }
 0x41e   :  { %17067 = vst [vmem:[#allocation206_spill] sm:$0xff] %v10493_v39  ;;  %v10515_v57 = vsel %vm16313_vm11, %v17075_v52, %v17074_v35  ;;  %v1626_v52 = vsel %vm1615_vm10, %v17056_v6, %v17072_v24  ;;  %v10540_v39 = vpop.permute.xlu2 %2198  ;;  %v10546_v6 = vmul.f32 %v17083_v2, %v17060_v41  ;;  %v17089_v2 = vperm.slane %v10379_v62, 0 }
 0x41f   :  { %17069 = vst [vmem:[#allocation205_spill] sm:$0xff] %v10498_v10  ;;  %v17076_v10 = vld [vmem:[#allocation214_spill] sm:$0xff]  ;;  %v1659_v24 = vperm.slane %v1626_v52, 0  ;;  %v17091_v52 = vperm.slane %v10363_v33, 0 }
 0x420   :  { %17073 = vst [vmem:[#allocation208_spill] sm:$0xff] %v10510_v0  ;;  %v1623_v8 = vsel %vm1615_vm10, %v17052_v45, %v17076_v10  ;;  %v1624_v47 = vsel %vm1615_vm10, %v17076_v10, %v17057_v36  ;;  %v17079_v0 = vld [vmem:[#allocation215_spill] sm:$0xff]  ;;  %v1644_v45 = vsel %vm1643_vm12, %v1627_v15, %v17077_v7  ;;  %v17081_v36 = vld [vmem:[#allocation218_spill] sm:$0xff]  ;;  %vm1813_vm12 = vcmask 334848  }
 0x421   :  { %v10528_v40 = vsel %vm16313_vm11, %v17079_v0, %v17078_v30  ;;  %v10538_v10 = vsel %vm16313_vm11, %v17081_v36, %v17080_v4  ;;  %17082 = vst [vmem:[#allocation211_spill] sm:$0xff] %v10540_v39  ;;  %v1656_v12 = vperm.slane %v1623_v8, 0  ;;  %v1657_v59 = vperm.slane %v1624_v47, 0  ;;  %v10557_v47 = vpop.permute.xlu1 %2196 }
 0x422   :  { %17084 = vst [vmem:[#allocation209_spill] sm:$0xff] %v10546_v6  ;;  %v17086_v15 = vperm.slane %v10327_v55, 0  ;;  %v1660_v39 = vperm.slane %v1644_v45, 0  ;;  %v10562_v13 = vmul.f32 %v17089_v2, %v17060_v41  ;;  %v10567_v58 = vmul.f32 %v17091_v52, %v17060_v41  ;;  %v17094_v6 = vld [vmem:[#allocation221_spill] sm:$0xff]  ;;  %v17095_v45 = vld [vmem:[#allocation220_spill] sm:$0xff]  ;;  %v17099_v2 = vld [vmem:[#allocation223_spill] sm:$0xff] }
 0x423   :  { %17085 = vst [vmem:[#allocation217_spill] sm:$0xff] %v10549_v1  ;;  %v10572_v55 = vsel %vm16313_vm11, %v17094_v6, %v17093_v18  ;;  %vm1742_vm10 = vcmask 605184   ;;  %v17097_v8 = vperm.slane %v17042_v53, 0  ;;  %v1716_v33 = vsel %vm16313_vm11, %v17074_v35, %v17099_v2 }
 0x424   :  { %v10554_v51 = vmul.f32 %v17086_v15, %v17060_v41  ;;  %17088 = vst [vmem:[#allocation212_spill] sm:$0xff] %v10557_v47  ;;  %v10575_v15 = vmul.f32 %v1653_v50, %v17095_v45  ;;  %v10586_v52 = vmul.f32 %v1654_v43, %v17095_v45  ;;  %v10597_v50 = vsel %vm16313_vm11, %v17099_v2, %v17079_v0  ;;  %v17106_v43 = vld [vmem:[#allocation226_spill] sm:$0xff] }
 0x425   :  { %17090 = vst [vmem:[#allocation214_spill] sm:$0xff] %v10562_v13  ;;  %v10580_v62 = vmul.f32 %v17097_v8, %v17060_v41  ;;  %v10592_v13 = vmul.f32 %v1657_v59, %v17095_v45  ;;  %v10600_v53 = vmul.f32 %v1659_v24, %v17095_v45  ;;  %v10603_v41 = vmul.f32 %v1660_v39, %v17095_v45  ;;  %v17107_v8 = vld [vmem:[#allocation224_spill] sm:$0xff] }
 0x426   :  { %17087 = vst [vmem:[#allocation213_spill] sm:$0xff] %v10554_v51  ;;  %v10606_v35 = vmul.f32 %v1652_v63, %v17095_v45  ;;  %v1719_v59 = vsel %vm16313_vm11, %v17078_v30, %v17106_v43  ;;  %v10616_v2 = vmul.f32 %v1650_v14, %v17095_v45  ;;  %v1749_v24 = vperm.slane %v1716_v33, 0  ;;  %v17110_v63 = vld [vmem:[#allocation228_spill] sm:$0xff]  ;;  %v17111_v51 = vld [vmem:[#allocation227_spill] sm:$0xff] }
 0x427   :  { %17092 = vst [vmem:[#allocation210_spill] sm:$0xff] %v10567_v58  ;;  %v10589_v58 = vmul.f32 %v1656_v12, %v17095_v45  ;;  %v1720_v39 = vsel %vm16313_vm11, %v17106_v43, %v17081_v36  ;;  %v10624_v12 = vsel %vm1813_vm12, %v17111_v51, %v17110_v63  ;;  %v17114_v33 = vld [vmem:[#allocation231_spill] sm:$0xff]  ;;  %v1752_v43 = vperm.slane %v1719_v59, 0 }
 0x428   :  { %17096 = vst [vmem:[#allocation216_spill] sm:$0xff] %v10575_v15  ;;  %v17120_v15 = vperm.slane %v10423_v46, 0  ;;  %v17122_v1 = vperm.slane %v10449_v3, 0  ;;  %v17125_v46 = vperm.slane %v10490_v22, 0  ;;  %v17129_v3 = vperm.slane %v10461_v60, 0 }
 0x429   :  { %17098 = vst [vmem:[#allocation215_spill] sm:$0xff] %v10580_v62  ;;  %v17108_v62 = vld [vmem:[#allocation232_spill] sm:$0xff] }
 0x42a   :  { %17100 = vst [vmem:[#allocation219_spill] sm:$0xff] %v10586_v52  ;;  %v1726_v0 = vsel %vm16313_vm11, %v17108_v62, %v17107_v8  ;;  %v17113_v8 = vld [vmem:[#allocation225_spill] sm:$0xff]  ;;  %v1725_v51 = vsel %vm16313_vm11, %v17093_v18, %v17108_v62  ;;  %v17116_v52 = vld [vmem:[#allocation234_spill] sm:$0xff]  ;;  %v10657_v18 = vmul.f32 %v17120_v15, %v17095_v45  ;;  %v10663_v47 = vmul.f32 %v17122_v1, %v17095_v45 }
 0x42b   :  { %17101 = vst [vmem:[#allocation218_spill] sm:$0xff] %v10589_v58  ;;  %v10649_v58 = vpop.permute.xlu2 %2204  ;;  %v10671_v15 = vmul.f32 %v17125_v46, %v17095_v45  ;;  %v10681_v1 = vmul.f32 %v17129_v3, %v17095_v45  ;;  %v17134_v46 = vld [vmem:[#allocation235_spill] sm:$0xff] }
 0x42c   :  { %17102 = vst [vmem:[#allocation222_spill] sm:$0xff] %v10592_v13  ;;  %v17112_v13 = vld [vmem:[#allocation229_spill] sm:$0xff]  ;;  %v17141_v3 = vld [vmem:[#allocation239_spill] sm:$0xff] }
 0x42d   :  { %17103 = vst [vmem:[#allocation221_spill] sm:$0xff] %v10600_v53  ;;  %v1722_v30 = vsel %vm16313_vm11, %v17080_v4, %v17112_v13  ;;  %v1723_v14 = vsel %vm16313_vm11, %v17112_v13, %v17094_v6  ;;  %v1743_v4 = vsel %vm1742_vm10, %v1726_v0, %v17113_v8  ;;  %v10651_v6 = vpop.permute.xlu0 %2330  ;;  %v1753_v13 = vperm.slane %v1720_v39, 0  ;;  %v17133_v39 = vld [vmem:[#allocation238_spill] sm:$0xff] }
 0x42e   :  { %17104 = vst [vmem:[#allocation220_spill] sm:$0xff] %v10603_v41  ;;  %v1755_v59 = vperm.slane %v1722_v30, 0  ;;  %v1756_v62 = vperm.slane %v1723_v14, 0  ;;  %vm16315_vm10 = vcmask 326656   ;;  %v10666_v41 = vpop.permute.xlu1 %2202  ;;  %v17127_v30 = vld [vmem:[#allocation237_spill] sm:$0xff]  ;;  %v17128_v14 = vld [vmem:[#allocation236_spill] sm:$0xff]  ;;  %v10691_v22 = vsel %vm1813_vm12, %v17110_v63, %v17133_v39 }
 0x42f   :  { %17105 = vst [vmem:[#allocation223_spill] sm:$0xff] %v10606_v35  ;;  %v17117_v35 = vld [vmem:[#allocation233_spill] sm:$0xff]  ;;  %v10676_v0 = vsel %vm1813_vm12, %v17128_v14, %v17127_v30  ;;  %vm16314_vm11 = vcmask 392192  }
 0x430   :  { %17109 = vst [vmem:[#allocation226_spill] sm:$0xff] %v10616_v2  ;;  %v17115_v2 = vld [vmem:[#allocation230_spill] sm:$0xff]  ;;  %v10647_v53 = vsel %vm1813_vm12, %v17117_v35, %v17116_v52  ;;  %v10700_v60 = vmul.f32 %v1755_v59, %v17134_v46 }
 0x431   :  { %v10637_v36 = vsel %vm1813_vm12, %v17115_v2, %v17114_v33  ;;  %17118 = vst [vmem:[#allocation224_spill] sm:$0xff] %v10649_v58  ;;  %v1758_v58 = vperm.slane %v1725_v51, 0  ;;  %v17131_v51 = vperm.slane %v17077_v7, 0  ;;  %v10705_v7 = vsel %vm1813_vm12, %v17133_v39, %v17115_v2  ;;  %v17146_v39 = vld [vmem:[#allocation241_spill] sm:$0xff] }
 0x432   :  { %17119 = vst [vmem:[#allocation232_spill] sm:$0xff] %v10651_v6  ;;  %v1759_v6 = vperm.slane %v1743_v4, 0 }
 0x433   :  { %17121 = vst [vmem:[#allocation228_spill] sm:$0xff] %v10657_v18  ;;  %v10686_v4 = vmul.f32 %v17131_v51, %v17095_v45  ;;  %v10708_v45 = vmul.f32 %v1756_v62, %v17134_v46  ;;  %v10711_v63 = vmul.f32 %v1758_v58, %v17134_v46  ;;  %v17142_v51 = vld [vmem:[#allocation247_spill] sm:$0xff]  ;;  %v10726_v62 = vmul.f32 %v1749_v24, %v17134_v46  ;;  %v17151_v18 = vld [vmem:[#allocation246_spill] sm:$0xff] }
 0x434   :  { %17123 = vst [vmem:[#allocation227_spill] sm:$0xff] %v10663_v47  ;;  %v10697_v47 = vmul.f32 %v1753_v13, %v17134_v46  ;;  %v1825_v59 = vsel %vm1813_vm12, %v17142_v51, %v17141_v3  ;;  %v1848_v58 = vperm.slane %v10691_v22, 0  ;;  %v1819_v13 = vsel %vm1813_vm12, %v17146_v39, %v17117_v35  ;;  %v17148_v3 = vld [vmem:[#allocation242_spill] sm:$0xff] }
 0x435   :  { %17124 = vst [vmem:[#allocation229_spill] sm:$0xff] %v10666_v41 }
 0x436   :  { %17126 = vst [vmem:[#allocation225_spill] sm:$0xff] %v10671_v15  ;;  %v10694_v15 = vmul.f32 %v1752_v43, %v17134_v46  ;;  %v10714_v43 = vmul.f32 %v1759_v6, %v17134_v46  ;;  %v1818_v6 = vsel %vm1813_vm12, %v17114_v33, %v17146_v39  ;;  %v17153_v39 = vld [vmem:[#allocation240_spill] sm:$0xff] }
 0x437   :  { %17130 = vst [vmem:[#allocation231_spill] sm:$0xff] %v10681_v1  ;;  %v17147_v1 = vld [vmem:[#allocation243_spill] sm:$0xff]  ;;  %v1842_v24 = vsel %vm1841_vm4, %v1825_v59, %v17153_v39  ;;  %v17158_v59 = vperm.slane %v10538_v10, 0  ;;  %vm2008_vm4 = vcmask 130048   ;;  %v17160_v10 = vperm.slane %v10597_v50, 0 }
 0x438   :  { %17132 = vst [vmem:[#allocation230_spill] sm:$0xff] %v10686_v4  ;;  %v17143_v4 = vperm.slane %v10528_v40, 0  ;;  %v10740_v40 = vpop.permute.xlu0 %2380  ;;  %v1858_v38 = vperm.slane %v1842_v24, 0  ;;  %v17162_v24 = vperm.slane %v10572_v55, 0  ;;  %v17165_v50 = vperm.slane %v17113_v8, 0 }
 0x439   :  { %17135 = vst [vmem:[#allocation234_spill] sm:$0xff] %v10694_v15  ;;  %v10774_v41 = vmul.f32 %v17158_v59, %v17134_v46  ;;  %v1922_v8 = vsel %vm16315_vm10, %v8877_v44, %v8879_v11 }
 0x43a   :  { %17136 = vst [vmem:[#allocation233_spill] sm:$0xff] %v10697_v47  ;;  %v10723_v2 = vmul.f32 %v17143_v4, %v17134_v46  ;;  %v17150_v4 = vld [vmem:[#allocation244_spill] sm:$0xff]  ;;  %v17152_v47 = vld [vmem:[#allocation245_spill] sm:$0xff] }
 0x43b   :  { %17137 = vst [vmem:[#allocation237_spill] sm:$0xff] %v10700_v60  ;;  %v1821_v22 = vsel %vm1813_vm12, %v17116_v52, %v17150_v4  ;;  %v1822_v33 = vsel %vm1813_vm12, %v17150_v4, %v17128_v14  ;;  %v1916_v35 = vsel %vm16315_vm10, %v17152_v47, %v17151_v18  ;;  %v10763_v60 = vpop.permute.xlu2 %2279  ;;  %v1851_v14 = vperm.slane %v1818_v6, 0 }
 0x43c   :  { %17138 = vst [vmem:[#allocation236_spill] sm:$0xff] %v10708_v45  ;;  %v10738_v45 = vsel %vm16315_vm10, %v17148_v3, %v17147_v1  ;;  %v1824_v3 = vsel %vm1813_vm12, %v17127_v30, %v17142_v51  ;;  %v1852_v4 = vperm.slane %v1819_v13, 0  ;;  %v1854_v30 = vperm.slane %v1821_v22, 0  ;;  %v10777_v13 = vpop.permute.xlu1 %2237 }
 0x43d   :  { %17139 = vst [vmem:[#allocation238_spill] sm:$0xff] %v10711_v63  ;;  %v17154_v63 = vld [vmem:[#allocation249_spill] sm:$0xff]  ;;  %v1943_v15 = vperm.slane %v10738_v45, 0  ;;  %v1855_v51 = vperm.slane %v1822_v33, 0  ;;  %v1857_v21 = vperm.slane %v1824_v3, 0  ;;  %v1917_v45 = vsel %vm16315_vm10, %v17151_v18, %v9033_v34 }
 0x43e   :  { %17140 = vst [vmem:[#allocation235_spill] sm:$0xff] %v10714_v43  ;;  %v10793_v22 = vmul.f32 %v17162_v24, %v17134_v46  ;;  %v10807_v18 = vmul.f32 %v17165_v50, %v17134_v46  ;;  %v1920_v55 = vsel %vm16315_vm10, %v17154_v63, %v9106_v32  ;;  %v1924_v3 = vsel %vm16315_vm10, %v9187_v25, %v8967_v23 }
 0x43f   :  { %17144 = vst [vmem:[#allocation239_spill] sm:$0xff] %v10723_v2  ;;  %v17155_v2 = vld [vmem:[#allocation248_spill] sm:$0xff]  ;;  %v1915_v23 = vsel %vm16315_vm10, %v8942_v29, %v17152_v47  ;;  %v1950_v59 = vperm.slane %v1920_v55, 0  ;;  %vm2107_vm12 = vcmask 121856  }
 0x440   :  { %17145 = vst [vmem:[#allocation247_spill] sm:$0xff] %v10726_v62  ;;  %v10761_v52 = vsel %vm16315_vm10, %v17155_v2, %v17154_v63  ;;  %v17156_v62 = vperm.slane %v10515_v57, 0  ;;  %v1914_v57 = vsel %vm16315_vm10, %v17147_v1, %v8942_v29  ;;  %v1918_v33 = vsel %vm16315_vm10, %v9033_v34, %v17155_v2  ;;  %v10815_v34 = vpop.permute.xlu0 %2386 }
 0x441   :  { %17149 = vst [vmem:[#allocation241_spill] sm:$0xff] %v10740_v40  ;;  %v1946_v40 = vperm.slane %v1916_v35, 0  ;;  %v1949_v6 = vperm.slane %v10761_v52, 0  ;;  %v10799_v1 = vmul.f32 %v1851_v14, %v8866_v28  ;;  %v10802_v35 = vmul.f32 %v1852_v4, %v8866_v28 }
 0x442   :  { %v10769_v43 = vmul.f32 %v17156_v62, %v17134_v46  ;;  %17159 = vst [vmem:[#allocation242_spill] sm:$0xff] %v10774_v41  ;;  %v10788_v62 = vmul.f32 %v17160_v10, %v17134_v46  ;;  %v10818_v2 = vmul.f32 %v1854_v30, %v8866_v28  ;;  %v10821_v52 = vmul.f32 %v1855_v51, %v8866_v28 }
 0x443   :  { %17163 = vst [vmem:[#allocation246_spill] sm:$0xff] %v10793_v22  ;;  %v1944_v46 = vperm.slane %v1914_v57, 0  ;;  %v1947_v14 = vperm.slane %v1917_v45, 0  ;;  %v1921_v63 = vsel %vm16315_vm10, %v9106_v32, %v8877_v44  ;;  %v1948_v4 = vperm.slane %v1918_v33, 0 }
 0x444   :  { %17157 = vst [vmem:[#allocation243_spill] sm:$0xff] %v10769_v43  ;;  %v10833_v30 = vmul.f32 %v1857_v21, %v8866_v28  ;;  %v10836_v51 = vmul.f32 %v1858_v38, %v8866_v28  ;;  %v1923_v57 = vsel %vm16315_vm10, %v8879_v11, %v9187_v25  ;;  %v1938_v45 = vsel %vm16326_vm5, %v1924_v3, %v16844_v9  ;;  %v10853_v38 = vpop.permute.xlu2 %2285  ;;  %v17231_v43 = vld [vmem:[#allocation149_spill] sm:$0xff] }
 0x445   :  { %17161 = vst [vmem:[#allocation244_spill] sm:$0xff] %v10788_v62  ;;  %v17169_v32 = vperm.slane %v10637_v36, 0  ;;  %v1952_v29 = vperm.slane %v1922_v8, 0  ;;  %v1951_v47 = vperm.slane %v1921_v63, 0  ;;  %v10851_v21 = vsel %vm2008_vm4, %v9169_v27, %v9044_v61 }
 0x446   :  { %17164 = vst [vmem:[#allocation245_spill] sm:$0xff] %v10802_v35  ;;  %v10856_v10 = vmul.f32 %v1848_v58, %v8866_v28  ;;  %v1945_v11 = vperm.slane %v1915_v23, 0  ;;  %v10859_v25 = vmul.f32 %v1947_v14, %v8944_v19  ;;  %v10862_v36 = vmul.f32 %v1946_v40, %v8944_v19  ;;  %v10879_v40 = vpop.permute.xlu1 %2283 }
 0x447   :  { %17166 = vst [vmem:[#allocation240_spill] sm:$0xff] %v10807_v18  ;;  %v10846_v44 = vmul.f32 %v17169_v32, %v8866_v28  ;;  %v10865_v24 = vmul.f32 %v1944_v46, %v8944_v19  ;;  %v10868_v33 = vmul.f32 %v1948_v4, %v8944_v19  ;;  %v1953_v50 = vperm.slane %v1923_v57, 0 }
 0x448   :  { %17167 = vst [vmem:[#allocation249_spill] sm:$0xff] %v10821_v52  ;;  %v1954_v55 = vperm.slane %v1938_v45, 0  ;;  %v10873_v58 = vsel %vm2008_vm4, %v9287_v16, %v9126_v48  ;;  %v10876_v3 = vmul.f32 %v1950_v59, %v8944_v19  ;;  %v17176_v46 = vperm.slane %v10624_v12, 0  ;;  %v10899_v59 = vpop.permute.xlu0 %2392 }
 0x449   :  { %17168 = vst [vmem:[#allocation248_spill] sm:$0xff] %v10833_v30  ;;  %v10887_v63 = vmul.f32 %v1951_v47, %v8944_v19  ;;  %v10892_v23 = vsel %vm2008_vm4, %v9275_v56, %v9065_v49  ;;  %v10897_v4 = vsel %vm2008_vm4, %v9401_v31, %v9202_v20  ;;  %v10902_v57 = vmul.f32 %v1943_v15, %v8944_v19  ;;  %v17279_v30 = vld [vmem:[#allocation261_spill] sm:$0xff] }
 0x44a   :  { %17170 = vst [vmem:[#allocation281_spill] sm:$0xff] %v10846_v44  ;;  %v10884_v14 = vmul.f32 %v17176_v46, %v8866_v28  ;;  %v17180_v45 = vperm.slane %v10647_v53, 0  ;;  %v17182_v56 = vperm.slane %v10705_v7, 0  ;;  %v17184_v46 = vperm.slane %v10676_v0, 0  ;;  %v17194_v0 = vld [vmem:[#allocation72_spill] sm:$0xff]  ;;  %v17198_v7 = vld [vmem:[#allocation106_spill] sm:$0xff] }
 0x44b   :  { %17171 = vst [vmem:[#allocation282_spill] sm:$0xff] %v10856_v10  ;;  %v10921_v15 = vmul.f32 %v1953_v50, %v8944_v19  ;;  %v10924_v12 = vmul.f32 %v1954_v55, %v8944_v19  ;;  %v17187_v53 = vperm.slane %v17153_v39, 0  ;;  %v17190_v50 = vld [vmem:[#allocation50_spill] sm:$0xff]  ;;  %v17192_v39 = vperm.slane %v16844_v9, 0  ;;  %v17195_v9 = vld [vmem:[#allocation55_spill] sm:$0xff]  ;;  %v17272_v10 = vld [vmem:[#allocation260_spill] sm:$0xff] }
 0x44c   :  { %17172 = vst [vmem:[#allocation283_spill] sm:$0xff] %v10862_v36  ;;  %v10908_v32 = vmul.f32 %v17180_v45, %v8866_v28  ;;  %v10913_v47 = vmul.f32 %v17182_v56, %v8866_v28  ;;  %v10918_v8 = vmul.f32 %v17184_v46, %v8866_v28  ;;  %v10935_v46 = vmul.f32 %v1949_v6, %v8944_v19  ;;  %v17284_v44 = vld [vmem:[#allocation266_spill] sm:$0xff] }
 0x44d   :  { %17173 = vst [vmem:[#allocation284_spill] sm:$0xff] %v10865_v24  ;;  %v10929_v45 = vmul.f32 %v17187_v53, %v8866_v28  ;;  %v2010_v55 = vsel %vm2008_vm4, %v9065_v49, %v17190_v50  ;;  %v10944_v28 = vmul.f32 %v1952_v29, %v8944_v19  ;;  %v10949_v53 = vmul.f32 %v17192_v39, %v8944_v19  ;;  %v17196_v39 = vld [vmem:[#allocation88_spill] sm:$0xff] }
 0x44e   :  { %17174 = vst [vmem:[#allocation285_spill] sm:$0xff] %v10868_v33  ;;  %v10954_v6 = vsel %vm2008_vm4, %v17190_v50, %v9169_v27  ;;  %v2013_v49 = vsel %vm2008_vm4, %v9044_v61, %v17194_v0  ;;  %v2017_v29 = vsel %vm2008_vm4, %v9567_v54, %v9401_v31  ;;  %v10968_v56 = vsel %vm2107_vm12, %v17196_v39, %v17195_v9  ;;  %v17197_v50 = vld [vmem:[#allocation70_spill] sm:$0xff]  ;;  %v17220_v33 = vld [vmem:[#allocation128_spill] sm:$0xff] }
 0x44f   :  { %17175 = vst [vmem:[#allocation286_spill] sm:$0xff] %v10876_v3  ;;  %v2016_v27 = vsel %vm2008_vm4, %v9126_v48, %v9567_v54  ;;  %v10976_v61 = vsel %vm2107_vm12, %v17198_v7, %v17197_v50  ;;  %v2043_v31 = vperm.slane %v2010_v55, 0  ;;  %v17201_v48 = vld [vmem:[#allocation121_spill] sm:$0xff]  ;;  %v2046_v18 = vperm.slane %v2013_v49, 0  ;;  %v17204_v49 = vld [vmem:[#allocation100_spill] sm:$0xff] }
 0x450   :  { %17177 = vst [vmem:[#allocation287_spill] sm:$0xff] %v10884_v14  ;;  %v2049_v55 = vperm.slane %v2016_v27, 0  ;;  %vm2135_vm10 = vcmask 384000   ;;  %v17212_v52 = vperm.slane %v10851_v21, 0  ;;  %v17218_v21 = vld [vmem:[#allocation139_spill] sm:$0xff]  ;;  %vm2333_vm5 = vcmask 367616  }
 0x451   :  { %17178 = vst [vmem:[#allocation288_spill] sm:$0xff] %v10887_v63  ;;  %v2020_v63 = vsel %vm2008_vm4, %v9659_v17, %v9516_v26  ;;  %v2014_v26 = vsel %vm2008_vm4, %v17194_v0, %v9287_v16  ;;  %v10981_v16 = vmul.f32 %v1945_v11, %v8944_v19  ;;  %v2019_v0 = vsel %vm2008_vm4, %v9202_v20, %v9659_v17  ;;  %v10994_v19 = vpop.permute.xlu0 %2398  ;;  %v17203_v17 = vld [vmem:[#allocation94_spill] sm:$0xff]  ;;  %v17208_v20 = vld [vmem:[#allocation103_spill] sm:$0xff]  ;;  %v17214_v11 = vld [vmem:[#allocation116_spill] sm:$0xff] }
 0x452   :  { %17179 = vst [vmem:[#allocation289_spill] sm:$0xff] %v10902_v57  ;;  %v2037_v39 = vsel %vm16314_vm11, %v2020_v63, %v9289_v42  ;;  %v11001_v63 = vsel %vm2107_vm12, %v9981_v5, %v17203_v17  ;;  %v2052_v22 = vperm.slane %v2019_v0, 0  ;;  %vm2206_vm11 = vcmask 113664   ;;  %v17223_v57 = vld [vmem:[#allocation138_spill] sm:$0xff] }
 0x453   :  { %17181 = vst [vmem:[#allocation290_spill] sm:$0xff] %v10908_v32  ;;  %v11013_v27 = vmul.f32 %v2049_v55, %v17204_v49  ;;  %v17224_v32 = vld [vmem:[#allocation195_spill] sm:$0xff] }
 0x454   :  { %17183 = vst [vmem:[#allocation291_spill] sm:$0xff] %v10913_v47  ;;  %v2050_v47 = vperm.slane %v2017_v29, 0 }
 0x455   :  { %17185 = vst [vmem:[#allocation292_spill] sm:$0xff] %v10918_v8  ;;  %v2047_v8 = vperm.slane %v2014_v26, 0  ;;  %v11007_v26 = vmul.f32 %v2046_v18, %v17204_v49 }
 0x456   :  { %17186 = vst [vmem:[#allocation293_spill] sm:$0xff] %v10921_v15  ;;  %v11018_v0 = vmul.f32 %v2050_v47, %v17204_v49  ;;  %v11037_v47 = vmul.f32 %v17212_v52, %v17204_v49 }
 0x457   :  { %17188 = vst [vmem:[#allocation294_spill] sm:$0xff] %v10929_v45  ;;  %v17200_v45 = vld [vmem:[#allocation77_spill] sm:$0xff]  ;;  %v11010_v29 = vmul.f32 %v2047_v8, %v17204_v49 }
 0x458   :  { %17189 = vst [vmem:[#allocation295_spill] sm:$0xff] %v10935_v46  ;;  %v10991_v54 = vsel %vm2107_vm12, %v17201_v48, %v17200_v45  ;;  %v2053_v46 = vperm.slane %v2037_v39, 0  ;;  %v11021_v39 = vmul.f32 %v2052_v22, %v17204_v49  ;;  %v2112_v22 = vsel %vm2107_vm12, %v17197_v50, %v9936_v37 }
 0x459   :  { %17191 = vst [vmem:[#allocation50_spill] sm:$0xff] %v10944_v28  ;;  %v2044_v28 = vperm.slane %v10954_v6, 0  ;;  %v17211_v6 = vld [vmem:[#allocation118_spill] sm:$0xff]  ;;  %v2115_v52 = vsel %vm2107_vm12, %v17200_v45, %v17218_v21  ;;  %v11059_v50 = vsel %vm2107_vm12, %v17218_v21, %v9981_v5  ;;  %v11076_v5 = vsel %vm2206_vm11, %v17224_v32, %v17223_v57  ;;  %v11080_v14 = vpop.permute.xlu0 %2432 }
 0x45a   :  { %17193 = vst [vmem:[#allocation296_spill] sm:$0xff] %v10949_v53  ;;  %v10978_v53 = vpop.permute.xlu2 %2291  ;;  %v2109_v18 = vsel %vm2107_vm12, %v17195_v9, %v17211_v6  ;;  %v11029_v8 = vsel %vm2107_vm12, %v17211_v6, %v17198_v7  ;;  %v11032_v55 = vmul.f32 %v2053_v46, %v17204_v49  ;;  %v2113_v9 = vsel %vm2107_vm12, %v9936_v37, %v17201_v48  ;;  %v17216_v46 = vld [vmem:[#allocation150_spill] sm:$0xff]  ;;  %v17217_v6 = vld [vmem:[#allocation156_spill] sm:$0xff]  ;;  %v17221_v37 = vld [vmem:[#allocation179_spill] sm:$0xff] }
 0x45b   :  { %17199 = vst [vmem:[#allocation72_spill] sm:$0xff] %v10981_v16  ;;  %v11003_v16 = vpop.permute.xlu1 %2289  ;;  %v11064_v48 = vsel %vm2206_vm11, %v17221_v37, %v17220_v33  ;;  %v2142_v62 = vperm.slane %v2109_v18, 0  ;;  %v2118_v45 = vsel %vm2107_vm12, %v17203_v17, %v17217_v6  ;;  %v2145_v41 = vperm.slane %v2112_v22, 0 }
 0x45c   :  { %17202 = vst [vmem:[#allocation55_spill] sm:$0xff] %v10994_v19  ;;  %v2146_v35 = vperm.slane %v2113_v9, 0  ;;  %v17229_v9 = vperm.slane %v10873_v58, 0  ;;  %v17238_v58 = vperm.slane %v10897_v4, 0 }
 0x45d   :  { %17205 = vst [vmem:[#allocation88_spill] sm:$0xff] %v11007_v26 }
 0x45e   :  { %17206 = vst [vmem:[#allocation70_spill] sm:$0xff] %v11010_v29  ;;  %v2119_v29 = vsel %vm2107_vm12, %v17217_v6, %v17216_v46  ;;  %v2148_v46 = vperm.slane %v2115_v52, 0  ;;  %v17226_v6 = vperm.slane %v10892_v23, 0  ;;  %vm2305_vm12 = vcmask 105472  }
 0x45f   :  { %17207 = vst [vmem:[#allocation106_spill] sm:$0xff] %v11013_v27  ;;  %v2136_v18 = vsel %vm2135_vm10, %v2119_v29, %v17208_v20  ;;  %v11098_v29 = vmul.f32 %v17229_v9, %v17204_v49  ;;  %vm16323_vm10 = vcmask 375808   ;;  %v11106_v23 = vmul.f32 %v2044_v28, %v17204_v49  ;;  %v17271_v27 = vld [vmem:[#allocation253_spill] sm:$0xff] }
 0x460   :  { %17209 = vst [vmem:[#allocation77_spill] sm:$0xff] %v11018_v0  ;;  %v17215_v0 = vld [vmem:[#allocation161_spill] sm:$0xff]  ;;  %v11090_v19 = vmul.f32 %v17226_v6, %v17204_v49  ;;  %v2152_v52 = vperm.slane %v2136_v18, 0  ;;  %v11117_v9 = vmul.f32 %v17238_v58, %v17204_v49  ;;  %v17240_v18 = vperm.slane %v9289_v42, 0 }
 0x461   :  { %17210 = vst [vmem:[#allocation121_spill] sm:$0xff] %v11021_v39  ;;  %v11048_v7 = vsel %vm2206_vm11, %v17215_v0, %v17214_v11  ;;  %v11067_v0 = vmul.f32 %v2043_v31, %v17204_v49  ;;  %v2151_v39 = vperm.slane %v2118_v45, 0  ;;  %v17232_v31 = vld [vmem:[#allocation211_spill] sm:$0xff]  ;;  %v17255_v42 = vperm.slane %v10968_v56, 0 }
 0x462   :  { %17213 = vst [vmem:[#allocation94_spill] sm:$0xff] %v11037_v47  ;;  %v11078_v21 = vpop.permute.xlu2 %2297  ;;  %v11103_v17 = vsel %vm2206_vm11, %v17232_v31, %v17231_v43  ;;  %v17235_v45 = vld [vmem:[#allocation171_spill] sm:$0xff] }
 0x463   :  { %17219 = vst [vmem:[#allocation100_spill] sm:$0xff] %v11059_v50  ;;  %v11093_v22 = vpop.permute.xlu1 %2295  ;;  %v11109_v6 = vmul.f32 %v2145_v41, %v17235_v45  ;;  %v11112_v15 = vmul.f32 %v2146_v35, %v17235_v45  ;;  %v11122_v50 = vmul.f32 %v17240_v18, %v17204_v49  ;;  %v17244_v35 = vld [vmem:[#allocation198_spill] sm:$0xff]  ;;  %v11140_v58 = vmul.f32 %v2148_v46, %v17235_v45 }
 0x464   :  { %17222 = vst [vmem:[#allocation103_spill] sm:$0xff] %v11067_v0  ;;  %v11137_v4 = vsel %vm2206_vm11, %v17220_v33, %v17244_v35  ;;  %v17246_v49 = vld [vmem:[#allocation166_spill] sm:$0xff]  ;;  %v11160_v46 = vmul.f32 %v2151_v39, %v17235_v45  ;;  %v11163_v18 = vmul.f32 %v2152_v52, %v17235_v45 }
 0x465   :  { %17225 = vst [vmem:[#allocation118_spill] sm:$0xff] %v11078_v21 }
 0x466   :  { %17227 = vst [vmem:[#allocation116_spill] sm:$0xff] %v11090_v19  ;;  %v17264_v19 = vld [vmem:[#allocation197_spill] sm:$0xff] }
 0x467   :  { %17228 = vst [vmem:[#allocation161_spill] sm:$0xff] %v11093_v22 }
 0x468   :  { %17230 = vst [vmem:[#allocation150_spill] sm:$0xff] %v11098_v29  ;;  %v17242_v29 = vld [vmem:[#allocation182_spill] sm:$0xff] }
 0x469   :  { %17233 = vst [vmem:[#allocation156_spill] sm:$0xff] %v11103_v17  ;;  %v11127_v28 = vsel %vm2206_vm11, %v17214_v11, %v17242_v29  ;;  %v11132_v41 = vsel %vm2206_vm11, %v17242_v29, %v17221_v37  ;;  %v11147_v11 = vsel %vm2206_vm11, %v17244_v35, %v17224_v32  ;;  %v17249_v29 = vld [vmem:[#allocation212_spill] sm:$0xff]  ;;  %v17251_v32 = vperm.slane %v10976_v61, 0  ;;  %v17254_v61 = vld [vmem:[#allocation7_spill] sm:$0xff]  ;;  %v17260_v17 = vld [vmem:[#allocation229_spill] sm:$0xff] }
 0x46a   :  { %17234 = vst [vmem:[#allocation139_spill] sm:$0xff] %v11106_v23  ;;  %v11157_v33 = vsel %vm2206_vm11, %v17223_v57, %v17249_v29  ;;  %v11176_v57 = vmul.f32 %v2142_v62, %v17235_v45  ;;  %v2245_v39 = vperm.slane %v11147_v11, 0  ;;  %v11180_v23 = vpop.permute.xlu2 %2303  ;;  %v17258_v11 = vld [vmem:[#allocation279_spill] sm:$0xff]  ;;  %v2217_v56 = vsel %vm2206_vm11, %v17231_v43, %v17260_v17 }
 0x46b   :  { %17236 = vst [vmem:[#allocation128_spill] sm:$0xff] %v11109_v6  ;;  %v11168_v35 = vmul.f32 %v17251_v32, %v17235_v45  ;;  %v2247_v62 = vperm.slane %v11157_v33, 0  ;;  %v11198_v52 = vsel %vm2305_vm12, %v10853_v38, %v17258_v11  ;;  %v17263_v33 = vld [vmem:[#allocation12_spill] sm:$0xff]  ;;  %v17267_v43 = vld [vmem:[#allocation15_spill] sm:$0xff] }
 0x46c   :  { %17237 = vst [vmem:[#allocation179_spill] sm:$0xff] %v11112_v15  ;;  %v2244_v15 = vperm.slane %v11137_v4, 0  ;;  %v11192_v4 = vsel %vm2206_vm11, %v17249_v29, %v17232_v31  ;;  %v17262_v31 = vld [vmem:[#allocation10_spill] sm:$0xff]  ;;  %v17270_v6 = vld [vmem:[#allocation256_spill] sm:$0xff] }
 0x46d   :  { %17239 = vst [vmem:[#allocation138_spill] sm:$0xff] %v11117_v9  ;;  %v11173_v9 = vpop.permute.xlu0 %47 }
 0x46e   :  { %17241 = vst [vmem:[#allocation195_spill] sm:$0xff] %v11122_v50  ;;  %v17247_v50 = vld [vmem:[#allocation184_spill] sm:$0xff]  ;;  %v81_v32 = vmul.f32 %v17254_v61, %v11173_v9  ;;  %v82_v29 = vmul.f32 %v17262_v31, %v11173_v9 }
 0x46f   :  { %17243 = vst [vmem:[#allocation149_spill] sm:$0xff] %v11132_v41  ;;  %v11152_v37 = vsel %vm2305_vm12, %v10763_v60, %v17247_v50  ;;  %v11187_v60 = vmul.f32 %v17255_v42, %v17235_v45  ;;  %v17261_v42 = vld [vmem:[#allocation18_spill] sm:$0xff]  ;;  %v11215_v41 = vsel %vm2305_vm12, %v10978_v53, %v17264_v19 }
 0x470   :  { %17245 = vst [vmem:[#allocation211_spill] sm:$0xff] %v11140_v58 }
 0x471   :  { %17248 = vst [vmem:[#allocation182_spill] sm:$0xff] %v11152_v37  ;;  %v17259_v37 = vld [vmem:[#allocation224_spill] sm:$0xff] }
 0x472   :  { %17250 = vst [vmem:[#allocation198_spill] sm:$0xff] %v11160_v46  ;;  %v2218_v61 = vsel %vm2206_vm11, %v17260_v17, %v17259_v37  ;;  %v11217_v46 = vpop.permute.xlu1 %2301  ;;  %v17266_v37 = vld [vmem:[#allocation13_spill] sm:$0xff]  ;;  %v86_v17 = vmul.f32 %v17267_v43, %v11173_v9  ;;  %v17274_v43 = vperm.slane %v10991_v54, 0  ;;  %v17282_v54 = vld [vmem:[#allocation274_spill] sm:$0xff] }
 0x473   :  { %17252 = vst [vmem:[#allocation184_spill] sm:$0xff] %v11168_v35  ;;  %v85_v58 = vmul.f32 %v17266_v37, %v11173_v9  ;;  %v2235_v31 = vsel %vm16323_vm10, %v2218_v61, %v17246_v49  ;;  %v194_v35 = vadd.f32 %v17271_v27, %v81_v32  ;;  %v17273_v37 = vld [vmem:[#allocation262_spill] sm:$0xff]  ;;  %v17276_v49 = vld [vmem:[#allocation259_spill] sm:$0xff]  ;;  %v17278_v27 = vld [vmem:[#allocation9_spill] sm:$0xff]  ;;  %vm16342_vm10 = vcmask 97280  }
 0x474   :  { %17253 = vst [vmem:[#allocation212_spill] sm:$0xff] %v11176_v57  ;;  %v11236_v3 = vmul.f32 %v17274_v43, %v17235_v45  ;;  %v79_v32 = vmul.f32 %v17278_v27, %v11173_v9  ;;  %v17294_v27 = vld [vmem:[#allocation217_spill] sm:$0xff] }
 0x475   :  { %17256 = vst [vmem:[#allocation7_spill] sm:$0xff] %v11187_v60  ;;  %v89_v60 = vmul.f32 %v17261_v42, %v11173_v9  ;;  %v17268_v42 = vld [vmem:[#allocation16_spill] sm:$0xff]  ;;  %v198_v47 = vadd.f32 %v17272_v10, %v85_v58  ;;  %v199_v10 = vadd.f32 %v17279_v30, %v86_v17  ;;  %v294_v61 = vadd.f32 %v17284_v44, %v194_v35  ;;  %v17290_v44 = vld [vmem:[#allocation271_spill] sm:$0xff] }
 0x476   :  { %17257 = vst [vmem:[#allocation297_spill] sm:$0xff] %v11192_v4  ;;  %v83_v4 = vmul.f32 %v17263_v33, %v11173_v9  ;;  %v88_v57 = vmul.f32 %v17268_v42, %v11173_v9  ;;  %v17269_v33 = vld [vmem:[#allocation258_spill] sm:$0xff]  ;;  %v2250_v42 = vperm.slane %v2217_v56, 0  ;;  %v17280_v58 = vld [vmem:[#allocation272_spill] sm:$0xff]  ;;  %v17287_v30 = vperm.slane %v11001_v63, 0 }
 0x477   :  { %17265 = vst [vmem:[#allocation279_spill] sm:$0xff] %v11215_v41  ;;  %v195_v0 = vadd.f32 %v17269_v33, %v82_v29  ;;  %v202_v24 = vadd.f32 %v17270_v6, %v89_v60  ;;  %v17277_v33 = vld [vmem:[#allocation270_spill] sm:$0xff]  ;;  %v2251_v60 = vperm.slane %v2235_v31, 0  ;;  %v17285_v41 = vld [vmem:[#allocation20_spill] sm:$0xff]  ;;  %v17292_v31 = vld [vmem:[#allocation21_spill] sm:$0xff]  ;;  %v11274_v63 = vsel %vm2305_vm12, %v11078_v21, %v17294_v27 }
 0x478   :  { %v201_v26 = vadd.f32 %v17273_v37, %v88_v57  ;;  %17275 = vst [vmem:[#allocation224_spill] sm:$0xff] %v11236_v3  ;;  %v196_v29 = vadd.f32 %v17276_v49, %v83_v4  ;;  %v298_v57 = vadd.f32 %v17280_v58, %v198_v47  ;;  %v17281_v37 = vld [vmem:[#allocation22_spill] sm:$0xff]  ;;  %v17283_v3 = vld [vmem:[#allocation275_spill] sm:$0xff]  ;;  %v11258_v17 = vmul.f32 %v17287_v30, %v17235_v45  ;;  %v17296_v58 = vld [vmem:[#allocation273_spill] sm:$0xff] }
 0x479   :  { %v295_v6 = vadd.f32 %v17277_v33, %v195_v0  ;;  %v302_v56 = vadd.f32 %v17283_v3, %v202_v24  ;;  %v17286_v0 = vperm.slane %v11029_v8, 0  ;;  %v17288_v47 = vperm.slane %v17208_v20, 0  ;;  %v11265_v24 = vpop.permute.xlu2 %2378  ;;  %v17293_v33 = vld [vmem:[#allocation28_spill] sm:$0xff]  ;;  %17295 = vst [vmem:[#allocation18_spill] sm:$0xff] %v11274_v63  ;;  %v17297_v20 = vld [vmem:[#allocation37_spill] sm:$0xff] }
 0x47a   :  { %v301_v43 = vadd.f32 %v17282_v54, %v201_v26  ;;  %v398_v49 = vadd.f32 %v17285_v41, %v298_v57  ;;  %v296_v3 = vadd.f32 %v17290_v44, %v196_v29  ;;  %v17291_v41 = vld [vmem:[#allocation33_spill] sm:$0xff]  ;;  %v299_v57 = vadd.f32 %v17296_v58, %v199_v10  ;;  %v17298_v54 = vld [vmem:[#allocation251_spill] sm:$0xff]  ;;  %v17311_v21 = vld [vmem:[#allocation52_spill] sm:$0xff] }
 0x47b   :  { %v395_v36 = vadd.f32 %v17281_v37, %v295_v6  ;;  %v11253_v4 = vmul.f32 %v17286_v0, %v17235_v45  ;;  %v11263_v26 = vmul.f32 %v17288_v47, %v17235_v45  ;;  %v402_v6 = vadd.f32 %v17293_v33, %v302_v56  ;;  %v17299_v30 = vld [vmem:[#allocation41_spill] sm:$0xff]  ;;  %v17300_v29 = vld [vmem:[#allocation39_spill] sm:$0xff]  ;;  %v11283_v56 = vpop.permute.xlu1 %2336  ;;  %v17312_v45 = vld [vmem:[#allocation54_spill] sm:$0xff] }
 0x47c   :  { %v401_v8 = vadd.f32 %v17292_v31, %v301_v43  ;;  %v498_v37 = vadd.f32 %v17297_v20, %v398_v49  ;;  %v192_v0 = vadd.f32 %v17298_v54, %v79_v32  ;;  %v17302_v43 = vld [vmem:[#allocation25_spill] sm:$0xff]  ;;  %v11286_v33 = vmul.f32 %v2244_v15, %v10777_v13  ;;  %v17304_v49 = vld [vmem:[#allocation51_spill] sm:$0xff] }
 0x47d   :  { %17289 = vst [vmem:[#allocation229_spill] sm:$0xff] %v11263_v26  ;;  %v495_v35 = vadd.f32 %v17291_v41, %v395_v36  ;;  %v17301_v36 = vld [vmem:[#allocation42_spill] sm:$0xff]  ;;  %v394_v31 = vadd.f32 %v17302_v43, %v294_v61  ;;  %v11289_v10 = vmul.f32 %v2245_v39, %v10777_v13  ;;  %v11293_v32 = vmul.f32 %v2247_v62, %v10777_v13  ;;  %v17306_v20 = vld [vmem:[#allocation63_spill] sm:$0xff] }
 0x47e   :  { %v501_v44 = vadd.f32 %v17300_v29, %v401_v8  ;;  %v502_v41 = vadd.f32 %v17301_v36, %v402_v6  ;;  %v598_v58 = vadd.f32 %v17304_v49, %v498_v37  ;;  %v17305_v8 = vld [vmem:[#allocation24_spill] sm:$0xff]  ;;  %v11299_v54 = vmul.f32 %v2250_v42, %v10777_v13  ;;  %v17308_v29 = vld [vmem:[#allocation66_spill] sm:$0xff]  ;;  %v17310_v62 = vld [vmem:[#allocation71_spill] sm:$0xff] }
 0x47f   :  { %v595_v47 = vadd.f32 %v17299_v30, %v495_v35  ;;  %17303 = vst [vmem:[#allocation10_spill] sm:$0xff] %v11289_v10  ;;  %v396_v6 = vadd.f32 %v17305_v8, %v296_v3  ;;  %v17307_v30 = vld [vmem:[#allocation27_spill] sm:$0xff]  ;;  %v11304_v39 = vmul.f32 %v2251_v60, %v10777_v13  ;;  %v17309_v37 = vld [vmem:[#allocation264_spill] sm:$0xff]  ;;  %v11314_v42 = vsel %vm2305_vm12, %v17247_v50, %v10879_v40  ;;  %v17319_v50 = vld [vmem:[#allocation69_spill] sm:$0xff] }
 0x480   :  { %v399_v15 = vadd.f32 %v17307_v30, %v299_v57  ;;  %v698_v36 = vadd.f32 %v17308_v29, %v598_v58  ;;  %v292_v43 = vadd.f32 %v17309_v37, %v192_v0  ;;  %v601_v35 = vadd.f32 %v17311_v21, %v501_v44  ;;  %v17313_v8 = vld [vmem:[#allocation35_spill] sm:$0xff]  ;;  %v17314_v57 = vld [vmem:[#allocation81_spill] sm:$0xff]  ;;  %v17320_v29 = vld [vmem:[#allocation32_spill] sm:$0xff] }
 0x481   :  { %v695_v61 = vadd.f32 %v17306_v20, %v595_v47  ;;  %v602_v3 = vadd.f32 %v17312_v45, %v502_v41  ;;  %v494_v47 = vadd.f32 %v17313_v8, %v394_v31  ;;  %v11319_v60 = vsel %vm2305_vm12, %v10879_v40, %v10853_v38  ;;  %v17316_v45 = vld [vmem:[#allocation29_spill] sm:$0xff]  ;;  %v17318_v20 = vld [vmem:[#allocation67_spill] sm:$0xff]  ;;  %v17322_v40 = vld [vmem:[#allocation30_spill] sm:$0xff] }
 0x482   :  { %v798_v0 = vadd.f32 %v17314_v57, %v698_v36  ;;  %v17315_v58 = vperm.slane %v11064_v48, 0  ;;  %v496_v44 = vadd.f32 %v17316_v45, %v396_v6  ;;  %v17317_v41 = vld [vmem:[#allocation93_spill] sm:$0xff]  ;;  %v499_v37 = vadd.f32 %v17320_v29, %v399_v15  ;;  %v11339_v57 = vpop.permute.xlu2 %2384  ;;  %v17331_v29 = vld [vmem:[#allocation126_spill] sm:$0xff]  ;;  %v17351_v26 = vld [vmem:[#allocation147_spill] sm:$0xff] }
 0x483   :  { %v795_v49 = vadd.f32 %v17310_v62, %v695_v61  ;;  %v701_v61 = vadd.f32 %v17318_v20, %v601_v35  ;;  %v702_v30 = vadd.f32 %v17319_v50, %v602_v3  ;;  %v17321_v62 = vld [vmem:[#allocation97_spill] sm:$0xff]  ;;  %v392_v8 = vadd.f32 %v17322_v40, %v292_v43  ;;  %v17326_v35 = vld [vmem:[#allocation84_spill] sm:$0xff]  ;;  %v17327_v3 = vld [vmem:[#allocation47_spill] sm:$0xff] }
 0x484   :  { %v11325_v21 = vmul.f32 %v17315_v58, %v10777_v13  ;;  %v898_v38 = vadd.f32 %v17321_v62, %v798_v0  ;;  %v17323_v36 = vperm.slane %v11127_v28, 0  ;;  %v17324_v6 = vld [vmem:[#allocation109_spill] sm:$0xff]  ;;  %v594_v20 = vadd.f32 %v17327_v3, %v494_v47  ;;  %v17328_v43 = vld [vmem:[#allocation112_spill] sm:$0xff]  ;;  %v17332_v62 = vld [vmem:[#allocation99_spill] sm:$0xff] }
 0x485   :  { %v895_v31 = vadd.f32 %v17317_v41, %v795_v49  ;;  %v17325_v49 = vld [vmem:[#allocation82_spill] sm:$0xff]  ;;  %v802_v41 = vadd.f32 %v17326_v35, %v702_v30  ;;  %v11350_v28 = vsel %vm2305_vm12, %v17258_v11, %v11003_v16  ;;  %v17334_v11 = vld [vmem:[#allocation123_spill] sm:$0xff]  ;;  %v17335_v3 = vld [vmem:[#allocation92_spill] sm:$0xff] }
 0x486   :  { %v11337_v48 = vmul.f32 %v17323_v36, %v10777_v13  ;;  %v801_v45 = vadd.f32 %v17325_v49, %v701_v61  ;;  %v992_v50 = vadd.f32 %v17328_v43, %v898_v38  ;;  %v17330_v61 = vld [vmem:[#allocation49_spill] sm:$0xff]  ;;  %v11361_v36 = vpop.permute.xlu1 %2382  ;;  %v17336_v43 = vld [vmem:[#allocation40_spill] sm:$0xff]  ;;  %v17348_v10 = vld [vmem:[#allocation130_spill] sm:$0xff] }
 0x487   :  { %v989_v58 = vadd.f32 %v17324_v6, %v895_v31  ;;  %v11356_v31 = vsel %vm2305_vm12, %v11003_v16, %v10978_v53  ;;  %v596_v30 = vadd.f32 %v17330_v61, %v496_v44  ;;  %v17333_v6 = vld [vmem:[#allocation44_spill] sm:$0xff]  ;;  %v902_v38 = vadd.f32 %v17335_v3, %v802_v41  ;;  %v17337_v15 = vld [vmem:[#allocation241_spill] sm:$0xff]  ;;  %v17340_v61 = vld [vmem:[#allocation62_spill] sm:$0xff] }
 0x488   :  { %17329 = vst [vmem:[#allocation12_spill] sm:$0xff] %v11356_v31  ;;  %v901_v40 = vadd.f32 %v17332_v62, %v801_v45  ;;  %v599_v49 = vadd.f32 %v17333_v6, %v499_v37  ;;  %v1091_v35 = vadd.f32 %v17334_v11, %v992_v50  ;;  %v492_v0 = vadd.f32 %v17336_v43, %v392_v8  ;;  %v17338_v16 = vld [vmem:[#allocation141_spill] sm:$0xff]  ;;  %v17341_v50 = vld [vmem:[#allocation144_spill] sm:$0xff]  ;;  %v17342_v41 = vld [vmem:[#allocation107_spill] sm:$0xff] }
 0x489   :  { %v1088_v47 = vadd.f32 %v17331_v29, %v989_v58  ;;  %v11370_v53 = vsel %vm16342_vm10, %v11265_v24, %v17337_v15  ;;  %v17339_v58 = vld [vmem:[#allocation111_spill] sm:$0xff]  ;;  %v694_v29 = vadd.f32 %v17340_v61, %v594_v20  ;;  %v2343_v62 = vperm.slane %v11350_v28, 0  ;;  %v17343_v24 = vld [vmem:[#allocation64_spill] sm:$0xff]  ;;  %v17349_v31 = vld [vmem:[#allocation57_spill] sm:$0xff] }
 0x48a   :  { %v995_v45 = vadd.f32 %v17339_v58, %v901_v40  ;;  %v1190_v6 = vadd.f32 %v17341_v50, %v1091_v35  ;;  %v996_v11 = vadd.f32 %v17342_v41, %v902_v38  ;;  %v2313_v8 = vsel %vm2305_vm12, %v17264_v19, %v11093_v22  ;;  %v17344_v43 = vld [vmem:[#allocation152_spill] sm:$0xff]  ;;  %v17346_v58 = vld [vmem:[#allocation59_spill] sm:$0xff] }
 0x48b   :  { %v1187_v44 = vadd.f32 %v17338_v16, %v1088_v47  ;;  %v696_v3 = vadd.f32 %v17343_v24, %v596_v30  ;;  %v17345_v16 = vld [vmem:[#allocation125_spill] sm:$0xff]  ;;  %v699_v20 = vadd.f32 %v17346_v58, %v599_v49  ;;  %v17347_v61 = vld [vmem:[#allocation155_spill] sm:$0xff]  ;;  %v592_v35 = vadd.f32 %v17349_v31, %v492_v0  ;;  %v17360_v58 = vld [vmem:[#allocation74_spill] sm:$0xff] }
 0x48c   :  { %v1094_v40 = vadd.f32 %v17345_v16, %v995_v45  ;;  %v1289_v28 = vadd.f32 %v17347_v61, %v1190_v6  ;;  %v1095_v37 = vadd.f32 %v17348_v10, %v996_v11  ;;  %v17350_v50 = vld [vmem:[#allocation167_spill] sm:$0xff]  ;;  %v17355_v10 = vperm.slane %v11048_v7, 0  ;;  %v11406_v11 = vpop.permute.xlu2 %2390  ;;  %v17361_v61 = vld [vmem:[#allocation160_spill] sm:$0xff]  ;;  %v17362_v7 = vld [vmem:[#allocation65_spill] sm:$0xff] }
 0x48d   :  { %v1286_v47 = vadd.f32 %v17344_v43, %v1187_v44  ;;  %v17352_v22 = vld [vmem:[#allocation87_spill] sm:$0xff]  ;;  %v2408_v44 = vsel %vm16342_vm10, %v11339_v57, %v10815_v34  ;;  %v2346_v31 = vperm.slane %v2313_v8, 0  ;;  %17356 = vst [vmem:[#allocation197_spill] sm:$0xff] %v11406_v11  ;;  %v17358_v43 = vld [vmem:[#allocation102_spill] sm:$0xff]  ;;  %v11417_v8 = vsel %vm2305_vm12, %v17294_v27, %v11217_v46  ;;  %v17369_v27 = vld [vmem:[#allocation201_spill] sm:$0xff] }
 0x48e   :  { %v1193_v19 = vadd.f32 %v17351_v26, %v1094_v40  ;;  %v794_v30 = vadd.f32 %v17352_v22, %v694_v29  ;;  %v17353_v45 = vld [vmem:[#allocation175_spill] sm:$0xff]  ;;  %v11401_v0 = vmul.f32 %v17355_v10, %v10777_v13  ;;  %v2317_v26 = vsel %vm2305_vm12, %v11217_v46, %v11180_v23  ;;  %v17357_v22 = vld [vmem:[#allocation186_spill] sm:$0xff]  ;;  %v17364_v10 = vld [vmem:[#allocation101_spill] sm:$0xff] }
 0x48f   :  { %v1385_v41 = vadd.f32 %v17350_v50, %v1286_v47  ;;  %v1388_v49 = vadd.f32 %v17353_v45, %v1289_v28  ;;  %v17354_v24 = vld [vmem:[#allocation143_spill] sm:$0xff]  ;;  %v692_v50 = vadd.f32 %v17362_v7, %v592_v35  ;;  %v2438_v45 = vperm.slane %v2408_v44, 0  ;;  %v17363_v23 = vld [vmem:[#allocation158_spill] sm:$0xff]  ;;  %v17366_v35 = vld [vmem:[#allocation177_spill] sm:$0xff] }
 0x490   :  { %v1194_v6 = vadd.f32 %v17354_v24, %v1095_v37  ;;  %v894_v47 = vadd.f32 %v17358_v43, %v794_v30  ;;  %v17359_v16 = vld [vmem:[#allocation79_spill] sm:$0xff]  ;;  %v799_v37 = vadd.f32 %v17360_v58, %v699_v20  ;;  %v1292_v24 = vadd.f32 %v17363_v23, %v1193_v19  ;;  %v11426_v20 = vpop.permute.xlu1 %2388  ;;  %v17365_v30 = vld [vmem:[#allocation189_spill] sm:$0xff]  ;;  %v17370_v58 = vld [vmem:[#allocation132_spill] sm:$0xff] }
 0x491   :  { %v1481_v29 = vadd.f32 %v17357_v22, %v1385_v41  ;;  %v796_v40 = vadd.f32 %v17359_v16, %v696_v3  ;;  %v11424_v3 = vsel %vm16342_vm10, %v11406_v11, %v10899_v59  ;;  %v17367_v22 = vld [vmem:[#allocation80_spill] sm:$0xff]  ;;  %v17372_v23 = vld [vmem:[#allocation89_spill] sm:$0xff]  ;;  %v17379_v11 = vld [vmem:[#allocation206_spill] sm:$0xff] }
 0x492   :  { %v1293_v28 = vadd.f32 %v17361_v61, %v1194_v6  ;;  %v988_v41 = vadd.f32 %v17364_v10, %v894_v47  ;;  %v1484_v6 = vadd.f32 %v17365_v30, %v1388_v49  ;;  %v792_v43 = vadd.f32 %v17367_v22, %v692_v50  ;;  %v17368_v16 = vld [vmem:[#allocation232_spill] sm:$0xff]  ;;  %v17374_v30 = vld [vmem:[#allocation278_spill] sm:$0xff] }
 0x493   :  { %v2334_v46 = vsel %vm2333_vm5, %v2317_v26, %v17368_v16  ;;  %v1580_v19 = vadd.f32 %v17369_v27, %v1481_v29  ;;  %v17371_v61 = vperm.slane %v11076_v5, 0  ;;  %v896_v10 = vadd.f32 %v17372_v23, %v796_v40  ;;  %v17373_v38 = vld [vmem:[#allocation96_spill] sm:$0xff]  ;;  %v17376_v29 = vld [vmem:[#allocation173_spill] sm:$0xff] }
 0x494   :  { %v1392_v44 = vadd.f32 %v17366_v35, %v1293_v28  ;;  %v1087_v47 = vadd.f32 %v17370_v58, %v988_v41  ;;  %v899_v49 = vadd.f32 %v17373_v38, %v799_v37  ;;  %v17375_v35 = vld [vmem:[#allocation95_spill] sm:$0xff]  ;;  %v1391_v27 = vadd.f32 %v17376_v29, %v1292_v24  ;;  %v17377_v41 = vld [vmem:[#allocation145_spill] sm:$0xff]  ;;  %v17378_v5 = vld [vmem:[#allocation204_spill] sm:$0xff] }
 0x495   :  { %v11438_v7 = vmul.f32 %v17371_v61, %v10777_v13  ;;  %v892_v50 = vadd.f32 %v17375_v35, %v792_v43  ;;  %v2350_v16 = vperm.slane %v2334_v46, 0  ;;  %v1583_v61 = vadd.f32 %v17378_v5, %v1484_v6  ;;  %v17380_v40 = vld [vmem:[#allocation108_spill] sm:$0xff]  ;;  %v17383_v35 = vld [vmem:[#allocation105_spill] sm:$0xff]  ;;  %v17387_v5 = vld [vmem:[#allocation191_spill] sm:$0xff] }
 0x496   :  { %v1488_v28 = vadd.f32 %v17374_v30, %v1392_v44  ;;  %v1186_v58 = vadd.f32 %v17377_v41, %v1087_v47  ;;  %v2406_v38 = vsel %vm16342_vm10, %v17337_v15, %v11361_v36  ;;  %v17381_v37 = vld [vmem:[#allocation216_spill] sm:$0xff]  ;;  %v11456_v43 = vmul.f32 %v2343_v62, %v11283_v56  ;;  %v17382_v30 = vld [vmem:[#allocation163_spill] sm:$0xff] }
 0x497   :  { %v986_v23 = vadd.f32 %v17380_v40, %v892_v50  ;;  %v1679_v44 = vadd.f32 %v17381_v37, %v1580_v19  ;;  %v990_v47 = vadd.f32 %v17383_v35, %v896_v10  ;;  %v17384_v46 = vld [vmem:[#allocation104_spill] sm:$0xff]  ;;  %v11464_v50 = vmul.f32 %v2346_v31, %v11283_v56  ;;  %v17388_v40 = vld [vmem:[#allocation178_spill] sm:$0xff] }
 0x498   :  { %v1587_v63 = vadd.f32 %v17379_v11, %v1488_v28  ;;  %v1285_v24 = vadd.f32 %v17382_v30, %v1186_v58  ;;  %v993_v29 = vadd.f32 %v17384_v46, %v899_v49  ;;  %v17385_v6 = vld [vmem:[#allocation220_spill] sm:$0xff]  ;;  %v17386_v11 = vld [vmem:[#allocation133_spill] sm:$0xff]  ;;  %v1487_v15 = vadd.f32 %v17387_v5, %v1391_v27  ;;  %v17389_v37 = vld [vmem:[#allocation218_spill] sm:$0xff] }
 0x499   :  { %v1085_v28 = vadd.f32 %v17386_v11, %v986_v23  ;;  %v2363_v19 = vmul.f32 %v2350_v16, %v11283_v56  ;;  %v1682_v26 = vadd.f32 %v17389_v37, %v1583_v61  ;;  %v17390_v58 = vld [vmem:[#allocation235_spill] sm:$0xff]  ;;  %v17391_v10 = vperm.slane %v11198_v52, 0  ;;  %v17393_v31 = vld [vmem:[#allocation234_spill] sm:$0xff]  ;;  %v11483_v61 = vpop.permute.xlu1 %2394  ;;  %v17440_v22 = vld [vmem:[#allocation128_spill] sm:$0xff] }
 0x49a   :  { %v1686_v41 = vadd.f32 %v17385_v6, %v1587_v63  ;;  %v1384_v62 = vadd.f32 %v17388_v40, %v1285_v24  ;;  %v17392_v63 = vld [vmem:[#allocation148_spill] sm:$0xff]  ;;  %v2436_v35 = vperm.slane %v2406_v38, 0  ;;  %v1778_v46 = vadd.f32 %v17393_v31, %v1679_v44  ;;  %v17394_v6 = vld [vmem:[#allocation187_spill] sm:$0xff]  ;;  %v17395_v24 = vld [vmem:[#allocation122_spill] sm:$0xff] }
 0x49b   :  { %v11474_v49 = vmul.f32 %v17391_v10, %v11283_v56  ;;  %v1184_v23 = vadd.f32 %v17392_v63, %v1085_v28  ;;  %v11480_v16 = vmul.f32 %v2438_v45, %v11080_v14  ;;  %v1089_v11 = vadd.f32 %v17395_v24, %v990_v47  ;;  %v17397_v40 = vld [vmem:[#allocation165_spill] sm:$0xff]  ;;  %v17398_v28 = vld [vmem:[#allocation8_spill] sm:$0xff]  ;;  %v17405_v24 = vld [vmem:[#allocation223_spill] sm:$0xff] }
 0x49c   :  { %v1785_v30 = vadd.f32 %v17390_v58, %v1686_v41  ;;  %v1480_v27 = vadd.f32 %v17394_v6, %v1384_v62  ;;  %v17396_v41 = vld [vmem:[#allocation129_spill] sm:$0xff]  ;;  %v78_v38 = vmul.f32 %v17398_v28, %v11173_v9  ;;  %v17399_v58 = vld [vmem:[#allocation207_spill] sm:$0xff]  ;;  %v17401_v45 = vperm.slane %v11314_v42, 0 }
 0x49d   :  { %v1092_v5 = vadd.f32 %v17396_v41, %v993_v29  ;;  %v1283_v37 = vadd.f32 %v17397_v40, %v1184_v23  ;;  %v1586_v44 = vadd.f32 %v17399_v58, %v1487_v15  ;;  %v17400_v10 = vld [vmem:[#allocation205_spill] sm:$0xff]  ;;  %v2409_v47 = vsel %vm16342_vm10, %v10815_v34, %v11426_v20  ;;  %v17403_v23 = vld [vmem:[#allocation176_spill] sm:$0xff]  ;;  %v17404_v15 = vld [vmem:[#allocation11_spill] sm:$0xff] }
 0x49e   :  { %v1884_v52 = vadd.f32 %v10836_v51, %v1785_v30  ;;  %v1579_v62 = vadd.f32 %v17400_v10, %v1480_v27  ;;  %v11495_v63 = vmul.f32 %v17401_v45, %v11283_v56  ;;  %v17402_v29 = vld [vmem:[#allocation237_spill] sm:$0xff]  ;;  %v11504_v6 = vmul.f32 %v2436_v35, %v11080_v14  ;;  %v17407_v58 = vld [vmem:[#allocation140_spill] sm:$0xff] }
 0x49f   :  { %v1781_v51 = vadd.f32 %v17402_v29, %v1682_v26  ;;  %v1382_v31 = vadd.f32 %v17403_v23, %v1283_v37  ;;  %v80_v27 = vmul.f32 %v17404_v15, %v11173_v9  ;;  %v1877_v42 = vadd.f32 %v10799_v1, %v1778_v46  ;;  %v17406_v40 = vld [vmem:[#allocation137_spill] sm:$0xff]  ;;  %v17408_v10 = vld [vmem:[#allocation180_spill] sm:$0xff]  ;;  %v17411_v23 = vld [vmem:[#allocation239_spill] sm:$0xff] }
 0x4a0   :  { %v1980_v30 = vadd.f32 %v10924_v12, %v1884_v52  ;;  %v1678_v41 = vadd.f32 %v17405_v24, %v1579_v62  ;;  %v1188_v28 = vadd.f32 %v17406_v40, %v1089_v11  ;;  %v1191_v34 = vadd.f32 %v17407_v58, %v1092_v5  ;;  %v17409_v52 = vld [vmem:[#allocation14_spill] sm:$0xff]  ;;  %v17410_v45 = vld [vmem:[#allocation221_spill] sm:$0xff]  ;;  %v17413_v5 = vld [vmem:[#allocation208_spill] sm:$0xff] }
 0x4a1   :  { %v1478_v12 = vadd.f32 %v17408_v10, %v1382_v31  ;;  %v84_v37 = vmul.f32 %v17409_v52, %v11173_v9  ;;  %v2439_v35 = vperm.slane %v2409_v47, 0  ;;  %v1685_v29 = vadd.f32 %v17410_v45, %v1586_v44  ;;  %v17412_v1 = vld [vmem:[#allocation17_spill] sm:$0xff]  ;;  %v17416_v40 = vld [vmem:[#allocation159_spill] sm:$0xff]  ;;  %v17417_v10 = vld [vmem:[#allocation162_spill] sm:$0xff] }
 0x4a2   :  { %v2079_v26 = vadd.f32 %v11032_v55, %v1980_v30  ;;  %v1777_v15 = vadd.f32 %v17411_v23, %v1678_v41  ;;  %v87_v46 = vmul.f32 %v17412_v1, %v11173_v9  ;;  %v1880_v62 = vadd.f32 %v10818_v2, %v1781_v51  ;;  %v17414_v55 = vld [vmem:[#allocation19_spill] sm:$0xff]  ;;  %v17415_v47 = vld [vmem:[#allocation281_spill] sm:$0xff]  ;;  %v17418_v51 = vld [vmem:[#allocation226_spill] sm:$0xff] }
 0x4a3   :  { %v1577_v24 = vadd.f32 %v17413_v5, %v1478_v12  ;;  %v90_v30 = vmul.f32 %v17414_v55, %v11173_v9  ;;  %v1973_v31 = vadd.f32 %v10859_v25, %v1877_v42  ;;  %v11529_v44 = vsel %vm16342_vm10, %v10899_v59, %v11483_v61  ;;  %v17419_v9 = vld [vmem:[#allocation238_spill] sm:$0xff]  ;;  %v17420_v42 = vld [vmem:[#allocation283_spill] sm:$0xff] }
 0x4a4   :  { %v2178_v11 = vadd.f32 %v11163_v18, %v2079_v26  ;;  %v1876_v41 = vadd.f32 %v17415_v47, %v1777_v15  ;;  %v1287_v58 = vadd.f32 %v17416_v40, %v1188_v28  ;;  %v1290_v2 = vadd.f32 %v17417_v10, %v1191_v34  ;;  %v17421_v45 = vld [vmem:[#allocation250_spill] sm:$0xff]  ;;  %v11543_v15 = vpop.permute.xlu1 %2400  ;;  %v17423_v34 = vld [vmem:[#allocation247_spill] sm:$0xff]  ;;  %v17428_v10 = vld [vmem:[#allocation168_spill] sm:$0xff] }
 0x4a5   :  { %v1676_v26 = vadd.f32 %v17418_v51, %v1577_v24  ;;  %v11537_v12 = vmul.f32 %v2439_v35, %v11080_v14  ;;  %v1784_v25 = vadd.f32 %v17419_v9, %v1685_v29  ;;  %v191_v59 = vadd.f32 %v17421_v45, %v78_v38  ;;  %v17422_v23 = vld [vmem:[#allocation286_spill] sm:$0xff]  ;;  %v17425_v24 = vld [vmem:[#allocation88_spill] sm:$0xff]  ;;  %v17427_v40 = vld [vmem:[#allocation263_spill] sm:$0xff] }
 0x4a6   :  { %v2277_v18 = vadd.f32 %v11304_v39, %v2178_v11  ;;  %v1972_v52 = vadd.f32 %v17420_v42, %v1876_v41  ;;  %v1976_v1 = vadd.f32 %v17422_v23, %v1880_v62  ;;  %v17424_v39 = vld [vmem:[#allocation254_spill] sm:$0xff]  ;;  %v2072_v55 = vadd.f32 %v17425_v24, %v1973_v31  ;;  %v17429_v51 = vld [vmem:[#allocation181_spill] sm:$0xff]  ;;  %v17434_v31 = vld [vmem:[#allocation23_spill] sm:$0xff] }
 0x4a7   :  { %v1775_v5 = vadd.f32 %v17423_v34, %v1676_v26  ;;  %v197_v11 = vadd.f32 %v17424_v39, %v84_v37  ;;  %v2442_v35 = vperm.slane %v11529_v44, 0  ;;  %v17426_v47 = vld [vmem:[#allocation94_spill] sm:$0xff]  ;;  %v291_v41 = vadd.f32 %v17427_v40, %v191_v59  ;;  %v17432_v26 = vld [vmem:[#allocation248_spill] sm:$0xff] }
 0x4a8   :  { %v11545_v28 = vadd.f32 %v2363_v19, %v2277_v18  ;;  %v2071_v29 = vadd.f32 %v17426_v47, %v1972_v52  ;;  %v1386_v38 = vadd.f32 %v17428_v10, %v1287_v58  ;;  %v11555_v62 = vadd.f32 %v17429_v51, %v1290_v2  ;;  %v17430_v9 = vld [vmem:[#allocation282_spill] sm:$0xff]  ;;  %v17431_v18 = vld [vmem:[#allocation267_spill] sm:$0xff]  ;;  %v17433_v37 = vld [vmem:[#allocation184_spill] sm:$0xff] }
 0x4a9   :  { %v1874_v19 = vadd.f32 %v17430_v9, %v1775_v5  ;;  %v297_v42 = vadd.f32 %v17431_v18, %v197_v11  ;;  %v1883_v45 = vadd.f32 %v17432_v26, %v1784_v25  ;;  %v391_v34 = vadd.f32 %v17434_v31, %v291_v41  ;;  %v17435_v39 = vld [vmem:[#allocation252_spill] sm:$0xff]  ;;  %v17436_v52 = vld [vmem:[#allocation106_spill] sm:$0xff]  ;;  %v17438_v58 = vld [vmem:[#allocation31_spill] sm:$0xff] }
 0x4aa   :  { %v2170_v23 = vadd.f32 %v17433_v37, %v2071_v29  ;;  %v193_v24 = vadd.f32 %v17435_v39, %v80_v27  ;;  %v2075_v47 = vadd.f32 %v17436_v52, %v1976_v1  ;;  %v17437_v59 = vld [vmem:[#allocation284_spill] sm:$0xff]  ;;  %v17439_v2 = vld [vmem:[#allocation255_spill] sm:$0xff]  ;;  %v2171_v5 = vadd.f32 %v17440_v22, %v2072_v55  ;;  %v17442_v18 = vld [vmem:[#allocation265_spill] sm:$0xff] }
 0x4ab   :  { %v1970_v40 = vadd.f32 %v17437_v59, %v1874_v19  ;;  %v397_v10 = vadd.f32 %v17438_v58, %v297_v42  ;;  %v200_v51 = vadd.f32 %v17439_v2, %v87_v46  ;;  %v17441_v9 = vld [vmem:[#allocation43_spill] sm:$0xff]  ;;  %v17444_v37 = vld [vmem:[#allocation45_spill] sm:$0xff]  ;;  %v17445_v31 = vld [vmem:[#allocation268_spill] sm:$0xff]  ;;  %vm3669_vm5 = vcmask 719872  }
 0x4ac   :  { %v2269_v11 = vadd.f32 %v11325_v21, %v2170_v23  ;;  %v491_v25 = vadd.f32 %v17441_v9, %v391_v34  ;;  %v293_v29 = vadd.f32 %v17442_v18, %v193_v24  ;;  %v17443_v26 = vld [vmem:[#allocation103_spill] sm:$0xff]  ;;  %v17446_v39 = vld [vmem:[#allocation257_spill] sm:$0xff]  ;;  %v17448_v59 = vld [vmem:[#allocation58_spill] sm:$0xff]  ;;  %v11579_v23 = vpop.permute.xlu1 %2477 }
 0x4ad   :  { %v2069_v41 = vadd.f32 %v17443_v26, %v1970_v40  ;;  %v497_v27 = vadd.f32 %v17444_v37, %v397_v10  ;;  %v300_v1 = vadd.f32 %v17445_v31, %v200_v51  ;;  %v203_v19 = vadd.f32 %v17446_v39, %v90_v30  ;;  %v17447_v52 = vld [vmem:[#allocation293_spill] sm:$0xff]  ;;  %v17449_v55 = vld [vmem:[#allocation26_spill] sm:$0xff]  ;;  %v17450_v34 = vld [vmem:[#allocation212_spill] sm:$0xff] }
 0x4ae   :  { %v1979_v42 = vadd.f32 %v17447_v52, %v1883_v45  ;;  %v2368_v46 = vadd.f32 %v11474_v49, %v2269_v11  ;;  %v591_v22 = vadd.f32 %v17448_v59, %v491_v25  ;;  %v393_v21 = vadd.f32 %v17449_v55, %v293_v29  ;;  %v17451_v58 = vld [vmem:[#allocation60_spill] sm:$0xff]  ;;  %v17452_v2 = vld [vmem:[#allocation34_spill] sm:$0xff]  ;;  %v17453_v9 = vld [vmem:[#allocation269_spill] sm:$0xff] }
 0x4af   :  { %v2168_v24 = vadd.f32 %v17450_v34, %v2069_v41  ;;  %v597_v40 = vadd.f32 %v17451_v58, %v497_v27  ;;  %v400_v10 = vadd.f32 %v17452_v2, %v300_v1  ;;  %v303_v51 = vadd.f32 %v17453_v9, %v203_v19  ;;  %v17454_v18 = vld [vmem:[#allocation73_spill] sm:$0xff]  ;;  %v17455_v11 = vld [vmem:[#allocation38_spill] sm:$0xff]  ;;  %v17456_v26 = vld [vmem:[#allocation75_spill] sm:$0xff] }
 0x4b0   :  { %v2270_v30 = vadd.f32 %v11286_v33, %v2171_v5  ;;  %v2464_v45 = vadd.f32 %v11480_v16, %v2368_v46  ;;  %v691_v49 = vadd.f32 %v17454_v18, %v591_v22  ;;  %v493_v25 = vadd.f32 %v17455_v11, %v393_v21  ;;  %v17457_v31 = vld [vmem:[#allocation46_spill] sm:$0xff]  ;;  %v17458_v39 = vld [vmem:[#allocation36_spill] sm:$0xff]  ;;  %v17459_v52 = vld [vmem:[#allocation211_spill] sm:$0xff] }
 0x4b1   :  { %v2267_v29 = vadd.f32 %v11337_v48, %v2168_v24  ;;  %v697_v37 = vadd.f32 %v17456_v26, %v597_v40  ;;  %v500_v41 = vadd.f32 %v17457_v31, %v400_v10  ;;  %v403_v27 = vadd.f32 %v17458_v39, %v303_v51  ;;  %v17460_v33 = vld [vmem:[#allocation85_spill] sm:$0xff]  ;;  %v17462_v22 = vld [vmem:[#allocation90_spill] sm:$0xff]  ;;  %v17464_v34 = vld [vmem:[#allocation48_spill] sm:$0xff] }
 0x4b2   :  { %v2174_v1 = vadd.f32 %v17459_v52, %v2075_v47  ;;  %v11595_v19 = vadd.f32 %v11579_v23, %v2464_v45  ;;  %v791_v5 = vadd.f32 %v17460_v33, %v691_v49  ;;  %v17461_v16 = vld [vmem:[#allocation53_spill] sm:$0xff]  ;;  %v2369_v58 = vadd.f32 %v11456_v43, %v2270_v30  ;;  %v17465_v47 = vld [vmem:[#allocation98_spill] sm:$0xff]  ;;  %v17466_v10 = vld [vmem:[#allocation68_spill] sm:$0xff] }
 0x4b3   :  { %v593_v46 = vadd.f32 %v17461_v16, %v493_v25  ;;  %v2366_v59 = vadd.f32 %v11495_v63, %v2267_v29  ;;  %v797_v55 = vadd.f32 %v17462_v22, %v697_v37  ;;  %v17463_v48 = vld [vmem:[#allocation61_spill] sm:$0xff]  ;;  %v503_v24 = vadd.f32 %v17464_v34, %v403_v27  ;;  %v17467_v45 = vld [vmem:[#allocation114_spill] sm:$0xff]  ;;  %v17468_v49 = vld [vmem:[#allocation76_spill] sm:$0xff] }
 0x4b4   :  { %v600_v21 = vadd.f32 %v17463_v48, %v500_v41  ;;  %v2496_v40 = vmax.f32 %v11595_v19, 0.0  ;;  %v891_v2 = vadd.f32 %v17465_v47, %v791_v5  ;;  %v17469_v11 = vld [vmem:[#allocation56_spill] sm:$0xff]  ;;  %v17470_v29 = vld [vmem:[#allocation185_spill] sm:$0xff]  ;;  %v17473_v41 = vld [vmem:[#allocation83_spill] sm:$0xff] }
 0x4b5   :  { %v693_v9 = vadd.f32 %v17466_v10, %v593_v46  ;;  %v2462_v51 = vadd.f32 %v11504_v6, %v2366_v59  ;;  %v897_v18 = vadd.f32 %v17467_v45, %v797_v55  ;;  %v603_v25 = vadd.f32 %v17469_v11, %v503_v24  ;;  %v17471_v37 = vld [vmem:[#allocation121_spill] sm:$0xff]  ;;  %v17474_v27 = vld [vmem:[#allocation120_spill] sm:$0xff]  ;;  %v17475_v33 = vld [vmem:[#allocation91_spill] sm:$0xff] }
 0x4b6   :  { %v700_v63 = vadd.f32 %v17468_v49, %v600_v21  ;;  %v1482_v26 = vadd.f32 %v17470_v29, %v1386_v38  ;;  %v2078_v31 = vadd.f32 %v17471_v37, %v1979_v42  ;;  %2525 = vrot.lane.b32.xlu0 %v2496_v40, %s7479_s23  ;;  %v17472_v43 = vld [vmem:[#allocation113_spill] sm:$0xff]  ;;  %v17476_v16 = vld [vmem:[#allocation78_spill] sm:$0xff]  ;;  %v2465_v38 = vadd.f32 %v11537_v12, %v2369_v58  ;;  %v17477_v59 = vld [vmem:[#allocation135_spill] sm:$0xff] }
 0x4b7   :  { %v985_v30 = vadd.f32 %v17472_v43, %v891_v2  ;;  %v793_v39 = vadd.f32 %v17473_v41, %v693_v9  ;;  %v11619_v6 = vadd.f32 %v11579_v23, %v2462_v51  ;;  %v991_v52 = vadd.f32 %v17474_v27, %v897_v18  ;;  %v17478_v55 = vld [vmem:[#allocation110_spill] sm:$0xff]  ;;  %v17479_v34 = vld [vmem:[#allocation131_spill] sm:$0xff]  ;;  %v17482_v51 = vld [vmem:[#allocation188_spill] sm:$0xff] }
 0x4b8   :  { %v800_v5 = vadd.f32 %v17475_v33, %v700_v63  ;;  %v703_v46 = vadd.f32 %v17476_v16, %v603_v25  ;;  %v2273_v42 = vadd.f32 %v11293_v32, %v2174_v1  ;;  %v17480_v47 = vld [vmem:[#allocation115_spill] sm:$0xff]  ;;  %v17481_v10 = vld [vmem:[#allocation86_spill] sm:$0xff]  ;;  %v1485_v45 = vadd.f32 %v17482_v51, %v11555_v62  ;;  %v17484_v58 = vld [vmem:[#allocation124_spill] sm:$0xff] }
 0x4b9   :  { %v1084_v22 = vadd.f32 %v17477_v59, %v985_v30  ;;  %v893_v48 = vadd.f32 %v17478_v55, %v793_v39  ;;  %v2494_v21 = vmax.f32 %v11619_v6, 0.0  ;;  %v1090_v24 = vadd.f32 %v17479_v34, %v991_v52  ;;  %v17483_v32 = vld [vmem:[#allocation146_spill] sm:$0xff]  ;;  %v17485_v49 = vld [vmem:[#allocation200_spill] sm:$0xff]  ;;  %v17486_v11 = vld [vmem:[#allocation151_spill] sm:$0xff] }
 0x4ba   :  { %v900_v2 = vadd.f32 %v17480_v47, %v800_v5  ;;  %v803_v9 = vadd.f32 %v17481_v10, %v703_v46  ;;  %v2455_v12 = vmul.f32 %v2442_v35, %v11080_v14  ;;  %v1581_v63 = vadd.f32 %v17485_v49, %v1482_v26  ;;  %v17487_v29 = vld [vmem:[#allocation119_spill] sm:$0xff]  ;;  %v17488_v43 = vld [vmem:[#allocation117_spill] sm:$0xff]  ;;  %v17489_v44 = vld [vmem:[#allocation198_spill] sm:$0xff] }
 0x4bb   :  { %v1183_v1 = vadd.f32 %v17483_v32, %v1084_v22  ;;  %v987_v18 = vadd.f32 %v17484_v58, %v893_v48  ;;  %2521 = vrot.lane.b32.xlu1 %v2494_v21, %s7479_s23  ;;  %v1189_v25 = vadd.f32 %v17486_v11, %v1090_v24  ;;  %v2372_v30 = vadd.f32 %v11464_v50, %v2273_v42  ;;  %v17490_v41 = vld [vmem:[#allocation164_spill] sm:$0xff]  ;;  %v17491_v27 = vld [vmem:[#allocation134_spill] sm:$0xff]  ;;  %v17494_v59 = vld [vmem:[#allocation127_spill] sm:$0xff] }
 0x4bc   :  { %v994_v37 = vadd.f32 %v17487_v29, %v900_v2  ;;  %v903_v62 = vadd.f32 %v17488_v43, %v803_v9  ;;  %v2177_v35 = vadd.f32 %v17489_v44, %v2078_v31  ;;  %v17492_v33 = vld [vmem:[#allocation172_spill] sm:$0xff]  ;;  %v11652_v5 = vadd.f32 %v11579_v23, %v2465_v38  ;;  %v17493_v16 = vld [vmem:[#allocation142_spill] sm:$0xff]  ;;  %v17495_v55 = vld [vmem:[#allocation203_spill] sm:$0xff] }
 0x4bd   :  { %v1282_v39 = vadd.f32 %v17490_v41, %v1183_v1  ;;  %v1086_v52 = vadd.f32 %v17491_v27, %v987_v18  ;;  %v1288_v26 = vadd.f32 %v17492_v33, %v1189_v25  ;;  %v1584_v48 = vadd.f32 %v17495_v55, %v1485_v45  ;;  %v17496_v34 = vld [vmem:[#allocation55_spill] sm:$0xff]  ;;  %v17498_v24 = vld [vmem:[#allocation157_spill] sm:$0xff]  ;;  %v17500_v9 = vld [vmem:[#allocation276_spill] sm:$0xff] }
 0x4be   :  { %v1093_v46 = vadd.f32 %v17493_v16, %v994_v37  ;;  %v997_v22 = vadd.f32 %v17494_v59, %v903_v62  ;;  %v2415_v50 = vsel %vm16342_vm10, %v17496_v34, %v11543_v15  ;;  %v17497_v31 = vld [vmem:[#allocation183_spill] sm:$0xff]  ;;  %v17501_v38 = vld [vmem:[#allocation154_spill] sm:$0xff]  ;;  %v17502_v1 = vld [vmem:[#allocation136_spill] sm:$0xff]  ;;  %v2468_v18 = vadd.f32 %v2455_v12, %v2372_v30 }
 0x4bf   :  { %v1381_v42 = vadd.f32 %v17497_v31, %v1282_v39  ;;  %v1185_v47 = vadd.f32 %v17498_v24, %v1086_v52  ;;  %v17499_v2 = vld [vmem:[#allocation219_spill] sm:$0xff]  ;;  %v1387_v51 = vadd.f32 %v17500_v9, %v1288_v26  ;;  %v2276_v49 = vadd.f32 %v11299_v54, %v2177_v35  ;;  %v17503_v45 = vld [vmem:[#allocation193_spill] sm:$0xff]  ;;  %v17505_v37 = vld [vmem:[#allocation194_spill] sm:$0xff] }
 0x4c0   :  { %v1680_v10 = vadd.f32 %v17499_v2, %v1581_v63  ;;  %v1192_v32 = vadd.f32 %v17501_v38, %v1093_v46  ;;  %v1096_v58 = vadd.f32 %v17502_v1, %v997_v22  ;;  %v17504_v25 = vld [vmem:[#allocation169_spill] sm:$0xff]  ;;  %v2497_v62 = vmax.f32 %v11652_v5, 0.0  ;;  %v17506_v44 = vld [vmem:[#allocation174_spill] sm:$0xff]  ;;  %v17510_v54 = vld [vmem:[#allocation192_spill] sm:$0xff] }
 0x4c1   :  { %v1477_v11 = vadd.f32 %v17503_v45, %v1381_v42  ;;  %v1284_v29 = vadd.f32 %v17504_v25, %v1185_v47  ;;  %v1483_v43 = vadd.f32 %v17505_v37, %v1387_v51  ;;  %v17507_v63 = vld [vmem:[#allocation153_spill] sm:$0xff]  ;;  %v17508_v27 = vperm.slane %v11417_v8, 0  ;;  %v17512_v46 = vld [vmem:[#allocation222_spill] sm:$0xff]  ;;  %v17515_v24 = vld [vmem:[#allocation228_spill] sm:$0xff] }
 0x4c2   :  { %v1291_v41 = vadd.f32 %v17506_v44, %v1192_v32  ;;  %v1195_v39 = vadd.f32 %v17507_v63, %v1096_v58  ;;  %v2445_v33 = vperm.slane %v2415_v50, 0  ;;  %v17509_v12 = vld [vmem:[#allocation209_spill] sm:$0xff]  ;;  %v1683_v59 = vadd.f32 %v17512_v46, %v1584_v48  ;;  %v17516_v47 = vld [vmem:[#allocation202_spill] sm:$0xff]  ;;  %v11693_v48 = vpop.permute.xlu2 %2396  ;;  %v17520_v1 = vld [vmem:[#allocation227_spill] sm:$0xff] }
 0x4c3   :  { %v2362_v52 = vmul.f32 %v17508_v27, %v11283_v56  ;;  %v1576_v30 = vadd.f32 %v17509_v12, %v1477_v11  ;;  %v1383_v35 = vadd.f32 %v17510_v54, %v1284_v29  ;;  %v17511_v26 = vld [vmem:[#allocation233_spill] sm:$0xff]  ;;  %2527 = vrot.lane.b32.xlu1 %v2497_v62, %s7479_s23  ;;  %v17521_v45 = vld [vmem:[#allocation196_spill] sm:$0xff]  ;;  %v11698_v25 = vadd.f32 %v11579_v23, %v2468_v18  ;;  %v17522_v37 = vld [vmem:[#allocation243_spill] sm:$0xff] }
 0x4c4   :  { %v1779_v16 = vadd.f32 %v17511_v26, %v1680_v10  ;;  %v17513_v22 = vld [vmem:[#allocation213_spill] sm:$0xff]  ;;  %v17519_v10 = vld [vmem:[#allocation170_spill] sm:$0xff]  ;;  %v2458_v29 = vmul.f32 %v2445_v33, %v11080_v14  ;;  %v17524_v63 = vld [vmem:[#allocation280_spill] sm:$0xff]  ;;  %v11711_v18 = vsel %vm16342_vm10, %v11693_v48, %v17496_v34 }
 0x4c5   :  { %v1582_v55 = vadd.f32 %v17513_v22, %v1483_v43  ;;  %v17514_v31 = vld [vmem:[#allocation277_spill] sm:$0xff]  ;;  %v1675_v8 = vadd.f32 %v17515_v24, %v1576_v30  ;;  %v1479_v50 = vadd.f32 %v17516_v47, %v1383_v35  ;;  %v1294_v38 = vadd.f32 %v17519_v10, %v1195_v39  ;;  %v17523_v44 = vld [vmem:[#allocation214_spill] sm:$0xff]  ;;  %v17526_v30 = vld [vmem:[#allocation236_spill] sm:$0xff] }
 0x4c6   :  { %v1390_v42 = vadd.f32 %v17514_v31, %v1291_v41  ;;  %v17517_v2 = vld [vmem:[#allocation149_spill] sm:$0xff]  ;;  %v2375_v32 = vadd.f32 %v2362_v52, %v2276_v49  ;;  %v1782_v54 = vadd.f32 %v17526_v30, %v1683_v59  ;;  %v17527_v49 = vld [vmem:[#allocation242_spill] sm:$0xff]  ;;  %v17529_v33 = vld [vmem:[#allocation287_spill] sm:$0xff] }
 0x4c7   :  { %v17518_v9 = vperm.slane %v17517_v2, 0  ;;  %v1681_v58 = vadd.f32 %v17520_v1, %v1582_v55  ;;  %v1774_v43 = vadd.f32 %v17522_v37, %v1675_v8  ;;  %v1578_v41 = vadd.f32 %v17523_v44, %v1479_v50  ;;  %v17525_v12 = vld [vmem:[#allocation245_spill] sm:$0xff]  ;;  %v17528_v35 = vld [vmem:[#allocation210_spill] sm:$0xff]  ;;  %v17531_v31 = vld [vmem:[#allocation199_spill] sm:$0xff] }
 0x4c8   :  { %v1486_v11 = vadd.f32 %v17521_v45, %v1390_v42  ;;  %v1393_v27 = vadd.f32 %v17524_v63, %v1294_v38  ;;  %v1878_v39 = vadd.f32 %v17525_v12, %v1779_v16  ;;  %v17530_v22 = vld [vmem:[#allocation225_spill] sm:$0xff]  ;;  %v2471_v24 = vadd.f32 %v2458_v29, %v2375_v32  ;;  %v17532_v8 = vld [vmem:[#allocation290_spill] sm:$0xff]  ;;  %v17533_v47 = vld [vmem:[#allocation231_spill] sm:$0xff] }
 0x4c9   :  { %v11690_v51 = vmul.f32 %v17518_v9, %v10777_v13  ;;  %v1780_v52 = vadd.f32 %v17527_v49, %v1681_v58  ;;  %v1873_v46 = vadd.f32 %v17529_v33, %v1774_v43  ;;  %v1677_v55 = vadd.f32 %v17530_v22, %v1578_v41  ;;  %v17534_v9 = vld [vmem:[#allocation289_spill] sm:$0xff]  ;;  %v17535_v10 = vld [vmem:[#allocation244_spill] sm:$0xff]  ;;  %v17536_v1 = vld [vmem:[#allocation215_spill] sm:$0xff] }
 0x4ca   :  { %v1585_v26 = vadd.f32 %v17528_v35, %v1486_v11  ;;  %v1489_v42 = vadd.f32 %v17531_v31, %v1393_v27  ;;  %v2500_v50 = vmax.f32 %v11698_v25, 0.0  ;;  %v2407_v2 = vsel %vm16342_vm10, %v11361_v36, %v11339_v57  ;;  %v17537_v45 = vld [vmem:[#allocation285_spill] sm:$0xff]  ;;  %v17539_v29 = vld [vmem:[#allocation295_spill] sm:$0xff]  ;;  %v17540_v44 = vld [vmem:[#allocation246_spill] sm:$0xff] }
 0x4cb   :  { %v1879_v16 = vadd.f32 %v17532_v8, %v1780_v52  ;;  %v1969_v34 = vadd.f32 %v17534_v9, %v1873_v46  ;;  %v1776_v38 = vadd.f32 %v17535_v10, %v1677_v55  ;;  %v1974_v11 = vadd.f32 %v17537_v45, %v1878_v39  ;;  %v17538_v37 = vld [vmem:[#allocation249_spill] sm:$0xff]  ;;  %v17541_v63 = vld [vmem:[#allocation116_spill] sm:$0xff]  ;;  %v17542_v36 = vld [vmem:[#allocation291_spill] sm:$0xff] }
 0x4cc   :  { %v1684_v59 = vadd.f32 %v17533_v47, %v1585_v26  ;;  %v1588_v58 = vadd.f32 %v17536_v1, %v1489_v42  ;;  %v1881_v32 = vadd.f32 %v17538_v37, %v1782_v54  ;;  %2533 = vrot.lane.b32.xlu1 %v2500_v50, %s7479_s23  ;;  %v17543_v12 = vld [vmem:[#allocation156_spill] sm:$0xff]  ;;  %v17545_v52 = vld [vmem:[#allocation230_spill] sm:$0xff]  ;;  %v2444_v54 = vperm.slane %v11711_v18, 0  ;;  %v17548_v31 = vld [vmem:[#allocation7_spill] sm:$0xff] }
 0x4cd   :  { %v1975_v43 = vadd.f32 %v17539_v29, %v1879_v16  ;;  %v2068_v57 = vadd.f32 %v17541_v63, %v1969_v34  ;;  %v1875_v27 = vadd.f32 %v17542_v36, %v1776_v38  ;;  %v17544_v30 = vperm.slane %v17543_v12, 0  ;;  %v17546_v35 = vld [vmem:[#allocation150_spill] sm:$0xff]  ;;  %v17547_v33 = vld [vmem:[#allocation292_spill] sm:$0xff] }
 0x4ce   :  { %v1783_v41 = vadd.f32 %v17540_v44, %v1684_v59  ;;  %v1687_v39 = vadd.f32 %v17545_v52, %v1588_v58  ;;  %v11742_v22 = vadd.f32 %v11579_v23, %v2471_v24  ;;  %v2437_v55 = vperm.slane %v2407_v2, 0  ;;  %v17549_v8 = vld [vmem:[#allocation72_spill] sm:$0xff]  ;;  %v17551_v9 = vld [vmem:[#allocation70_spill] sm:$0xff] }
 0x4cf   :  { %v2262_v49 = vmul.f32 %v17544_v30, %v10777_v13  ;;  %v2074_v26 = vadd.f32 %v17546_v35, %v1975_v43  ;;  %v2167_v42 = vadd.f32 %v17548_v31, %v2068_v57  ;;  %v1971_v16 = vadd.f32 %v17549_v8, %v1875_v27  ;;  %v17550_v47 = vld [vmem:[#allocation240_spill] sm:$0xff]  ;;  %v17554_v58 = vld [vmem:[#allocation50_spill] sm:$0xff]  ;;  %v17557_v43 = vld [vmem:[#allocation139_spill] sm:$0xff] }
 0x4d0   :  { %v1882_v46 = vadd.f32 %v17547_v33, %v1783_v41  ;;  %v1786_v59 = vadd.f32 %v17550_v47, %v1687_v39  ;;  %v2073_v34 = vadd.f32 %v17551_v9, %v1974_v11  ;;  %v17552_v10 = vld [vmem:[#allocation288_spill] sm:$0xff]  ;;  %v17555_v24 = vld [vmem:[#allocation182_spill] sm:$0xff]  ;;  %v17559_v11 = vld [vmem:[#allocation279_spill] sm:$0xff]  ;;  %v2503_v30 = vmax.f32 %v11742_v22, 0.0 }
 0x4d1   :  { %v1977_v38 = vadd.f32 %v17552_v10, %v1881_v32  ;;  %v17553_v1 = vld [vmem:[#allocation224_spill] sm:$0xff]  ;;  %v2266_v37 = vadd.f32 %v11401_v0, %v2167_v42  ;;  %v17556_v29 = vperm.slane %v17555_v24, 0  ;;  %v2070_v44 = vadd.f32 %v17557_v43, %v1971_v16  ;;  %v17558_v41 = vld [vmem:[#allocation294_spill] sm:$0xff]  ;;  %v17567_v9 = vld [vmem:[#allocation195_spill] sm:$0xff] }
 0x4d2   :  { %v2173_v18 = vadd.f32 %v17553_v1, %v2074_v26  ;;  %v1978_v45 = vadd.f32 %v17554_v58, %v1882_v46  ;;  %v1885_v63 = vadd.f32 %v17558_v41, %v1786_v59  ;;  %v17560_v36 = vperm.slane %v17559_v11, 0  ;;  %v17561_v27 = vld [vmem:[#allocation138_spill] sm:$0xff]  ;;  %v17563_v26 = vld [vmem:[#allocation296_spill] sm:$0xff]  ;;  %v17564_v46 = vld [vmem:[#allocation179_spill] sm:$0xff] }
 0x4d3   :  { %v2352_v2 = vmul.f32 %v17556_v29, %v11283_v56  ;;  %v17562_v0 = vperm.slane %v11370_v53, 0  ;;  %v2169_v35 = vadd.f32 %v11253_v4, %v2070_v44  ;;  %v2172_v31 = vadd.f32 %v17564_v46, %v2073_v34  ;;  %v17573_v43 = vld [vmem:[#allocation197_spill] sm:$0xff] }
 0x4d4   :  { %v2272_v57 = vadd.f32 %v11438_v7, %v2173_v18  ;;  %v2358_v32 = vmul.f32 %v17560_v36, %v11283_v56  ;;  %v2077_v12 = vadd.f32 %v17561_v27, %v1978_v45  ;;  %v1981_v33 = vadd.f32 %v17563_v26, %v1885_v63  ;;  %2539 = vrot.lane.b32.xlu1 %v2503_v30, %s7479_s23  ;;  %v17575_v36 = vld [vmem:[#allocation77_spill] sm:$0xff] }
 0x4d5   :  { %v2365_v52 = vadd.f32 %v2352_v2, %v2266_v37  ;;  %v2448_v39 = vmul.f32 %v17562_v0, %v11080_v14  ;;  %v17565_v42 = vperm.slane %v11424_v3, 0  ;;  %v2268_v53 = vadd.f32 %v11690_v51, %v2169_v35  ;;  %v17568_v3 = vld [vmem:[#allocation18_spill] sm:$0xff]  ;;  %v17572_v2 = vld [vmem:[#allocation229_spill] sm:$0xff] }
 0x4d6   :  { %v2371_v7 = vadd.f32 %v2358_v32, %v2272_v57  ;;  %v2176_v16 = vadd.f32 %v11258_v17, %v2077_v12  ;;  %v17566_v4 = vperm.slane %v11319_v60, 0  ;;  %v2080_v34 = vadd.f32 %v17567_v9, %v1981_v33  ;;  %v17570_v17 = vld [vmem:[#allocation166_spill] sm:$0xff]  ;;  %v17576_v12 = vld [vmem:[#allocation232_spill] sm:$0xff]  ;;  %v17577_v26 = vld [vmem:[#allocation297_spill] sm:$0xff] }
 0x4d7   :  { %v2454_v8 = vmul.f32 %v17565_v42, %v11080_v14  ;;  %v2461_v47 = vadd.f32 %v2448_v39, %v2365_v52  ;;  %v17569_v18 = vperm.slane %v17568_v3, 0  ;;  %v17571_v45 = vperm.slane %v17570_v17, 0  ;;  %v17574_v57 = vld [vmem:[#allocation10_spill] sm:$0xff]  ;;  %v17578_v33 = vld [vmem:[#allocation12_spill] sm:$0xff] }
 0x4d8   :  { %v2354_v59 = vmul.f32 %v17566_v4, %v11283_v56  ;;  %v2275_v1 = vadd.f32 %v2262_v49, %v2176_v16  ;;  %v2450_v24 = vmul.f32 %v2437_v55, %v11080_v14  ;;  %v2179_v60 = vadd.f32 %v17572_v2, %v2080_v34 }
 0x4d9   :  { %v2467_v10 = vadd.f32 %v2454_v8, %v2371_v7  ;;  %v2361_v58 = vmul.f32 %v17569_v18, %v11283_v56  ;;  %v2265_v37 = vmul.f32 %v17571_v45, %v10777_v13  ;;  %v2480_v51 = vadd.f32 %v11579_v23, %v2461_v47  ;;  %v17581_v8 = vld [vmem:[#allocation100_spill] sm:$0xff]  ;;  %v17584_v47 = vld [vmem:[#allocation161_spill] sm:$0xff] }
 0x4da   :  { %v2367_v29 = vadd.f32 %v2354_v59, %v2268_v53  ;;  %v2410_v44 = vsel %vm16342_vm10, %v11426_v20, %v17573_v43  ;;  %v2457_v63 = vmul.f32 %v2444_v54, %v11080_v14  ;;  %v2271_v11 = vadd.f32 %v17574_v57, %v2172_v31  ;;  %v17580_v54 = vld [vmem:[#allocation171_spill] sm:$0xff] }
 0x4db   :  { %v11794_v49 = vadd.f32 %v11579_v23, %v2467_v10  ;;  %v2374_v41 = vadd.f32 %v2361_v58, %v2275_v1  ;;  %v2076_v32 = vadd.f32 %v17575_v36, %v1977_v38  ;;  %v2493_v55 = vmax.f32 %v2480_v51, 0.0  ;;  %v17583_v38 = vld [vmem:[#allocation118_spill] sm:$0xff] }
 0x4dc   :  { %v2463_v27 = vadd.f32 %v2450_v24, %v2367_v29  ;;  %v2351_v52 = vperm.slane %v17576_v12, 0  ;;  %v2278_v35 = vadd.f32 %v2265_v37, %v2179_v60  ;;  %v2248_v20 = vperm.slane %v17577_v26, 0  ;;  %v17585_v10 = vld [vmem:[#allocation190_spill] sm:$0xff]  ;;  %v2403_v60 = vpop.permute.xlu2 %2402 }
 0x4dd   :  { %v2499_v0 = vmax.f32 %v11794_v49, 0.0  ;;  %v2470_v39 = vadd.f32 %v2457_v63, %v2374_v41  ;;  %v17579_v46 = vperm.slane %v17578_v33, 0  ;;  %v2440_v42 = vperm.slane %v2410_v44, 0  ;;  %2519 = vrot.lane.b32.xlu2 %v2493_v55, %s7479_s23  ;;  %2570 = vrot.lane.b32.xlu1 %v2493_v55, %s7480_s27  ;;  %s7549_s27 = smov 26  }
 0x4de   :  { %v17582_v31 = vperm.slane %v17581_v8, 0  ;;  %v2314_v53 = vsel %vm2305_vm12, %v17584_v47, %v17583_v38  ;;  %v2364_v4 = vmul.f32 %v2351_v52, %v11283_v56  ;;  %v2482_v34 = vadd.f32 %v11579_v23, %v2463_v27 }
 0x4df   :  { %v2357_v7 = vmul.f32 %v17579_v46, %v11283_v56  ;;  %2531 = vrot.lane.b32.xlu0 %v2499_v0, %s7479_s23  ;;  %v2447_v1 = vperm.slane %v17585_v10, 0  ;;  %v11820_v3 = vadd.f32 %v11579_v23, %v2470_v39  ;;  %v2347_v58 = vperm.slane %v2314_v53, 0 }
 0x4e0   :  { %v2162_v16 = vmul.f32 %v17582_v31, %v17580_v54  ;;  %v2377_v18 = vadd.f32 %v2364_v4, %v2278_v35  ;;  %v2453_v17 = vmul.f32 %v2440_v42, %v11080_v14  ;;  %v2261_v45 = vmul.f32 %v2248_v20, %v10777_v13 }
 0x4e1   :  { %v2370_v59 = vadd.f32 %v2357_v7, %v2271_v11  ;;  %v2413_v37 = vsel %vm16342_vm10, %v11483_v61, %v11693_v48  ;;  %v2460_v24 = vmul.f32 %v2447_v1, %v11080_v14  ;;  %v2495_v2 = vmax.f32 %v2482_v34, 0.0 }
 0x4e2   :  { %v2175_v9 = vadd.f32 %v2162_v16, %v2076_v32  ;;  %v2502_v43 = vmax.f32 %v11820_v3, 0.0  ;;  %v2360_v41 = vmul.f32 %v2347_v58, %v11283_v56  ;;  %v2443_v63 = vperm.slane %v2413_v37, 0 }
 0x4e3   :  { %v2466_v51 = vadd.f32 %v2453_v17, %v2370_v59  ;;  %v2473_v44 = vadd.f32 %v2460_v24, %v2377_v18  ;;  %v2416_v61 = vsel %vm16342_vm10, %v11543_v15, %v2403_v60  ;;  %vm16343_vm12 = vcmask 64512  }
 0x4e4   :  { %v2274_v29 = vadd.f32 %v2261_v45, %v2175_v9  ;;  %v2456_v11 = vmul.f32 %v2443_v63, %v11080_v14  ;;  %v2430_v56 = vsel %vm16339_vm15, %v2416_v61, %v17585_v10  ;;  %vm3802_vm15 = vcmask 687104  }
 0x4e5   :  { %2523 = vrot.lane.b32.xlu2 %v2495_v2, %s7479_s23  ;;  %v2485_v48 = vadd.f32 %v11579_v23, %v2466_v51  ;;  %v11838_v57 = vadd.f32 %v11579_v23, %v2473_v44  ;;  %v2446_v12 = vperm.slane %v2430_v56, 0 }
 0x4e6   :  { %v2373_v13 = vadd.f32 %v2360_v41, %v2274_v29 }
 0x4e7   :  { %2537 = vrot.lane.b32.xlu0 %v2502_v43, %s7479_s23  ;;  %v2498_v32 = vmax.f32 %v2485_v48, 0.0  ;;  %v2505_v27 = vmax.f32 %v11838_v57, 0.0  ;;  %v2459_v52 = vmul.f32 %v2446_v12, %v11080_v14 }
 0x4e8   :  { %v2469_v36 = vadd.f32 %v2456_v11, %v2373_v13 }
 0x4e9   :  { %v2472_v39 = vadd.f32 %v2459_v52, %v11545_v28 }
 0x4ea   :  { %v2488_v15 = vadd.f32 %v11579_v23, %v2469_v36 }
 0x4eb   :  { %v2491_v26 = vadd.f32 %v11579_v23, %v2472_v39 }
 0x4ec   :  { %v2501_v35 = vmax.f32 %v2488_v15, 0.0 }
 0x4ed   :  { %2529 = vrot.lane.b32.xlu2 %v2498_v32, %s7479_s23  ;;  %v2504_v20 = vmax.f32 %v2491_v26, 0.0 }
 0x4ef   :  { %2543 = vrot.lane.b32.xlu0 %v2505_v27, %s7479_s23 }
 0x4f5   :  { %2535 = vrot.lane.b32.xlu2 %v2501_v35, %s7479_s23 }
 0x4fd   :  { %2541 = vrot.lane.b32.xlu2 %v2504_v20, %s7479_s23  ;;  %s16348_s23 = smov 120  }
 0x528   :  { %v2526_v8 = vpop.permute.xlu0 %2525 }
 0x52d   :  { %v2522_v33 = vpop.permute.xlu1 %2521 }
 0x535   :  { %v2528_v54 = vpop.permute.xlu1 %2527 }
 0x536   :  { %v2548_v14 = vsel %vm130_vm0, %v2526_v8, %v2528_v54 }
 0x537   :  { %v2520_v46 = vpop.permute.xlu2 %2519  ;;  %v2577_v23 = vmax.f32 %v2496_v40, %v2548_v14 }
 0x538   :  { %v2545_v7 = vsel %vm130_vm0, %v2520_v46, %v2522_v33 }
 0x539   :  { %v2574_v42 = vmax.f32 %v2493_v55, %v2545_v7 }
 0x53b   :  { %2600 = vrot.lane.b32.xlu2 %v2574_v42, %s16333_s16 }
 0x53e   :  { %v2534_v59 = vpop.permute.xlu1 %2533 }
 0x53f   :  { %v2524_v28 = vpop.permute.xlu2 %2523 }
 0x540   :  { %v2547_v31 = vsel %vm130_vm0, %v2524_v28, %v2526_v8  ;;  %v2546_v16 = vsel %vm130_vm0, %v2522_v33, %v2524_v28 }
 0x541   :  { %v2576_v38 = vmax.f32 %v2495_v2, %v2547_v31  ;;  %v2575_v47 = vmax.f32 %v2494_v21, %v2546_v16 }
 0x543   :  { %2604 = vrot.lane.b32.xlu1 %v2576_v38, %s16333_s16  ;;  %2602 = vrot.lane.b32.xlu0 %v2575_v47, %s16333_s16 }
 0x544   :  { %2606 = vrot.lane.b32.xlu2 %v2577_v23, %s16333_s16 }
 0x547   :  { %v2530_v55 = vpop.permute.xlu2 %2529 }
 0x548   :  { %v2549_v53 = vsel %vm130_vm0, %v2528_v54, %v2530_v55 }
 0x549   :  { %v11867_v4 = vmax.f32 %v2497_v62, %v2549_v53  ;;  %v2540_v62 = vpop.permute.xlu1 %2539 }
 0x54b   :  { %2608 = vrot.lane.b32.xlu0 %v11867_v4, %s16333_s16 }
 0x54f   :  { %v2536_v19 = vpop.permute.xlu2 %2535 }
 0x550   :  { %v2552_v6 = vsel %vm130_vm0, %v2534_v59, %v2536_v19 }
 0x551   :  { %v2532_v40 = vpop.permute.xlu0 %2531  ;;  %v11876_v34 = vmax.f32 %v2500_v50, %v2552_v6  ;;  %v2571_v45 = vpop.permute.xlu1 %2570 }
 0x552   :  { %v2550_v21 = vsel %vm130_vm0, %v2530_v55, %v2532_v40  ;;  %v2551_v9 = vsel %vm130_vm0, %v2532_v40, %v2534_v59 }
 0x553   :  { %v2579_v10 = vmax.f32 %v2498_v32, %v2550_v21  ;;  %v2580_v5 = vmax.f32 %v2499_v0, %v2551_v9  ;;  %2614 = vrot.lane.b32.xlu0 %v11876_v34, %s16333_s16 }
 0x555   :  { %2610 = vrot.lane.b32.xlu1 %v2579_v10, %s16333_s16  ;;  %2612 = vrot.lane.b32.xlu2 %v2580_v5, %s16333_s16 }
 0x557   :  { %v2542_v1 = vpop.permute.xlu2 %2541 }
 0x558   :  { %v2555_v58 = vsel %vm130_vm0, %v2540_v62, %v2542_v1 }
 0x559   :  { %v2538_v18 = vpop.permute.xlu0 %2537  ;;  %v11889_v49 = vmax.f32 %v2503_v30, %v2555_v58 }
 0x55a   :  { %v2553_v25 = vsel %vm130_vm0, %v2536_v19, %v2538_v18  ;;  %v2554_v50 = vsel %vm130_vm0, %v2538_v18, %v2540_v62 }
 0x55b   :  { %v2582_v0 = vmax.f32 %v2501_v35, %v2553_v25  ;;  %v2583_v17 = vmax.f32 %v2502_v43, %v2554_v50  ;;  %2620 = vrot.lane.b32.xlu0 %v11889_v49, %s16333_s16 }
 0x55d   :  { %2616 = vrot.lane.b32.xlu1 %v2582_v0, %s16333_s16  ;;  %2618 = vrot.lane.b32.xlu2 %v2583_v17, %s16333_s16 }
 0x561   :  { %v2544_v37 = vpop.permute.xlu0 %2543 }
 0x562   :  { %v2556_v24 = vsel %vm130_vm0, %v2542_v1, %v2544_v37  ;;  %v2573_v51 = vsel %vm159_vm1, %v2544_v37, %v2571_v45  ;;  %vm16341_vm0 = vcmask 261120   ;;  %vm2857_vm1 = vcmask 998400  }
 0x563   :  { %v11899_v22 = vmax.f32 %v2504_v20, %v2556_v24  ;;  %v2586_v30 = vmax.f32 %v2505_v27, %v2573_v51  ;;  %2651 = vrot.lane.b32.xlu0 %v2574_v42, %s7492_s17  ;;  %s7551_s17 = smov 88  }
 0x565   :  { %2622 = vrot.lane.b32.xlu1 %v11899_v22, %s16333_s16  ;;  %2624 = vrot.lane.b32.xlu2 %v2586_v30, %s16333_s16  ;;  %s7557_s16 = smov 84  }
 0x595   :  { %v2601_v3 = vpop.permute.xlu2 %2600 }
 0x59e   :  { %v2607_v29 = vpop.permute.xlu2 %2606 }
 0x5af   :  { %v2613_v56 = vpop.permute.xlu2 %2612 }
 0x5b5   :  { %v2605_v2 = vpop.permute.xlu1 %2604  ;;  %v2603_v60 = vpop.permute.xlu0 %2602 }
 0x5b6   :  { %v2628_v43 = vsel %vm16338_vm8, %v2605_v2, %v2607_v29  ;;  %v2626_v44 = vsel %vm16338_vm8, %v2601_v3, %v2603_v60  ;;  %v2627_v41 = vsel %vm16338_vm8, %v2603_v60, %v2605_v2 }
 0x5b7   :  { %v11908_v63 = vmax.f32 %v2576_v38, %v2628_v43  ;;  %v11910_v13 = vmax.f32 %v2574_v42, %v2626_v44  ;;  %v11912_v61 = vmax.f32 %v2575_v47, %v2627_v41  ;;  %v2619_v26 = vpop.permute.xlu2 %2618 }
 0x5b9   :  { %2670 = vst [vmem:[#allocation2 + $0x10] sm:$0xff] %v11908_v63  ;;  %2697 = vrot.lane.b32.xlu2 %v11912_v61, %s16331_s28  ;;  %2695 = vrot.lane.b32.xlu1 %v11910_v13, %s16331_s28 }
 0x5ba   :  { %2668 = vst [vmem:[#allocation2] sm:$0xff] %v11910_v13  ;;  %2699 = vrot.lane.b32.xlu0 %v11908_v63, %s16331_s28 }
 0x5bb   :  { %2669 = vst [vmem:[#allocation2 + $0x8] sm:$0xff] %v11912_v61 }
 0x5bd   :  { %v2609_v48 = vpop.permute.xlu0 %2608 }
 0x5be   :  { %v2629_v57 = vsel %vm16338_vm8, %v2607_v29, %v2609_v48 }
 0x5bf   :  { %v11924_v11 = vmax.f32 %v2577_v23, %v2629_v57  ;;  %v2625_v28 = vpop.permute.xlu2 %2624 }
 0x5c1   :  { %2671 = vst [vmem:[#allocation2 + $0x18] sm:$0xff] %v11924_v11  ;;  %2701 = vrot.lane.b32.xlu1 %v11924_v11, %s16331_s28 }
 0x5c5   :  { %v2615_v36 = vpop.permute.xlu0 %2614 }
 0x5c6   :  { %v2632_v27 = vsel %vm16338_vm8, %v2613_v56, %v2615_v36 }
 0x5c7   :  { %v2611_v32 = vpop.permute.xlu1 %2610  ;;  %v11932_v52 = vmax.f32 %v2580_v5, %v2632_v27 }
 0x5c8   :  { %v2631_v12 = vsel %vm16338_vm8, %v2611_v32, %v2613_v56  ;;  %v2630_v15 = vsel %vm16338_vm8, %v2609_v48, %v2611_v32 }
 0x5c9   :  { %v11934_v39 = vmax.f32 %v2579_v10, %v2631_v12  ;;  %v11937_v35 = vmax.f32 %v11867_v4, %v2630_v15  ;;  %2674 = vst [vmem:[#allocation2 + $0x30] sm:$0xff] %v11932_v52  ;;  %2707 = vrot.lane.b32.xlu1 %v11932_v52, %s16331_s28 }
 0x5cb   :  { %2673 = vst [vmem:[#allocation2 + $0x28] sm:$0xff] %v11934_v39  ;;  %2703 = vrot.lane.b32.xlu2 %v11937_v35, %s16331_s28  ;;  %2705 = vrot.lane.b32.xlu0 %v11934_v39, %s16331_s28 }
 0x5cc   :  { %2672 = vst [vmem:[#allocation2 + $0x20] sm:$0xff] %v11937_v35 }
 0x5cd   :  { %v2621_v20 = vpop.permute.xlu0 %2620 }
 0x5ce   :  { %v2635_v46 = vsel %vm16338_vm8, %v2619_v26, %v2621_v20 }
 0x5cf   :  { %v2617_v33 = vpop.permute.xlu1 %2616  ;;  %v2664_v54 = vmax.f32 %v2583_v17, %v2635_v46 }
 0x5d0   :  { %v2634_v7 = vsel %vm16338_vm8, %v2617_v33, %v2619_v26  ;;  %v2633_v42 = vsel %vm16338_vm8, %v2615_v36, %v2617_v33 }
 0x5d1   :  { %v2663_v8 = vmax.f32 %v2582_v0, %v2634_v7  ;;  %v11952_v14 = vmax.f32 %v11876_v34, %v2633_v42  ;;  %2677 = vst [vmem:[#allocation2 + $0x48] sm:$0xff] %v2664_v54  ;;  %2713 = vrot.lane.b32.xlu1 %v2664_v54, %s16331_s28 }
 0x5d3   :  { %2676 = vst [vmem:[#allocation2 + $0x40] sm:$0xff] %v2663_v8  ;;  %2709 = vrot.lane.b32.xlu2 %v11952_v14, %s16331_s28  ;;  %2711 = vrot.lane.b32.xlu0 %v2663_v8, %s16331_s28 }
 0x5d4   :  { %2675 = vst [vmem:[#allocation2 + $0x38] sm:$0xff] %v11952_v14 }
 0x5d5   :  { %v2652_v31 = vpop.permute.xlu0 %2651 }
 0x5d6   :  { %v2654_v23 = vsel %vm559_vm9, %v2625_v28, %v2652_v31  ;;  %vm16358_vm9 = vcmask 195584  }
 0x5d7   :  { %v2623_v16 = vpop.permute.xlu1 %2622  ;;  %v11962_v55 = vmax.f32 %v2586_v30, %v2654_v23 }
 0x5d8   :  { %v2637_v38 = vsel %vm16338_vm8, %v2623_v16, %v2625_v28  ;;  %v2636_v47 = vsel %vm16338_vm8, %v2621_v20, %v2623_v16  ;;  %vm3872_vm8 = vcmask 670720  }
 0x5d9   :  { %v2666_v53 = vmax.f32 %v11899_v22, %v2637_v38  ;;  %v2665_v4 = vmax.f32 %v11889_v49, %v2636_v47  ;;  %2719 = vrot.lane.b32.xlu1 %v11962_v55, %s16331_s28  ;;  %2681 = vst.msk [vmem:[#allocation2 + $0x60] sm:$0xff] %vm16341_vm0, %v11962_v55 }
 0x5db   :  { %2679 = vst [vmem:[#allocation2 + $0x58] sm:$0xff] %v2666_v53  ;;  %2715 = vrot.lane.b32.xlu2 %v2665_v4, %s16331_s28  ;;  %2717 = vrot.lane.b32.xlu0 %v2666_v53, %s16331_s28  ;;  %s7556_s28 = smov 82  }
 0x5dc   :  { %2678 = vst [vmem:[#allocation2 + $0x50] sm:$0xff] %v2665_v4 }
 0x5e1   :  { %2765 = vrot.lane.b32.xlu1 %v11912_v61, %s7487_s14 }
 0x5e3   :  { %2746 = vrot.lane.b32.xlu2 %v11910_v13, %s7483_s29  ;;  %2763 = vrot.lane.b32.xlu0 %v11910_v13, %s7487_s14 }
 0x5e9   :  { %2771 = vrot.lane.b32.xlu1 %v11937_v35, %s7487_s14 }
 0x5eb   :  { %2767 = vrot.lane.b32.xlu2 %v11908_v63, %s7487_s14  ;;  %2769 = vrot.lane.b32.xlu0 %v11924_v11, %s7487_s14 }
 0x5f1   :  { %2777 = vrot.lane.b32.xlu1 %v11952_v14, %s7487_s14 }
 0x5f3   :  { %2773 = vrot.lane.b32.xlu2 %v11934_v39, %s7487_s14  ;;  %2775 = vrot.lane.b32.xlu0 %v11932_v52, %s7487_s14 }
 0x5f9   :  { %2783 = vrot.lane.b32.xlu1 %v2665_v4, %s7487_s14 }
 0x5fb   :  { %2779 = vrot.lane.b32.xlu2 %v2663_v8, %s7487_s14  ;;  %2781 = vrot.lane.b32.xlu0 %v2664_v54, %s7487_s14 }
 0x601   :  { %2814 = vrot.lane.b32.xlu1 %v11910_v13, %s7489_s15 }
 0x603   :  { %2785 = vrot.lane.b32.xlu2 %v2666_v53, %s7487_s14  ;;  %2787 = vrot.lane.b32.xlu0 %v11962_v55, %s7487_s14  ;;  %s16346_s14 = smov 24  }
 0x609   :  { %2835 = vrot.lane.b32.xlu1 %v11908_v63, %s7547_s2 }
 0x60b   :  { %2831 = vrot.lane.b32.xlu2 %v11910_v13, %s7547_s2  ;;  %2833 = vrot.lane.b32.xlu0 %v11912_v61, %s7547_s2 }
 0x611   :  { %2841 = vrot.lane.b32.xlu1 %v11934_v39, %s7547_s2 }
 0x613   :  { %2837 = vrot.lane.b32.xlu2 %v11924_v11, %s7547_s2  ;;  %2839 = vrot.lane.b32.xlu0 %v11937_v35, %s7547_s2  ;;  %v2698_v59 = vpop.permute.xlu2 %2697 }
 0x619   :  { %2847 = vrot.lane.b32.xlu1 %v2663_v8, %s7547_s2 }
 0x61b   :  { %2843 = vrot.lane.b32.xlu2 %v11932_v52, %s7547_s2  ;;  %2845 = vrot.lane.b32.xlu0 %v11952_v14, %s7547_s2 }
 0x621   :  { %2853 = vrot.lane.b32.xlu1 %v2666_v53, %s7547_s2 }
 0x623   :  { %2849 = vrot.lane.b32.xlu2 %v2664_v54, %s7547_s2  ;;  %2851 = vrot.lane.b32.xlu0 %v2665_v4, %s7547_s2 }
 0x625   :  { %v2704_v19 = vpop.permute.xlu2 %2703 }
 0x629   :  { %2901 = vrot.lane.b32.xlu1 %v11910_v13, %s16348_s23 }
 0x62b   :  { %2855 = vrot.lane.b32.xlu2 %v11962_v55, %s7547_s2  ;;  %2883 = vrot.lane.b32.xlu0 %v11910_v13, %s7549_s27  ;;  %v2696_v40 = vpop.permute.xlu1 %2695  ;;  %s16356_s2 = smov 80  }
 0x62c   :  { %v2721_v21 = vsel %vm16337_vm2, %v2696_v40, %v2698_v59  ;;  %v2700_v9 = vpop.permute.xlu0 %2699 }
 0x62d   :  { %v2710_v6 = vpop.permute.xlu2 %2709  ;;  %2750 = vst [vmem:[#allocation2 + $0x68] sm:$0xff] %v2721_v21  ;;  %v2722_v34 = vsel %vm16337_vm2, %v2698_v59, %v2700_v9 }
 0x62e   :  { %2751 = vst [vmem:[#allocation2 + $0x70] sm:$0xff] %v2722_v34 }
 0x631   :  { %4190 = vrot.lane.b32.xlu1 %v11908_v63, %s7549_s27 }
 0x633   :  { %4259 = vrot.lane.b32.xlu2 %v11908_v63, %s16346_s14  ;;  %4261 = vrot.lane.b32.xlu0 %v11924_v11, %s16346_s14  ;;  %v2702_v10 = vpop.permute.xlu1 %2701 }
 0x634   :  { %v2723_v62 = vsel %vm16337_vm2, %v2700_v9, %v2702_v10  ;;  %v2724_v1 = vsel %vm16337_vm2, %v2702_v10, %v2704_v19 }
 0x635   :  { %v2716_v5 = vpop.permute.xlu2 %2715  ;;  %2752 = vst [vmem:[#allocation2 + $0x78] sm:$0xff] %v2723_v62 }
 0x636   :  { %2753 = vst [vmem:[#allocation2 + $0x80] sm:$0xff] %v2724_v1 }
 0x639   :  { %3649 = vrot.lane.b32.xlu1 %v11924_v11, %s7551_s17 }
 0x63b   :  { %4192 = vrot.lane.b32.xlu2 %v11924_v11, %s7549_s27  ;;  %3647 = vrot.lane.b32.xlu0 %v11908_v63, %s7551_s17  ;;  %v2708_v18 = vpop.permute.xlu1 %2707 }
 0x63c   :  { %v2727_v50 = vsel %vm16337_vm2, %v2708_v18, %v2710_v6 }
 0x63d   :  { %v2706_v58 = vpop.permute.xlu0 %2705  ;;  %v2747_v25 = vpop.permute.xlu2 %2746  ;;  %2756 = vst [vmem:[#allocation2 + $0x98] sm:$0xff] %v2727_v50 }
 0x63e   :  { %v2725_v49 = vsel %vm16337_vm2, %v2704_v19, %v2706_v58  ;;  %v2726_v0 = vsel %vm16337_vm2, %v2706_v58, %v2708_v18 }
 0x63f   :  { %2754 = vst [vmem:[#allocation2 + $0x88] sm:$0xff] %v2725_v49 }
 0x640   :  { %2755 = vst [vmem:[#allocation2 + $0x90] sm:$0xff] %v2726_v0 }
 0x641   :  { %3579 = vrot.lane.b32.xlu1 %v11912_v61, %s16354_s19 }
 0x643   :  { %4121 = vrot.lane.b32.xlu2 %v11908_v63, %s7489_s15  ;;  %4123 = vrot.lane.b32.xlu0 %v11924_v11, %s7489_s15  ;;  %v2714_v17 = vpop.permute.xlu1 %2713 }
 0x644   :  { %v2730_v24 = vsel %vm16337_vm2, %v2714_v17, %v2716_v5 }
 0x645   :  { %v2712_v45 = vpop.permute.xlu0 %2711  ;;  %v2768_v37 = vpop.permute.xlu2 %2767  ;;  %2759 = vst [vmem:[#allocation2 + $0xb0] sm:$0xff] %v2730_v24 }
 0x646   :  { %v2728_v51 = vsel %vm16337_vm2, %v2710_v6, %v2712_v45  ;;  %v2729_v22 = vsel %vm16337_vm2, %v2712_v45, %v2714_v17 }
 0x647   :  { %2757 = vst [vmem:[#allocation2 + $0xa0] sm:$0xff] %v2728_v51 }
 0x648   :  { %2758 = vst [vmem:[#allocation2 + $0xa8] sm:$0xff] %v2729_v22 }
 0x649   :  { %4054 = vrot.lane.b32.xlu1 %v11924_v11, %s7483_s29 }
 0x64b   :  { %3581 = vrot.lane.b32.xlu2 %v11908_v63, %s16354_s19  ;;  %4052 = vrot.lane.b32.xlu0 %v11908_v63, %s7483_s29  ;;  %v2720_v30 = vpop.permute.xlu1 %2719 }
 0x64c   :  { %v2749_v2 = vsel %vm16340_vm3, %v2720_v30, %v2747_v25 }
 0x64d   :  { %v2718_v3 = vpop.permute.xlu0 %2717  ;;  %v2774_v29 = vpop.permute.xlu2 %2773  ;;  %2762 = vst.msk [vmem:[#allocation2 + $0xc8] sm:$0xff] %vm16341_vm0, %v2749_v2 }
 0x64e   :  { %v2731_v60 = vsel %vm16337_vm2, %v2716_v5, %v2718_v3  ;;  %v2732_v43 = vsel %vm16337_vm2, %v2718_v3, %v2720_v30  ;;  %vm3942_vm2 = vcmask 654336  }
 0x64f   :  { %2760 = vst [vmem:[#allocation2 + $0xb8] sm:$0xff] %v2731_v60 }
 0x650   :  { %2761 = vst [vmem:[#allocation2 + $0xc0] sm:$0xff] %v2732_v43 }
 0x651   :  { %3645 = vrot.lane.b32.xlu1 %v11912_v61, %s7551_s17 }
 0x653   :  { %3511 = vrot.lane.b32.xlu2 %v11912_v61, %s7553_s1  ;;  %3513 = vrot.lane.b32.xlu0 %v11908_v63, %s7553_s1  ;;  %v2766_v44 = vpop.permute.xlu1 %2765 }
 0x654   :  { %v2790_v57 = vsel %vm430_vm6, %v2766_v44, %v2768_v37 }
 0x655   :  { %v2764_v41 = vpop.permute.xlu0 %2763  ;;  %v2780_v48 = vpop.permute.xlu2 %2779  ;;  %2819 = vst [vmem:[#allocation2 + $0xd8] sm:$0xff] %v2790_v57 }
 0x656   :  { %v2789_v56 = vsel %vm430_vm6, %v2764_v41, %v2766_v44 }
 0x657   :  { %2818 = vst [vmem:[#allocation2 + $0xd0] sm:$0xff] %v2789_v56 }
 0x659   :  { %4257 = vrot.lane.b32.xlu1 %v11912_v61, %s16346_s14 }
 0x65b   :  { %3990 = vrot.lane.b32.xlu2 %v11908_v63, %s16351_s20  ;;  %3992 = vrot.lane.b32.xlu0 %v11924_v11, %s16351_s20  ;;  %v2772_v36 = vpop.permute.xlu1 %2771 }
 0x65c   :  { %v2793_v12 = vsel %vm430_vm6, %v2772_v36, %v2774_v29 }
 0x65d   :  { %v2770_v32 = vpop.permute.xlu0 %2769  ;;  %v2786_v27 = vpop.permute.xlu2 %2785  ;;  %2822 = vst [vmem:[#allocation2 + $0xf0] sm:$0xff] %v2793_v12 }
 0x65e   :  { %v2791_v15 = vsel %vm430_vm6, %v2768_v37, %v2770_v32  ;;  %v2792_v26 = vsel %vm430_vm6, %v2770_v32, %v2772_v36 }
 0x65f   :  { %2820 = vst [vmem:[#allocation2 + $0xe0] sm:$0xff] %v2791_v15 }
 0x660   :  { %2821 = vst [vmem:[#allocation2 + $0xe8] sm:$0xff] %v2792_v26 }
 0x661   :  { %3577 = vrot.lane.b32.xlu1 %v11910_v13, %s16354_s19 }
 0x663   :  { %3444 = vrot.lane.b32.xlu2 %v11912_v61, %s7544_s26  ;;  %3446 = vrot.lane.b32.xlu0 %v11908_v63, %s7544_s26  ;;  %v2778_v20 = vpop.permute.xlu1 %2777 }
 0x664   :  { %v2796_v7 = vsel %vm430_vm6, %v2778_v20, %v2780_v48 }
 0x665   :  { %v2776_v33 = vpop.permute.xlu0 %2775  ;;  %v2832_v46 = vpop.permute.xlu2 %2831  ;;  %2825 = vst [vmem:[#allocation2 + $0x108] sm:$0xff] %v2796_v7 }
 0x666   :  { %v2794_v42 = vsel %vm430_vm6, %v2774_v29, %v2776_v33  ;;  %v2795_v54 = vsel %vm430_vm6, %v2776_v33, %v2778_v20 }
 0x667   :  { %2823 = vst [vmem:[#allocation2 + $0xf8] sm:$0xff] %v2794_v42 }
 0x668   :  { %2824 = vst [vmem:[#allocation2 + $0x100] sm:$0xff] %v2795_v54 }
 0x669   :  { %3922 = vrot.lane.b32.xlu1 %v11924_v11, %s16356_s2 }
 0x66b   :  { %3651 = vrot.lane.b32.xlu2 %v11937_v35, %s7551_s17  ;;  %3920 = vrot.lane.b32.xlu0 %v11908_v63, %s16356_s2  ;;  %v2784_v8 = vpop.permute.xlu1 %2783 }
 0x66c   :  { %v2799_v16 = vsel %vm430_vm6, %v2784_v8, %v2786_v27 }
 0x66d   :  { %v2782_v28 = vpop.permute.xlu0 %2781  ;;  %v2838_v31 = vpop.permute.xlu2 %2837  ;;  %2828 = vst [vmem:[#allocation2 + $0x120] sm:$0xff] %v2799_v16 }
 0x66e   :  { %v2797_v23 = vsel %vm430_vm6, %v2780_v48, %v2782_v28  ;;  %v2798_v38 = vsel %vm430_vm6, %v2782_v28, %v2784_v8 }
 0x66f   :  { %2826 = vst [vmem:[#allocation2 + $0x110] sm:$0xff] %v2797_v23 }
 0x670   :  { %2827 = vst [vmem:[#allocation2 + $0x118] sm:$0xff] %v2798_v38 }
 0x671   :  { %3379 = vrot.lane.b32.xlu1 %v11908_v63, %s7537_s25 }
 0x673   :  { %4188 = vrot.lane.b32.xlu2 %v11912_v61, %s7549_s27  ;;  %3377 = vrot.lane.b32.xlu0 %v11912_v61, %s7537_s25  ;;  %v2815_v47 = vpop.permute.xlu1 %2814 }
 0x675   :  { %v2788_v53 = vpop.permute.xlu0 %2787  ;;  %v2844_v4 = vpop.permute.xlu2 %2843 }
 0x676   :  { %v2800_v59 = vsel %vm430_vm6, %v2786_v27, %v2788_v53  ;;  %v2817_v19 = vsel %vm16345_vm7, %v2788_v53, %v2815_v47  ;;  %vm2886_vm6 = vcmask 211968  }
 0x677   :  { %2829 = vst [vmem:[#allocation2 + $0x128] sm:$0xff] %v2800_v59 }
 0x678   :  { %2830 = vst.msk [vmem:[#allocation2 + $0x130] sm:$0xff] %vm16341_vm0, %v2817_v19 }
 0x679   :  { %3850 = vrot.lane.b32.xlu1 %v11908_v63, %s7556_s28 }
 0x67b   :  { %3509 = vrot.lane.b32.xlu2 %v11910_v13, %s7553_s1  ;;  %3583 = vrot.lane.b32.xlu0 %v11924_v11, %s16354_s19  ;;  %v2836_v40 = vpop.permute.xlu1 %2835 }
 0x67c   :  { %v2860_v9 = vsel %vm2857_vm1, %v2836_v40, %v2838_v31 }
 0x67d   :  { %v2834_v6 = vpop.permute.xlu0 %2833  ;;  %v2850_v21 = vpop.permute.xlu2 %2849  ;;  %2890 = vst [vmem:[#allocation2 + $0x148] sm:$0xff] %v2860_v9 }
 0x67e   :  { %v2858_v34 = vsel %vm2857_vm1, %v2832_v46, %v2834_v6  ;;  %v12102_v10 = vsel %vm2857_vm1, %v2834_v6, %v2836_v40 }
 0x67f   :  { %2888 = vst [vmem:[#allocation2 + $0x138] sm:$0xff] %v2858_v34 }
 0x681   :  { %3310 = vrot.lane.b32.xlu1 %v11912_v61, %s7532_s22 }
 0x683   :  { %3852 = vrot.lane.b32.xlu2 %v11924_v11, %s7556_s28  ;;  %4119 = vrot.lane.b32.xlu0 %v11912_v61, %s7489_s15  ;;  %v2842_v5 = vpop.permute.xlu1 %2841 }
 0x684   :  { %v2863_v18 = vsel %vm2857_vm1, %v2842_v5, %v2844_v4 }
 0x685   :  { %v2840_v62 = vpop.permute.xlu0 %2839  ;;  %v2856_v1 = vpop.permute.xlu2 %2855  ;;  %2893 = vst [vmem:[#allocation2 + $0x160] sm:$0xff] %v2863_v18 }
 0x686   :  { %v2861_v58 = vsel %vm2857_vm1, %v2838_v31, %v2840_v62  ;;  %v2862_v25 = vsel %vm2857_vm1, %v2840_v62, %v2842_v5 }
 0x687   :  { %2891 = vst [vmem:[#allocation2 + $0x150] sm:$0xff] %v2861_v58 }
 0x688   :  { %2892 = vst [vmem:[#allocation2 + $0x158] sm:$0xff] %v2862_v25 }
 0x689   :  { %3515 = vrot.lane.b32.xlu1 %v11924_v11, %s7553_s1 }
 0x68b   :  { %3312 = vrot.lane.b32.xlu2 %v11908_v63, %s7532_s22  ;;  %3442 = vrot.lane.b32.xlu0 %v11910_v13, %s7544_s26  ;;  %v2848_v50 = vpop.permute.xlu1 %2847 }
 0x68c   :  { %v2866_v17 = vsel %vm2857_vm1, %v2848_v50, %v2850_v21 }
 0x68d   :  { %v2846_v49 = vpop.permute.xlu0 %2845  ;;  %v12119_v0 = vpop.permute.xlu2 %4259  ;;  %2896 = vst [vmem:[#allocation2 + $0x178] sm:$0xff] %v2866_v17 }
 0x68e   :  { %v2864_v45 = vsel %vm2857_vm1, %v2844_v4, %v2846_v49  ;;  %v2865_v37 = vsel %vm2857_vm1, %v2846_v49, %v2848_v50 }
 0x68f   :  { %2894 = vst [vmem:[#allocation2 + $0x168] sm:$0xff] %v2864_v45 }
 0x690   :  { %2895 = vst [vmem:[#allocation2 + $0x170] sm:$0xff] %v2865_v37 }
 0x691   :  { %4050 = vrot.lane.b32.xlu1 %v11912_v61, %s7483_s29 }
 0x693   :  { %3780 = vrot.lane.b32.xlu2 %v11908_v63, %s7557_s16  ;;  %3782 = vrot.lane.b32.xlu0 %v11924_v11, %s7557_s16  ;;  %v2854_v24 = vpop.permute.xlu1 %2853 }
 0x694   :  { %v2869_v30 = vsel %vm2857_vm1, %v2854_v24, %v2856_v1 }
 0x695   :  { %v2852_v51 = vpop.permute.xlu0 %2851  ;;  %v12130_v22 = vpop.permute.xlu2 %4192  ;;  %2899 = vst [vmem:[#allocation2 + $0x190] sm:$0xff] %v2869_v30 }
 0x696   :  { %v2867_v3 = vsel %vm2857_vm1, %v2850_v21, %v2852_v51  ;;  %v2868_v29 = vsel %vm2857_vm1, %v2852_v51, %v2854_v24  ;;  %vm16344_vm1 = vcmask 80896  }
 0x697   :  { %2897 = vst [vmem:[#allocation2 + $0x180] sm:$0xff] %v2867_v3 }
 0x698   :  { %2898 = vst [vmem:[#allocation2 + $0x188] sm:$0xff] %v2868_v29 }
 0x699   :  { %3375 = vrot.lane.b32.xlu1 %v11910_v13, %s7537_s25 }
 0x69b   :  { %3242 = vrot.lane.b32.xlu2 %v11912_v61, %s7558_s30  ;;  %3244 = vrot.lane.b32.xlu0 %v11908_v63, %s7558_s30  ;;  %v12141_v2 = vpop.permute.xlu1 %2901 }
 0x69d   :  { %v2884_v60 = vpop.permute.xlu0 %2883  ;;  %v12143_v43 = vpop.permute.xlu2 %4121 }
 0x69e   :  { %v2887_v44 = vsel %vm2886_vm6, %v2856_v1, %v2884_v60 }
 0x69f   :  { %2900 = vst.msk [vmem:[#allocation2 + $0x198] sm:$0xff] %vm16341_vm0, %v2887_v44 }
 0x6a1   :  { %3712 = vrot.lane.b32.xlu1 %v11924_v11, %s7559_s13 }
 0x6a3   :  { %3448 = vrot.lane.b32.xlu2 %v11924_v11, %s7544_s26  ;;  %3710 = vrot.lane.b32.xlu0 %v11908_v63, %s7559_s13  ;;  %v4191_v41 = vpop.permute.xlu1 %4190 }
 0x6a4   :  { %v4213_v56 = vsel %vm2886_vm6, %v4191_v41, %v12130_v22 }
 0x6a5   :  { %v12153_v48 = vpop.permute.xlu0 %4261  ;;  %v12155_v57 = vpop.permute.xlu2 %3581 }
 0x6a6   :  { %v4282_v36 = vsel %vm16358_vm9, %v12119_v0, %v12153_v48 }
 0x6a7   :  { %4749 = vmatpush.msra.mxu3 %v4282_v36 }
 0x6a9   :  { %4750 = vmatpush.msra.mxu3 %v4213_v56  ;;  %3174 = vrot.lane.b32.xlu1 %v11912_v61, %s7560_s21 }
 0x6ab   :  { %3988 = vrot.lane.b32.xlu2 %v11912_v61, %s16351_s20  ;;  %4263 = vrot.lane.b32.xlu0 %v11937_v35, %s16346_s14  ;;  %v3650_v32 = vpop.permute.xlu1 %3649 }
 0x6ad   :  { %v3648_v27 = vpop.permute.xlu0 %3647  ;;  %v3512_v12 = vpop.permute.xlu2 %3511 }
 0x6ae   :  { %v3671_v15 = vsel %vm3669_vm5, %v3648_v27, %v3650_v32 }
 0x6af   :  { %4719 = vmatpush.msra.mxu2 %v3671_v15 }
 0x6b1   :  { %3381 = vrot.lane.b32.xlu1 %v11924_v11, %s7537_s25 }
 0x6b3   :  { %3176 = vrot.lane.b32.xlu2 %v11908_v63, %s7560_s21  ;;  %3308 = vrot.lane.b32.xlu0 %v11910_v13, %s7532_s22  ;;  %v3580_v26 = vpop.permute.xlu1 %3579 }
 0x6b4   :  { %v3605_v46 = vsel %vm16343_vm12, %v3580_v26, %v12155_v57 }
 0x6b5   :  { %v12175_v20 = vpop.permute.xlu0 %4123  ;;  %v12177_v33 = vpop.permute.xlu2 %3990  ;;  %4720 = vmatpush.msra.mxu2 %v3605_v46 }
 0x6b6   :  { %v4144_v7 = vsel %vm16345_vm7, %v12143_v43, %v12175_v20 }
 0x6b7   :  { %4751 = vmatpush.msra.mxu3 %v4144_v7 }
 0x6b9   :  { %3918 = vrot.lane.b32.xlu1 %v11912_v61, %s16356_s2 }
 0x6bb   :  { %3653 = vrot.lane.b32.xlu2 %v11934_v39, %s7551_s17  ;;  %3655 = vrot.lane.b32.xlu0 %v11932_v52, %s7551_s17  ;;  %v12190_v42 = vpop.permute.xlu1 %4054 }
 0x6bd   :  { %v12192_v54 = vpop.permute.xlu0 %4052  ;;  %v12194_v8 = vpop.permute.xlu2 %3444 }
 0x6be   :  { %v4075_v28 = vsel %vm16340_vm3, %v12192_v54, %v12190_v42 }
 0x6bf   :  { %4752 = vmatpush.msra.mxu3 %v4075_v28 }
 0x6c1   :  { %3109 = vrot.lane.b32.xlu1 %v11908_v63, %s7517_s24 }
 0x6c3   :  { %4194 = vrot.lane.b32.xlu2 %v11937_v35, %s7549_s27  ;;  %3107 = vrot.lane.b32.xlu0 %v11912_v61, %s7517_s24  ;;  %v3646_v52 = vpop.permute.xlu1 %3645 }
 0x6c4   :  { %v3670_v23 = vsel %vm3669_vm5, %v3646_v52, %v3648_v27 }
 0x6c5   :  { %v12205_v31 = vpop.permute.xlu0 %3513  ;;  %v12207_v16 = vpop.permute.xlu2 %3651  ;;  %4673 = vmatpush.msra.mxu0 %v3670_v23 }
 0x6c6   :  { %v3537_v38 = vsel %vm16344_vm1, %v3512_v12, %v12205_v31  ;;  %v12214_v47 = vsel %vm3669_vm5, %v3650_v32, %v12207_v16 }
 0x6c7   :  { %4721 = vmatpush.msra.mxu2 %v3537_v38 }
 0x6c9   :  { %3585 = vrot.lane.b32.xlu1 %v11937_v35, %s16354_s19 }
 0x6cb   :  { %3240 = vrot.lane.b32.xlu2 %v11910_v13, %s7558_s30  ;;  %3314 = vrot.lane.b32.xlu0 %v11924_v11, %s7532_s22  ;;  %v4258_v53 = vpop.permute.xlu1 %4257 }
 0x6cc   :  { %v4281_v19 = vsel %vm16358_vm9, %v4258_v53, %v12119_v0 }
 0x6cd   :  { %v12222_v4 = vpop.permute.xlu0 %3992  ;;  %v4189_v59 = vpop.permute.xlu2 %4188  ;;  %4703 = vmatpush.msra.mxu1 %v4281_v19 }
 0x6ce   :  { %v4013_v40 = vsel %vm16341_vm0, %v12177_v33, %v12222_v4  ;;  %v4212_v6 = vsel %vm2886_vm6, %v4189_v59, %v4191_v41 }
 0x6cf   :  { %4753 = vmatpush.msra.mxu3 %v4013_v40  ;;  %4704 = vmatpush.msra.mxu1 %v4212_v6 }
 0x6d1   :  { %4125 = vrot.lane.b32.xlu1 %v11937_v35, %s7489_s15 }
 0x6d3   :  { %3587 = vrot.lane.b32.xlu2 %v11934_v39, %s16354_s19  ;;  %3848 = vrot.lane.b32.xlu0 %v11912_v61, %s7556_s28  ;;  %v3578_v21 = vpop.permute.xlu1 %3577 }
 0x6d4   :  { %v3604_v5 = vsel %vm16343_vm12, %v3578_v21, %v3580_v26 }
 0x6d5   :  { %v3447_v9 = vpop.permute.xlu0 %3446  ;;  %v3510_v34 = vpop.permute.xlu2 %3509  ;;  %4674 = vmatpush.msra.mxu0 %v3604_v5 }
 0x6d6   :  { %v3469_v62 = vsel %vm16342_vm10, %v12194_v8, %v3447_v9  ;;  %v3536_v1 = vsel %vm16344_vm1, %v3510_v34, %v3512_v12 }
 0x6d7   :  { %4722 = vmatpush.msra.mxu2 %v3469_v62  ;;  %4675 = vmatpush.msra.mxu0 %v3536_v1 }
 0x6d9   :  { %3172 = vrot.lane.b32.xlu1 %v11910_v13, %s7560_s21 }
 0x6db   :  { %3040 = vrot.lane.b32.xlu2 %v11912_v61, %s7510_s18  ;;  %3042 = vrot.lane.b32.xlu0 %v11908_v63, %s7510_s18  ;;  %v12246_v18 = vpop.permute.xlu1 %3922 }
 0x6dd   :  { %v12248_v58 = vpop.permute.xlu0 %3920  ;;  %v12250_v25 = vpop.permute.xlu2 %3852 }
 0x6de   :  { %v3944_v50 = vsel %vm3942_vm2, %v12248_v58, %v12246_v18 }
 0x6df   :  { %4754 = vmatpush.msra.mxu3 %v3944_v50 }
 0x6e1   :  { %3519 = vrot.lane.b32.xlu1 %v11934_v39, %s7553_s1 }
 0x6e3   :  { %3246 = vrot.lane.b32.xlu2 %v11924_v11, %s7558_s30  ;;  %3517 = vrot.lane.b32.xlu0 %v11937_v35, %s7553_s1  ;;  %v12261_v49 = vpop.permute.xlu1 %3379 }
 0x6e5   :  { %v3378_v0 = vpop.permute.xlu0 %3377  ;;  %v12263_v17 = vpop.permute.xlu2 %3312 }
 0x6e6   :  { %v3402_v45 = vsel %vm2206_vm11, %v3378_v0, %v12261_v49 }
 0x6e7   :  { %4723 = vmatpush.msra.mxu2 %v3402_v45 }
 0x6e9   :  { %2973 = vrot.lane.b32.xlu1 %v11912_v61, %s7504_s0 }
 0x6eb   :  { %3778 = vrot.lane.b32.xlu2 %v11912_v61, %s7557_s16  ;;  %4056 = vrot.lane.b32.xlu0 %v11937_v35, %s7483_s29  ;;  %v12273_v37 = vpop.permute.xlu1 %3850 }
 0x6ec   :  { %v3874_v30 = vsel %vm3872_vm8, %v12273_v37, %v12250_v25 }
 0x6ed   :  { %v12275_v24 = vpop.permute.xlu0 %3583  ;;  %v12277_v51 = vpop.permute.xlu2 %3780  ;;  %4755 = vmatpush.msra.mxu3 %v3874_v30 }
 0x6ee   :  { %v12285_v3 = vsel %vm16343_vm12, %v12155_v57, %v12275_v24 }
 0x6f1   :  { %3178 = vrot.lane.b32.xlu1 %v11924_v11, %s7560_s21 }
 0x6f3   :  { %2975 = vrot.lane.b32.xlu2 %v11908_v63, %s7504_s0  ;;  %3105 = vrot.lane.b32.xlu0 %v11910_v13, %s7517_s24  ;;  %v12293_v29 = vpop.permute.xlu1 %3310 }
 0x6f4   :  { %v3335_v41 = vsel %vm2008_vm4, %v12293_v29, %v12263_v17 }
 0x6f5   :  { %v4120_v60 = vpop.permute.xlu0 %4119  ;;  %v12295_v44 = vpop.permute.xlu2 %3242  ;;  %4724 = vmatpush.msra.mxu2 %v3335_v41 }
 0x6f6   :  { %v4143_v57 = vsel %vm16345_vm7, %v4120_v60, %v12143_v43  ;;  %4049 = vst.msk [vmem:[#allocation2 + $0x880] sm:$0xff] %vm16341_vm0, %v12295_v44 }
 0x6f7   :  { %4705 = vmatpush.msra.mxu1 %v4143_v57 }
 0x6f9   :  { %3708 = vrot.lane.b32.xlu1 %v11912_v61, %s7559_s13 }
 0x6fb   :  { %3450 = vrot.lane.b32.xlu2 %v11937_v35, %s7544_s26  ;;  %3452 = vrot.lane.b32.xlu0 %v11934_v39, %s7544_s26  ;;  %v12310_v56 = vpop.permute.xlu1 %3515 }
 0x6fc   :  { %v12317_v43 = vsel %vm16344_vm1, %v12205_v31, %v12310_v56 }
 0x6fd   :  { %v3443_v36 = vpop.permute.xlu0 %3442  ;;  %v12312_v32 = vpop.permute.xlu2 %3448 }
 0x6fe   :  { %v3468_v27 = vsel %vm16342_vm10, %v3443_v36, %v12194_v8  ;;  %v12323_v12 = vsel %vm16342_vm10, %v3447_v9, %v12312_v32  ;;  %vm3198_vm10 = vcmask 539648  }
 0x6ff   :  { %4676 = vmatpush.msra.mxu0 %v3468_v27 }
 0x701   :  { %2905 = vrot.lane.b32.xlu1 %v11908_v63, %s16348_s23 }
 0x703   :  { %3994 = vrot.lane.b32.xlu2 %v11937_v35, %s16351_s20  ;;  %2903 = vrot.lane.b32.xlu0 %v11912_v61, %s16348_s23  ;;  %v4051_v15 = vpop.permute.xlu1 %4050 }
 0x704   :  { %v4074_v7 = vsel %vm16340_vm3, %v4051_v15, %v12192_v54  ;;  %vm3266_vm3 = vcmask 523264  }
 0x705   :  { %v12331_v26 = vpop.permute.xlu0 %3782  ;;  %v3989_v46 = vpop.permute.xlu2 %3988  ;;  %4706 = vmatpush.msra.mxu1 %v4074_v7 }
 0x706   :  { %v3804_v8 = vsel %vm3802_vm15, %v12277_v51, %v12331_v26  ;;  %v4012_v63 = vsel %vm16341_vm0, %v3989_v46, %v12177_v33  ;;  %vm3732_vm0 = vcmask 703488  }
 0x707   :  { %4756 = vmatpush.msra.mxu3 %v3804_v8  ;;  %4707 = vmatpush.msra.mxu1 %v4012_v63 }
 0x709   :  { %3383 = vrot.lane.b32.xlu1 %v11937_v35, %s7537_s25 }
 0x70b   :  { %3038 = vrot.lane.b32.xlu2 %v11910_v13, %s7510_s18  ;;  %3111 = vrot.lane.b32.xlu0 %v11924_v11, %s7517_s24  ;;  %v3376_v61 = vpop.permute.xlu1 %3375 }
 0x70c   :  { %v3401_v33 = vsel %vm2206_vm11, %v3376_v61, %v3378_v0 }
 0x70d   :  { %v12346_v54 = vpop.permute.xlu0 %3244  ;;  %v12348_v28 = vpop.permute.xlu2 %3176  ;;  %4677 = vmatpush.msra.mxu0 %v3401_v33 }
 0x70e   :  { %v3268_v52 = vsel %vm3266_vm3, %v12295_v44, %v12346_v54 }
 0x70f   :  { %4725 = vmatpush.msra.mxu2 %v3268_v52 }
 0x711   :  { %2971 = vrot.lane.b32.xlu1 %v11910_v13, %s7504_s0 }
 0x713   :  { %3385 = vrot.lane.b32.xlu2 %v11934_v39, %s7537_s25  ;;  %3924 = vrot.lane.b32.xlu0 %v11937_v35, %s16356_s2  ;;  %v12360_v31 = vpop.permute.xlu1 %3712 }
 0x715   :  { %v12362_v23 = vpop.permute.xlu0 %3710  ;;  %v3654_v38 = vpop.permute.xlu2 %3653 }
 0x716   :  { %v12366_v53 = vsel %vm3669_vm5, %v12207_v16, %v3654_v38  ;;  %v3734_v13 = vsel %vm3732_vm0, %v12362_v23, %v12360_v31 }
 0x717   :  { %4757 = vmatpush.msra.mxu3 %v3734_v13 }
 0x719   :  { %3318 = vrot.lane.b32.xlu1 %v11934_v39, %s7532_s22 }
 0x71b   :  { %3044 = vrot.lane.b32.xlu2 %v11924_v11, %s7510_s18  ;;  %3316 = vrot.lane.b32.xlu0 %v11937_v35, %s7532_s22  ;;  %v12377_v59 = vpop.permute.xlu1 %3174 }
 0x71c   :  { %v3200_v40 = vsel %vm3198_vm10, %v12377_v59, %v12348_v28 }
 0x71d   :  { %v12379_v19 = vpop.permute.xlu0 %4263  ;;  %v12381_v16 = vpop.permute.xlu2 %4194  ;;  %4726 = vmatpush.msra.mxu2 %v3200_v40 }
 0x71e   :  { %v4283_v6 = vsel %vm16358_vm9, %v12153_v48, %v12379_v19  ;;  %v4214_v21 = vsel %vm2886_vm6, %v12130_v22, %v12381_v16 }
 0x71f   :  { %4795 = vmatpush.msrb.mxu3 %v4283_v6 }
 0x721   :  { %4796 = vmatpush.msrb.mxu3 %v4214_v21  ;;  %3248 = vrot.lane.b32.xlu1 %v11937_v35, %s7558_s30 }
 0x723   :  { %3854 = vrot.lane.b32.xlu2 %v11937_v35, %s7556_s28  ;;  %2977 = vrot.lane.b32.xlu0 %v11924_v11, %s7504_s0  ;;  %v12398_v9 = vpop.permute.xlu1 %3381 }
 0x724   :  { %v12405_v22 = vsel %vm2206_vm11, %v12261_v49, %v12398_v9 }
 0x725   :  { %v3309_v34 = vpop.permute.xlu0 %3308  ;;  %v12400_v48 = vpop.permute.xlu2 %3240 }
 0x726   :  { %v3334_v5 = vsel %vm2008_vm4, %v3309_v34, %v12293_v29  ;;  %v3267_v62 = vsel %vm3266_vm3, %v12400_v48, %v12295_v44 }
 0x727   :  { %4678 = vmatpush.msra.mxu0 %v3334_v5  ;;  %4048 = vst [vmem:[#allocation2 + $0x878] sm:$0xff] %v3267_v62 }
 0x729   :  { %4679 = vmatpush.msra.mxu0 %v3267_v62  ;;  %2907 = vrot.lane.b32.xlu1 %v11924_v11, %s16348_s23 }
 0x72b   :  { %3250 = vrot.lane.b32.xlu2 %v11934_v39, %s7558_s30  ;;  %3784 = vrot.lane.b32.xlu0 %v11937_v35, %s7557_s16  ;;  %v3919_v1 = vpop.permute.xlu1 %3918 }
 0x72c   :  { %v3943_v0 = vsel %vm3942_vm2, %v3919_v1, %v12248_v58 }
 0x72d   :  { %v12418_v50 = vpop.permute.xlu0 %3655  ;;  %v12420_v49 = vpop.permute.xlu2 %3587  ;;  %4708 = vmatpush.msra.mxu1 %v3943_v0 }
 0x72e   :  { %v12426_v45 = vsel %vm3669_vm5, %v3654_v38, %v12418_v50 }
 0x731   :  { %3714 = vrot.lane.b32.xlu1 %v11937_v35, %s7559_s13 }
 0x733   :  { %3180 = vrot.lane.b32.xlu2 %v11937_v35, %s7560_s21  ;;  %3182 = vrot.lane.b32.xlu0 %v11934_v39, %s7560_s21  ;;  %v12434_v11 = vpop.permute.xlu1 %3109 }
 0x735   :  { %v12436_v30 = vpop.permute.xlu0 %3107  ;;  %v12438_v29 = vpop.permute.xlu2 %3040 }
 0x736   :  { %v3132_v58 = vsel %vm1420_vm14, %v12436_v30, %v12434_v11 }
 0x737   :  { %4727 = vmatpush.msra.mxu2 %v3132_v58 }
 0x739   :  { %3115 = vrot.lane.b32.xlu1 %v11934_v39, %s7517_s24 }
 0x73b   :  { %4265 = vrot.lane.b32.xlu2 %v11934_v39, %s16346_s14  ;;  %3113 = vrot.lane.b32.xlu0 %v11937_v35, %s7517_s24  ;;  %v3586_v60 = vpop.permute.xlu1 %3585 }
 0x73c   :  { %v12455_v57 = vsel %vm16343_vm12, %v12275_v24, %v3586_v60  ;;  %v12469_v15 = vsel %vm16343_vm12, %v3586_v60, %v12420_v49  ;;  %vm17586_vm12 = vcmask 97280   ;;  %v12563_v60 = vld [vmem:[#allocation2 + $0x40] sm:$0xff] }
 0x73d   :  { %v12449_v44 = vpop.permute.xlu0 %3314  ;;  %v12451_v41 = vpop.permute.xlu2 %3246 }
 0x73e   :  { %v12460_v36 = vsel %vm2008_vm4, %v12263_v17, %v12449_v44  ;;  %v12465_v27 = vsel %vm3266_vm3, %v12346_v54, %v12451_v41  ;;  %v7438_v54 = vld [vmem:[#allocation2 + $0x20] sm:$0xff] }
 0x741   :  { %3046 = vrot.lane.b32.xlu1 %v11937_v35, %s7510_s18 }
 0x743   :  { %3657 = vrot.lane.b32.xlu2 %v11952_v14, %s7551_s17  ;;  %4196 = vrot.lane.b32.xlu0 %v11934_v39, %s7549_s27  ;;  %v12477_v17 = vpop.permute.xlu1 %4125  ;;  %v12486_v14 = vld [vmem:[#allocation2 + $0x28] sm:$0xff]  ;;  %v12490_v39 = vld [vmem:[#allocation2 + $0x30] sm:$0xff] }
 0x744   :  { %v4145_v7 = vsel %vm16345_vm7, %v12175_v20, %v12477_v17  ;;  %vm17589_vm7 = vcmask 261120  }
 0x745   :  { %v3849_v24 = vpop.permute.xlu0 %3848  ;;  %v3779_v46 = vpop.permute.xlu2 %3778  ;;  %4797 = vmatpush.msrb.mxu3 %v4145_v7  ;;  %v12581_v7 = vld [vmem:[#allocation2 + $0x38] sm:$0xff] }
 0x746   :  { %v3873_v8 = vsel %vm3872_vm8, %v3849_v24, %v12273_v37  ;;  %v3803_v35 = vsel %vm3802_vm15, %v3779_v46, %v12277_v51 }
 0x747   :  { %4709 = vmatpush.msra.mxu1 %v3873_v8 }
 0x749   :  { %4710 = vmatpush.msra.mxu1 %v3803_v35  ;;  %4127 = vrot.lane.b32.xlu1 %v12486_v14, %s7489_s15 }
 0x74b   :  { %3589 = vrot.lane.b32.xlu0 %v12490_v39, %s16354_s19  ;;  %3048 = vrot.lane.b32.xlu2 %v12486_v14, %s7510_s18  ;;  %v3173_v20 = vpop.permute.xlu1 %3172 }
 0x74c   :  { %v3199_v63 = vsel %vm3198_vm10, %v3173_v20, %v12377_v59 }
 0x74d   :  { %v12496_v37 = vpop.permute.xlu0 %3042  ;;  %v12498_v51 = vpop.permute.xlu2 %2975  ;;  %4680 = vmatpush.msra.mxu0 %v3199_v63  ;;  %v4344_v63 = vld [vmem:[#allocation2 + $0x70] sm:$0xff] }
 0x74e   :  { %v3065_v61 = vsel %vm16353_vm13, %v12438_v29, %v12496_v37 }
 0x74f   :  { %4728 = vmatpush.msra.mxu2 %v3065_v61 }
 0x751   :  { %3521 = vrot.lane.b32.xlu1 %v12490_v39, %s7553_s1 }
 0x753   :  { %2981 = vrot.lane.b32.xlu0 %v12486_v14, %s7504_s0  ;;  %2979 = vrot.lane.b32.xlu2 %v7438_v54, %s7504_s0  ;;  %v12510_v33 = vpop.permute.xlu1 %3519 }
 0x755   :  { %v3518_v52 = vpop.permute.xlu0 %3517  ;;  %v3451_v38 = vpop.permute.xlu2 %3450 }
 0x756   :  { %v12514_v13 = vsel %vm16344_vm1, %v12310_v56, %v3518_v52  ;;  %v12518_v59 = vsel %vm17586_vm12, %v12312_v32, %v3451_v38  ;;  %v12522_v40 = vsel %vm16344_vm1, %v3518_v52, %v12510_v33  ;;  %vm17587_vm12 = vcmask 588800  }
 0x757   :  { %vm17588_vm1 = vcmask 244736  }
 0x759   :  { %2911 = vrot.lane.b32.xlu1 %v12486_v14, %s16348_s23 }
 0x75b   :  { %2909 = vrot.lane.b32.xlu0 %v7438_v54, %s16348_s23  ;;  %4058 = vrot.lane.b32.xlu2 %v12486_v14, %s7483_s29  ;;  %v12529_v6 = vpop.permute.xlu1 %2973  ;;  %s17603_s23 = smov 120  }
 0x75c   :  { %v2998_v32 = vsel %vm17587_vm12, %v12529_v6, %v12498_v51  ;;  %vm17591_vm12 = vcmask 261120  }
 0x75d   :  { %v12531_v56 = vpop.permute.xlu0 %4056  ;;  %v12533_v21 = vpop.permute.xlu2 %3994  ;;  %4729 = vmatpush.msra.mxu2 %v2998_v32  ;;  %v4369_v32 = vld [vmem:[#allocation2 + $0x138] sm:$0xff] }
 0x75e   :  { %v4076_v34 = vsel %vm17588_vm1, %v12190_v42, %v12531_v56  ;;  %v4014_v5 = vsel %vm17589_vm7, %v12222_v4, %v12533_v21  ;;  %vm17590_vm7 = vcmask 97280   ;;  %vm16350_vm1 = vcmask 982016  }
 0x75f   :  { %4798 = vmatpush.msrb.mxu3 %v4076_v34 }
 0x761   :  { %4799 = vmatpush.msrb.mxu3 %v4014_v5  ;;  %3996 = vrot.lane.b32.xlu1 %v12486_v14, %s16351_s20 }
 0x763   :  { %3454 = vrot.lane.b32.xlu0 %v12490_v39, %s7544_s26  ;;  %4267 = vrot.lane.b32.xlu2 %v12490_v39, %s16346_s14  ;;  %v12550_v62 = vpop.permute.xlu1 %3178 }
 0x764   :  { %v3201_v4 = vsel %vm3198_vm10, %v12348_v28, %v12550_v62 }
 0x765   :  { %v3106_v1 = vpop.permute.xlu0 %3105  ;;  %v3039_v42 = vpop.permute.xlu2 %3038 }
 0x766   :  { %v3131_v0 = vsel %vm1420_vm14, %v3106_v1, %v12436_v30  ;;  %v3064_v58 = vsel %vm16353_vm13, %v3039_v42, %v12438_v29  ;;  %v4343_v1 = vld [vmem:[#allocation2 + $0x68] sm:$0xff] }
 0x767   :  { %4681 = vmatpush.msra.mxu0 %v3131_v0 }
 0x769   :  { %4682 = vmatpush.msra.mxu0 %v3064_v58  ;;  %3387 = vrot.lane.b32.xlu1 %v12490_v39, %s7537_s25  ;;  %v4330_v58 = vld [vmem:[#allocation2] sm:$0xff] }
 0x76b   :  { %4198 = vrot.lane.b32.xlu0 %v12490_v39, %s7549_s27  ;;  %3659 = vrot.lane.b32.xlu2 %v12563_v60, %s7551_s17  ;;  %v3709_v28 = vpop.permute.xlu1 %3708 }
 0x76c   :  { %v3733_v29 = vsel %vm3732_vm0, %v3709_v28, %v12362_v23 }
 0x76d   :  { %v12567_v24 = vpop.permute.xlu0 %3452  ;;  %v12569_v30 = vpop.permute.xlu2 %3385  ;;  %4711 = vmatpush.msra.mxu1 %v3733_v29 }
 0x76e   :  { %v12575_v46 = vsel %vm17590_vm7, %v3451_v38, %v12567_v24  ;;  %vm17592_vm7 = vcmask 588800  }
 0x76f   :  { %4765 = vmatpush.msrb.mxu1 %v12214_v47 }
 0x771   :  { %4766 = vmatpush.msrb.mxu1 %v12285_v3  ;;  %4129 = vrot.lane.b32.xlu1 %v12490_v39, %s7489_s15 }
 0x773   :  { %3591 = vrot.lane.b32.xlu0 %v12581_v7, %s16354_s19  ;;  %3926 = vrot.lane.b32.xlu2 %v12486_v14, %s16356_s2  ;;  %v12587_v23 = vpop.permute.xlu1 %2905 }
 0x774   :  { %4767 = vmatpush.msrb.mxu1 %v12317_v43  ;;  %v4357_v43 = vld [vmem:[#allocation2 + $0xd8] sm:$0xff] }
 0x775   :  { %v2904_v8 = vpop.permute.xlu0 %2903  ;;  %v12590_v47 = vpop.permute.xlu2 %3044 }
 0x776   :  { %v2928_v3 = vsel %vm16350_vm1, %v12141_v2, %v2904_v8  ;;  %3707 = vst.msk [vmem:[#allocation2 + $0x678] sm:$0xff] %vm17591_vm12, %v2904_v8  ;;  %v3066_v35 = vsel %vm16353_vm13, %v12496_v37, %v12590_v47  ;;  %v2929_v20 = vsel %vm16350_vm1, %v2904_v8, %v12587_v23  ;;  %4768 = vmatpush.msrb.mxu1 %v12323_v12  ;;  %vm17593_vm12 = vmmov %vm17592_vm7 }
 0x777   :  { %4730 = vmatpush.msra.mxu2 %v2929_v20  ;;  %3706 = vst [vmem:[#allocation2 + $0x670] sm:$0xff] %v2928_v3 }
 0x778   :  { %4769 = vmatpush.msrb.mxu1 %v12405_v22 }
 0x779   :  { %4731 = vmatpush.msra.mxu2 %v12102_v10  ;;  %3523 = vrot.lane.b32.xlu1 %v12581_v7, %s7553_s1 }
 0x77a   :  { %4770 = vmatpush.msrb.mxu1 %v12460_v36 }
 0x77b   :  { %3856 = vrot.lane.b32.xlu0 %v12486_v14, %s7556_s28  ;;  %3320 = vrot.lane.b32.xlu2 %v12490_v39, %s7532_s22  ;;  %v3384_v37 = vpop.permute.xlu1 %3383 }
 0x77c   :  { %4732 = vmatpush.msra.mxu2 %v4357_v43  ;;  %4771 = vmatpush.msrb.mxu1 %v12465_v27  ;;  %v3404_v10 = vsel %vm2206_vm11, %v12398_v9, %v3384_v37  ;;  %v12625_v54 = vsel %vm2206_vm11, %v3384_v37, %v12569_v30  ;;  %v4331_v27 = vld [vmem:[#allocation2 + $0x8] sm:$0xff]  ;;  %v4358_v37 = vld [vmem:[#allocation2 + $0xe0] sm:$0xff] }
 0x77d   :  { %v12611_v12 = vpop.permute.xlu0 %3111  ;;  %v12613_v22 = vpop.permute.xlu2 %3854  ;;  %v4371_v43 = vld [vmem:[#allocation2 + $0x148] sm:$0xff] }
 0x77e   :  { %v3133_v36 = vsel %vm1420_vm14, %v12434_v11, %v12611_v12  ;;  %v3875_v61 = vsel %vm3872_vm8, %v12250_v25, %v12613_v22  ;;  %4733 = vmatpush.msra.mxu2 %v4344_v63  ;;  %4772 = vmatpush.msrb.mxu1 %v3201_v4 }
 0x780   :  { %4734 = vmatpush.msra.mxu2 %v4331_v27  ;;  %4773 = vmatpush.msrb.mxu1 %v3133_v36  ;;  %v4332_v36 = vld [vmem:[#allocation2 + $0x10] sm:$0xff] }
 0x781   :  { %3786 = vrot.lane.b32.xlu1 %v12486_v14, %s7557_s16 }
 0x782   :  { %4774 = vmatpush.msrb.mxu1 %v3066_v35 }
 0x783   :  { %3252 = vrot.lane.b32.xlu0 %v12490_v39, %s7558_s30  ;;  %4060 = vrot.lane.b32.xlu2 %v12490_v39, %s7483_s29  ;;  %v2972_v25 = vpop.permute.xlu1 %2971 }
 0x784   :  { %v2997_v52 = vsel %vm17592_vm7, %v2972_v25, %v12529_v6  ;;  %v4356_v6 = vld [vmem:[#allocation2 + $0xd0] sm:$0xff] }
 0x785   :  { %v12633_v9 = vpop.permute.xlu0 %3924  ;;  %v12635_v11 = vpop.permute.xlu2 %3250  ;;  %4683 = vmatpush.msra.mxu0 %v2997_v52 }
 0x786   :  { %v3945_v38 = vsel %vm3942_vm2, %v12246_v18, %v12633_v9 }
 0x787   :  { %4800 = vmatpush.msrb.mxu3 %v3945_v38  ;;  %4684 = vmatpush.msra.mxu0 %v2928_v3 }
 0x789   :  { %4801 = vmatpush.msrb.mxu3 %v3875_v61  ;;  %4269 = vrot.lane.b32.xlu1 %v12581_v7, %s16346_s14 }
 0x78a   :  { %4685 = vmatpush.msra.mxu0 %v4369_v32 }
 0x78b   :  { %3998 = vrot.lane.b32.xlu0 %v12490_v39, %s16351_s20  ;;  %3456 = vrot.lane.b32.xlu2 %v12581_v7, %s7544_s26  ;;  %v12648_v34 = vpop.permute.xlu1 %3318 }
 0x78c   :  { %4686 = vmatpush.msra.mxu0 %v4356_v6 }
 0x78d   :  { %v3317_v18 = vpop.permute.xlu0 %3316  ;;  %v3181_v5 = vpop.permute.xlu2 %3180 }
 0x78e   :  { %v3337_v42 = vsel %vm2008_vm4, %v12449_v44, %v3317_v18  ;;  %v3202_v4 = vsel %vm3198_vm10, %v12550_v62, %v3181_v5  ;;  %v12656_v0 = vsel %vm2008_vm4, %v3317_v18, %v12648_v34  ;;  %4687 = vmatpush.msra.mxu0 %v4343_v1 }
 0x790   :  { %4688 = vmatpush.msra.mxu0 %v4330_v58 }
 0x791   :  { %3716 = vrot.lane.b32.xlu1 %v12486_v14, %s7559_s13 }
 0x792   :  { %4811 = vmatpush.msrb.mxu0 %v12366_v53 }
 0x793   :  { %3184 = vrot.lane.b32.xlu0 %v12490_v39, %s7560_s21  ;;  %4271 = vrot.lane.b32.xlu2 %v12563_v60, %s16346_s14  ;;  %v3249_v44 = vpop.permute.xlu1 %3248  ;;  %s17649_s14 = smov 42  }
 0x794   :  { %4812 = vmatpush.msrb.mxu0 %v12455_v57  ;;  %v3270_v29 = vsel %vm3266_vm3, %v12451_v41, %v3249_v44  ;;  %v3271_v8 = vsel %vm3266_vm3, %v3249_v44, %v12635_v11  ;;  %v12682_v41 = vld [vmem:[%s16032_s3 + $0x8] sm:$0xff]  ;;  %v12692_v57 = vld [vmem:[#allocation2 + $0x48] sm:$0xff] }
 0x795   :  { %v2978_v62 = vpop.permute.xlu0 %2977  ;;  %v12666_v28 = vpop.permute.xlu2 %4265  ;;  %6963 = vmatmul.msk.f32.vlgmr.msra.gmra.mxu3 %vm17592_vm7, %v12682_v41 }
 0x796   :  { %v2999_v53 = vsel %vm17593_vm12, %v12498_v51, %v2978_v62  ;;  %v4284_v14 = vsel %vm16358_vm9, %v12379_v19, %v12666_v28  ;;  %4813 = vmatpush.msrb.mxu0 %v12514_v13  ;;  %vm17594_vm12 = vmmov %vm17592_vm7  ;;  %v12688_v19 = vld [vmem:[#allocation2 + $0x50] sm:$0xff] }
 0x797   :  { %4775 = vmatpush.msrb.mxu1 %v2999_v53  ;;  %4841 = vmatpush.msrb.mxu2 %v4284_v14  ;;  %v4372_v14 = vld [vmem:[#allocation2 + $0x150] sm:$0xff] }
 0x798   :  { %4814 = vmatpush.msrb.mxu0 %v12518_v59  ;;  %6961 = vmatmul.msk.f32.vlgmr.msra.gmra.mxu1 %vm17594_vm12, %v12682_v41  ;;  %vm17595_vm12 = vcmask 244736  }
 0x799   :  { %3663 = vrot.lane.b32.xlu1 %v12688_v19, %s7551_s17 }
 0x79a   :  { %4815 = vmatpush.msrb.mxu0 %v3404_v10 }
 0x79b   :  { %3661 = vrot.lane.b32.xlu0 %v12692_v57, %s7551_s17  ;;  %3389 = vrot.lane.b32.xlu2 %v12581_v7, %s7537_s25  ;;  %v12698_v51 = vpop.permute.xlu1 %2907 }
 0x79c   :  { %4816 = vmatpush.msrb.mxu0 %v3337_v42  ;;  %v2930_v3 = vsel %vm16350_vm1, %v12587_v23, %v12698_v51 }
 0x79d   :  { %v12700_v13 = vpop.permute.xlu0 %3784  ;;  %v12702_v59 = vpop.permute.xlu2 %3657  ;;  %4776 = vmatpush.msrb.mxu1 %v2930_v3 }
 0x79e   :  { %v3805_v35 = vsel %vm3802_vm15, %v12331_v26, %v12700_v13  ;;  %v12713_v20 = vsel %vm3669_vm5, %v12418_v50, %v12702_v59  ;;  %4817 = vmatpush.msrb.mxu0 %v3270_v29  ;;  %v4345_v26 = vld [vmem:[#allocation2 + $0x78] sm:$0xff] }
 0x79f   :  { %4802 = vmatpush.msrb.mxu3 %v3805_v35  ;;  %4777 = vmatpush.msrb.mxu1 %v4371_v43 }
 0x7a0   :  { %4818 = vmatpush.msrb.mxu0 %v3202_v4 }
 0x7a1   :  { %4202 = vrot.lane.b32.xlu1 %v12563_v60, %s7549_s27  ;;  %4778 = vmatpush.msrb.mxu1 %v4358_v37  ;;  %v4346_v37 = vld [vmem:[#allocation2 + $0x80] sm:$0xff] }
 0x7a3   :  { %4200 = vrot.lane.b32.xlu0 %v12581_v7, %s7549_s27  ;;  %3928 = vrot.lane.b32.xlu2 %v12490_v39, %s16356_s2  ;;  %v12721_v50 = vpop.permute.xlu1 %3714 }
 0x7a4   :  { %4779 = vmatpush.msrb.mxu1 %v4345_v26  ;;  %v3735_v63 = vsel %vm3732_vm0, %v12360_v31, %v12721_v50  ;;  %v4347_v26 = vld [vmem:[#allocation2 + $0x88] sm:$0xff] }
 0x7a5   :  { %v12723_v23 = vpop.permute.xlu0 %3182  ;;  %v12725_v10 = vpop.permute.xlu2 %3048  ;;  %4803 = vmatpush.msrb.mxu3 %v3735_v63 }
 0x7a6   :  { %v3203_v61 = vsel %vm3198_vm10, %v3181_v5, %v12723_v23  ;;  %4780 = vmatpush.msrb.mxu1 %v4332_v36 }
 0x7a7   :  { %4857 = vmatpush.msra.mxu3 %v12426_v45 }
 0x7a9   :  { %4858 = vmatpush.msra.mxu3 %v12469_v15  ;;  %3593 = vrot.lane.b32.xlu1 %v12563_v60, %s16354_s19 }
 0x7ab   :  { %3322 = vrot.lane.b32.xlu0 %v12581_v7, %s7532_s22  ;;  %3117 = vrot.lane.b32.xlu2 %v12490_v39, %s7517_s24  ;;  %v12740_v31 = vpop.permute.xlu1 %3115 }
 0x7ac   :  { %4859 = vmatpush.msra.mxu3 %v12522_v40 }
 0x7ad   :  { %v3114_v27 = vpop.permute.xlu0 %3113  ;;  %v2980_v25 = vpop.permute.xlu2 %2979 }
 0x7ae   :  { %v3134_v45 = vsel %vm1420_vm14, %v12611_v12, %v3114_v27  ;;  %v3000_v15 = vsel %vm17592_vm7, %v2978_v62, %v2980_v25  ;;  %v3135_v52 = vsel %vm1420_vm14, %v3114_v27, %v12740_v31  ;;  %4860 = vmatpush.msra.mxu3 %v12575_v46  ;;  %vm17596_vm7 = vcmask 228352   ;;  %v4334_v27 = vld [vmem:[#allocation2 + $0x20] sm:$0xff] }
 0x7af   :  { %4819 = vmatpush.msrb.mxu0 %v3134_v45 }
 0x7b0   :  { %4861 = vmatpush.msra.mxu3 %v12625_v54 }
 0x7b1   :  { %4131 = vrot.lane.b32.xlu1 %v12581_v7, %s7489_s15 }
 0x7b2   :  { %4862 = vmatpush.msra.mxu3 %v12656_v0 }
 0x7b3   :  { %3858 = vrot.lane.b32.xlu0 %v12490_v39, %s7556_s28  ;;  %3595 = vrot.lane.b32.xlu2 %v12692_v57, %s16354_s19  ;;  %v3047_v40 = vpop.permute.xlu1 %3046 }
 0x7b4   :  { %4863 = vmatpush.msra.mxu3 %v3271_v8  ;;  %v3067_v46 = vsel %vm16353_vm13, %v12590_v47, %v3047_v40  ;;  %v3068_v6 = vsel %vm16353_vm13, %v3047_v40, %v12725_v10  ;;  %v4373_v8 = vld [vmem:[#allocation2 + $0x158] sm:$0xff]  ;;  %vm17607_vm13 = vcmask 588800  }
 0x7b5   :  { %v12757_v12 = vpop.permute.xlu0 %4196  ;;  %v12759_v38 = vpop.permute.xlu2 %4058  ;;  %4820 = vmatpush.msrb.mxu0 %v3067_v46 }
 0x7b6   :  { %v4215_v54 = vsel %vm2886_vm6, %v12381_v16, %v12757_v12  ;;  %v4077_v32 = vsel %vm17595_vm12, %v12531_v56, %v12759_v38  ;;  %4864 = vmatpush.msra.mxu3 %v3203_v61  ;;  %vm17597_vm12 = vcmask 64512   ;;  %v4333_v61 = vld [vmem:[#allocation2 + $0x18] sm:$0xff] }
 0x7b7   :  { %4842 = vmatpush.msrb.mxu2 %v4215_v54  ;;  %4821 = vmatpush.msrb.mxu0 %v3000_v15 }
 0x7b8   :  { %4865 = vmatpush.msra.mxu3 %v3135_v52 }
 0x7b9   :  { %3254 = vrot.lane.b32.xlu1 %v12581_v7, %s7558_s30 }
 0x7ba   :  { %4866 = vmatpush.msra.mxu3 %v3068_v6 }
 0x7bb   :  { %3050 = vrot.lane.b32.xlu0 %v12490_v39, %s7510_s18  ;;  %4133 = vrot.lane.b32.xlu2 %v12563_v60, %s7489_s15  ;;  %v12777_v16 = vpop.permute.xlu1 %4127 }
 0x7bc   :  { %v4146_v18 = vsel %vm17596_vm7, %v12477_v17, %v12777_v16  ;;  %vm17598_vm7 = vcmask 80896  }
 0x7bd   :  { %v12779_v56 = vpop.permute.xlu0 %3589  ;;  %v12781_v47 = vpop.permute.xlu2 %4267  ;;  %4843 = vmatpush.msrb.mxu2 %v4146_v18  ;;  %v12933_v18 = vld [vmem:[%s16032_s3] sm:$0xff] }
 0x7be   :  { %v12789_v5 = vsel %vm17597_vm12, %v12420_v49, %v12779_v56  ;;  %v4285_v1 = vsel %vm16358_vm9, %v12666_v28, %v12781_v47  ;;  %vm17599_vm12 = vcmask 588800   ;;  %4689 = vmatmul.f32.vlgmr.msra.gmra.mxu0 %v12933_v18  ;;  %4735 = vmatmul.f32.vlgmr.msra.gmra.mxu2 %v12933_v18 }
 0x7bf   :  { %4887 = vmatpush.msra.mxu1 %v4285_v1  ;;  %4844 = vmatpush.msrb.mxu2 %v4077_v32 }
 0x7c1   :  { %3788 = vrot.lane.b32.xlu1 %v12490_v39, %s7557_s16 }
 0x7c3   :  { %3527 = vrot.lane.b32.xlu0 %v12692_v57, %s7553_s1  ;;  %3525 = vrot.lane.b32.xlu2 %v12563_v60, %s7553_s1  ;;  %v12800_v17 = vpop.permute.xlu1 %3521 }
 0x7c4   :  { %v12809_v4 = vsel %vm17598_vm7, %v12510_v33, %v12800_v17  ;;  %vm17600_vm7 = vcmask 261120  }
 0x7c5   :  { %v12802_v49 = vpop.permute.xlu0 %2981  ;;  %v12804_v42 = vpop.permute.xlu2 %3659 }
 0x7c6   :  { %v3001_v0 = vsel %vm17599_vm12, %v2980_v25, %v12802_v49  ;;  %v12816_v58 = vsel %vm3669_vm5, %v12702_v59, %v12804_v42  ;;  %vm17601_vm12 = vcmask 97280  }
 0x7c7   :  { %4867 = vmatpush.msra.mxu3 %v3001_v0 }
 0x7c9   :  { %2983 = vrot.lane.b32.xlu1 %v12490_v39, %s7504_s0 }
 0x7cb   :  { %4064 = vrot.lane.b32.xlu0 %v12563_v60, %s7483_s29  ;;  %4062 = vrot.lane.b32.xlu2 %v12581_v7, %s7483_s29  ;;  %v12824_v33 = vpop.permute.xlu1 %2911 }
 0x7cd   :  { %v2910_v44 = vpop.permute.xlu0 %2909  ;;  %v12826_v62 = vpop.permute.xlu2 %3926 }
 0x7ce   :  { %v2931_v28 = vsel %vm16350_vm1, %v12698_v51, %v2910_v44  ;;  %v3946_v29 = vsel %vm3942_vm2, %v12633_v9, %v12826_v62  ;;  %v2932_v53 = vsel %vm16350_vm1, %v2910_v44, %v12824_v33  ;;  %v4359_v51 = vld [vmem:[#allocation2 + $0xe8] sm:$0xff]  ;;  %v4360_v9 = vld [vmem:[#allocation2 + $0xf0] sm:$0xff]  ;;  %vm17606_vm1 = vcmask 97280  }
 0x7cf   :  { %4822 = vmatpush.msrb.mxu0 %v2931_v28  ;;  %4868 = vmatpush.msra.mxu3 %v2932_v53 }
 0x7d1   :  { %4823 = vmatpush.msrb.mxu0 %v4372_v14  ;;  %4869 = vmatpush.msra.mxu3 %v4373_v8 }
 0x7d2   :  { %3460 = vrot.lane.b32.xlu1 %v12692_v57, %s7544_s26 }
 0x7d3   :  { %3458 = vrot.lane.b32.xlu0 %v12563_v60, %s7544_s26  ;;  %3186 = vrot.lane.b32.xlu2 %v12581_v7, %s7560_s21  ;;  %v12841_v59 = vpop.permute.xlu1 %3996 }
 0x7d4   :  { %4824 = vmatpush.msrb.mxu0 %v4359_v51  ;;  %4870 = vmatpush.msra.mxu3 %v4360_v9  ;;  %v4015_v43 = vsel %vm17600_vm7, %v12533_v21, %v12841_v59  ;;  %vm17602_vm7 = vcmask 244736  }
 0x7d5   :  { %v3455_v3 = vpop.permute.xlu0 %3454  ;;  %v12843_v35 = vpop.permute.xlu2 %3320  ;;  %4845 = vmatpush.msrb.mxu2 %v4015_v43 }
 0x7d6   :  { %v12850_v63 = vsel %vm17601_vm12, %v12567_v24, %v3455_v3  ;;  %v12855_v36 = vsel %vm2008_vm4, %v12648_v34, %v12843_v35  ;;  %4825 = vmatpush.msrb.mxu0 %v4346_v37  ;;  %4871 = vmatpush.msra.mxu3 %v4347_v26  ;;  %vm17604_vm12 = vcmask 228352  }
 0x7d7   :  { %4846 = vmatpush.msrb.mxu2 %v3946_v29 }
 0x7d8   :  { %4826 = vmatpush.msrb.mxu0 %v4333_v61  ;;  %4872 = vmatpush.msra.mxu3 %v4334_v27 }
 0x7da   :  { %4002 = vrot.lane.b32.xlu1 %v12563_v60, %s16351_s20 }
 0x7db   :  { %4000 = vrot.lane.b32.xlu0 %v12581_v7, %s16351_s20  ;;  %3718 = vrot.lane.b32.xlu2 %v12490_v39, %s7559_s13  ;;  %v3388_v21 = vpop.permute.xlu1 %3387  ;;  %s17613_s20 = smov 24  }
 0x7dc   :  { %v12869_v25 = vsel %vm2206_vm11, %v12569_v30, %v3388_v21 }
 0x7dd   :  { %v12863_v24 = vpop.permute.xlu0 %4198  ;;  %v12865_v34 = vpop.permute.xlu2 %4060 }
 0x7de   :  { %v4216_v45 = vsel %vm2886_vm6, %v12757_v12, %v12863_v24  ;;  %v4078_v15 = vsel %vm17602_vm7, %v12759_v38, %v12865_v34  ;;  %vm17605_vm7 = vcmask 64512  }
 0x7df   :  { %4888 = vmatpush.msra.mxu1 %v4216_v45  ;;  %v13071_v45 = vld [vmem:[#allocation2 + $0x58] sm:$0xff] }
 0x7e2   :  { %3391 = vrot.lane.b32.xlu1 %v12563_v60, %s7537_s25 }
 0x7e3   :  { %3119 = vrot.lane.b32.xlu0 %v12581_v7, %s7517_s24  ;;  %2913 = vrot.lane.b32.xlu2 %v12490_v39, %s17603_s23  ;;  %v12883_v30 = vpop.permute.xlu1 %4129  ;;  %v12904_v39 = vld [vmem:[%s16032_s3 + $0x18] sm:$0xff] }
 0x7e4   :  { %v4147_v12 = vsel %vm17604_vm12, %v12777_v16, %v12883_v30  ;;  %6964 = vmatmul.msk.f32.gmra.mxu3 %vm17607_vm13, %v12904_v39  ;;  %vm17608_vm12 = vmmov %vm17607_vm13  ;;  %vm17609_vm13 = vcmask 80896  }
 0x7e5   :  { %v12885_v52 = vpop.permute.xlu0 %3591  ;;  %v12887_v40 = vpop.permute.xlu2 %3456  ;;  %4889 = vmatpush.msra.mxu1 %v4147_v12 }
 0x7e6   :  { %v12895_v38 = vsel %vm17605_vm7, %v12779_v56, %v12885_v52  ;;  %v12899_v46 = vsel %vm17606_vm1, %v3455_v3, %v12887_v40  ;;  %6962 = vmatmul.msk.f32.gmra.mxu1 %vm17608_vm12, %v12904_v39  ;;  %vm17610_vm1 = vmmov %vm17608_vm12  ;;  %vm17612_vm12 = vcmask 261120  }
 0x7e7   :  { %4890 = vmatpush.msra.mxu1 %v4078_v15  ;;  %vm17611_vm7 = vmmov %vm17610_vm1 }
 0x7ea   :  { %3932 = vrot.lane.b32.xlu1 %v12563_v60, %s16356_s2 }
 0x7eb   :  { %3930 = vrot.lane.b32.xlu0 %v12581_v7, %s16356_s2  ;;  %3393 = vrot.lane.b32.xlu2 %v12692_v57, %s7537_s25  ;;  %v12916_v54 = vpop.permute.xlu1 %3523 }
 0x7ec   :  { %v12925_v16 = vsel %vm17609_vm13, %v12800_v17, %v12916_v54  ;;  %6965 = vmatmul.msk.f32.vlgmr.msrb.gmra.mxu3 %vm17610_vm1, %v12682_v41  ;;  %vm17614_vm13 = vcmask 64512   ;;  %vm17615_vm1 = vcmask 80896  }
 0x7ed   :  { %v12918_v32 = vpop.permute.xlu0 %3856  ;;  %v12920_v6 = vpop.permute.xlu2 %4271 }
 0x7ee   :  { %v3876_v56 = vsel %vm3872_vm8, %v12613_v22, %v12918_v32  ;;  %4781 = vmatmul.f32.vlgmr.msrb.gmra.mxu1 %v12933_v18 }
 0x7ef   :  { %4847 = vmatpush.msrb.mxu2 %v3876_v56 }
 0x7f2   :  { %3326 = vrot.lane.b32.xlu1 %v12692_v57, %s7532_s22 }
 0x7f3   :  { %3324 = vrot.lane.b32.xlu0 %v12563_v60, %s7532_s22  ;;  %3052 = vrot.lane.b32.xlu2 %v12581_v7, %s7510_s18  ;;  %v12946_v22 = vpop.permute.xlu1 %3786 }
 0x7f4   :  { %v3806_v0 = vsel %vm3802_vm15, %v12700_v13, %v12946_v22  ;;  %6966 = vmatmul.msk.f32.gmra.mxu3 %vm17611_vm7, %v12904_v39  ;;  %vm17616_vm7 = vmmov %vm17614_vm13 }
 0x7f5   :  { %v12948_v1 = vpop.permute.xlu0 %3252  ;;  %v12950_v17 = vpop.permute.xlu2 %3389  ;;  %4848 = vmatpush.msrb.mxu2 %v3806_v0 }
 0x7f6   :  { %v3272_v44 = vsel %vm3266_vm3, %v12635_v11, %v12948_v1  ;;  %v12960_v28 = vsel %vm2206_vm11, %v3388_v21, %v12950_v17 }
 0x7fa   :  { %2985 = vrot.lane.b32.xlu1 %v12581_v7, %s7504_s0 }
 0x7fb   :  { %3862 = vrot.lane.b32.xlu0 %v12563_v60, %s7556_s28  ;;  %3860 = vrot.lane.b32.xlu2 %v12581_v7, %s7556_s28  ;;  %v4270_v13 = vpop.permute.xlu1 %4269 }
 0x7fc   :  { %v4286_v53 = vsel %vm16358_vm9, %v12781_v47, %v4270_v13  ;;  %v4287_v14 = vsel %vm16358_vm9, %v4270_v13, %v12920_v6  ;;  %4873 = vmatmul.f32.vlgmr.msra.gmra.mxu3 %v12933_v18 }
 0x7fd   :  { %v12970_v29 = vpop.permute.xlu0 %3998  ;;  %v12972_v11 = vpop.permute.xlu2 %3928  ;;  %4933 = vmatpush.msra.mxu0 %v4286_v53  ;;  %4979 = vmatpush.msrb.mxu3 %v4287_v14 }
 0x7fe   :  { %v4016_v8 = vsel %vm17612_vm12, %v12841_v59, %v12970_v29  ;;  %v3947_v51 = vsel %vm3942_vm2, %v12826_v62, %v12972_v11  ;;  %vm17617_vm12 = vcmask 228352  }
 0x7ff   :  { %4891 = vmatpush.msra.mxu1 %v4016_v8 }
 0x801   :  { %4892 = vmatpush.msra.mxu1 %v3947_v51 }
 0x802   :  { %3790 = vrot.lane.b32.xlu1 %v12581_v7, %s7557_s16 }
 0x803   :  { %3258 = vrot.lane.b32.xlu0 %v12692_v57, %s7558_s30  ;;  %3256 = vrot.lane.b32.xlu2 %v12563_v60, %s7558_s30  ;;  %v12991_v47 = vpop.permute.xlu1 %3716 }
 0x804   :  { %v3736_v59 = vsel %vm3732_vm0, %v12721_v50, %v12991_v47 }
 0x805   :  { %v12993_v9 = vpop.permute.xlu0 %3184  ;;  %v12995_v62 = vpop.permute.xlu2 %3117  ;;  %4849 = vmatpush.msrb.mxu2 %v3736_v59 }
 0x806   :  { %v3204_v3 = vsel %vm3198_vm10, %v12723_v23, %v12993_v9  ;;  %v3136_v43 = vsel %vm1420_vm14, %v12740_v31, %v12995_v62 }
 0x807   :  { %4903 = vmatpush.msra.mxu2 %v12713_v20 }
 0x809   :  { %4904 = vmatpush.msra.mxu2 %v12789_v5 }
 0x80a   :  { %3188 = vrot.lane.b32.xlu1 %v12563_v60, %s7560_s21 }
 0x80b   :  { %2915 = vrot.lane.b32.xlu0 %v12581_v7, %s17603_s23  ;;  %3792 = vrot.lane.b32.xlu2 %v12563_v60, %s7557_s16  ;;  %v13014_v50 = vpop.permute.xlu1 %3663 }
 0x80c   :  { %4905 = vmatpush.msra.mxu2 %v12809_v4 }
 0x80d   :  { %v3662_v23 = vpop.permute.xlu0 %3661  ;;  %v13017_v31 = vpop.permute.xlu2 %3595 }
 0x80e   :  { %v13021_v20 = vsel %vm3669_vm5, %v12804_v42, %v3662_v23  ;;  %v13025_v5 = vsel %vm3669_vm5, %v3662_v23, %v13014_v50  ;;  %4906 = vmatpush.msra.mxu2 %v12850_v63  ;;  %v4348_v23 = vld [vmem:[#allocation2 + $0x90] sm:$0xff] }
 0x810   :  { %4907 = vmatpush.msra.mxu2 %v12869_v25 }
 0x812   :  { %3722 = vrot.lane.b32.xlu1 %v12563_v60, %s7559_s13  ;;  %4908 = vmatpush.msra.mxu2 %v12855_v36 }
 0x813   :  { %3720 = vrot.lane.b32.xlu0 %v12581_v7, %s7559_s13  ;;  %3190 = vrot.lane.b32.xlu2 %v12692_v57, %s7560_s21  ;;  %v13036_v42 = vpop.permute.xlu1 %4202 }
 0x814   :  { %4909 = vmatpush.msra.mxu2 %v3272_v44 }
 0x815   :  { %v4201_v4 = vpop.permute.xlu0 %4200  ;;  %v13038_v37 = vpop.permute.xlu2 %4133 }
 0x816   :  { %v4217_v26 = vsel %vm2886_vm6, %v12863_v24, %v4201_v4  ;;  %v4218_v63 = vsel %vm2886_vm6, %v4201_v4, %v13036_v42  ;;  %4910 = vmatpush.msra.mxu2 %v3204_v3  ;;  %v4335_v4 = vld [vmem:[#allocation2 + $0x28] sm:$0xff] }
 0x817   :  { %4934 = vmatpush.msra.mxu0 %v4217_v26  ;;  %4980 = vmatpush.msrb.mxu3 %v4218_v63 }
 0x818   :  { %4911 = vmatpush.msra.mxu2 %v3136_v43 }
 0x81a   :  { %3123 = vrot.lane.b32.xlu1 %v12692_v57, %s7517_s24 }
 0x81b   :  { %3121 = vrot.lane.b32.xlu0 %v12563_v60, %s7517_s24  ;;  %4273 = vrot.lane.b32.xlu2 %v12692_v57, %s17613_s20  ;;  %v3594_v7 = vpop.permute.xlu1 %3593 }
 0x81c   :  { %v13054_v27 = vsel %vm17614_vm13, %v12885_v52, %v3594_v7  ;;  %v13065_v25 = vsel %vm17616_vm7, %v3594_v7, %v13017_v31  ;;  %vm17618_vm13 = vmmov %vm17617_vm12  ;;  %vm17620_vm7 = vcmask 572416  }
 0x81d   :  { %v13050_v36 = vpop.permute.xlu0 %3322  ;;  %v3526_v61 = vpop.permute.xlu2 %3525 }
 0x81e   :  { %v3340_v21 = vsel %vm2008_vm4, %v12843_v35, %v13050_v36  ;;  %v13061_v24 = vsel %vm17615_vm1, %v12916_v54, %v3526_v61  ;;  %vm17619_vm1 = vcmask 244736  }
 0x822   :  { %3054 = vrot.lane.b32.xlu1 %v12563_v60, %s7510_s18 }
 0x823   :  { %4204 = vrot.lane.b32.xlu0 %v12692_v57, %s7549_s27  ;;  %3665 = vrot.lane.b32.xlu2 %v13071_v45, %s7551_s17  ;;  %v4132_v35 = vpop.permute.xlu1 %4131 }
 0x824   :  { %v4148_v12 = vsel %vm17617_vm12, %v12883_v30, %v4132_v35  ;;  %v4149_v54 = vsel %vm17618_vm13, %v4132_v35, %v13038_v37  ;;  %vm17621_vm12 = vcmask 80896   ;;  %vm17622_vm13 = vcmask 588800  }
 0x825   :  { %v13075_v15 = vpop.permute.xlu0 %3858  ;;  %v4063_v52 = vpop.permute.xlu2 %4062  ;;  %4935 = vmatpush.msra.mxu0 %v4148_v12  ;;  %4981 = vmatpush.msrb.mxu3 %v4149_v54 }
 0x826   :  { %v3877_v56 = vsel %vm3872_vm8, %v12918_v32, %v13075_v15  ;;  %v4079_v0 = vsel %vm17619_vm1, %v12865_v34, %v4063_v52 }
 0x827   :  { %4893 = vmatpush.msra.mxu1 %v3877_v56  ;;  %4936 = vmatpush.msra.mxu0 %v4079_v0 }
 0x82a   :  { %4135 = vrot.lane.b32.xlu1 %v12692_v57, %s7489_s15 }
 0x82b   :  { %3597 = vrot.lane.b32.xlu0 %v12688_v19, %s16354_s19  ;;  %3056 = vrot.lane.b32.xlu2 %v12692_v57, %s7510_s18  ;;  %v13092_v30 = vpop.permute.xlu1 %3254 }
 0x82c   :  { %v3273_v34 = vsel %vm3266_vm3, %v12948_v1, %v13092_v30 }
 0x82d   :  { %v3051_v44 = vpop.permute.xlu0 %3050  ;;  %v13094_v32 = vpop.permute.xlu2 %3186 }
 0x82e   :  { %v3069_v13 = vsel %vm17620_vm7, %v12725_v10, %v3051_v44  ;;  %v3205_v53 = vsel %vm3198_vm10, %v12993_v9, %v13094_v32  ;;  %vm17623_vm7 = vcmask 982016  }
 0x82f   :  { %4912 = vmatpush.msra.mxu2 %v3069_v13 }
 0x832   :  { %3529 = vrot.lane.b32.xlu1 %v12688_v19, %s7553_s1 }
 0x833   :  { %2989 = vrot.lane.b32.xlu0 %v12692_v57, %s7504_s0  ;;  %2987 = vrot.lane.b32.xlu2 %v12563_v60, %s7504_s0  ;;  %v13110_v14 = vpop.permute.xlu1 %3788 }
 0x834   :  { %v3807_v10 = vsel %vm3802_vm15, %v12946_v22, %v13110_v14 }
 0x835   :  { %v13112_v1 = vpop.permute.xlu0 %3527  ;;  %v13114_v8 = vpop.permute.xlu2 %3718  ;;  %4894 = vmatpush.msra.mxu1 %v3807_v10 }
 0x836   :  { %v13121_v51 = vsel %vm17621_vm12, %v3526_v61, %v13112_v1  ;;  %v3737_v9 = vsel %vm3732_vm0, %v12991_v47, %v13114_v8  ;;  %vm17624_vm12 = vcmask 97280  }
 0x837   :  { %4895 = vmatpush.msra.mxu1 %v3737_v9 }
 0x839   :  { %4949 = vmatpush.msrb.mxu1 %v12816_v58 }
 0x83a   :  { %2919 = vrot.lane.b32.xlu1 %v12692_v57, %s17603_s23 }
 0x83b   :  { %2917 = vrot.lane.b32.xlu0 %v12563_v60, %s17603_s23  ;;  %4066 = vrot.lane.b32.xlu2 %v12692_v57, %s7483_s29  ;;  %v13133_v22 = vpop.permute.xlu1 %2983 }
 0x83c   :  { %4950 = vmatpush.msrb.mxu1 %v12895_v38  ;;  %v3002_v58 = vsel %vm17622_vm13, %v12802_v49, %v13133_v22  ;;  %v4374_v49 = vld [vmem:[#allocation2 + $0x160] sm:$0xff]  ;;  %vm17625_vm13 = vmmov %vm17624_vm12 }
 0x83d   :  { %v13136_v59 = vpop.permute.xlu0 %4064  ;;  %v13138_v47 = vpop.permute.xlu2 %2913  ;;  %4913 = vmatpush.msra.mxu2 %v3002_v58 }
 0x83e   :  { %v4080_v3 = vsel %vm17619_vm1, %v4063_v52, %v13136_v59  ;;  %v2933_v60 = vsel %vm17623_vm7, %v12824_v33, %v13138_v47  ;;  %4951 = vmatpush.msrb.mxu1 %v12925_v16  ;;  %vm17627_vm1 = vcmask 261120   ;;  %vm17628_vm7 = vcmask 572416  }
 0x83f   :  { %4982 = vmatpush.msrb.mxu3 %v4080_v3  ;;  %4914 = vmatpush.msra.mxu2 %v2933_v60 }
 0x840   :  { %4952 = vmatpush.msrb.mxu1 %v12899_v46  ;;  %v4361_v46 = vld [vmem:[#allocation2 + $0xf8] sm:$0xff] }
 0x841   :  { %4915 = vmatpush.msra.mxu2 %v4374_v49 }
 0x842   :  { %3667 = vrot.lane.b32.xlu1 %v11962_v55, %s7551_s17  ;;  %4953 = vmatpush.msrb.mxu1 %v12960_v28  ;;  %s17626_s17 = smov 32  }
 0x843   :  { %3462 = vrot.lane.b32.xlu0 %v12688_v19, %s7544_s26  ;;  %4275 = vrot.lane.b32.xlu2 %v12688_v19, %s17613_s20 }
 0x844   :  { %v13157_v33 = vpop.permute.xlu1 %3460  ;;  %4954 = vmatpush.msrb.mxu1 %v3340_v21  ;;  %4916 = vmatpush.msra.mxu2 %v4361_v46 }
 0x845   :  { %v3459_v38 = vpop.permute.xlu0 %3458  ;;  %v13159_v16 = vpop.permute.xlu2 %3393 }
 0x846   :  { %v13163_v43 = vsel %vm17624_vm12, %v12887_v40, %v3459_v38  ;;  %v13167_v28 = vsel %vm17625_vm13, %v3459_v38, %v13157_v33  ;;  %4955 = vmatpush.msrb.mxu1 %v3273_v34  ;;  %4917 = vmatpush.msra.mxu2 %v4348_v23  ;;  %vm17629_vm12 = vmmov %vm17627_vm1  ;;  %vm17630_vm13 = vcmask 588800   ;;  %v13279_v38 = vld [vmem:[#allocation2] sm:$0xff] }
 0x848   :  { %4956 = vmatpush.msrb.mxu1 %v3205_v53  ;;  %4918 = vmatpush.msra.mxu2 %v4335_v4 }
 0x84a   :  { %3395 = vrot.lane.b32.xlu1 %v12688_v19, %s7537_s25 }
 0x84b   :  { %4206 = vrot.lane.b32.xlu0 %v12688_v19, %s7549_s27  ;;  %4004 = vrot.lane.b32.xlu2 %v12692_v57, %s17626_s17 }
 0x84c   :  { %v13175_v40 = vpop.permute.xlu1 %4002 }
 0x84d   :  { %v4001_v26 = vpop.permute.xlu0 %4000  ;;  %v13177_v63 = vpop.permute.xlu2 %3052 }
 0x84e   :  { %v4017_v7 = vsel %vm17627_vm1, %v12970_v29, %v4001_v26  ;;  %v3070_v61 = vsel %vm17628_vm7, %v3051_v44, %v13177_v63  ;;  %v4018_v21 = vsel %vm17629_vm12, %v4001_v26, %v13175_v40  ;;  %v13209_v44 = vld [vmem:[%s16032_s3 + $0x10] sm:$0xff]  ;;  %vm17631_vm1 = vmmov %vm17630_vm13 }
 0x84f   :  { %4937 = vmatpush.msra.mxu0 %v4017_v7  ;;  %4983 = vmatpush.msrb.mxu3 %v4018_v21  ;;  %vm17632_vm7 = vmmov %vm17631_vm1 }
 0x850   :  { %4738 = vmatmul.f32.gmra.mxu2 %v13209_v44  ;;  %4692 = vmatmul.f32.gmra.mxu0 %v13209_v44  ;;  %vm17633_vm12 = vmmov %vm17631_vm1 }
 0x851   :  { %4784 = vmatmul.f32.gmra.mxu1 %v13209_v44  ;;  %4876 = vmatmul.f32.gmra.mxu3 %v13209_v44 }
 0x852   :  { %4137 = vrot.lane.b32.xlu1 %v12688_v19, %s7489_s15 }
 0x853   :  { %3599 = vrot.lane.b32.xlu0 %v13071_v45, %s16354_s19  ;;  %3934 = vrot.lane.b32.xlu2 %v12692_v57, %s16356_s2  ;;  %s7561_s19 = smov 56  }
 0x854   :  { %v3392_v35 = vpop.permute.xlu1 %3391 }
 0x855   :  { %v13191_v52 = vpop.permute.xlu0 %3119  ;;  %v3861_v29 = vpop.permute.xlu2 %3860  ;;  %v13195_v12 = vsel %vm2206_vm11, %v12950_v17, %v3392_v35  ;;  %v13204_v0 = vsel %vm2206_vm11, %v3392_v35, %v13159_v16 }
 0x856   :  { %v3137_v54 = vsel %vm1420_vm14, %v12995_v62, %v13191_v52  ;;  %v3878_v56 = vsel %vm3872_vm8, %v13075_v15, %v3861_v29 }
 0x857   :  { %4957 = vmatpush.msrb.mxu1 %v3137_v54 }
 0x858   :  { %6967 = vmatmul.msk.f32.vlgmr.msrb.gmra.mxu2 %vm17630_vm13, %v12682_v41  ;;  %4827 = vmatmul.f32.vlgmr.msrb.gmra.mxu0 %v12933_v18  ;;  %vm17634_vm13 = vmmov %vm17631_vm1 }
 0x859   :  { %4958 = vmatpush.msrb.mxu1 %v3070_v61 }
 0x85a   :  { %3531 = vrot.lane.b32.xlu1 %v13071_v45, %s7553_s1  ;;  %6969 = vmatmul.msk.f32.vlgmr.msra.gmra.mxu1 %vm17631_vm1, %v12682_v41  ;;  %vm17635_vm1 = vcmask 982016  }
 0x85b   :  { %3864 = vrot.lane.b32.xlu0 %v12692_v57, %s7556_s28  ;;  %3328 = vrot.lane.b32.xlu2 %v12688_v19, %s7532_s22 }
 0x85c   :  { %v13219_v17 = vpop.permute.xlu1 %3932 }
 0x85d   :  { %v3931_v62 = vpop.permute.xlu0 %3930  ;;  %v3257_v15 = vpop.permute.xlu2 %3256 }
 0x85e   :  { %v3948_v34 = vsel %vm3942_vm2, %v12972_v11, %v3931_v62  ;;  %v13227_v13 = vsel %vm3266_vm3, %v13092_v30, %v3257_v15  ;;  %v3949_v53 = vsel %vm3942_vm2, %v3931_v62, %v13219_v17 }
 0x85f   :  { %4938 = vmatpush.msra.mxu0 %v3948_v34  ;;  %4984 = vmatpush.msrb.mxu3 %v3949_v53 }
 0x860   :  { %6968 = vmatmul.msk.f32.gmra.mxu2 %vm17632_vm7, %v12904_v39  ;;  %4830 = vmatmul.f32.gmra.mxu0 %v13209_v44 }
 0x861   :  { %4939 = vmatpush.msra.mxu0 %v3878_v56  ;;  %v4375_v56 = vld [vmem:[#allocation2 + $0x168] sm:$0xff] }
 0x862   :  { %3794 = vrot.lane.b32.xlu1 %v12692_v57, %s7557_s16  ;;  %6970 = vmatmul.msk.f32.gmra.mxu1 %vm17633_vm12, %v12904_v39  ;;  %vm17636_vm12 = vmmov %vm17632_vm7 }
 0x863   :  { %3260 = vrot.lane.b32.xlu0 %v12688_v19, %s7558_s30  ;;  %4068 = vrot.lane.b32.xlu2 %v12688_v19, %s7483_s29 }
 0x864   :  { %v13240_v11 = vpop.permute.xlu1 %3326 }
 0x865   :  { %v3325_v30 = vpop.permute.xlu0 %3324  ;;  %v13244_v10 = vpop.permute.xlu2 %3792 }
 0x866   :  { %v13248_v9 = vsel %vm2008_vm4, %v13050_v36, %v3325_v30  ;;  %v13252_v58 = vsel %vm2008_vm4, %v3325_v30, %v13240_v11  ;;  %v13346_v30 = vld [vmem:[%s16032_s3 + $0x8] sm:$0xff] }
 0x868   :  { %4919 = vmatmul.f32.vlgmr.msra.gmra.mxu2 %v12933_v18 }
 0x86a   :  { %3464 = vrot.lane.b32.xlu1 %v13071_v45, %s7544_s26 }
 0x86b   :  { %4279 = vrot.lane.b32.xlu0 %v11962_v55, %s17613_s20  ;;  %4277 = vrot.lane.b32.xlu2 %v13071_v45, %s17613_s20 }
 0x86c   :  { %v13263_v41 = vpop.permute.xlu1 %2985 }
 0x86d   :  { %v13267_v36 = vpop.permute.xlu0 %3862  ;;  %v13269_v3 = vpop.permute.xlu2 %3190  ;;  %v3003_v60 = vsel %vm17634_vm13, %v13133_v22, %v13263_v41  ;;  %vm17637_vm13 = vmmov %vm17632_vm7 }
 0x86e   :  { %v3879_v49 = vsel %vm3872_vm8, %v3861_v29, %v13267_v36  ;;  %4959 = vmatpush.msrb.mxu1 %v3003_v60 }
 0x86f   :  { %4985 = vmatpush.msrb.mxu3 %v3879_v49 }
 0x870   :  { %4922 = vmatmul.f32.gmra.mxu2 %v13209_v44 }
 0x872   :  { %3192 = vrot.lane.b32.xlu1 %v12688_v19, %s7560_s21 }
 0x873   :  { %4303 = vrot.lane.b32.xlu0 %v13279_v38, %s7561_s19  ;;  %4006 = vrot.lane.b32.xlu2 %v12688_v19, %s17626_s17 }
 0x874   :  { %v3791_v22 = vpop.permute.xlu1 %3790 }
 0x875   :  { %v13285_v46 = vpop.permute.xlu0 %3258  ;;  %v13287_v23 = vpop.permute.xlu2 %4273  ;;  %v3808_v4 = vsel %vm3802_vm15, %v13110_v14, %v3791_v22  ;;  %v3809_v26 = vsel %vm3802_vm15, %v3791_v22, %v13244_v10 }
 0x876   :  { %v13295_v7 = vsel %vm3266_vm3, %v3257_v15, %v13285_v46  ;;  %v4288_v61 = vsel %vm16358_vm9, %v12920_v6, %v13287_v23  ;;  %4940 = vmatpush.msra.mxu0 %v3808_v4  ;;  %4986 = vmatpush.msrb.mxu3 %v3809_v26  ;;  %v4349_v15 = vld [vmem:[#allocation2 + $0x98] sm:$0xff] }
 0x877   :  { %5025 = vmatpush.msrb.mxu2 %v4288_v61 }
 0x87a   :  { %4210 = vrot.lane.b32.xlu1 %v11962_v55, %s7549_s27 }
 0x87b   :  { %4208 = vrot.lane.b32.xlu0 %v13071_v45, %s7549_s27  ;;  %3724 = vrot.lane.b32.xlu2 %v12692_v57, %s7559_s13  ;;  %s16355_s27 = smov 58  }
 0x87c   :  { %v3189_v14 = vpop.permute.xlu1 %3188 }
 0x87d   :  { %v13307_v21 = vpop.permute.xlu0 %2915  ;;  %v13309_v35 = vpop.permute.xlu2 %3665  ;;  %v13313_v6 = vsel %vm3198_vm10, %v13094_v32, %v3189_v14  ;;  %v13325_v57 = vsel %vm3198_vm10, %v3189_v14, %v13269_v3  ;;  %v4362_v32 = vld [vmem:[#allocation2 + $0x100] sm:$0xff]  ;;  %v4376_v14 = vld [vmem:[#allocation2 + $0x170] sm:$0xff] }
 0x87e   :  { %v2934_v29 = vsel %vm17635_vm1, %v13138_v47, %v13307_v21  ;;  %v13321_v54 = vsel %vm3669_vm5, %v13014_v50, %v13309_v35  ;;  %vm17638_vm1 = vmmov %vm17632_vm7 }
 0x87f   :  { %4960 = vmatpush.msrb.mxu1 %v2934_v29 }
 0x881   :  { %4961 = vmatpush.msrb.mxu1 %v4375_v56 }
 0x882   :  { %4234 = vrot.lane.b32.xlu1 %v13279_v38, %s16355_s27  ;;  %s17643_s27 = smov 40  }
 0x883   :  { %3936 = vrot.lane.b32.xlu0 %v12688_v19, %s16356_s2  ;;  %3397 = vrot.lane.b32.xlu2 %v13071_v45, %s7537_s25  ;;  %v4336_v19 = vld [vmem:[#allocation2 + $0x30] sm:$0xff] }
 0x884   :  { %4962 = vmatpush.msrb.mxu1 %v4362_v32  ;;  %v13333_v50 = vpop.permute.xlu1 %3722 }
 0x885   :  { %v3721_v47 = vpop.permute.xlu0 %3720  ;;  %v13335_v62 = vpop.permute.xlu2 %3056 }
 0x886   :  { %v3738_v34 = vsel %vm3732_vm0, %v13114_v8, %v3721_v47  ;;  %v3739_v53 = vsel %vm3732_vm0, %v3721_v47, %v13333_v50  ;;  %4963 = vmatpush.msrb.mxu1 %v4349_v15  ;;  %v13355_v8 = vld [vmem:[#allocation2 + $0x50] sm:$0xff]  ;;  %v4350_v47 = vld [vmem:[#allocation2 + $0xa0] sm:$0xff]  ;;  %v4351_v15 = vld [vmem:[#allocation2 + $0xa8] sm:$0xff] }
 0x887   :  { %4941 = vmatpush.msra.mxu0 %v3738_v34  ;;  %4987 = vmatpush.msrb.mxu3 %v3739_v53 }
 0x888   :  { %4964 = vmatpush.msrb.mxu1 %v4336_v19  ;;  %6971 = vmatmul.msk.f32.vlgmr.msra.gmra.mxu0 %vm17632_vm7, %v13346_v30  ;;  %vm17639_vm7 = vcmask 572416  }
 0x889   :  { %4995 = vmatpush.msrb.mxu0 %v13021_v20  ;;  %5041 = vmatpush.msra.mxu3 %v13025_v5 }
 0x88a   :  { %4141 = vrot.lane.b32.xlu1 %v11962_v55, %s7489_s15  ;;  %6973 = vmatmul.msk.f32.vlgmr.msrb.gmra.mxu3 %vm17636_vm12, %v13346_v30  ;;  %vm17640_vm12 = vmmov %vm17638_vm1 }
 0x88b   :  { %4996 = vmatpush.msrb.mxu0 %v13054_v27  ;;  %4139 = vrot.lane.b32.xlu0 %v13071_v45, %s7489_s15  ;;  %s7563_s15 = smov 60  }
 0x88c   :  { %3125 = vrot.lane.b32.xlu2 %v13355_v8, %s7517_s24  ;;  %v13360_v20 = vpop.permute.xlu1 %3123  ;;  %5042 = vmatpush.msra.mxu3 %v13065_v25 }
 0x88d   :  { %4997 = vmatpush.msrb.mxu0 %v13061_v24  ;;  %v3122_v5 = vpop.permute.xlu0 %3121  ;;  %v2988_v60 = vpop.permute.xlu2 %2987  ;;  %4965 = vmatmul.f32.vlgmr.msrb.gmra.mxu1 %v12933_v18 }
 0x88e   :  { %v3138_v27 = vsel %vm1420_vm14, %v13191_v52, %v3122_v5  ;;  %v3004_v49 = vsel %vm17637_vm13, %v13263_v41, %v2988_v60  ;;  %v3139_v24 = vsel %vm1420_vm14, %v3122_v5, %v13360_v20  ;;  %5043 = vmatpush.msra.mxu3 %v13121_v51  ;;  %vm17641_vm13 = vcmask 244736   ;;  %v4337_v5 = vld [vmem:[#allocation2 + $0x38] sm:$0xff] }
 0x88f   :  { %4998 = vmatpush.msrb.mxu0 %v13163_v43 }
 0x890   :  { %5044 = vmatpush.msra.mxu3 %v13167_v28  ;;  %6972 = vmatmul.msk.f32.gmra.mxu0 %vm17638_vm1, %v12904_v39  ;;  %vm17642_vm1 = vmmov %vm17639_vm7 }
 0x891   :  { %4999 = vmatpush.msrb.mxu0 %v13195_v12 }
 0x892   :  { %4165 = vrot.lane.b32.xlu1 %v13279_v38, %s7563_s15  ;;  %5045 = vmatpush.msra.mxu3 %v13204_v0 }
 0x893   :  { %5000 = vmatpush.msrb.mxu0 %v13248_v9  ;;  %3866 = vrot.lane.b32.xlu0 %v13355_v8, %s7556_s28 }
 0x894   :  { %3330 = vrot.lane.b32.xlu2 %v13071_v45, %s7532_s22  ;;  %v3055_v25 = vpop.permute.xlu1 %3054  ;;  %6974 = vmatmul.msk.f32.gmra.mxu3 %vm17640_vm12, %v12904_v39  ;;  %vm17645_vm12 = vcmask 64512  }
 0x895   :  { %5001 = vmatpush.msrb.mxu0 %v13227_v13  ;;  %v13387_v51 = vpop.permute.xlu0 %4204  ;;  %v13389_v43 = vpop.permute.xlu2 %4066  ;;  %v3071_v28 = vsel %vm17639_vm7, %v13177_v63, %v3055_v25  ;;  %4968 = vmatmul.f32.gmra.mxu1 %v13209_v44  ;;  %v3072_v0 = vsel %vm17642_vm1, %v3055_v25, %v13335_v62  ;;  %vm17644_vm7 = vcmask 228352   ;;  %vm17647_vm1 = vcmask 588800  }
 0x896   :  { %v4219_v52 = vsel %vm2886_vm6, %v13036_v42, %v13387_v51  ;;  %v4081_v12 = vsel %vm17641_vm13, %v13136_v59, %v13389_v43  ;;  %5046 = vmatpush.msra.mxu3 %v13252_v58  ;;  %vm17646_vm13 = vcmask 80896  }
 0x897   :  { %5002 = vmatpush.msrb.mxu0 %v13313_v6  ;;  %5026 = vmatpush.msrb.mxu2 %v4219_v52  ;;  %v4377_v6 = vld [vmem:[#allocation2 + $0x178] sm:$0xff] }
 0x898   :  { %5047 = vmatpush.msra.mxu3 %v13295_v7 }
 0x899   :  { %5003 = vmatpush.msrb.mxu0 %v3138_v27 }
 0x89a   :  { %4070 = vrot.lane.b32.xlu1 %v13071_v45, %s7483_s29  ;;  %5048 = vmatpush.msra.mxu3 %v13325_v57 }
 0x89b   :  { %3628 = vrot.lane.b32.xlu0 %v13279_v38, %s17643_s27  ;;  %5004 = vmatpush.msrb.mxu0 %v3071_v28  ;;  %s7564_s27 = smov 62  }
 0x89c   :  { %3058 = vrot.lane.b32.xlu2 %v13355_v8, %s7510_s18  ;;  %v13414_v39 = vpop.permute.xlu1 %4135  ;;  %5049 = vmatpush.msra.mxu3 %v3139_v24 }
 0x89d   :  { %v13416_v42 = vpop.permute.xlu0 %3597  ;;  %v13418_v59 = vpop.permute.xlu2 %4275  ;;  %v4150_v63 = vsel %vm17644_vm7, %v13038_v37, %v13414_v39  ;;  %5005 = vmatpush.msrb.mxu0 %v3004_v49  ;;  %vm17648_vm7 = vcmask 261120  }
 0x89e   :  { %v13426_v13 = vsel %vm17645_vm12, %v13017_v31, %v13416_v42  ;;  %v4289_v9 = vsel %vm16358_vm9, %v13287_v23, %v13418_v59  ;;  %5050 = vmatpush.msra.mxu3 %v3072_v0  ;;  %5027 = vmatpush.msrb.mxu2 %v4150_v63  ;;  %vm17650_vm12 = vcmask 982016  }
 0x89f   :  { %5071 = vmatpush.msra.mxu1 %v4289_v9 }
 0x8a0   :  { %5028 = vmatpush.msrb.mxu2 %v4081_v12 }
 0x8a2   :  { %3796 = vrot.lane.b32.xlu1 %v13355_v8, %s7557_s16 }
 0x8a3   :  { %3262 = vrot.lane.b32.xlu0 %v13071_v45, %s7558_s30 }
 0x8a4   :  { %4072 = vrot.lane.b32.xlu2 %v11962_v55, %s7483_s29  ;;  %v13437_v31 = vpop.permute.xlu1 %3529 }
 0x8a5   :  { %v13439_v37 = vpop.permute.xlu0 %2989  ;;  %v13441_v58 = vpop.permute.xlu2 %4004  ;;  %v13446_v41 = vsel %vm17646_vm13, %v13112_v1, %v13437_v31  ;;  %vm17651_vm13 = vmmov %vm17650_vm12 }
 0x8a6   :  { %v3005_v22 = vsel %vm17647_vm1, %v2988_v60, %v13439_v37  ;;  %v4019_v23 = vsel %vm17648_vm7, %v13175_v40, %v13441_v58  ;;  %vm17652_vm1 = vcmask 97280   ;;  %vm17653_vm7 = vmmov %vm17650_vm12 }
 0x8a7   :  { %5051 = vmatpush.msra.mxu3 %v3005_v22  ;;  %5029 = vmatpush.msrb.mxu2 %v4019_v23 }
 0x8aa   :  { %3560 = vrot.lane.b32.xlu1 %v13279_v38, %s17649_s14  ;;  %s17654_s14 = smov 44  }
 0x8ab   :  { %2991 = vrot.lane.b32.xlu0 %v13355_v8, %s7504_s0 }
 0x8ac   :  { %4096 = vrot.lane.b32.xlu2 %v13279_v38, %s7564_s27  ;;  %v13459_v1 = vpop.permute.xlu1 %2919 }
 0x8ad   :  { %v2918_v4 = vpop.permute.xlu0 %2917  ;;  %v13461_v26 = vpop.permute.xlu2 %3934 }
 0x8ae   :  { %v2935_v40 = vsel %vm17650_vm12, %v13307_v21, %v2918_v4  ;;  %v3950_v7 = vsel %vm3942_vm2, %v13219_v17, %v13461_v26  ;;  %v2936_v61 = vsel %vm17651_vm13, %v2918_v4, %v13459_v1  ;;  %v4363_v17 = vld [vmem:[#allocation2 + $0x108] sm:$0xff]  ;;  %v4364_v21 = vld [vmem:[#allocation2 + $0x110] sm:$0xff]  ;;  %vm17657_vm12 = vcmask 228352  }
 0x8af   :  { %5006 = vmatpush.msrb.mxu0 %v2935_v40  ;;  %5030 = vmatpush.msrb.mxu2 %v3950_v7  ;;  %vm17658_vm13 = vcmask 64512   ;;  %v13627_v40 = vld [vmem:[%s16032_s3 + $0x18] sm:$0xff] }
 0x8b0   :  { %5052 = vmatpush.msra.mxu3 %v2936_v61 }
 0x8b1   :  { %5007 = vmatpush.msrb.mxu0 %v4376_v14 }
 0x8b2   :  { %3194 = vrot.lane.b32.xlu1 %v13071_v45, %s7560_s21  ;;  %5053 = vmatpush.msra.mxu3 %v4377_v6 }
 0x8b3   :  { %4010 = vrot.lane.b32.xlu0 %v11962_v55, %s17626_s17  ;;  %5008 = vmatpush.msrb.mxu0 %v4363_v17 }
 0x8b4   :  { %4008 = vrot.lane.b32.xlu2 %v13071_v45, %s17626_s17  ;;  %v3668_v29 = vpop.permute.xlu1 %3667  ;;  %5054 = vmatpush.msra.mxu3 %v4364_v21 }
 0x8b5   :  { %v13476_v57 = vpop.permute.xlu0 %3462  ;;  %v13478_v56 = vpop.permute.xlu2 %3328  ;;  %v3680_v32 = vsel %vm3669_vm5, %v13309_v35, %v3668_v29  ;;  %5009 = vmatpush.msrb.mxu0 %v4350_v47  ;;  %v4338_v35 = vld [vmem:[#allocation2 + $0x40] sm:$0xff]  ;;  %vm17655_vm5 = vcmask 244736  }
 0x8b6   :  { %v13485_v34 = vsel %vm17652_vm1, %v13157_v33, %v13476_v57  ;;  %v13490_v53 = vsel %vm2008_vm4, %v13240_v11, %v13478_v56  ;;  %v13494_v19 = vsel %vm17653_vm7, %v3680_v32, %v12141_v2  ;;  %5055 = vmatpush.msra.mxu3 %v4351_v15  ;;  %vm17660_vm1 = vcmask 80896  }
 0x8b7   :  { %5010 = vmatpush.msrb.mxu0 %v4337_v5  ;;  %vm17661_vm7 = vcmask 261120  }
 0x8b8   :  { %5056 = vmatpush.msra.mxu3 %v4338_v35  ;;  %5011 = vmatmul.f32.vlgmr.msrb.gmra.mxu0 %v12933_v18 }
 0x8b9   :  { %5057 = vmatmul.f32.vlgmr.msra.gmra.mxu3 %v12933_v18 }
 0x8ba   :  { %3492 = vrot.lane.b32.xlu1 %v13279_v38, %s17654_s14  ;;  %s17656_s14 = smov 8  }
 0x8bb   :  { %2921 = vrot.lane.b32.xlu0 %v13355_v8, %s17603_s23 }
 0x8bc   :  { %3726 = vrot.lane.b32.xlu2 %v13355_v8, %s7559_s13  ;;  %v3396_v2 = vpop.permute.xlu1 %3395 }
 0x8bd   :  { %v13504_v33 = vpop.permute.xlu0 %4206  ;;  %v13506_v11 = vpop.permute.xlu2 %4068  ;;  %v3410_v60 = vsel %vm2206_vm11, %v13159_v16, %v3396_v2 }
 0x8be   :  { %v4220_v18 = vsel %vm2886_vm6, %v13387_v51, %v13504_v33  ;;  %v4082_v27 = vsel %vm17655_vm5, %v13389_v43, %v13506_v11  ;;  %vm17663_vm5 = vcmask 588800  }
 0x8bf   :  { %5072 = vmatpush.msra.mxu1 %v4220_v18 }
 0x8c0   :  { %5014 = vmatmul.f32.gmra.mxu0 %v13209_v44 }
 0x8c1   :  { %5060 = vmatmul.f32.gmra.mxu3 %v13209_v44 }
 0x8c2   :  { %3940 = vrot.lane.b32.xlu1 %v11962_v55, %s16356_s2 }
 0x8c3   :  { %3938 = vrot.lane.b32.xlu0 %v13071_v45, %s16356_s2  ;;  %s7565_s2 = smov 112  }
 0x8c4   :  { %3601 = vrot.lane.b32.xlu2 %v11962_v55, %s17656_s14  ;;  %v13524_v16 = vpop.permute.xlu1 %4137  ;;  %s17659_s14 = smov 46  }
 0x8c5   :  { %v13526_v8 = vpop.permute.xlu0 %3599  ;;  %v4278_v49 = vpop.permute.xlu2 %4277  ;;  %v4151_v24 = vsel %vm17657_vm12, %v13414_v39, %v13524_v16  ;;  %vm17664_vm12 = vcmask 97280  }
 0x8c6   :  { %v13534_v25 = vsel %vm17658_vm13, %v13416_v42, %v13526_v8  ;;  %v4290_v51 = vsel %vm16358_vm9, %v13418_v59, %v4278_v49  ;;  %5073 = vmatpush.msra.mxu1 %v4151_v24  ;;  %vm4307_vm13 = vcmask 457728  }
 0x8c7   :  { %5117 = vmatpush.msra.mxu0 %v4290_v51 }
 0x8c8   :  { %5074 = vmatpush.msra.mxu1 %v4082_v27 }
 0x8ca   :  { %3425 = vrot.lane.b32.xlu1 %v13279_v38, %s17659_s14  ;;  %s7567_s14 = smov 116  }
 0x8cb   :  { %3965 = vrot.lane.b32.xlu0 %v13279_v38, %s7565_s2 }
 0x8cc   :  { %3127 = vrot.lane.b32.xlu2 %v13071_v45, %s7517_s24  ;;  %v13544_v43 = vpop.permute.xlu1 %3531 }
 0x8cd   :  { %v13546_v28 = vpop.permute.xlu0 %3864  ;;  %v13548_v52 = vpop.permute.xlu2 %4006  ;;  %v13553_v12 = vsel %vm17660_vm1, %v13437_v31, %v13544_v43  ;;  %vm17665_vm1 = vmmov %vm17663_vm5 }
 0x8ce   :  { %v3880_v0 = vsel %vm3872_vm8, %v13267_v36, %v13546_v28  ;;  %v4020_v39 = vsel %vm17661_vm7, %v13441_v58, %v13548_v52  ;;  %vm4238_vm7 = vcmask 474112  }
 0x8cf   :  { %5031 = vmatpush.msrb.mxu2 %v3880_v0  ;;  %5075 = vmatpush.msra.mxu1 %v4020_v39 }
 0x8d2   :  { %3870 = vrot.lane.b32.xlu1 %v11962_v55, %s7556_s28 }
 0x8d3   :  { %3868 = vrot.lane.b32.xlu0 %v13071_v45, %s7556_s28  ;;  %s17662_s28 = smov 48  }
 0x8d4   :  { %3533 = vrot.lane.b32.xlu2 %v11962_v55, %s7553_s1  ;;  %v13567_v42 = vpop.permute.xlu1 %3794  ;;  %s7566_s1 = smov 114  }
 0x8d5   :  { %v13569_v59 = vpop.permute.xlu0 %3260  ;;  %v13571_v36 = vpop.permute.xlu2 %3724  ;;  %v3810_v63 = vsel %vm3802_vm15, %v13244_v10, %v13567_v42 }
 0x8d6   :  { %v3276_v9 = vsel %vm3266_vm3, %v13285_v46, %v13569_v59  ;;  %v3740_v31 = vsel %vm3732_vm0, %v13333_v50, %v13571_v36  ;;  %5032 = vmatpush.msrb.mxu2 %v3810_v63 }
 0x8d8   :  { %5033 = vmatpush.msrb.mxu2 %v3740_v31 }
 0x8d9   :  { %6975 = vmatmul.msk.f32.vlgmr.msrb.gmra.mxu2 %vm17663_vm5, %v13346_v30  ;;  %vm17667_vm5 = vcmask 572416  }
 0x8da   :  { %5087 = vmatpush.msra.mxu2 %v13321_v54  ;;  %3358 = vrot.lane.b32.xlu1 %v13279_v38, %s17662_s28 }
 0x8db   :  { %3895 = vrot.lane.b32.xlu0 %v13279_v38, %s7566_s1 }
 0x8dc   :  { %3060 = vrot.lane.b32.xlu2 %v13071_v45, %s7510_s18  ;;  %v13591_v10 = vpop.permute.xlu1 %3464  ;;  %5088 = vmatpush.msra.mxu2 %v13426_v13 }
 0x8dd   :  { %v4280_v46 = vpop.permute.xlu0 %4279  ;;  %v13594_v50 = vpop.permute.xlu2 %3397  ;;  %v13599_v54 = vsel %vm17664_vm12, %v13476_v57, %v13591_v10  ;;  %vm16359_vm12 = vcmask 490496  }
 0x8de   :  { %v13603_v58 = vsel %vm2206_vm11, %v3396_v2, %v13594_v50  ;;  %5089 = vmatpush.msra.mxu2 %v13446_v41  ;;  %v4291_v22 = vsel %vm16358_vm9, %v4278_v49, %v4280_v46  ;;  %vm17676_vm9 = vcmask 261120  }
 0x8e0   :  { %5090 = vmatpush.msra.mxu2 %v13485_v34 }
 0x8e1   :  { %6976 = vmatmul.msk.f32.gmra.mxu2 %vm17665_vm1, %v13627_v40 }
 0x8e2   :  { %3800 = vrot.lane.b32.xlu1 %v11962_v55, %s7557_s16  ;;  %5091 = vmatpush.msra.mxu2 %v3410_v60 }
 0x8e3   :  { %3798 = vrot.lane.b32.xlu0 %v13071_v45, %s7557_s16  ;;  %s17670_s16 = smov 100  }
 0x8e4   :  { %3466 = vrot.lane.b32.xlu2 %v11962_v55, %s7544_s26  ;;  %v13613_v13 = vpop.permute.xlu1 %3192  ;;  %5092 = vmatpush.msra.mxu2 %v13490_v53  ;;  %s17666_s26 = smov 96  }
 0x8e5   :  { %v13617_v41 = vpop.permute.xlu0 %4303  ;;  %v3208_v4 = vsel %vm3198_vm10, %v13269_v3, %v13613_v13 }
 0x8e6   :  { %v13619_v23 = vpop.permute.xlu2 %3125  ;;  %v4312_v7 = vsel %vm4307_vm13, %v4291_v22, %v13617_v41  ;;  %5093 = vmatpush.msra.mxu2 %v3276_v9 }
 0x8e7   :  { %v3140_v61 = vsel %vm1420_vm14, %v13360_v20, %v13619_v23  ;;  %5163 = vmatpush.msrb.mxu3 %v4312_v7 }
 0x8e8   :  { %5094 = vmatpush.msra.mxu2 %v3208_v4 }
 0x8ea   :  { %3291 = vrot.lane.b32.xlu1 %v13279_v38, %s17666_s26  ;;  %5095 = vmatpush.msra.mxu2 %v3140_v61  ;;  %v4656_v61 = vld [vmem:[%s16033_s4 + $0x8] sm:$0xff] }
 0x8eb   :  { %3825 = vrot.lane.b32.xlu0 %v13279_v38, %s7567_s14 }
 0x8ec   :  { %2993 = vrot.lane.b32.xlu2 %v13071_v45, %s7504_s0  ;;  %v4211_v3 = vpop.permute.xlu1 %4210 }
 0x8ed   :  { %v4209_v14 = vpop.permute.xlu0 %4208 }
 0x8ee   :  { %v13642_v6 = vpop.permute.xlu2 %3330  ;;  %v4221_v20 = vsel %vm2886_vm6, %v13504_v33, %v4209_v14  ;;  %v4222_v21 = vsel %vm2886_vm6, %v4209_v14, %v4211_v3  ;;  %vm17669_vm6 = vcmask 228352   ;;  %v4655_v3 = vld [vmem:[%s16033_s4] sm:$0xff]  ;;  %v4378_v14 = vld [vmem:[#allocation2 + $0x180] sm:$0xff] }
 0x8ef   :  { %v13649_v17 = vsel %vm2008_vm4, %v13478_v56, %v13642_v6  ;;  %5118 = vmatpush.msra.mxu0 %v4221_v20  ;;  %vm17671_vm1 = vmmov %vm17669_vm6 }
 0x8f2   :  { %3730 = vrot.lane.b32.xlu1 %v11962_v55, %s7559_s13 }
 0x8f3   :  { %3728 = vrot.lane.b32.xlu0 %v13071_v45, %s7559_s13  ;;  %s7568_s13 = smov 118  }
 0x8f4   :  { %3399 = vrot.lane.b32.xlu2 %v11962_v55, %s7537_s25  ;;  %v13658_v29 = vpop.permute.xlu1 %4234  ;;  %s17668_s25 = smov 98  }
 0x8f5   :  { %v13660_v57 = vpop.permute.xlu0 %3936  ;;  %v4243_v56 = vsel %vm4238_vm7, %v4222_v21, %v13658_v29  ;;  %v4352_v21 = vld [vmem:[#allocation2 + $0xb0] sm:$0xff] }
 0x8f6   :  { %v13662_v32 = vpop.permute.xlu2 %3058  ;;  %v3951_v47 = vsel %vm3942_vm2, %v13461_v26, %v13660_v57  ;;  %5164 = vmatpush.msrb.mxu3 %v4243_v56 }
 0x8f7   :  { %v3073_v15 = vsel %vm17667_vm5, %v13335_v62, %v13662_v32  ;;  %5076 = vmatpush.msra.mxu1 %v3951_v47  ;;  %v13682_v62 = vld [vmem:[#allocation2 + $0x8] sm:$0xff]  ;;  %vm16360_vm5 = vcmask 506880  }
 0x8f8   :  { %5096 = vmatpush.msra.mxu2 %v3073_v15  ;;  %v4339_v15 = vld [vmem:[#allocation2 + $0x48] sm:$0xff] }
 0x8fa   :  { %3223 = vrot.lane.b32.xlu1 %v13279_v38, %s17668_s25  ;;  %s17673_s25 = smov 58  }
 0x8fb   :  { %3755 = vrot.lane.b32.xlu0 %v13279_v38, %s7568_s13 }
 0x8fc   :  { %2923 = vrot.lane.b32.xlu2 %v13071_v45, %s17603_s23  ;;  %v4142_v34 = vpop.permute.xlu1 %4141 }
 0x8fd   :  { %v4140_v53 = vpop.permute.xlu0 %4139 }
 0x8fe   :  { %v4073_v26 = vpop.permute.xlu2 %4072  ;;  %v4152_v5 = vsel %vm17669_vm6, %v13524_v16, %v4140_v53  ;;  %v4153_v45 = vsel %vm17671_vm1, %v4140_v53, %v4142_v34  ;;  %vm17674_vm6 = vcmask 244736   ;;  %v13813_v34 = vld [vmem:[%s16032_s3] sm:$0xff] }
 0x8ff   :  { %5119 = vmatpush.msra.mxu0 %v4152_v5  ;;  %vm17675_vm1 = vmmov %vm17674_vm6 }
 0x902   :  { %3155 = vrot.lane.b32.xlu1 %v13279_v38, %s17670_s16  ;;  %s17678_s16 = smov 104  }
 0x903   :  { %4305 = vrot.lane.b32.xlu0 %v13682_v62, %s7561_s19  ;;  %s17672_s19 = smov 102  }
 0x904   :  { %3332 = vrot.lane.b32.xlu2 %v11962_v55, %s7532_s22  ;;  %v13689_v35 = vpop.permute.xlu1 %4165 }
 0x905   :  { %v13691_v2 = vpop.permute.xlu0 %3866  ;;  %v4174_v60 = vsel %vm16359_vm12, %v4153_v45, %v13689_v35  ;;  %vm17677_vm12 = vmmov %vm17676_vm9 }
 0x906   :  { %v13693_v33 = vpop.permute.xlu2 %4096  ;;  %v3881_v18 = vsel %vm3872_vm8, %v13546_v28, %v13691_v2  ;;  %5165 = vmatpush.msrb.mxu3 %v4174_v60 }
 0x907   :  { %5077 = vmatpush.msra.mxu1 %v3881_v18 }
 0x90a   :  { %3088 = vrot.lane.b32.xlu1 %v13279_v38, %s17672_s19 }
 0x90b   :  { %4236 = vrot.lane.b32.xlu0 %v13682_v62, %s17673_s25 }
 0x90c   :  { %3264 = vrot.lane.b32.xlu2 %v11962_v55, %s7558_s30  ;;  %v4071_v27 = vpop.permute.xlu1 %4070 }
 0x90d   :  { %v3629_v16 = vpop.permute.xlu0 %3628  ;;  %v4083_v24 = vsel %vm17674_vm6, %v13506_v11, %v4071_v27  ;;  %v4084_v51 = vsel %vm17675_vm1, %v4071_v27, %v4073_v26  ;;  %vm17681_vm1 = vcmask 64512  }
 0x90e   :  { %v4009_v49 = vpop.permute.xlu2 %4008  ;;  %3644 = vst.msk [vmem:[#allocation2 + $0x610] sm:$0xff] %vm17676_vm9, %v3629_v16  ;;  %v4105_v0 = vsel %vm16360_vm5, %v4084_v51, %v13693_v33  ;;  %5120 = vmatpush.msra.mxu0 %v4083_v24  ;;  %vm17679_vm9 = vcmask 588800  }
 0x90f   :  { %v4021_v28 = vsel %vm17677_vm12, %v13548_v52, %v4009_v49  ;;  %5166 = vmatpush.msrb.mxu3 %v4105_v0  ;;  %vm17680_vm6 = vmmov %vm17679_vm9 }
 0x910   :  { %5121 = vmatpush.msra.mxu0 %v4021_v28  ;;  %vm17683_vm5 = vmmov %vm17680_vm6 }
 0x912   :  { %3021 = vrot.lane.b32.xlu1 %v13279_v38, %s17678_s16 }
 0x913   :  { %4167 = vrot.lane.b32.xlu0 %v13682_v62, %s7563_s15 }
 0x914   :  { %3196 = vrot.lane.b32.xlu2 %v11962_v55, %s7560_s21  ;;  %v13720_v11 = vpop.permute.xlu1 %3796 }
 0x915   :  { %v13722_v39 = vpop.permute.xlu0 %3262  ;;  %v3811_v63 = vsel %vm3802_vm15, %v13567_v42, %v13720_v11 }
 0x916   :  { %v13724_v52 = vpop.permute.xlu2 %3726  ;;  %v3277_v9 = vsel %vm3266_vm3, %v13569_v59, %v13722_v39  ;;  %5078 = vmatpush.msra.mxu1 %v3811_v63 }
 0x917   :  { %v3741_v31 = vsel %vm3732_vm0, %v13571_v36, %v13724_v52 }
 0x918   :  { %5079 = vmatpush.msra.mxu1 %v3741_v31 }
 0x919   :  { %6977 = vmatmul.msk.f32.vlgmr.msra.gmra.mxu1 %vm17679_vm9, %v13346_v30  ;;  %vm17682_vm9 = vcmask 326656  }
 0x91a   :  { %2953 = vrot.lane.b32.xlu1 %v13279_v38, %s17613_s20  ;;  %5133 = vmatpush.msrb.mxu1 %v13494_v19 }
 0x91b   :  { %2925 = vrot.lane.b32.xlu0 %v11962_v55, %s17603_s23 }
 0x91c   :  { %3129 = vrot.lane.b32.xlu2 %v11962_v55, %s7517_s24  ;;  %v3561_v42 = vpop.permute.xlu1 %3560  ;;  %5134 = vmatpush.msrb.mxu1 %v13534_v25 }
 0x91d   :  { %v13745_v59 = vpop.permute.xlu0 %2991  ;;  %3576 = vst.msk [vmem:[#allocation2 + $0x5a8] sm:$0xff] %vm17677_vm12, %v3561_v42 }
 0x91e   :  { %v3602_v36 = vpop.permute.xlu2 %3601  ;;  %v3006_v38 = vsel %vm17680_vm6, %v13439_v37, %v13745_v59  ;;  %5135 = vmatpush.msrb.mxu1 %v13553_v12  ;;  %vm17686_vm6 = vcmask 982016  }
 0x91f   :  { %v3615_v19 = vsel %vm17681_vm1, %v13526_v8, %v3602_v36  ;;  %5097 = vmatpush.msra.mxu2 %v3006_v38  ;;  %vm17687_vm1 = vcmask 80896   ;;  %v4379_v36 = vld [vmem:[#allocation2 + $0x188] sm:$0xff]  ;;  %v4366_v38 = vld [vmem:[#allocation2 + $0x120] sm:$0xff] }
 0x920   :  { %v13755_v46 = vsel %vm17682_vm9, %v3615_v19, %v3629_v16  ;;  %5136 = vmatpush.msrb.mxu1 %v13599_v54  ;;  %vm17688_vm9 = vcmask 343040  }
 0x921   :  { %6978 = vmatmul.msk.f32.gmra.mxu1 %vm17683_vm5, %v13627_v40  ;;  %vm17684_vm5 = vmmov %vm17677_vm12 }
 0x922   :  { %2995 = vrot.lane.b32.xlu1 %v11962_v55, %s7504_s0  ;;  %5137 = vmatpush.msrb.mxu1 %v13603_v58  ;;  %vm17685_vm12 = vmmov %vm17684_vm5 }
 0x923   :  { %3062 = vrot.lane.b32.xlu0 %v11962_v55, %s7510_s18 }
 0x924   :  { %4098 = vrot.lane.b32.xlu2 %v13682_v62, %s7564_s27  ;;  %v13767_v37 = vpop.permute.xlu1 %3194  ;;  %5138 = vmatpush.msrb.mxu1 %v13649_v17 }
 0x925   :  { %v4011_v8 = vpop.permute.xlu0 %4010  ;;  %v3209_v12 = vsel %vm3198_vm10, %v13613_v13, %v13767_v37 }
 0x926   :  { %v13770_v25 = vpop.permute.xlu2 %3127  ;;  %v4022_v54 = vsel %vm17684_vm5, %v4009_v49, %v4011_v8  ;;  %5139 = vmatpush.msrb.mxu1 %v3277_v9  ;;  %vm17689_vm5 = vcmask 572416   ;;  %v13851_v8 = vpop.f32.mrf.mxu3 }
 0x927   :  { %v3141_v55 = vsel %vm1420_vm14, %v13619_v23, %v13770_v25  ;;  %v4036_v58 = vsel %vm3266_vm3, %v4022_v54, %v12400_v48 }
 0x928   :  { %5167 = vmatpush.msrb.mxu3 %v4036_v58  ;;  %5140 = vmatpush.msrb.mxu1 %v3209_v12  ;;  %v4353_v12 = vld [vmem:[#allocation2 + $0xb8] sm:$0xff] }
 0x92a   :  { %3827 = vrot.lane.b32.xlu1 %v13682_v62, %s7567_s14  ;;  %5141 = vmatpush.msrb.mxu1 %v3141_v55 }
 0x92b   :  { %3897 = vrot.lane.b32.xlu0 %v13682_v62, %s7566_s1 }
 0x92c   :  { %3967 = vrot.lane.b32.xlu2 %v13682_v62, %s7565_s2  ;;  %v3493_v13 = vpop.permute.xlu1 %3492 }
 0x92d   :  { %v2922_v22 = vpop.permute.xlu0 %2921  ;;  %3508 = vst.msk [vmem:[#allocation2 + $0x540] sm:$0xff] %vm17685_vm12, %v3493_v13  ;;  %vm3969_vm12 = vcmask 916480  }
 0x92e   :  { %v3534_v4 = vpop.permute.xlu2 %3533  ;;  %v2937_v48 = vsel %vm17686_vm6, %v13459_v1, %v2922_v22  ;;  %v4365_v1 = vld [vmem:[#allocation2 + $0x118] sm:$0xff]  ;;  %vm17690_vm6 = vcmask 261120  }
 0x92f   :  { %v3547_v23 = vsel %vm17687_vm1, %v13544_v43, %v3534_v4  ;;  %5098 = vmatpush.msra.mxu2 %v2937_v48  ;;  %vm17691_vm1 = vcmask 97280   ;;  %v13861_v4 = vpop.f32.mrf.mxu1 }
 0x930   :  { %v13793_v7 = vsel %vm17688_vm9, %v3547_v23, %v3561_v42  ;;  %vm17692_vm9 = vcmask 359424  }
 0x931   :  { %5099 = vmatpush.msra.mxu2 %v4378_v14 }
 0x932   :  { %4664 = vperm.xlu1 %7320, %v4656_v61  }
 0x933   :  { %4659 = vperm.xlu0 %7319, %v4655_v3   ;;  %5100 = vmatpush.msra.mxu2 %v4365_v1  ;;  %v13868_v1 = vpop.f32.mrf.mxu3 }
 0x934   :  { %3757 = vrot.lane.b32.xlu2 %v13682_v62, %s7568_s13  ;;  %v3941_v43 = vpop.permute.xlu1 %3940 }
 0x935   :  { %v3939_v20 = vpop.permute.xlu0 %3938  ;;  %5101 = vmatpush.msra.mxu2 %v4352_v21 }
 0x936   :  { %v13803_v17 = vpop.permute.xlu2 %3060  ;;  %v3952_v56 = vsel %vm3942_vm2, %v13660_v57, %v3939_v20  ;;  %v3953_v53 = vsel %vm3942_vm2, %v3939_v20, %v3941_v43  ;;  %vm17693_vm2 = vcmask 588800   ;;  %v13876_v43 = vld [vmem:[%s16032_s3 + $0x10] sm:$0xff]  ;;  %v4536_v20 = vld [vmem:[#allocation2 + $0x670] sm:$0xff] }
 0x937   :  { %v3074_v47 = vsel %vm17689_vm5, %v13662_v32, %v13803_v17  ;;  %5122 = vmatpush.msra.mxu0 %v3952_v56  ;;  %5102 = vmatpush.msra.mxu2 %v4339_v15  ;;  %vm3899_vm5 = vcmask 932864  }
 0x938   :  { %5142 = vmatpush.msrb.mxu1 %v3074_v47  ;;  %5103 = vmatmul.f32.vlgmr.msra.gmra.mxu2 %v13813_v34 }
 0x93c   :  { %v3426_v57 = vpop.permute.xlu1 %3425 }
 0x93d   :  { %v13817_v26 = vpop.permute.xlu0 %3965  ;;  %3441 = vst.msk [vmem:[#allocation2 + $0x4d8] sm:$0xff] %vm17690_vm6, %v3426_v57 }
 0x93e   :  { %v3467_v5 = vpop.permute.xlu2 %3466  ;;  %v3974_v32 = vsel %vm3969_vm12, %v3953_v53, %v13817_v26 }
 0x93f   :  { %v3479_v62 = vsel %vm17691_vm1, %v13591_v10, %v3467_v5  ;;  %5168 = vmatpush.msrb.mxu3 %v3974_v32  ;;  %vm17694_vm1 = vcmask 375808   ;;  %v13892_v5 = vpop.f32.mrf.mxu0  ;;  %v4524_v32 = vld [vmem:[#allocation2 + $0x610] sm:$0xff] }
 0x940   :  { %v13825_v45 = vsel %vm17692_vm9, %v3479_v62, %v3493_v13  ;;  %5106 = vmatmul.f32.gmra.mxu2 %v13209_v44  ;;  %vm17696_vm9 = vmmov %vm17690_vm6  ;;  %v4340_v13 = vld [vmem:[#allocation2 + $0x50] sm:$0xff] }
 0x944   :  { %v3871_v60 = vpop.permute.xlu1 %3870 }
 0x945   :  { %v3869_v18 = vpop.permute.xlu0 %3868 }
 0x946   :  { %v13828_v27 = vpop.permute.xlu2 %2993  ;;  %v3882_v16 = vsel %vm3872_vm8, %v13691_v2, %v3869_v18  ;;  %v3883_v10 = vsel %vm3872_vm8, %v3869_v18, %v3871_v60  ;;  %vm17695_vm8 = vcmask 982016   ;;  %v4511_v60 = vld [vmem:[#allocation2 + $0x5a8] sm:$0xff] }
 0x947   :  { %v3007_v49 = vsel %vm17693_vm2, %v13745_v59, %v13828_v27  ;;  %5123 = vmatpush.msra.mxu0 %v3882_v16 }
 0x948   :  { %5143 = vmatpush.msrb.mxu1 %v3007_v49 }
 0x94c   :  { %v3359_v24 = vpop.permute.xlu1 %3358 }
 0x94d   :  { %v13836_v51 = vpop.permute.xlu0 %3895  ;;  %3374 = vst.msk [vmem:[#allocation2 + $0x470] sm:$0xff] %vm17690_vm6, %v3359_v24  ;;  %vm3759_vm6 = vcmask 965632  }
 0x94e   :  { %v3400_v44 = vpop.permute.xlu2 %3399  ;;  %v3904_v28 = vsel %vm3899_vm5, %v3883_v10, %v13836_v51 }
 0x94f   :  { %v3412_v2 = vsel %vm2206_vm11, %v13594_v50, %v3400_v44  ;;  %5169 = vmatpush.msrb.mxu3 %v3904_v28  ;;  %vm3829_vm11 = vcmask 949248   ;;  %v13912_v44 = vpop.f32.mrf.mxu0  ;;  %v4485_v28 = vld [vmem:[#allocation2 + $0x4d8] sm:$0xff] }
 0x950   :  { %v3428_v0 = vsel %vm17694_vm1, %v3412_v2, %v3426_v57  ;;  %vm17699_vm1 = vmmov %vm17696_vm9 }
 0x954   :  { %v3801_v63 = vpop.permute.xlu1 %3800 }
 0x955   :  { %v3799_v9 = vpop.permute.xlu0 %3798 }
 0x956   :  { %v13844_v31 = vpop.permute.xlu2 %2923  ;;  %v3812_v42 = vsel %vm3802_vm15, %v13720_v11, %v3799_v9  ;;  %v3813_v50 = vsel %vm3802_vm15, %v3799_v9, %v3801_v63  ;;  %vm17697_vm15 = vcmask 392192  }
 0x957   :  { %v2938_v59 = vsel %vm17695_vm8, %v2922_v22, %v13844_v31  ;;  %5124 = vmatpush.msra.mxu0 %v3812_v42  ;;  %vm17700_vm8 = vcmask 801792  }
 0x958   :  { %5144 = vmatpush.msrb.mxu1 %v2938_v59 }
 0x95a   :  { %5145 = vmatpush.msrb.mxu1 %v4379_v36 }
 0x95c   :  { %5146 = vmatpush.msrb.mxu1 %v4366_v38  ;;  %v3292_v19 = vpop.permute.xlu1 %3291 }
 0x95d   :  { %v13853_v54 = vpop.permute.xlu0 %3825  ;;  %3307 = vst.msk [vmem:[#allocation2 + $0x408] sm:$0xff] %vm17696_vm9, %v3292_v19 }
 0x95e   :  { %v3333_v55 = vpop.permute.xlu2 %3332  ;;  %5147 = vmatpush.msrb.mxu1 %v4353_v12  ;;  %v3834_v11 = vsel %vm3829_vm11, %v3813_v50, %v13853_v54 }
 0x95f   :  { %v3345_v58 = vsel %vm2008_vm4, %v13642_v6, %v3333_v55  ;;  %5170 = vmatpush.msrb.mxu3 %v3834_v11  ;;  %vm17698_vm4 = vcmask 785408   ;;  %v13932_v55 = vpop.f32.mrf.mxu0 }
 0x960   :  { %v3361_v22 = vsel %vm17697_vm15, %v3345_v58, %v3359_v24  ;;  %5148 = vmatpush.msrb.mxu1 %v4340_v13  ;;  %vm17704_vm15 = vmmov %vm17699_vm1  ;;  %v4498_v24 = vld [vmem:[#allocation2 + $0x540] sm:$0xff] }
 0x961   :  { %5149 = vmatmul.f32.vlgmr.msrb.gmra.mxu1 %v13813_v34 }
 0x964   :  { %v3731_v48 = vpop.permute.xlu1 %3730  ;;  %v4459_v42 = vld [vmem:[#allocation2 + $0x408] sm:$0xff] }
 0x965   :  { %v3729_v23 = vpop.permute.xlu0 %3728 }
 0x966   :  { %v3265_v61 = vpop.permute.xlu2 %3264  ;;  %v3742_v3 = vsel %vm3732_vm0, %v13724_v52, %v3729_v23  ;;  %v13879_v52 = vpop.f32.mrf.mxu1 }
 0x967   :  { %v3278_v14 = vsel %vm3266_vm3, %v13722_v39, %v3265_v61  ;;  %5125 = vmatpush.msra.mxu0 %v3742_v3  ;;  %v3743_v39 = vsel %vm3732_vm0, %v3729_v23, %v3731_v48  ;;  %vm17701_vm0 = vmmov %vm17693_vm2 }
 0x968   :  { %v3294_v6 = vsel %vm17698_vm4, %v3278_v14, %v3292_v19  ;;  %6979 = vmatmul.msk.f32.vlgmr.msra.gmra.mxu0 %vm17693_vm2, %v13346_v30  ;;  %vm17702_vm9 = vmmov %vm17701_vm0  ;;  %vm17705_vm4 = vcmask 818176   ;;  %v4601_v14 = vld [vmem:[#allocation2 + $0x878] sm:$0xff] }
 0x969   :  { %5152 = vmatmul.f32.gmra.mxu1 %v13876_v43  ;;  %5179 = vmatpush.msrb.mxu0 %v4536_v20  ;;  %vm17706_vm2 = vmmov %vm17701_vm0 }
 0x96b   :  { %5180 = vmatpush.msrb.mxu0 %v13755_v46  ;;  %v13895_v46 = vpop.f32.mrf.mxu3 }
 0x96c   :  { %v3224_v21 = vpop.permute.xlu1 %3223 }
 0x96d   :  { %v13883_v56 = vpop.permute.xlu0 %3755  ;;  %5181 = vmatpush.msrb.mxu0 %v13793_v7  ;;  %3239 = vst.msk [vmem:[#allocation2 + $0x3a0] sm:$0xff] %vm17699_vm1, %v3224_v21  ;;  %v4537_v7 = vld [vmem:[#allocation2 + $0x678] sm:$0xff] }
 0x96e   :  { %v3197_v47 = vpop.permute.xlu2 %3196  ;;  %v3764_v15 = vsel %vm3759_vm6, %v3743_v39, %v13883_v56  ;;  %v13903_v62 = vpop.f32.mrf.mxu1 }
 0x96f   :  { %v3210_v53 = vsel %vm3198_vm10, %v13767_v37, %v3197_v47  ;;  %5182 = vmatpush.msrb.mxu0 %v13825_v45  ;;  %5171 = vmatpush.msrb.mxu3 %v3764_v15  ;;  %v13901_v37 = vpop.f32.mrf.mxu2  ;;  %vm17703_vm10 = vmmov %vm17699_vm1 }
 0x970   :  { %v3226_v57 = vsel %vm17700_vm8, %v3210_v53, %v3224_v21  ;;  %6980 = vmatmul.msk.f32.gmra.mxu0 %vm17701_vm0, %v13627_v40  ;;  %6981 = vmatmul.msk.f32.vlgmr.msrb.gmra.mxu3 %vm17702_vm9, %v13346_v30  ;;  %vm17710_vm8 = vmmov %vm17703_vm10  ;;  %vm17712_vm0 = vcmask 490496   ;;  %v13953_v53 = vpop.f32.mrf.mxu0 }
 0x971   :  { %5183 = vmatpush.msrb.mxu0 %v3428_v0  ;;  %5225 = vmatpush.msra.mxu3 %v4537_v7 }
 0x973   :  { %5184 = vmatpush.msrb.mxu0 %v3361_v22  ;;  %5226 = vmatpush.msra.mxu3 %v4524_v32  ;;  %v13916_v2 = vpop.f32.mrf.mxu3  ;;  %v4602_v32 = vld [vmem:[#allocation2 + $0x880] sm:$0xff] }
 0x974   :  { %v3156_v45 = vpop.permute.xlu1 %3155  ;;  %v4446_v59 = vld [vmem:[#allocation2 + $0x3a0] sm:$0xff] }
 0x975   :  { %v4306_v18 = vpop.permute.xlu0 %4305  ;;  %5185 = vmatpush.msrb.mxu0 %v3294_v6  ;;  %3171 = vst.msk [vmem:[#allocation2 + $0x338] sm:$0xff] %vm17703_vm10, %v3156_v45  ;;  %5227 = vmatpush.msra.mxu3 %v4511_v60 }
 0x976   :  { %v3130_v16 = vpop.permute.xlu2 %3129  ;;  %v4308_v30 = vsel %vm4307_vm13, %v13617_v41, %v4306_v18  ;;  %4325 = vst.msk [vmem:[#allocation2 + $0xa20] sm:$0xff] %vm17704_vm15, %v4306_v18  ;;  %v4472_v41 = vld [vmem:[#allocation2 + $0x470] sm:$0xff]  ;;  %vm17708_vm13 = vmmov %vm17699_vm1  ;;  %v13929_v19 = vpop.f32.mrf.mxu1 }
 0x977   :  { %v3142_v49 = vsel %vm1420_vm14, %v13770_v25, %v3130_v16  ;;  %5186 = vmatpush.msrb.mxu0 %v3226_v57  ;;  %5209 = vmatpush.msrb.mxu2 %v4308_v30  ;;  %vm17707_vm14 = vmmov %vm17699_vm1  ;;  %vm17709_vm1 = vcmask 506880   ;;  %v13927_v50 = vpop.f32.mrf.mxu2 }
 0x978   :  { %v3158_v10 = vsel %vm17705_vm4, %v3142_v49, %v3156_v45  ;;  %5228 = vmatpush.msra.mxu3 %v4498_v24  ;;  %vm17717_vm4 = vcmask 195584  }
 0x979   :  { %6982 = vmatmul.msk.f32.gmra.mxu3 %vm17706_vm2, %v13627_v40  ;;  %5187 = vmatpush.msrb.mxu0 %v3158_v10 }
 0x97a   :  { %5229 = vmatpush.msra.mxu3 %v4485_v28  ;;  %v13969_v28 = vpop.f32.mrf.mxu0 }
 0x97c   :  { %5230 = vmatpush.msra.mxu3 %v4472_v41  ;;  %v13918_v0 = vpop.permute.xlu1 %3088  ;;  %v4433_v12 = vld [vmem:[#allocation2 + $0x338] sm:$0xff] }
 0x97d   :  { %v4237_v25 = vpop.permute.xlu0 %4236  ;;  %v4654_v9 = vld [vmem:[#allocation2 + $0xa20] sm:$0xff]  ;;  %3104 = vst.msk [vmem:[#allocation2 + $0x2d0] sm:$0xff] %vm17707_vm14, %v13918_v0  ;;  %vm17720_vm14 = vcmask 572416  }
 0x97e   :  { %v4099_v63 = vpop.permute.xlu2 %4098  ;;  %v4239_v36 = vsel %vm4238_vm7, %v13658_v29, %v4237_v25  ;;  %4256 = vst.msk [vmem:[#allocation2 + $0x9b8] sm:$0xff] %vm17708_vm13, %v4237_v25  ;;  %5255 = vmatpush.msra.mxu1 %v4654_v9  ;;  %5231 = vmatpush.msra.mxu3 %v4459_v42  ;;  %v13934_v29 = vpop.f32.mrf.mxu3  ;;  %vm17711_vm7 = vmmov %vm17710_vm8  ;;  %vm17721_vm13 = vcmask 850944   ;;  %v4381_v25 = vld [vmem:[#allocation2 + $0x198] sm:$0xff] }
 0x97f   :  { %v4101_v38 = vsel %vm17709_vm1, %v13693_v33, %v4099_v63  ;;  %5210 = vmatpush.msrb.mxu2 %v4239_v36  ;;  %4118 = vst.msk [vmem:[#allocation2 + $0x8e8] sm:$0xff] %vm17710_vm8, %v4099_v63  ;;  %vm17713_vm9 = vmmov %vm17711_vm7  ;;  %v13942_v61 = vpop.f32.mrf.mxu2  ;;  %v13945_v3 = vpop.f32.mrf.mxu1  ;;  %vm17722_vm1 = vcmask 834560  }
 0x980   :  { %5232 = vmatpush.msra.mxu3 %v4446_v59  ;;  %vm17714_vm10 = vmmov %vm17711_vm7  ;;  %v4380_v59 = vld [vmem:[#allocation2 + $0x190] sm:$0xff] }
 0x981   :  { %vm17716_vm15 = vmmov %vm17711_vm7 }
 0x982   :  { %5233 = vmatpush.msra.mxu3 %v4433_v12  ;;  %vm17718_vm2 = vmmov %vm17711_vm7  ;;  %v4367_v12 = vld [vmem:[#allocation2 + $0x128] sm:$0xff] }
 0x983   :  { %vm17723_vm8 = vmmov %vm17718_vm2 }
 0x984   :  { %v3022_v11 = vpop.permute.xlu1 %3021  ;;  %v4420_v58 = vld [vmem:[#allocation2 + $0x2d0] sm:$0xff] }
 0x985   :  { %v4168_v13 = vpop.permute.xlu0 %4167  ;;  %v4641_v22 = vld [vmem:[#allocation2 + $0x9b8] sm:$0xff]  ;;  %3037 = vst.msk [vmem:[#allocation2 + $0x268] sm:$0xff] %vm17711_vm7, %v3022_v11  ;;  %5234 = vmatpush.msra.mxu3 %v4420_v58  ;;  %vm17724_vm7 = vmmov %vm17718_vm2  ;;  %v4354_v58 = vld [vmem:[#allocation2 + $0xc0] sm:$0xff] }
 0x986   :  { %v3968_v33 = vpop.permute.xlu2 %3967  ;;  %v4170_v48 = vsel %vm17712_vm0, %v13689_v35, %v4168_v13  ;;  %4187 = vst.msk [vmem:[#allocation2 + $0x950] sm:$0xff] %vm17713_vm9, %v4168_v13  ;;  %5256 = vmatpush.msra.mxu1 %v4641_v22  ;;  %v13955_v57 = vpop.f32.mrf.mxu3  ;;  %v4615_v7 = vld [vmem:[#allocation2 + $0x8e8] sm:$0xff]  ;;  %v7451_v22 = vld [vmem:[%s16032_s3 + $0x8] sm:$0xff]  ;;  %s17727_s3 = smov 126  }
 0x987   :  { %v3970_v23 = vsel %vm3969_vm12, %v13817_v26, %v3968_v33  ;;  %5211 = vmatpush.msrb.mxu2 %v4170_v48  ;;  %3987 = vst.msk [vmem:[#allocation2 + $0x818] sm:$0xff] %vm17714_vm10, %v3968_v33  ;;  %vm17715_vm12 = vcmask 982016   ;;  %v13958_v45 = vpop.f32.mrf.mxu2  ;;  %vm17730_vm10 = vcmask 1031168  }
 0x989   :  { %5212 = vmatpush.msrb.mxu2 %v4101_v38  ;;  %v4355_v38 = vld [vmem:[#allocation2 + $0xc8] sm:$0xff] }
 0x98b   :  { %5213 = vmatpush.msrb.mxu2 %v4601_v14 }
 0x98c   :  { %v2954_v6 = vpop.permute.xlu1 %2953  ;;  %v4407_v20 = vld [vmem:[#allocation2 + $0x268] sm:$0xff] }
 0x98d   :  { %v2926_v39 = vpop.permute.xlu0 %2925  ;;  %v4628_v21 = vld [vmem:[#allocation2 + $0x950] sm:$0xff]  ;;  %5214 = vmatpush.msrb.mxu2 %v3970_v23  ;;  %5235 = vmatpush.msra.mxu3 %v4407_v20 }
 0x98e   :  { %v3758_v35 = vpop.permute.xlu2 %3757  ;;  %v2939_v26 = vsel %vm17715_vm12, %v13844_v31, %v2926_v39  ;;  %5257 = vmatpush.msra.mxu1 %v4628_v21  ;;  %v2957_v15 = vsel %vm17717_vm4, %v2926_v39, %v2954_v6  ;;  %v13960_v31 = vpop.f32.mrf.mxu1  ;;  %vm17731_vm12 = vmmov %vm17730_vm10 }
 0x98f   :  { %v3760_v47 = vsel %vm3759_vm6, %v13883_v56, %v3758_v35  ;;  %3777 = vst.msk [vmem:[#allocation2 + $0x6e0] sm:$0xff] %vm17716_vm15, %v3758_v35  ;;  %v4589_v56 = vld [vmem:[#allocation2 + $0x818] sm:$0xff]  ;;  %vm17719_vm6 = vcmask 588800   ;;  %v13971_v41 = vpop.f32.mrf.mxu3  ;;  %v13973_v63 = vpop.f32.mrf.mxu2  ;;  %vm17732_vm15 = vmmov %vm17730_vm10 }
 0x990   :  { %5258 = vmatpush.msra.mxu1 %v4615_v7  ;;  %2970 = vst.msk [vmem:[#allocation2 + $0x200] sm:$0xff] %vm17718_vm2, %v2957_v15  ;;  %vm17733_vm4 = vmmov %vm17730_vm10 }
 0x991   :  { %vm17734_vm2 = vmmov %vm17733_vm4 }
 0x992   :  { %5259 = vmatpush.msra.mxu1 %v4602_v32 }
 0x994   :  { %5260 = vmatpush.msra.mxu1 %v4589_v56  ;;  %v2996_v60 = vpop.permute.xlu1 %2995 }
 0x995   :  { %v3063_v18 = vpop.permute.xlu0 %3062  ;;  %v3008_v16 = vsel %vm17719_vm6, %v13828_v27, %v2996_v60  ;;  %v4368_v27 = vld [vmem:[#allocation2 + $0x130] sm:$0xff] }
 0x996   :  { %v3075_v30 = vsel %vm17720_vm14, %v13803_v17, %v3063_v18  ;;  %v3024_v49 = vsel %vm17721_vm13, %v3008_v16, %v3022_v11  ;;  %v13975_v17 = vpop.f32.mrf.mxu1  ;;  %v4342_v11 = vld [vmem:[#allocation2 + $0x60] sm:$0xff]  ;;  %vm17736_vm14 = vmmov %vm17734_vm2 }
 0x997   :  { %v3091_v10 = vsel %vm17722_vm1, %v3075_v30, %v13918_v0  ;;  %v4394_v24 = vld [vmem:[#allocation2 + $0x200] sm:$0xff]  ;;  %v13986_v13 = vpop.f32.mrf.mxu3  ;;  %v4923_v35 = vpop.f32.mrf.mxu2  ;;  %vm17737_vm13 = vmmov %vm17734_vm2 }
 0x998   :  { %5188 = vmatpush.msrb.mxu0 %v3091_v10  ;;  %5236 = vmatpush.msra.mxu3 %v4394_v24  ;;  %vm17738_vm1 = vmmov %vm17734_vm2 }
 0x99a   :  { %5189 = vmatpush.msrb.mxu0 %v3024_v49  ;;  %5237 = vmatpush.msra.mxu3 %v4381_v25 }
 0x99c   :  { %v3828_v9 = vpop.permute.xlu1 %3827  ;;  %5190 = vmatpush.msrb.mxu0 %v2939_v26  ;;  %5238 = vmatpush.msra.mxu3 %v4368_v27 }
 0x99d   :  { %v3898_v42 = vpop.permute.xlu0 %3897  ;;  %v3830_v0 = vsel %vm3829_vm11, %v13853_v54, %v3828_v9  ;;  %3847 = vst.msk [vmem:[#allocation2 + $0x748] sm:$0xff] %vm17723_vm8, %v3828_v9  ;;  %v13984_v54 = vpop.f32.mrf.mxu0  ;;  %vm17739_vm8 = vmmov %vm17738_vm1 }
 0x99e   :  { %v3900_v36 = vsel %vm3899_vm5, %v13836_v51, %v3898_v42  ;;  %3917 = vst.msk [vmem:[#allocation2 + $0x7b0] sm:$0xff] %vm17724_vm7, %v3898_v42  ;;  %5191 = vmatpush.msrb.mxu0 %v4380_v59  ;;  %5239 = vmatpush.msra.mxu3 %v4355_v38  ;;  %v4341_v51 = vld [vmem:[#allocation2 + $0x58] sm:$0xff]  ;;  %vm17725_vm5 = vmmov %vm17719_vm6  ;;  %v4969_v21 = vpop.f32.mrf.mxu1 }
 0x99f   :  { %5215 = vmatpush.msrb.mxu2 %v3900_v36  ;;  %vm17726_vm11 = vmmov %vm17725_vm5  ;;  %v5058_v56 = vpop.f32.mrf.mxu3 }
 0x9a0   :  { %5192 = vmatpush.msrb.mxu0 %v4367_v12  ;;  %5240 = vmatpush.msra.mxu3 %v4342_v11  ;;  %vm17728_vm0 = vmmov %vm17725_vm5 }
 0x9a1   :  { %5216 = vmatpush.msrb.mxu2 %v3830_v0  ;;  %5241 = vmatmul.f32.vlgmr.msra.gmra.mxu3 %v13813_v34  ;;  %vm17729_vm9 = vmmov %vm17728_vm0 }
 0x9a2   :  { %5193 = vmatpush.msrb.mxu0 %v4354_v58  ;;  %vm17735_vm6 = vmmov %vm17734_vm2 }
 0x9a3   :  { %5217 = vmatpush.msrb.mxu2 %v3760_v47  ;;  %vm17740_vm7 = vmmov %vm17738_vm1 }
 0x9a4   :  { %v13988_v33 = vpop.permute.xlu1 %4664  ;;  %5194 = vmatpush.msrb.mxu0 %v4341_v51  ;;  %6983 = vmatmul.msk.f32.vlgmr.msrb.gmra.mxu2 %vm17725_vm5, %v7451_v22  ;;  %v4563_v14 = vld [vmem:[#allocation2 + $0x748] sm:$0xff]  ;;  %vm17741_vm5 = vmmov %vm17738_vm1 }
 0x9a5   :  { %v13994_v48 = vpop.permute.xlu0 %4659  ;;  %v4576_v23 = vld [vmem:[#allocation2 + $0x7b0] sm:$0xff]  ;;  %5195 = vmatmul.f32.vlgmr.msrb.gmra.mxu0 %v13813_v34  ;;  %v4694_v6 = vadd.f32 %v13912_v44, %v13988_v33  ;;  %v4740_v34 = vadd.f32 %v13927_v50, %v13988_v33  ;;  %v4550_v44 = vld [vmem:[#allocation2 + $0x6e0] sm:$0xff]  ;;  %v4878_v50 = vadd.f32 %v13955_v57, %v13988_v33  ;;  %v4924_v0 = vadd.f32 %v4923_v35, %v13988_v33 }
 0x9a6   :  { %5261 = vmatpush.msra.mxu1 %v4576_v23  ;;  %v4737_v20 = vadd.f32 %v13901_v37, %v13994_v48  ;;  %v4691_v39 = vadd.f32 %v13892_v5, %v13994_v48  ;;  %v4832_v5 = vadd.f32 %v13953_v53, %v13988_v33  ;;  %v4967_v53 = vadd.f32 %v13975_v17, %v13994_v48  ;;  %v5081_v24 = vpop.f32.mrf.mxu1 }
 0x9a7   :  { %v4717_v26 = vadd.f32 %v13879_v52, %v4694_v6  ;;  %v14029_v52 = vadd.f32 %v13868_v1, %v4740_v34  ;;  %v4921_v1 = vadd.f32 %v13973_v63, %v13994_v48  ;;  %v4829_v57 = vadd.f32 %v13932_v55, %v13994_v48  ;;  %v5035_v55 = vpop.f32.mrf.mxu2  ;;  %v5061_v23 = vpop.f32.mrf.mxu3 }
 0x9a8   :  { %v14005_v47 = vadd.f32 %v13851_v8, %v4737_v20  ;;  %v4714_v15 = vadd.f32 %v13861_v4, %v4691_v39  ;;  %5262 = vmatpush.msra.mxu1 %v4563_v14  ;;  %v4783_v8 = vadd.f32 %v13903_v62, %v13994_v48  ;;  %v4786_v4 = vadd.f32 %v13929_v19, %v13988_v33  ;;  %v5012_v62 = vpop.f32.mrf.mxu0 }
 0x9a9   :  { %v14010_v7 = vmax.f32 %v4717_v26, 0.0  ;;  %5244 = vmatmul.f32.gmra.mxu3 %v13876_v43  ;;  %v4875_v16 = vadd.f32 %v13934_v29, %v13994_v48  ;;  %v5059_v30 = vadd.f32 %v5058_v56, %v13994_v48  ;;  %v5285_v49 = vmax.f32 %v14029_v52, 0.0 }
 0x9aa   :  { %v5272_v37 = vmax.f32 %v14005_v47, 0.0  ;;  %v14013_v32 = vmax.f32 %v4714_v15, 0.0  ;;  %5263 = vmatpush.msra.mxu1 %v4550_v44  ;;  %v14036_v19 = vadd.f32 %v13895_v46, %v4783_v8  ;;  %v14039_v60 = vadd.f32 %v13916_v2, %v4786_v4 }
 0x9ab   :  { %6985 = vmatmul.msk.f32.vlgmr.msra.gmra.mxu1 %vm17726_vm11, %v7451_v22  ;;  %5349 = vrot.lane.b32.xlu0 %v14010_v7, %s17727_s3  ;;  %v14053_v2 = vadd.f32 %v13969_v28, %v4921_v1  ;;  %v14061_v10 = vadd.f32 %v13971_v41, %v4967_v53  ;;  %v14068_v25 = vadd.f32 %v13958_v45, %v4832_v5  ;;  %vm17742_vm11 = vmmov %vm17738_vm1 }
 0x9ac   :  { %5325 = vrot.lane.b32.xlu1 %v5272_v37, %s17727_s3  ;;  %5323 = vrot.lane.b32.xlu2 %v14013_v32, %s17727_s3  ;;  %v5273_v46 = vmax.f32 %v14036_v19, 0.0  ;;  %v5286_v18 = vmax.f32 %v14039_v60, 0.0  ;;  %v14071_v29 = vadd.f32 %v13960_v31, %v4878_v50  ;;  %v14076_v41 = vadd.f32 %v13942_v61, %v4829_v57 }
 0x9ad   :  { %6984 = vmatmul.msk.f32.gmra.mxu2 %vm17728_vm0, %v13627_v40  ;;  %5198 = vmatmul.f32.gmra.mxu0 %v13876_v43  ;;  %v5013_v43 = vadd.f32 %v5012_v62, %v13994_v48  ;;  %v5276_v63 = vmax.f32 %v14053_v2, 0.0  ;;  %v5277_v27 = vmax.f32 %v14061_v10, 0.0  ;;  %v14079_v9 = vadd.f32 %v13945_v3, %v4875_v16  ;;  %vm17743_vm0 = vmmov %vm17738_vm1 }
 0x9ae   :  { %v7321_v28 = vpack.i.bf16 %v5286_v18, %v5273_v46  ;;  %v14085_v45 = vadd.f32 %v5081_v24, %v5059_v30  ;;  %v5287_v3 = vmax.f32 %v14068_v25, 0.0  ;;  %v5288_v31 = vmax.f32 %v14071_v29, 0.0  ;;  %v5084_v35 = vpop.f32.mrf.mxu1  ;;  %v5632_v25 = vld [vmem:[%s16034_s5 + $0x68] sm:$0xff]  ;;  %v5631_v29 = vld [vmem:[%s16034_s5 + $0x60] sm:$0xff] }
 0x9af   :  { %v14083_v17 = vadd.f32 %v5035_v55, %v5013_v43  ;;  %v7331_v61 = vpack.i.bf16 %v5277_v27, %v5276_v63  ;;  %v5275_v42 = vmax.f32 %v14079_v9, 0.0  ;;  %v4970_v59 = vadd.f32 %v4969_v21, %v13988_v33  ;;  %v5038_v39 = vpop.f32.mrf.mxu2 }
 0x9b0   :  { %v5279_v38 = vmax.f32 %v14085_v45, 0.0  ;;  %v7336_v12 = vpack.i.bf16 %v5288_v31, %v5287_v3  ;;  %v14113_v58 = vadd.f32 %v13984_v54, %v4924_v0  ;;  %v5015_v22 = vpop.f32.mrf.mxu0  ;;  %v5062_v20 = vadd.f32 %v5061_v23, %v13988_v33 }
 0x9b1   :  { %v5278_v36 = vmax.f32 %v14083_v17, 0.0  ;;  %v14116_v51 = vadd.f32 %v13986_v13, %v4970_v59  ;;  %v5016_v6 = vadd.f32 %v5015_v22, %v13988_v33 }
 0x9b2   :  { %v5289_v54 = vmax.f32 %v14113_v58, 0.0  ;;  %v14131_v26 = vadd.f32 %v5084_v35, %v5062_v20 }
 0x9b3   :  { %6986 = vmatmul.msk.f32.gmra.mxu1 %vm17729_vm9, %v13627_v40  ;;  %7332 = vrot.lane.b32.xlu0 %v7331_v61, %s17727_s3  ;;  %v5274_v40 = vmax.f32 %v14076_v41, 0.0  ;;  %v7346_v14 = vpack.i.bf16 %v5279_v38, %v5278_v36  ;;  %v5290_v13 = vmax.f32 %v14116_v51, 0.0  ;;  %v14129_v21 = vadd.f32 %v5038_v39, %v5016_v6  ;;  %vm17744_vm9 = vmmov %vm17743_vm0  ;;  %v5697_v51 = vld [vmem:[%s16034_s5 + $0x270] sm:$0xff] }
 0x9b4   :  { %5351 = vrot.lane.b32.xlu1 %v5285_v49, %s17727_s3  ;;  %7322 = vrot.lane.b32.xlu2 %v7321_v28, %s17727_s3  ;;  %v5292_v44 = vmax.f32 %v14131_v26, 0.0 }
 0x9b5   :  { %v7326_v11 = vpack.i.bf16 %v5275_v42, %v5274_v40  ;;  %v7341_v15 = vpack.i.bf16 %v5290_v13, %v5289_v54  ;;  %v5291_v34 = vmax.f32 %v14129_v21, 0.0 }
 0x9b7   :  { %v7356_v8 = vpack.i.bf16 %v5292_v44, %v5291_v34 }
 0x9bb   :  { %7347 = vrot.lane.b32.xlu0 %v7346_v14, %s17727_s3  ;;  %v5104_v4 = vpop.f32.mrf.mxu2 }
 0x9bc   :  { %7337 = vrot.lane.b32.xlu1 %v7336_v12, %s17727_s3  ;;  %7327 = vrot.lane.b32.xlu2 %v7326_v11, %s17727_s3  ;;  %v5105_v62 = vadd.f32 %v5104_v4, %v13994_v48 }
 0x9c3   :  { %v5107_v16 = vpop.f32.mrf.mxu2 }
 0x9c4   :  { %7342 = vrot.lane.b32.xlu2 %v7341_v15, %s17727_s3  ;;  %v5108_v61 = vadd.f32 %v5107_v16, %v13988_v33 }
 0x9cc   :  { %7357 = vrot.lane.b32.xlu2 %v7356_v8, %s17727_s3 }
 0x9de   :  { %v5150_v5 = vpop.f32.mrf.mxu1 }
 0x9df   :  { %v5151_v56 = vadd.f32 %v5150_v5, %v13994_v48 }
 0x9e5   :  { %v5127_v50 = vpop.f32.mrf.mxu0 }
 0x9e6   :  { %v14147_v1 = vadd.f32 %v5127_v50, %v5105_v62  ;;  %v5153_v55 = vpop.f32.mrf.mxu1 }
 0x9e7   :  { %v5154_v0 = vadd.f32 %v5153_v55, %v13988_v33 }
 0x9e8   :  { %v5280_v43 = vmax.f32 %v14147_v1, 0.0 }
 0x9ed   :  { %v5130_v24 = vpop.f32.mrf.mxu0 }
 0x9ee   :  { %v14160_v59 = vadd.f32 %v5130_v24, %v5108_v61 }
 0x9f0   :  { %v5293_v22 = vmax.f32 %v14160_v59, 0.0  ;;  %v5696_v59 = vld [vmem:[%s16034_s5 + $0x268] sm:$0xff] }
 0x9f3   :  { %v5173_v53 = vpop.f32.mrf.mxu3 }
 0x9f4   :  { %v14149_v57 = vadd.f32 %v5173_v53, %v5151_v56 }
 0x9f6   :  { %v5281_v30 = vmax.f32 %v14149_v57, 0.0  ;;  %v5713_v57 = vld [vmem:[%s16034_s5 + $0x2f0] sm:$0xff] }
 0x9f8   :  { %v7351_v28 = vpack.i.bf16 %v5281_v30, %v5280_v43 }
 0x9fa   :  { %7352 = vrot.lane.b32.xlu1 %v7351_v28, %s17727_s3 }
 0x9fc   :  { %v5176_v12 = vpop.f32.mrf.mxu3 }
 0x9fd   :  { %v14162_v11 = vadd.f32 %v5176_v12, %v5154_v0 }
 0x9ff   :  { %v16361_v23 = vmax.f32 %v14162_v11, 0.0 }
 0xa01   :  { %v7361_v14 = vpack.i.bf16 %v16361_v23, %v5293_v22 }
 0xa03   :  { %7362 = vrot.lane.b32.xlu0 %v7361_v14, %s17727_s3 }
 0xa06   :  { %v5324_v6 = vpop.permute.xlu2 %5323 }
 0xa0e   :  { %v7323_v20 = vpop.permute.xlu2 %7322 }
 0xa0f   :  { %v7324_v39 = vunpack.i.l.bf16 %v7323_v20 }
 0xa16   :  { %v7328_v56 = vpop.permute.xlu2 %7327 }
 0xa17   :  { %v7329_v28 = vunpack.i.l.bf16 %v7328_v56 }
 0xa1d   :  { %v5350_v15 = vpop.permute.xlu0 %5349 }
 0xa1e   :  { %v5326_v35 = vpop.permute.xlu1 %5325 }
 0xa1f   :  { %v5375_v8 = vsel %vm17730_vm10, %v5324_v6, %v5326_v35  ;;  %v5376_v4 = vsel %vm17731_vm12, %v5326_v35, %v7324_v39  ;;  %v7330_v6 = vunpack.i.h.bf16 %v7328_v56  ;;  %v5377_v35 = vsel %vm17732_vm15, %v7324_v39, %v7329_v28  ;;  %vm17745_vm10 = vmmov %vm17743_vm0 }
 0xa20   :  { %v14174_v5 = vmax.f32 %v14013_v32, %v5375_v8  ;;  %v14178_v50 = vmax.f32 %v5272_v37, %v5376_v4  ;;  %v14204_v56 = vmax.f32 %v5273_v46, %v5377_v35  ;;  %vm17746_vm12 = vmmov %vm17743_vm0 }
 0xa21   :  { %vm17747_vm15 = vmmov %vm17743_vm0 }
 0xa22   :  { %v7366_v62 = vpack.i.bf16 %v14178_v50, %v14174_v5  ;;  %v5196_v53 = vpop.f32.mrf.mxu0 }
 0xa23   :  { %v5197_v2 = vadd.f32 %v5196_v53, %v13994_v48  ;;  %v7325_v53 = vunpack.i.h.bf16 %v7323_v20 }
 0xa24   :  { %7367 = vrot.lane.b32.xlu1 %v7366_v62, %s7504_s0  ;;  %v5242_v16 = vpop.f32.mrf.mxu3 }
 0xa25   :  { %v5243_v24 = vadd.f32 %v5242_v16, %v13994_v48  ;;  %v14184_v0 = vpop.permute.xlu0 %7332 }
 0xa26   :  { %v5352_v55 = vpop.permute.xlu1 %5351  ;;  %v7335_v47 = vunpack.i.h.bf16 %v14184_v0  ;;  %v7334_v37 = vunpack.i.l.bf16 %v14184_v0  ;;  %v5681_v0 = vld [vmem:[%s16034_s5 + $0x1f0] sm:$0xff] }
 0xa27   :  { %v5219_v61 = vpop.f32.mrf.mxu2 }
 0xa28   :  { %v5265_v12 = vpop.f32.mrf.mxu1  ;;  %v5380_v8 = vsel %vm17733_vm4, %v7334_v37, %v7335_v47  ;;  %v5379_v16 = vsel %vm17734_vm2, %v7330_v6, %v7334_v37  ;;  %v14219_v35 = vadd.f32 %v5219_v61, %v5197_v2  ;;  %v5387_v2 = vsel %vm17739_vm8, %v5350_v15, %v5352_v55  ;;  %vm17748_vm4 = vmmov %vm17743_vm0 }
 0xa29   :  { %v14188_v14 = vadd.f32 %v5265_v12, %v5243_v24  ;;  %v14198_v4 = vmax.f32 %v5276_v63, %v5380_v8  ;;  %v14211_v12 = vpop.permute.xlu2 %7342  ;;  %v14215_v37 = vmax.f32 %v5275_v42, %v5379_v16  ;;  %vm17749_vm2 = vmmov %vm17743_vm0  ;;  %vm17754_vm8 = vcmask 244736  }
 0xa2a   :  { %v5199_v24 = vpop.f32.mrf.mxu0  ;;  %v7345_v9 = vunpack.i.h.bf16 %v14211_v12  ;;  %v7344_v42 = vunpack.i.l.bf16 %v14211_v12  ;;  %v5282_v41 = vmax.f32 %v14219_v35, 0.0  ;;  %v5708_v35 = vld [vmem:[%s16034_s5 + $0x2c8] sm:$0xff] }
 0xa2b   :  { %v5283_v62 = vmax.f32 %v14188_v14, 0.0  ;;  %v7386_v19 = vpack.i.bf16 %v14198_v4, %v14204_v56  ;;  %v5200_v8 = vadd.f32 %v5199_v24, %v13988_v33 }
 0xa2c   :  { %5425 = vrot.lane.b32.xlu1 %v14013_v32, %s7483_s29  ;;  %v5378_v32 = vsel %vm17735_vm6, %v7329_v28, %v7330_v6  ;;  %v5245_v63 = vpop.f32.mrf.mxu3  ;;  %vm17750_vm6 = vmmov %vm17743_vm0 }
 0xa2d   :  { %5347 = vrot.lane.b32.xlu0 %v5283_v62, %s17727_s3  ;;  %v14224_v28 = vmax.f32 %v5274_v40, %v5378_v32  ;;  %v5246_v48 = vadd.f32 %v5245_v63, %v13988_v33  ;;  %v5388_v32 = vsel %vm17738_vm1, %v5352_v55, %v7325_v53  ;;  %vm17753_vm1 = vmmov %vm17743_vm0 }
 0xa2e   :  { %v7338_v39 = vpop.permute.xlu1 %7337 }
 0xa2f   :  { %v7339_v46 = vunpack.i.l.bf16 %v7338_v39  ;;  %v7381_v61 = vpack.i.bf16 %v14215_v37, %v14224_v28  ;;  %v7340_v15 = vunpack.i.h.bf16 %v7338_v39  ;;  %v5634_v39 = vld [vmem:[%s16034_s5 + $0x78] sm:$0xff] }
 0xa30   :  { %v5222_v23 = vpop.f32.mrf.mxu2  ;;  %v5268_v6 = vpop.f32.mrf.mxu1  ;;  %5821 = vmatpush.msra.mxu2 %v5634_v39  ;;  %v5621_v39 = vld [vmem:[%s16034_s5 + $0x10] sm:$0xff] }
 0xa31   :  { %v14229_v16 = vadd.f32 %v5222_v23, %v5200_v8  ;;  %v5389_v24 = vsel %vm17736_vm14, %v7325_v53, %v7339_v46  ;;  %v14237_v33 = vadd.f32 %v5268_v6, %v5246_v48  ;;  %v5392_v23 = vsel %vm17737_vm13, %v7344_v42, %v7345_v9  ;;  %v5626_v6 = vld [vmem:[%s16034_s5 + $0x38] sm:$0xff] }
 0xa32   :  { %v14251_v63 = vmax.f32 %v5286_v18, %v5389_v24  ;;  %v14261_v48 = vmax.f32 %v5285_v49, %v5388_v32  ;;  %v14264_v53 = vmax.f32 %v14010_v7, %v5387_v2  ;;  %v5390_v52 = vsel %vm17740_vm7, %v7339_v46, %v7340_v15  ;;  %v5633_v46 = vld [vmem:[%s16034_s5 + $0x70] sm:$0xff]  ;;  %v5624_v24 = vld [vmem:[%s16034_s5 + $0x28] sm:$0xff]  ;;  %v7348_v32 = vpop.permute.xlu0 %7347  ;;  %v5622_v2 = vld [vmem:[%s16034_s5 + $0x18] sm:$0xff] }
 0xa33   :  { %v5295_v40 = vmax.f32 %v14229_v16, 0.0  ;;  %v5296_v8 = vmax.f32 %v14237_v33, 0.0  ;;  %v5391_v49 = vsel %vm17741_vm5, %v7340_v15, %v7344_v42  ;;  %v14279_v58 = vmax.f32 %v5287_v3, %v5390_v52  ;;  %5822 = vmatpush.msra.mxu2 %v5633_v46  ;;  %v5630_v3 = vld [vmem:[%s16034_s5 + $0x58] sm:$0xff]  ;;  %v5627_v42 = vld [vmem:[%s16034_s5 + $0x40] sm:$0xff]  ;;  %v5649_v15 = vld [vmem:[%s16034_s5 + $0xf0] sm:$0xff] }
 0xa34   :  { %7387 = vrot.lane.b32.xlu1 %v7386_v19, %s7504_s0  ;;  %v14256_v19 = vmax.f32 %v5289_v54, %v5392_v23  ;;  %v7376_v18 = vpack.i.bf16 %v14261_v48, %v14264_v53  ;;  %v14283_v54 = vmax.f32 %v5288_v31, %v5391_v49  ;;  %v5628_v31 = vld [vmem:[%s16034_s5 + $0x48] sm:$0xff]  ;;  %v5623_v23 = vld [vmem:[%s16034_s5 + $0x20] sm:$0xff]  ;;  %v5682_v52 = vld [vmem:[%s16034_s5 + $0x1f8] sm:$0xff]  ;;  %v7350_v49 = vunpack.i.h.bf16 %v7348_v32 }
 0xa35   :  { %7382 = vrot.lane.b32.xlu0 %v7381_v61, %s7504_s0  ;;  %v7371_v20 = vpack.i.bf16 %v5295_v40, %v5282_v41  ;;  %5823 = vmatpush.msra.mxu2 %v5632_v25  ;;  %v5625_v61 = vld [vmem:[%s16034_s5 + $0x30] sm:$0xff]  ;;  %v5647_v46 = vld [vmem:[%s16034_s5 + $0xe0] sm:$0xff]  ;;  %v5620_v25 = vld [vmem:[%s16034_s5 + $0x8] sm:$0xff]  ;;  %vm17751_vm14 = vcmask 588800  }
 0xa36   :  { %v7396_v60 = vpack.i.bf16 %v14256_v19, %v14251_v63  ;;  %v7391_v55 = vpack.i.bf16 %v14283_v54, %v14279_v58  ;;  %5890 = vmatpush.msrb.mxu3 %v5682_v52  ;;  %vm17752_vm13 = vmmov %vm17751_vm14  ;;  %v5702_v33 = vld [vmem:[%s16034_s5 + $0x298] sm:$0xff] }
 0xa37   :  { %7372 = vrot.lane.b32.xlu2 %v7371_v20, %s17727_s3  ;;  %5824 = vmatpush.msra.mxu2 %v5631_v29  ;;  %v5650_v20 = vld [vmem:[%s16034_s5 + $0xf8] sm:$0xff]  ;;  %vm17755_vm7 = vmmov %vm17743_vm0 }
 0xa38   :  { %5844 = vmatpush.msra.mxu0 %v5650_v20  ;;  %5891 = vmatpush.msrb.mxu3 %v5681_v0  ;;  %v5694_v0 = vld [vmem:[%s16034_s5 + $0x258] sm:$0xff]  ;;  %vm17756_vm5 = vmmov %vm17752_vm13 }
 0xa39   :  { %5825 = vmatpush.msra.mxu2 %v5630_v3 }
 0xa3a   :  { %5845 = vmatpush.msra.mxu0 %v5649_v15 }
 0xa3c   :  { %5373 = vrot.lane.b32.xlu1 %v5296_v8, %s17727_s3 }
 0xa3d   :  { %7397 = vrot.lane.b32.xlu0 %v7396_v60, %s7504_s0  ;;  %v5648_v60 = vld [vmem:[%s16034_s5 + $0xe8] sm:$0xff] }
 0xa3e   :  { %5846 = vmatpush.msra.mxu0 %v5648_v60 }
 0xa3f   :  { %7377 = vrot.lane.b32.xlu2 %v7376_v18, %s7504_s0  ;;  %v5666_v18 = vld [vmem:[%s16034_s5 + $0x178] sm:$0xff] }
 0xa40   :  { %5867 = vmatpush.msrb.mxu1 %v5666_v18  ;;  %5847 = vmatpush.msra.mxu0 %v5647_v46  ;;  %v5646_v46 = vld [vmem:[%s16034_s5 + $0xd8] sm:$0xff] }
 0xa42   :  { %5848 = vmatpush.msra.mxu0 %v5646_v46  ;;  %v5674_v46 = vld [vmem:[%s16034_s5 + $0x1b8] sm:$0xff] }
 0xa47   :  { %7392 = vrot.lane.b32.xlu2 %v7391_v55, %s7504_s0  ;;  %v7349_v55 = vunpack.i.l.bf16 %v7348_v32 }
 0xa49   :  { %v5381_v3 = vsel %vm17742_vm11, %v7335_v47, %v7349_v55  ;;  %v5698_v47 = vld [vmem:[%s16034_s5 + $0x278] sm:$0xff]  ;;  %vm17758_vm11 = vmmov %vm17756_vm5 }
 0xa4a   :  { %v14379_v32 = vmax.f32 %v5277_v27, %v5381_v3  ;;  %v5644_v3 = vld [vmem:[%s16034_s5 + $0xc8] sm:$0xff] }
 0xa4f   :  { %5427 = vrot.lane.b32.xlu2 %v14010_v7, %s7483_s29  ;;  %v5629_v7 = vld [vmem:[%s16034_s5 + $0x50] sm:$0xff] }
 0xa50   :  { %5826 = vmatpush.msra.mxu2 %v5629_v7  ;;  %v5382_v7 = vsel %vm17743_vm0, %v7349_v55, %v7350_v49  ;;  %vm17759_vm0 = vmmov %vm17756_vm5 }
 0xa52   :  { %5827 = vmatpush.msra.mxu2 %v5628_v31 }
 0xa54   :  { %5828 = vmatpush.msra.mxu2 %v5627_v42 }
 0xa56   :  { %5829 = vmatpush.msra.mxu2 %v5626_v6  ;;  %v5619_v6 = vld [vmem:[%s16034_s5] sm:$0xff] }
 0xa58   :  { %5830 = vmatpush.msra.mxu2 %v5625_v61  ;;  %v5665_v61 = vld [vmem:[%s16034_s5 + $0x170] sm:$0xff] }
 0xa59   :  { %5868 = vmatpush.msrb.mxu1 %v5665_v61  ;;  %v5643_v61 = vld [vmem:[%s16034_s5 + $0xc0] sm:$0xff] }
 0xa5a   :  { %5831 = vmatpush.msra.mxu2 %v5624_v24  ;;  %v7358_v24 = vpop.permute.xlu2 %7357 }
 0xa5b   :  { %v7360_v18 = vunpack.i.h.bf16 %v7358_v24  ;;  %v7359_v52 = vunpack.i.l.bf16 %v7358_v24  ;;  %v5677_v24 = vld [vmem:[%s16034_s5 + $0x1d0] sm:$0xff] }
 0xa5c   :  { %5832 = vmatpush.msra.mxu2 %v5623_v23 }
 0xa5d   :  { %v5393_v45 = vsel %vm17746_vm12, %v7345_v9, %v7359_v52  ;;  %vm17762_vm12 = vmmov %vm17754_vm8 }
 0xa5e   :  { %5833 = vmatpush.msra.mxu2 %v5622_v2  ;;  %v14383_v2 = vmax.f32 %v5278_v36, %v5382_v7  ;;  %v5394_v36 = vsel %vm17747_vm15, %v7359_v52, %v7360_v18  ;;  %v14413_v55 = vmax.f32 %v5290_v13, %v5393_v45  ;;  %v5664_v13 = vld [vmem:[%s16034_s5 + $0x168] sm:$0xff]  ;;  %v5695_v7 = vld [vmem:[%s16034_s5 + $0x260] sm:$0xff]  ;;  %vm17763_vm15 = vmmov %vm17759_vm0 }
 0xa5f   :  { %v14417_v12 = vmax.f32 %v5291_v34, %v5394_v36  ;;  %v5680_v34 = vld [vmem:[%s16034_s5 + $0x1e8] sm:$0xff]  ;;  %5869 = vmatpush.msrb.mxu1 %v5664_v13  ;;  %v5659_v45 = vld [vmem:[%s16034_s5 + $0x140] sm:$0xff]  ;;  %v5690_v13 = vld [vmem:[%s16034_s5 + $0x238] sm:$0xff] }
 0xa60   :  { %5834 = vmatpush.msra.mxu2 %v5621_v39  ;;  %5892 = vmatpush.msrb.mxu3 %v5680_v34  ;;  %v5676_v52 = vld [vmem:[%s16034_s5 + $0x1c8] sm:$0xff]  ;;  %v5675_v36 = vld [vmem:[%s16034_s5 + $0x1c0] sm:$0xff]  ;;  %v5638_v34 = vld [vmem:[%s16034_s5 + $0x98] sm:$0xff] }
 0xa62   :  { %5835 = vmatpush.msra.mxu2 %v5620_v25  ;;  %v5679_v25 = vld [vmem:[%s16034_s5 + $0x1e0] sm:$0xff] }
 0xa63   :  { %5893 = vmatpush.msrb.mxu3 %v5679_v25  ;;  %v5637_v25 = vld [vmem:[%s16034_s5 + $0x90] sm:$0xff] }
 0xa64   :  { %5836 = vmatpush.msra.mxu2 %v5619_v6  ;;  %v5678_v6 = vld [vmem:[%s16034_s5 + $0x1d8] sm:$0xff] }
 0xa65   :  { %5894 = vmatpush.msrb.mxu3 %v5678_v6  ;;  %v5636_v6 = vld [vmem:[%s16034_s5 + $0x88] sm:$0xff] }
 0xa66   :  { %5913 = vmatpush.msrb.mxu2 %v5698_v47  ;;  %v5661_v47 = vld [vmem:[%s16034_s5 + $0x150] sm:$0xff] }
 0xa67   :  { %5895 = vmatpush.msrb.mxu3 %v5677_v24  ;;  %v5635_v24 = vld [vmem:[%s16034_s5 + $0x80] sm:$0xff] }
 0xa68   :  { %5914 = vmatpush.msrb.mxu2 %v5697_v51  ;;  %v5639_v51 = vld [vmem:[%s16034_s5 + $0xa0] sm:$0xff] }
 0xa69   :  { %5896 = vmatpush.msrb.mxu3 %v5676_v52  ;;  %v5685_v52 = vld [vmem:[%s16034_s5 + $0x210] sm:$0xff] }
 0xa6a   :  { %5915 = vmatpush.msrb.mxu2 %v5696_v59  ;;  %v5656_v59 = vld [vmem:[%s16034_s5 + $0x128] sm:$0xff] }
 0xa6b   :  { %5897 = vmatpush.msrb.mxu3 %v5675_v36 }
 0xa6c   :  { %v14353_v29 = vpop.permute.xlu1 %7352  ;;  %5916 = vmatpush.msrb.mxu2 %v5695_v7  ;;  %v5655_v7 = vld [vmem:[%s16034_s5 + $0x120] sm:$0xff] }
 0xa6d   :  { %v7355_v31 = vunpack.i.h.bf16 %v14353_v29  ;;  %v7354_v42 = vunpack.i.l.bf16 %v14353_v29  ;;  %5898 = vmatpush.msrb.mxu3 %v5674_v46  ;;  %v5714_v29 = vld [vmem:[%s16034_s5 + $0x2f8] sm:$0xff] }
 0xa6e   :  { %5917 = vmatpush.msrb.mxu2 %v5694_v0  ;;  %v5654_v0 = vld [vmem:[%s16034_s5 + $0x118] sm:$0xff] }
 0xa6f   :  { %v5383_v23 = vsel %vm17744_vm9, %v7350_v49, %v7354_v42  ;;  %v5384_v20 = vsel %vm17745_vm10, %v7354_v42, %v7355_v31  ;;  %v5662_v42 = vld [vmem:[%s16034_s5 + $0x158] sm:$0xff]  ;;  %vm17760_vm9 = vmmov %vm17759_vm0 }
 0xa70   :  { %v14387_v15 = vmax.f32 %v5279_v38, %v5383_v23  ;;  %v14391_v60 = vmax.f32 %v5280_v43, %v5384_v20  ;;  %v5642_v23 = vld [vmem:[%s16034_s5 + $0xb8] sm:$0xff]  ;;  %v5693_v20 = vld [vmem:[%s16034_s5 + $0x250] sm:$0xff]  ;;  %vm17761_vm10 = vmmov %vm17753_vm1 }
 0xa71   :  { %5918 = vmatpush.msrb.mxu2 %v5693_v20  ;;  %v5653_v20 = vld [vmem:[%s16034_s5 + $0x110] sm:$0xff] }
 0xa72   :  { %v7401_v10 = vpack.i.bf16 %v14387_v15, %v14383_v2  ;;  %v7406_v27 = vpack.i.bf16 %v14391_v60, %v14379_v32 }
 0xa74   :  { %7402 = vrot.lane.b32.xlu0 %v7401_v10, %s7504_s0  ;;  %7407 = vrot.lane.b32.xlu1 %v7406_v27, %s7504_s0  ;;  %v5641_v10 = vld [vmem:[%s16034_s5 + $0xb0] sm:$0xff]  ;;  %v5692_v27 = vld [vmem:[%s16034_s5 + $0x248] sm:$0xff] }
 0xa75   :  { %v14399_v17 = vpop.permute.xlu0 %7362  ;;  %5919 = vmatpush.msrb.mxu2 %v5692_v27  ;;  %v5652_v27 = vld [vmem:[%s16034_s5 + $0x108] sm:$0xff] }
 0xa76   :  { %v7365_v38 = vunpack.i.h.bf16 %v14399_v17  ;;  %v7364_v1 = vunpack.i.l.bf16 %v14399_v17  ;;  %v5722_v17 = vld [vmem:[%s16034_s5 + $0x338] sm:$0xff] }
 0xa78   :  { %v5395_v43 = vsel %vm17748_vm4, %v7360_v18, %v7364_v1  ;;  %v5396_v49 = vsel %vm17749_vm2, %v7364_v1, %v7365_v38  ;;  %v5660_v18 = vld [vmem:[%s16034_s5 + $0x148] sm:$0xff]  ;;  %vm17764_vm4 = vmmov %vm17759_vm0 }
 0xa79   :  { %v14421_v9 = vmax.f32 %v5292_v44, %v5395_v43  ;;  %v14425_v39 = vmax.f32 %v5293_v22, %v5396_v49  ;;  %v5645_v44 = vld [vmem:[%s16034_s5 + $0xd0] sm:$0xff]  ;;  %v5663_v22 = vld [vmem:[%s16034_s5 + $0x160] sm:$0xff]  ;;  %v5640_v1 = vld [vmem:[%s16034_s5 + $0xa8] sm:$0xff] }
 0xa7a   :  { %5849 = vmatpush.msra.mxu0 %v5645_v44  ;;  %5870 = vmatpush.msrb.mxu1 %v5663_v22  ;;  %v5691_v43 = vld [vmem:[%s16034_s5 + $0x240] sm:$0xff]  ;;  %v5658_v49 = vld [vmem:[%s16034_s5 + $0x138] sm:$0xff]  ;;  %v5689_v44 = vld [vmem:[%s16034_s5 + $0x230] sm:$0xff] }
 0xa7b   :  { %v7416_v21 = vpack.i.bf16 %v14425_v39, %v14413_v55  ;;  %v7411_v26 = vpack.i.bf16 %v14421_v9, %v14417_v12  ;;  %5920 = vmatpush.msrb.mxu2 %v5691_v43  ;;  %v5672_v22 = vld [vmem:[%s16034_s5 + $0x1a8] sm:$0xff]  ;;  %v5651_v43 = vld [vmem:[%s16034_s5 + $0x100] sm:$0xff]  ;;  %vm17765_vm2 = vmmov %vm17759_vm0 }
 0xa7c   :  { %5850 = vmatpush.msra.mxu0 %v5644_v3  ;;  %5871 = vmatpush.msrb.mxu1 %v5662_v42  ;;  %v5688_v3 = vld [vmem:[%s16034_s5 + $0x228] sm:$0xff]  ;;  %v5671_v42 = vld [vmem:[%s16034_s5 + $0x1a0] sm:$0xff] }
 0xa7d   :  { %7417 = vrot.lane.b32.xlu0 %v7416_v21, %s7504_s0  ;;  %7412 = vrot.lane.b32.xlu2 %v7411_v26, %s7504_s0  ;;  %v5657_v21 = vld [vmem:[%s16034_s5 + $0x130] sm:$0xff] }
 0xa7e   :  { %5851 = vmatpush.msra.mxu0 %v5643_v61  ;;  %5872 = vmatpush.msrb.mxu1 %v5661_v47  ;;  %v5673_v26 = vld [vmem:[%s16034_s5 + $0x1b0] sm:$0xff]  ;;  %v5687_v61 = vld [vmem:[%s16034_s5 + $0x220] sm:$0xff]  ;;  %v5670_v47 = vld [vmem:[%s16034_s5 + $0x198] sm:$0xff] }
 0xa7f   :  { %5921 = vmatpush.msrb.mxu2 %v5690_v13  ;;  %5899 = vmatpush.msrb.mxu3 %v5673_v26  ;;  %v5683_v13 = vld [vmem:[%s16034_s5 + $0x200] sm:$0xff] }
 0xa80   :  { %5852 = vmatpush.msra.mxu0 %v5642_v23  ;;  %5873 = vmatpush.msrb.mxu1 %v5660_v18  ;;  %v5686_v23 = vld [vmem:[%s16034_s5 + $0x218] sm:$0xff]  ;;  %v5669_v18 = vld [vmem:[%s16034_s5 + $0x190] sm:$0xff] }
 0xa81   :  { %5922 = vmatpush.msrb.mxu2 %v5689_v44  ;;  %5900 = vmatpush.msrb.mxu3 %v5672_v22  ;;  %v5729_v22 = vld [vmem:[%s16034_s5 + $0x370] sm:$0xff] }
 0xa82   :  { %5853 = vmatpush.msra.mxu0 %v5641_v10  ;;  %5874 = vmatpush.msrb.mxu1 %v5659_v45  ;;  %v5668_v45 = vld [vmem:[%s16034_s5 + $0x188] sm:$0xff] }
 0xa83   :  { %5923 = vmatpush.msrb.mxu2 %v5688_v3  ;;  %5901 = vmatpush.msrb.mxu3 %v5671_v42 }
 0xa84   :  { %5854 = vmatpush.msra.mxu0 %v5640_v1  ;;  %5875 = vmatpush.msrb.mxu1 %v5658_v49  ;;  %v5684_v1 = vld [vmem:[%s16034_s5 + $0x208] sm:$0xff]  ;;  %v5667_v49 = vld [vmem:[%s16034_s5 + $0x180] sm:$0xff] }
 0xa85   :  { %5585 = vrot.lane.b32.xlu2 %v14174_v5, %s17678_s16  ;;  %5924 = vmatpush.msrb.mxu2 %v5687_v61  ;;  %v5744_v61 = vld [vmem:[%s16034_s5 + $0x3e8] sm:$0xff] }
 0xa86   :  { %5855 = vmatpush.msra.mxu0 %v5639_v51  ;;  %5876 = vmatpush.msrb.mxu1 %v5657_v21 }
 0xa87   :  { %5902 = vmatpush.msrb.mxu3 %v5670_v47  ;;  %5925 = vmatpush.msrb.mxu2 %v5686_v23  ;;  %v5762_v47 = vld [vmem:[%s16034_s5 + $0x478] sm:$0xff] }
 0xa88   :  { %5856 = vmatpush.msra.mxu0 %v5638_v34  ;;  %5877 = vmatpush.msrb.mxu1 %v5656_v59 }
 0xa89   :  { %5903 = vmatpush.msrb.mxu3 %v5669_v18  ;;  %5926 = vmatpush.msrb.mxu2 %v5685_v52  ;;  %v5743_v18 = vld [vmem:[%s16034_s5 + $0x3e0] sm:$0xff]  ;;  %v5710_v52 = vld [vmem:[%s16034_s5 + $0x2d8] sm:$0xff] }
 0xa8a   :  { %5857 = vmatpush.msra.mxu0 %v5637_v25  ;;  %5878 = vmatpush.msrb.mxu1 %v5655_v7  ;;  %v5745_v25 = vld [vmem:[%s16034_s5 + $0x3f0] sm:$0xff]  ;;  %v5712_v7 = vld [vmem:[%s16034_s5 + $0x2e8] sm:$0xff] }
 0xa8b   :  { %5904 = vmatpush.msrb.mxu3 %v5668_v45  ;;  %5927 = vmatpush.msrb.mxu2 %v5684_v1 }
 0xa8c   :  { %5858 = vmatpush.msra.mxu0 %v5636_v6  ;;  %5879 = vmatpush.msrb.mxu1 %v5654_v0  ;;  %v5728_v6 = vld [vmem:[%s16034_s5 + $0x368] sm:$0xff]  ;;  %v5711_v0 = vld [vmem:[%s16034_s5 + $0x2e0] sm:$0xff] }
 0xa8d   :  { %5587 = vrot.lane.b32.xlu2 %v14264_v53, %s17678_s16  ;;  %5905 = vmatpush.msrb.mxu3 %v5667_v49  ;;  %v5742_v49 = vld [vmem:[%s16034_s5 + $0x3d8] sm:$0xff] }
 0xa8e   :  { %5859 = vmatpush.msra.mxu0 %v5635_v24  ;;  %5880 = vmatpush.msrb.mxu1 %v5653_v20  ;;  %v5727_v20 = vld [vmem:[%s16034_s5 + $0x360] sm:$0xff] }
 0xa8f   :  { %5928 = vmatpush.msrb.mxu2 %v5683_v13 }
 0xa90   :  { %5881 = vmatpush.msrb.mxu1 %v5652_v27  ;;  %5936 = vmatpush.msrb.mxu0 %v5714_v29  ;;  %v5761_v27 = vld [vmem:[%s16034_s5 + $0x470] sm:$0xff] }
 0xa91   :  { %v14584_v10 = vpop.permute.xlu2 %7372 }
 0xa92   :  { %v7374_v36 = vunpack.i.l.bf16 %v14584_v10  ;;  %5882 = vmatpush.msrb.mxu1 %v5651_v43  ;;  %5937 = vmatpush.msrb.mxu0 %v5713_v57  ;;  %v5726_v43 = vld [vmem:[%s16034_s5 + $0x358] sm:$0xff]  ;;  %v7375_v57 = vunpack.i.h.bf16 %v14584_v10 }
 0xa94   :  { %v5385_v51 = vsel %vm17750_vm6, %v7355_v31, %v7374_v36  ;;  %v5730_v31 = vld [vmem:[%s16034_s5 + $0x378] sm:$0xff]  ;;  %5938 = vmatpush.msrb.mxu0 %v5712_v7  ;;  %vm17766_vm6 = vmmov %vm17759_vm0 }
 0xa95   :  { %v14614_v34 = vmax.f32 %v5281_v30, %v5385_v51  ;;  %v5746_v30 = vld [vmem:[%s16034_s5 + $0x3f8] sm:$0xff]  ;;  %5959 = vmatpush.msra.mxu1 %v5730_v31  ;;  %v5760_v51 = vld [vmem:[%s16034_s5 + $0x468] sm:$0xff] }
 0xa96   :  { %v14602_v46 = vpop.permute.xlu1 %7367  ;;  %5982 = vmatpush.msra.mxu3 %v5746_v30  ;;  %5939 = vmatpush.msrb.mxu0 %v5711_v0  ;;  %v5740_v30 = vld [vmem:[%s16034_s5 + $0x3c8] sm:$0xff] }
 0xa97   :  { %v7370_v21 = vunpack.i.h.bf16 %v14602_v46  ;;  %v7369_v26 = vunpack.i.l.bf16 %v14602_v46  ;;  %5505 = vrot.lane.b32.xlu0 %v14614_v34, %s7504_s0  ;;  %5960 = vmatpush.msra.mxu1 %v5729_v22  ;;  %v5707_v22 = vld [vmem:[%s16034_s5 + $0x2c0] sm:$0xff]  ;;  %v5705_v46 = vld [vmem:[%s16034_s5 + $0x2b0] sm:$0xff] }
 0xa98   :  { %5983 = vmatpush.msra.mxu3 %v5745_v25  ;;  %5940 = vmatpush.msrb.mxu0 %v5710_v52  ;;  %v5759_v25 = vld [vmem:[%s16034_s5 + $0x460] sm:$0xff] }
 0xa99   :  { %v5537_v44 = vsel %vm17751_vm14, %v7369_v26, %v7370_v21  ;;  %v14642_v3 = vpop.permute.xlu2 %7377  ;;  %5961 = vmatpush.msra.mxu1 %v5728_v6  ;;  %v5739_v6 = vld [vmem:[%s16034_s5 + $0x3c0] sm:$0xff]  ;;  %vm17767_vm14 = vmmov %vm17759_vm0 }
 0xa9a   :  { %v14634_v59 = vmax.f32 %v14174_v5, %v5537_v44  ;;  %v7380_v5 = vunpack.i.h.bf16 %v14642_v3  ;;  %v7379_v42 = vunpack.i.l.bf16 %v14642_v3  ;;  %5984 = vmatpush.msra.mxu3 %v5744_v61  ;;  %v5741_v44 = vld [vmem:[%s16034_s5 + $0x3d0] sm:$0xff]  ;;  %v5397_v61 = vsel %vm17755_vm7, %v7365_v38, %v7375_v57  ;;  %v5738_v38 = vld [vmem:[%s16034_s5 + $0x3b8] sm:$0xff]  ;;  %vm17771_vm7 = vmmov %vm17759_vm0 }
 0xa9b   :  { %5962 = vmatpush.msra.mxu1 %v5727_v20 }
 0xa9c   :  { %5837 = vmatmul.f32.vlgmr.msra.gmra.mxu2 %v14634_v59  ;;  %v5549_v23 = vsel %vm17752_vm13, %v7379_v42, %v7380_v5  ;;  %5985 = vmatpush.msra.mxu3 %v5743_v18  ;;  %v5723_v42 = vld [vmem:[%s16034_s5 + $0x340] sm:$0xff]  ;;  %vm17768_vm13 = vmmov %vm17759_vm0 }
 0xa9d   :  { %6005 = vmatpush.msra.mxu2 %v5762_v47  ;;  %v14678_v1 = vmax.f32 %v14264_v53, %v5549_v23  ;;  %v5709_v53 = vld [vmem:[%s16034_s5 + $0x2d0] sm:$0xff]  ;;  %5963 = vmatpush.msra.mxu1 %v5726_v43  ;;  %v5706_v47 = vld [vmem:[%s16034_s5 + $0x2b8] sm:$0xff]  ;;  %v17757_v43 = vmax.f32 %v14162_v11, 0.0 }
 0xa9e   :  { %v5426_v24 = vpop.permute.xlu1 %5425  ;;  %5986 = vmatpush.msra.mxu3 %v5742_v49  ;;  %5941 = vmatpush.msrb.mxu0 %v5709_v53 }
 0xa9f   :  { %v5348_v45 = vpop.permute.xlu0 %5347  ;;  %6006 = vmatpush.msra.mxu2 %v5761_v27  ;;  %v14765_v49 = vmax.f32 %v17757_v43, %v5397_v61  ;;  %v5717_v43 = vld [vmem:[%s16034_s5 + $0x310] sm:$0xff] }
 0xaa0   :  { %v5386_v13 = vsel %vm17753_vm1, %v7374_v36, %v5348_v45  ;;  %v5431_v26 = vsel %vm17754_vm8, %v5348_v45, %v5426_v24  ;;  %v5725_v36 = vld [vmem:[%s16034_s5 + $0x350] sm:$0xff]  ;;  %5987 = vmatpush.msra.mxu3 %v5741_v44  ;;  %5942 = vmatpush.msrb.mxu0 %v5708_v35  ;;  %v5758_v24 = vld [vmem:[%s16034_s5 + $0x458] sm:$0xff]  ;;  %vm17769_vm1 = vmmov %vm17759_vm0 }
 0xaa1   :  { %v14696_v29 = vmax.f32 %v5282_v41, %v5386_v13  ;;  %v14700_v31 = vmax.f32 %v5283_v62, %v5431_v26  ;;  %6007 = vmatpush.msra.mxu2 %v5760_v51  ;;  %v14715_v62 = vpop.permute.xlu2 %7392  ;;  %v5724_v41 = vld [vmem:[%s16034_s5 + $0x348] sm:$0xff]  ;;  %5964 = vmatpush.msra.mxu1 %v5725_v36  ;;  %v5757_v45 = vld [vmem:[%s16034_s5 + $0x450] sm:$0xff]  ;;  %vm17770_vm8 = vmmov %vm17759_vm0 }
 0xaa2   :  { %5988 = vmatpush.msra.mxu3 %v5740_v30  ;;  %5943 = vmatpush.msrb.mxu0 %v5707_v22  ;;  %v7395_v13 = vunpack.i.h.bf16 %v14715_v62  ;;  %v7394_v53 = vunpack.i.l.bf16 %v14715_v62 }
 0xaa3   :  { %v7421_v14 = vpack.i.bf16 %v14700_v31, %v14696_v29  ;;  %5965 = vmatpush.msra.mxu1 %v5724_v41  ;;  %6008 = vmatpush.msra.mxu2 %v5759_v25  ;;  %v5756_v41 = vld [vmem:[%s16034_s5 + $0x448] sm:$0xff] }
 0xaa4   :  { %5840 = vmatmul.f32.gmra.mxu2 %v14678_v1  ;;  %5989 = vmatpush.msra.mxu3 %v5739_v6  ;;  %v5552_v25 = vsel %vm17763_vm15, %v7394_v53, %v7395_v13  ;;  %v5736_v6 = vld [vmem:[%s16034_s5 + $0x3a8] sm:$0xff]  ;;  %vm17777_vm15 = vmmov %vm17759_vm0 }
 0xaa5   :  { %7422 = vrot.lane.b32.xlu1 %v7421_v14, %s7504_s0  ;;  %5966 = vmatpush.msra.mxu1 %v5723_v42  ;;  %v5704_v14 = vld [vmem:[%s16034_s5 + $0x2a8] sm:$0xff]  ;;  %v5703_v42 = vld [vmem:[%s16034_s5 + $0x2a0] sm:$0xff] }
 0xaa6   :  { %v14729_v7 = vpop.permute.xlu1 %7387  ;;  %5944 = vmatpush.msrb.mxu0 %v5706_v47  ;;  %6009 = vmatpush.msra.mxu2 %v5758_v24  ;;  %v5755_v47 = vld [vmem:[%s16034_s5 + $0x440] sm:$0xff]  ;;  %v14845_v24 = vmax.f32 %v14279_v58, %v5552_v25  ;;  %v5793_v25 = vld [vmem:[%s16034_s5 + $0x570] sm:$0xff] }
 0xaa7   :  { %v7389_v0 = vunpack.i.l.bf16 %v14729_v7  ;;  %v7383_v23 = vpop.permute.xlu0 %7382  ;;  %v7390_v20 = vunpack.i.h.bf16 %v14729_v7  ;;  %5967 = vmatpush.msra.mxu1 %v5722_v17  ;;  %5990 = vmatpush.msra.mxu3 %v5738_v38  ;;  %v5718_v17 = vld [vmem:[%s16034_s5 + $0x318] sm:$0xff] }
 0xaa8   :  { %v7385_v52 = vunpack.i.h.bf16 %v7383_v23  ;;  %v7384_v27 = vunpack.i.l.bf16 %v7383_v23  ;;  %6010 = vmatpush.msra.mxu2 %v5757_v45  ;;  %5945 = vmatpush.msrb.mxu0 %v5705_v46  ;;  %v5735_v23 = vld [vmem:[%s16034_s5 + $0x3a0] sm:$0xff]  ;;  %v5754_v45 = vld [vmem:[%s16034_s5 + $0x438] sm:$0xff]  ;;  %v5753_v46 = vld [vmem:[%s16034_s5 + $0x430] sm:$0xff] }
 0xaa9   :  { %v5538_v18 = vsel %vm17756_vm5, %v7370_v21, %v7389_v0  ;;  %v5721_v21 = vld [vmem:[%s16034_s5 + $0x330] sm:$0xff]  ;;  %v7026_v7 = vld [vmem:[%s16034_s5 + $0x718] sm:$0xff]  ;;  %vm17772_vm5 = vmmov %vm17759_vm0 }
 0xaaa   :  { %v14768_v51 = vmax.f32 %v14178_v50, %v5538_v18  ;;  %v5539_v26 = vsel %vm17758_vm11, %v7389_v0, %v7384_v27  ;;  %v5540_v11 = vsel %vm17759_vm0, %v7384_v27, %v7385_v52  ;;  %v5541_v50 = vsel %vm17760_vm9, %v7385_v52, %v7390_v20  ;;  %5968 = vmatpush.msra.mxu1 %v5721_v21  ;;  %v5719_v0 = vld [vmem:[%s16034_s5 + $0x320] sm:$0xff]  ;;  %v5716_v21 = vld [vmem:[%s16034_s5 + $0x308] sm:$0xff]  ;;  %vm17773_vm11 = vmmov %vm17759_vm0 }
 0xaab   :  { %v14784_v36 = vmax.f32 %v14204_v56, %v5539_v26  ;;  %v14787_v44 = vmax.f32 %v14224_v28, %v5540_v11  ;;  %v14790_v35 = vmax.f32 %v14215_v37, %v5541_v50  ;;  %v5737_v56 = vld [vmem:[%s16034_s5 + $0x3b0] sm:$0xff]  ;;  %v5428_v37 = vpop.permute.xlu2 %5427  ;;  %v5720_v28 = vld [vmem:[%s16034_s5 + $0x328] sm:$0xff]  ;;  %5946 = vmatpush.msrb.mxu0 %v5704_v14  ;;  %6011 = vmatpush.msra.mxu2 %v5756_v41  ;;  %v5778_v26 = vld [vmem:[%s16034_s5 + $0x4f8] sm:$0xff]  ;;  %vm17774_vm9 = vcmask 261120  }
 0xaac   :  { %5860 = vmatmul.f32.vlgmr.msra.gmra.mxu0 %v14768_v51  ;;  %5991 = vmatpush.msra.mxu3 %v5737_v56  ;;  %v5732_v11 = vld [vmem:[%s16034_s5 + $0x388] sm:$0xff]  ;;  %v5731_v14 = vld [vmem:[%s16034_s5 + $0x380] sm:$0xff]  ;;  %v5777_v56 = vld [vmem:[%s16034_s5 + $0x4f0] sm:$0xff] }
 0xaad   :  { %5906 = vmatmul.f32.vlgmr.msrb.gmra.mxu3 %v14787_v44  ;;  %5531 = vrot.lane.b32.xlu1 %v14765_v49, %s7504_s0  ;;  %v5752_v50 = vld [vmem:[%s16034_s5 + $0x428] sm:$0xff] }
 0xaae   :  { %v5374_v62 = vpop.permute.xlu1 %5373  ;;  %5883 = vmatmul.f32.vlgmr.msrb.gmra.mxu1 %v14784_v36  ;;  %5929 = vmatmul.f32.vlgmr.msrb.gmra.mxu2 %v14790_v35  ;;  %v5776_v41 = vld [vmem:[%s16034_s5 + $0x4e8] sm:$0xff] }
 0xaaf   :  { %v5398_v30 = vsel %vm17761_vm10, %v7375_v57, %v5374_v62  ;;  %v5432_v22 = vsel %vm17762_vm12, %v5374_v62, %v5428_v37  ;;  %v14825_v57 = vpop.permute.xlu0 %7397  ;;  %5969 = vmatpush.msra.mxu1 %v5720_v28  ;;  %5947 = vmatpush.msrb.mxu0 %v5703_v42  ;;  %v5751_v62 = vld [vmem:[%s16034_s5 + $0x420] sm:$0xff]  ;;  %v5794_v37 = vld [vmem:[%s16034_s5 + $0x578] sm:$0xff]  ;;  %v5809_v42 = vld [vmem:[%s16034_s5 + $0x5f0] sm:$0xff] }
 0xab0   :  { %v14823_v10 = vmax.f32 %v5295_v40, %v5398_v30  ;;  %v14829_v61 = vmax.f32 %v5296_v8, %v5432_v22  ;;  %v7400_v16 = vunpack.i.h.bf16 %v14825_v57  ;;  %v7399_v40 = vunpack.i.l.bf16 %v14825_v57  ;;  %5992 = vmatpush.msra.mxu3 %v5736_v6  ;;  %6012 = vmatpush.msra.mxu2 %v5755_v47  ;;  %v5810_v28 = vld [vmem:[%s16034_s5 + $0x5f8] sm:$0xff]  ;;  %v5775_v30 = vld [vmem:[%s16034_s5 + $0x4e0] sm:$0xff]  ;;  %v5749_v6 = vld [vmem:[%s16034_s5 + $0x410] sm:$0xff] }
 0xab1   :  { %5970 = vmatpush.msra.mxu1 %v5719_v0  ;;  %5948 = vmatpush.msrb.mxu0 %v5702_v33  ;;  %v5750_v22 = vld [vmem:[%s16034_s5 + $0x418] sm:$0xff]  ;;  %v5792_v0 = vld [vmem:[%s16034_s5 + $0x568] sm:$0xff]  ;;  %vm17775_vm10 = vmmov %vm17774_vm9 }
 0xab2   :  { %v7426_v8 = vpack.i.bf16 %v14829_v61, %v14823_v10  ;;  %v5550_v38 = vsel %vm17764_vm4, %v7380_v5, %v7399_v40  ;;  %v5551_v18 = vsel %vm17765_vm2, %v7399_v40, %v7394_v53  ;;  %v5553_v58 = vsel %vm17766_vm6, %v7395_v13, %v7400_v16  ;;  %v5701_v5 = vld [vmem:[%s16034_s5 + $0x290] sm:$0xff]  ;;  %5993 = vmatpush.msra.mxu3 %v5735_v23  ;;  %v5715_v53 = vld [vmem:[%s16034_s5 + $0x300] sm:$0xff]  ;;  %v5774_v47 = vld [vmem:[%s16034_s5 + $0x4d8] sm:$0xff] }
 0xab3   :  { %v14861_v52 = vmax.f32 %v14261_v48, %v5550_v38  ;;  %v14864_v27 = vmax.f32 %v14251_v63, %v5551_v18  ;;  %v14868_v3 = vmax.f32 %v14283_v54, %v5553_v58  ;;  %5971 = vmatpush.msra.mxu1 %v5718_v17  ;;  %v5734_v48 = vld [vmem:[%s16034_s5 + $0x398] sm:$0xff]  ;;  %v5700_v63 = vld [vmem:[%s16034_s5 + $0x288] sm:$0xff]  ;;  %5949 = vmatpush.msrb.mxu0 %v5701_v5  ;;  %v5699_v54 = vld [vmem:[%s16034_s5 + $0x280] sm:$0xff]  ;;  %vm17779_vm2 = vcmask 850944  }
 0xab4   :  { %7427 = vrot.lane.b32.xlu0 %v7426_v8, %s7504_s0  ;;  %5994 = vmatpush.msra.mxu3 %v5734_v48  ;;  %v5733_v13 = vld [vmem:[%s16034_s5 + $0x390] sm:$0xff]  ;;  %v5808_v40 = vld [vmem:[%s16034_s5 + $0x5e8] sm:$0xff]  ;;  %v5791_v8 = vld [vmem:[%s16034_s5 + $0x560] sm:$0xff] }
 0xab5   :  { %5863 = vmatmul.f32.gmra.mxu0 %v14861_v52  ;;  %5909 = vmatmul.f32.gmra.mxu3 %v14845_v24  ;;  %v5748_v33 = vld [vmem:[%s16034_s5 + $0x408] sm:$0xff]  ;;  %v5807_v23 = vld [vmem:[%s16034_s5 + $0x5e0] sm:$0xff]  ;;  %v5773_v17 = vld [vmem:[%s16034_s5 + $0x4d0] sm:$0xff] }
 0xab6   :  { %5886 = vmatmul.f32.gmra.mxu1 %v14864_v27  ;;  %5932 = vmatmul.f32.gmra.mxu2 %v14868_v3  ;;  %v5747_v38 = vld [vmem:[%s16034_s5 + $0x400] sm:$0xff]  ;;  %v5790_v18 = vld [vmem:[%s16034_s5 + $0x558] sm:$0xff]  ;;  %v5772_v5 = vld [vmem:[%s16034_s5 + $0x4c8] sm:$0xff] }
 0xab7   :  { %6013 = vmatpush.msra.mxu2 %v5754_v45  ;;  %5972 = vmatpush.msra.mxu1 %v5717_v43  ;;  %v5806_v58 = vld [vmem:[%s16034_s5 + $0x5d8] sm:$0xff]  ;;  %v5789_v45 = vld [vmem:[%s16034_s5 + $0x550] sm:$0xff]  ;;  %vm17776_vm12 = vmmov %vm17759_vm0 }
 0xab8   :  { %5950 = vmatpush.msrb.mxu0 %v5700_v63  ;;  %5995 = vmatpush.msra.mxu3 %v5733_v13  ;;  %v5814_v48 = vld [vmem:[%s16034_s5 + $0x618] sm:$0xff]  ;;  %v5771_v63 = vld [vmem:[%s16034_s5 + $0x4c0] sm:$0xff]  ;;  %v5805_v43 = vld [vmem:[%s16034_s5 + $0x5d0] sm:$0xff] }
 0xab9   :  { %6014 = vmatpush.msra.mxu2 %v5753_v46  ;;  %5973 = vmatpush.msra.mxu1 %v5716_v21  ;;  %v5769_v13 = vld [vmem:[%s16034_s5 + $0x4b0] sm:$0xff]  ;;  %v5788_v21 = vld [vmem:[%s16034_s5 + $0x548] sm:$0xff]  ;;  %vm17778_vm4 = vmmov %vm17759_vm0 }
 0xaba   :  { %5951 = vmatpush.msrb.mxu0 %v5699_v54  ;;  %5996 = vmatpush.msra.mxu3 %v5732_v11  ;;  %v5770_v54 = vld [vmem:[%s16034_s5 + $0x4b8] sm:$0xff]  ;;  %v5813_v46 = vld [vmem:[%s16034_s5 + $0x610] sm:$0xff]  ;;  %v5812_v11 = vld [vmem:[%s16034_s5 + $0x608] sm:$0xff] }
 0xabb   :  { %6015 = vmatpush.msra.mxu2 %v5752_v50  ;;  %5974 = vmatpush.msra.mxu1 %v5715_v53  ;;  %v5787_v50 = vld [vmem:[%s16034_s5 + $0x540] sm:$0xff]  ;;  %vm17780_vm6 = vmmov %vm17759_vm0 }
 0xabc   :  { %6028 = vmatpush.msra.mxu0 %v5778_v26  ;;  %5997 = vmatpush.msra.mxu3 %v5731_v14  ;;  %v5804_v26 = vld [vmem:[%s16034_s5 + $0x5c8] sm:$0xff]  ;;  %v5803_v53 = vld [vmem:[%s16034_s5 + $0x5c0] sm:$0xff] }
 0xabd   :  { %6016 = vmatpush.msra.mxu2 %v5751_v62  ;;  %6051 = vmatpush.msrb.mxu1 %v5794_v37  ;;  %v5811_v14 = vld [vmem:[%s16034_s5 + $0x600] sm:$0xff]  ;;  %v5786_v62 = vld [vmem:[%s16034_s5 + $0x538] sm:$0xff] }
 0xabe   :  { %6029 = vmatpush.msra.mxu0 %v5777_v56  ;;  %6074 = vmatpush.msrb.mxu3 %v5810_v28  ;;  %v5768_v56 = vld [vmem:[%s16034_s5 + $0x4a8] sm:$0xff]  ;;  %v5802_v37 = vld [vmem:[%s16034_s5 + $0x5b8] sm:$0xff]  ;;  %v5767_v28 = vld [vmem:[%s16034_s5 + $0x4a0] sm:$0xff] }
 0xabf   :  { %6017 = vmatpush.msra.mxu2 %v5750_v22  ;;  %6052 = vmatpush.msrb.mxu1 %v5793_v25  ;;  %v5766_v22 = vld [vmem:[%s16034_s5 + $0x498] sm:$0xff]  ;;  %v5784_v25 = vld [vmem:[%s16034_s5 + $0x528] sm:$0xff] }
 0xac0   :  { %6030 = vmatpush.msra.mxu0 %v5776_v41  ;;  %6075 = vmatpush.msrb.mxu3 %v5809_v42  ;;  %v5785_v41 = vld [vmem:[%s16034_s5 + $0x530] sm:$0xff]  ;;  %v5800_v42 = vld [vmem:[%s16034_s5 + $0x5a8] sm:$0xff] }
 0xac1   :  { %6018 = vmatpush.msra.mxu2 %v5749_v6  ;;  %6053 = vmatpush.msrb.mxu1 %v5792_v0  ;;  %v5765_v6 = vld [vmem:[%s16034_s5 + $0x490] sm:$0xff]  ;;  %v5783_v0 = vld [vmem:[%s16034_s5 + $0x520] sm:$0xff] }
 0xac2   :  { %6031 = vmatpush.msra.mxu0 %v5775_v30  ;;  %6076 = vmatpush.msrb.mxu3 %v5808_v40  ;;  %v5801_v30 = vld [vmem:[%s16034_s5 + $0x5b0] sm:$0xff]  ;;  %v5764_v40 = vld [vmem:[%s16034_s5 + $0x488] sm:$0xff] }
 0xac3   :  { %6019 = vmatpush.msra.mxu2 %v5748_v33  ;;  %6054 = vmatpush.msrb.mxu1 %v5791_v8  ;;  %v5782_v33 = vld [vmem:[%s16034_s5 + $0x518] sm:$0xff] }
 0xac4   :  { %6032 = vmatpush.msra.mxu0 %v5774_v47  ;;  %6077 = vmatpush.msrb.mxu3 %v5807_v23  ;;  %v5799_v47 = vld [vmem:[%s16034_s5 + $0x5a0] sm:$0xff]  ;;  %v5798_v8 = vld [vmem:[%s16034_s5 + $0x598] sm:$0xff] }
 0xac5   :  { %6020 = vmatpush.msra.mxu2 %v5747_v38  ;;  %6055 = vmatpush.msrb.mxu1 %v5790_v18  ;;  %v5763_v23 = vld [vmem:[%s16034_s5 + $0x480] sm:$0xff]  ;;  %v5797_v38 = vld [vmem:[%s16034_s5 + $0x590] sm:$0xff]  ;;  %v5780_v18 = vld [vmem:[%s16034_s5 + $0x508] sm:$0xff] }
 0xac6   :  { %6033 = vmatpush.msra.mxu0 %v5773_v17  ;;  %6078 = vmatpush.msrb.mxu3 %v5806_v58  ;;  %v5781_v17 = vld [vmem:[%s16034_s5 + $0x510] sm:$0xff]  ;;  %v5796_v58 = vld [vmem:[%s16034_s5 + $0x588] sm:$0xff] }
 0xac7   :  { %6109 = vmatpush.msrb.mxu2 %v5814_v48  ;;  %6056 = vmatpush.msrb.mxu1 %v5789_v45  ;;  %v5795_v48 = vld [vmem:[%s16034_s5 + $0x580] sm:$0xff] }
 0xac8   :  { %6034 = vmatpush.msra.mxu0 %v5772_v5  ;;  %6079 = vmatpush.msrb.mxu3 %v5805_v43  ;;  %v5779_v5 = vld [vmem:[%s16034_s5 + $0x500] sm:$0xff] }
 0xac9   :  { %6110 = vmatpush.msrb.mxu2 %v5813_v46  ;;  %6057 = vmatpush.msrb.mxu1 %v5788_v21 }
 0xaca   :  { %6035 = vmatpush.msra.mxu0 %v5771_v63  ;;  %6080 = vmatpush.msrb.mxu3 %v5804_v26 }
 0xacb   :  { %6111 = vmatpush.msrb.mxu2 %v5812_v11  ;;  %6058 = vmatpush.msrb.mxu1 %v5787_v50 }
 0xacc   :  { %6036 = vmatpush.msra.mxu0 %v5770_v54  ;;  %6081 = vmatpush.msrb.mxu3 %v5803_v53 }
 0xacd   :  { %6112 = vmatpush.msrb.mxu2 %v5811_v14  ;;  %6059 = vmatpush.msrb.mxu1 %v5786_v62 }
 0xace   :  { %6037 = vmatpush.msra.mxu0 %v5769_v13  ;;  %6082 = vmatpush.msrb.mxu3 %v5802_v37 }
 0xacf   :  { %6060 = vmatpush.msrb.mxu1 %v5785_v41  ;;  %v7009_v41 = vld [vmem:[%s16034_s5 + $0x690] sm:$0xff] }
 0xad0   :  { %6038 = vmatpush.msra.mxu0 %v5768_v56  ;;  %6083 = vmatpush.msrb.mxu3 %v5801_v30  ;;  %v7041_v30 = vld [vmem:[%s16034_s5 + $0x790] sm:$0xff] }
 0xad1   :  { %6061 = vmatpush.msrb.mxu1 %v5784_v25 }
 0xad2   :  { %6039 = vmatpush.msra.mxu0 %v5767_v28  ;;  %6084 = vmatpush.msrb.mxu3 %v5800_v42  ;;  %v7025_v28 = vld [vmem:[%s16034_s5 + $0x710] sm:$0xff]  ;;  %v7024_v42 = vld [vmem:[%s16034_s5 + $0x708] sm:$0xff] }
 0xad3   :  { %6062 = vmatpush.msrb.mxu1 %v5783_v0 }
 0xad4   :  { %6040 = vmatpush.msra.mxu0 %v5766_v22  ;;  %6085 = vmatpush.msrb.mxu3 %v5799_v47  ;;  %v7057_v22 = vld [vmem:[%s16034_s5 + $0x810] sm:$0xff] }
 0xad5   :  { %6063 = vmatpush.msrb.mxu1 %v5782_v33  ;;  %v7056_v33 = vld [vmem:[%s16034_s5 + $0x808] sm:$0xff] }
 0xad6   :  { %6041 = vmatpush.msra.mxu0 %v5765_v6  ;;  %6086 = vmatpush.msrb.mxu3 %v5798_v8  ;;  %v7008_v6 = vld [vmem:[%s16034_s5 + $0x688] sm:$0xff]  ;;  %v7023_v8 = vld [vmem:[%s16034_s5 + $0x700] sm:$0xff] }
 0xad7   :  { %6064 = vmatpush.msrb.mxu1 %v5781_v17  ;;  %v7413_v53 = vpop.permute.xlu2 %7412  ;;  %v7007_v17 = vld [vmem:[%s16034_s5 + $0x680] sm:$0xff] }
 0xad8   :  { %6042 = vmatpush.msra.mxu0 %v5764_v40  ;;  %6087 = vmatpush.msrb.mxu3 %v5797_v38  ;;  %v7040_v40 = vld [vmem:[%s16034_s5 + $0x788] sm:$0xff] }
 0xad9   :  { %6065 = vmatpush.msrb.mxu1 %v5780_v18 }
 0xada   :  { %6043 = vmatpush.msra.mxu0 %v5763_v23  ;;  %6088 = vmatpush.msrb.mxu3 %v5796_v58 }
 0xadb   :  { %6066 = vmatpush.msrb.mxu1 %v5779_v5 }
 0xadc   :  { %6089 = vmatpush.msrb.mxu3 %v5795_v48 }
 0xae6   :  { %v7403_v63 = vpop.permute.xlu0 %7402  ;;  %v15084_v54 = vpop.permute.xlu1 %7407 }
 0xae7   :  { %v7405_v45 = vunpack.i.h.bf16 %v7403_v63  ;;  %v7404_v43 = vunpack.i.l.bf16 %v7403_v63  ;;  %v7410_v13 = vunpack.i.h.bf16 %v15084_v54  ;;  %v7409_v46 = vunpack.i.l.bf16 %v15084_v54  ;;  %v7045_v54 = vld [vmem:[%s16034_s5 + $0x7b0] sm:$0xff] }
 0xae9   :  { %v5544_v21 = vsel %vm17767_vm14, %v7404_v43, %v7405_v45  ;;  %v5545_v26 = vsel %vm17768_vm13, %v7405_v45, %v7410_v13  ;;  %v5542_v11 = vsel %vm17769_vm1, %v7390_v20, %v7409_v46  ;;  %v5543_v50 = vsel %vm17770_vm8, %v7409_v46, %v7404_v43  ;;  %v7010_v20 = vld [vmem:[%s16034_s5 + $0x698] sm:$0xff]  ;;  %v7005_v45 = vld [vmem:[%s16034_s5 + $0x670] sm:$0xff]  ;;  %v15200_v43 = vpop.permute.xlu2 %5585  ;;  %vm17781_vm14 = vmmov %vm17759_vm0 }
 0xaea   :  { %v15097_v14 = vmax.f32 %v14383_v2, %v5544_v21  ;;  %v15100_v56 = vmax.f32 %v14387_v15, %v5545_v26  ;;  %v15103_v62 = vmax.f32 %v14198_v4, %v5542_v11  ;;  %v15106_v37 = vmax.f32 %v14379_v32, %v5543_v50  ;;  %v7042_v4 = vld [vmem:[%s16034_s5 + $0x798] sm:$0xff]  ;;  %v7020_v26 = vld [vmem:[%s16034_s5 + $0x6e8] sm:$0xff]  ;;  %v7037_v50 = vld [vmem:[%s16034_s5 + $0x770] sm:$0xff] }
 0xaeb   :  { %v7058_v32 = vld [vmem:[%s16034_s5 + $0x818] sm:$0xff]  ;;  %v7415_v2 = vunpack.i.h.bf16 %v7413_v53  ;;  %v7414_v15 = vunpack.i.l.bf16 %v7413_v53  ;;  %v7004_v11 = vld [vmem:[%s16034_s5 + $0x668] sm:$0xff]  ;;  %v7053_v53 = vld [vmem:[%s16034_s5 + $0x7f0] sm:$0xff] }
 0xaec   :  { %5952 = vmatmul.f32.vlgmr.msrb.gmra.mxu0 %v15103_v62  ;;  %5975 = vmatmul.f32.vlgmr.msra.gmra.mxu1 %v15106_v37  ;;  %v7038_v46 = vld [vmem:[%s16034_s5 + $0x778] sm:$0xff]  ;;  %vm17782_vm13 = vmmov %vm17759_vm0 }
 0xaed   :  { %5998 = vmatmul.f32.vlgmr.msra.gmra.mxu3 %v15097_v14  ;;  %6021 = vmatmul.f32.vlgmr.msra.gmra.mxu2 %v15100_v56  ;;  %v5556_v23 = vsel %vm17771_vm7, %v7414_v15, %v7415_v2  ;;  %v7054_v21 = vld [vmem:[%s16034_s5 + $0x7f8] sm:$0xff]  ;;  %vm17783_vm1 = vmmov %vm17779_vm2 }
 0xaee   :  { %6428 = vmatpush.msra.mxu2 %v7026_v7  ;;  %6405 = vmatpush.msrb.mxu0 %v7010_v20  ;;  %v15176_v57 = vmax.f32 %v14417_v12, %v5556_v23  ;;  %v7055_v12 = vld [vmem:[%s16034_s5 + $0x800] sm:$0xff]  ;;  %vm17784_vm8 = vmmov %vm17774_vm9 }
 0xaef   :  { %v15136_v25 = vpop.permute.xlu0 %7417  ;;  %6451 = vmatpush.msra.mxu1 %v7042_v4  ;;  %6474 = vmatpush.msra.mxu3 %v7058_v32  ;;  %v7019_v7 = vld [vmem:[%s16034_s5 + $0x6e0] sm:$0xff]  ;;  %v7036_v4 = vld [vmem:[%s16034_s5 + $0x768] sm:$0xff]  ;;  %v15231_v32 = vmax.f32 %v14700_v31, %v15200_v43  ;;  %vm17785_vm7 = vmmov %vm17784_vm8 }
 0xaf0   :  { %v7420_v0 = vunpack.i.h.bf16 %v15136_v25  ;;  %v7419_v47 = vunpack.i.l.bf16 %v15136_v25  ;;  %6429 = vmatpush.msra.mxu2 %v7025_v28  ;;  %6406 = vmatpush.msrb.mxu0 %v7009_v41  ;;  %v7003_v20 = vld [vmem:[%s16034_s5 + $0x660] sm:$0xff]  ;;  %v7052_v28 = vld [vmem:[%s16034_s5 + $0x7e8] sm:$0xff]  ;;  %v7017_v41 = vld [vmem:[%s16034_s5 + $0x6d0] sm:$0xff] }
 0xaf1   :  { %6452 = vmatpush.msra.mxu1 %v7041_v30  ;;  %6475 = vmatpush.msra.mxu3 %v7057_v22  ;;  %v7035_v31 = vld [vmem:[%s16034_s5 + $0x760] sm:$0xff]  ;;  %v7001_v30 = vld [vmem:[%s16034_s5 + $0x650] sm:$0xff] }
 0xaf2   :  { %6430 = vmatpush.msra.mxu2 %v7024_v42  ;;  %v5554_v38 = vsel %vm17772_vm5, %v7400_v16, %v7419_v47  ;;  %v5555_v18 = vsel %vm17773_vm11, %v7419_v47, %v7414_v15  ;;  %v5557_v58 = vsel %vm17759_vm0, %v7415_v2, %v7420_v0  ;;  %6407 = vmatpush.msrb.mxu0 %v7008_v6  ;;  %v7022_v16 = vld [vmem:[%s16034_s5 + $0x6f8] sm:$0xff]  ;;  %v7051_v22 = vld [vmem:[%s16034_s5 + $0x7e0] sm:$0xff]  ;;  %v7016_v6 = vld [vmem:[%s16034_s5 + $0x6c8] sm:$0xff]  ;;  %vm6120_vm5 = vcmask 122880  }
 0xaf3   :  { %v15167_v5 = vmax.f32 %v14256_v19, %v5554_v38  ;;  %v15170_v48 = vmax.f32 %v14413_v55, %v5555_v18  ;;  %v15173_v63 = vmax.f32 %v14421_v9, %v5557_v58  ;;  %6453 = vmatpush.msra.mxu1 %v7040_v40  ;;  %6476 = vmatpush.msra.mxu3 %v7056_v33  ;;  %v7006_v19 = vld [vmem:[%s16034_s5 + $0x678] sm:$0xff]  ;;  %v7039_v55 = vld [vmem:[%s16034_s5 + $0x780] sm:$0xff]  ;;  %v7021_v9 = vld [vmem:[%s16034_s5 + $0x6f0] sm:$0xff]  ;;  %v15265_v40 = vpop.permute.xlu2 %5587  ;;  %vm6128_vm11 = vcmask 254080  }
 0xaf4   :  { %6431 = vmatpush.msra.mxu2 %v7023_v8  ;;  %6408 = vmatpush.msrb.mxu0 %v7007_v17  ;;  %v7018_v2 = vld [vmem:[%s16034_s5 + $0x6d8] sm:$0xff]  ;;  %v7000_v47 = vld [vmem:[%s16034_s5 + $0x648] sm:$0xff]  ;;  %v7033_v8 = vld [vmem:[%s16034_s5 + $0x750] sm:$0xff]  ;;  %v15284_v18 = vmax.f32 %v14829_v61, %v15265_v40  ;;  %vm6136_vm0 = vcmask 385280  }
 0xaf5   :  { %5955 = vmatmul.f32.gmra.mxu0 %v15167_v5  ;;  %5978 = vmatmul.f32.gmra.mxu1 %v15170_v48  ;;  %v7002_v15 = vld [vmem:[%s16034_s5 + $0x658] sm:$0xff]  ;;  %v7015_v23 = vld [vmem:[%s16034_s5 + $0x6c0] sm:$0xff]  ;;  %v7049_v38 = vld [vmem:[%s16034_s5 + $0x7d0] sm:$0xff] }
 0xaf6   :  { %6001 = vmatmul.f32.gmra.mxu3 %v15176_v57  ;;  %6024 = vmatmul.f32.gmra.mxu2 %v15173_v63  ;;  %v7034_v42 = vld [vmem:[%s16034_s5 + $0x758] sm:$0xff]  ;;  %v6999_v17 = vld [vmem:[%s16034_s5 + $0x640] sm:$0xff]  ;;  %v7048_v61 = vld [vmem:[%s16034_s5 + $0x7c8] sm:$0xff] }
 0xaf7   :  { %6432 = vmatpush.msra.mxu2 %v7022_v16  ;;  %6409 = vmatpush.msrb.mxu0 %v7006_v19  ;;  %v7050_v33 = vld [vmem:[%s16034_s5 + $0x7d8] sm:$0xff]  ;;  %v7032_v19 = vld [vmem:[%s16034_s5 + $0x748] sm:$0xff]  ;;  %v7079_v25 = vld [vmem:[%s16034_s5 + $0x8c0] sm:$0xff] }
 0xaf8   :  { %6454 = vmatpush.msra.mxu1 %v7039_v55  ;;  %6477 = vmatpush.msra.mxu3 %v7055_v12  ;;  %v7014_v58 = vld [vmem:[%s16034_s5 + $0x6b8] sm:$0xff]  ;;  %v7013_v55 = vld [vmem:[%s16034_s5 + $0x6b0] sm:$0xff] }
 0xaf9   :  { %6433 = vmatpush.msra.mxu2 %v7021_v9  ;;  %6410 = vmatpush.msrb.mxu0 %v7005_v45  ;;  %v6998_v16 = vld [vmem:[%s16034_s5 + $0x638] sm:$0xff]  ;;  %v6997_v12 = vld [vmem:[%s16034_s5 + $0x630] sm:$0xff]  ;;  %v7031_v9 = vld [vmem:[%s16034_s5 + $0x740] sm:$0xff] }
 0xafa   :  { %6455 = vmatpush.msra.mxu1 %v7038_v46  ;;  %6478 = vmatpush.msra.mxu3 %v7054_v21  ;;  %v7047_v45 = vld [vmem:[%s16034_s5 + $0x7c0] sm:$0xff]  ;;  %v7012_v46 = vld [vmem:[%s16034_s5 + $0x6a8] sm:$0xff] }
 0xafb   :  { %6434 = vmatpush.msra.mxu2 %v7020_v26  ;;  %6411 = vmatpush.msrb.mxu0 %v7004_v11  ;;  %v6996_v21 = vld [vmem:[%s16034_s5 + $0x628] sm:$0xff]  ;;  %v7030_v26 = vld [vmem:[%s16034_s5 + $0x738] sm:$0xff] }
 0xafc   :  { %6456 = vmatpush.msra.mxu1 %v7037_v50  ;;  %6479 = vmatpush.msra.mxu3 %v7053_v53  ;;  %v7046_v11 = vld [vmem:[%s16034_s5 + $0x7b8] sm:$0xff]  ;;  %v7011_v50 = vld [vmem:[%s16034_s5 + $0x6a0] sm:$0xff] }
 0xafd   :  { %6435 = vmatpush.msra.mxu2 %v7019_v7  ;;  %6412 = vmatpush.msrb.mxu0 %v7003_v20  ;;  %v6995_v53 = vld [vmem:[%s16034_s5 + $0x620] sm:$0xff]  ;;  %v7090_v7 = vld [vmem:[%s16034_s5 + $0x918] sm:$0xff] }
 0xafe   :  { %6987 = vmatmul.msk.f32.vlgmr.msrb.gmra.mxu2 %vm17774_vm9, %v15231_v32  ;;  %6457 = vmatpush.msra.mxu1 %v7036_v4  ;;  %v7029_v4 = vld [vmem:[%s16034_s5 + $0x730] sm:$0xff]  ;;  %vm6146_vm9 = vcmask 516480  }
 0xaff   :  { %6436 = vmatpush.msra.mxu2 %v7018_v2  ;;  %6413 = vmatpush.msrb.mxu0 %v7002_v15 }
 0xb00   :  { %6480 = vmatpush.msra.mxu3 %v7052_v28  ;;  %6458 = vmatpush.msra.mxu1 %v7035_v31  ;;  %v7089_v28 = vld [vmem:[%s16034_s5 + $0x910] sm:$0xff]  ;;  %v7074_v31 = vld [vmem:[%s16034_s5 + $0x898] sm:$0xff] }
 0xb01   :  { %6437 = vmatpush.msra.mxu2 %v7017_v41  ;;  %6414 = vmatpush.msrb.mxu0 %v7001_v30  ;;  %v7073_v41 = vld [vmem:[%s16034_s5 + $0x890] sm:$0xff]  ;;  %v7044_v30 = vld [vmem:[%s16034_s5 + $0x7a8] sm:$0xff] }
 0xb02   :  { %6481 = vmatpush.msra.mxu3 %v7051_v22  ;;  %6459 = vmatpush.msra.mxu1 %v7034_v42  ;;  %v7087_v22 = vld [vmem:[%s16034_s5 + $0x900] sm:$0xff]  ;;  %v7072_v42 = vld [vmem:[%s16034_s5 + $0x888] sm:$0xff] }
 0xb03   :  { %6438 = vmatpush.msra.mxu2 %v7016_v6  ;;  %6415 = vmatpush.msrb.mxu0 %v7000_v47  ;;  %v7043_v6 = vld [vmem:[%s16034_s5 + $0x7a0] sm:$0xff]  ;;  %v7086_v47 = vld [vmem:[%s16034_s5 + $0x8f8] sm:$0xff] }
 0xb04   :  { %6482 = vmatpush.msra.mxu3 %v7050_v33  ;;  %6460 = vmatpush.msra.mxu1 %v7033_v8  ;;  %v7071_v33 = vld [vmem:[%s16034_s5 + $0x880] sm:$0xff]  ;;  %v7085_v8 = vld [vmem:[%s16034_s5 + $0x8f0] sm:$0xff] }
 0xb05   :  { %6439 = vmatpush.msra.mxu2 %v7015_v23  ;;  %6416 = vmatpush.msrb.mxu0 %v6999_v17  ;;  %v7070_v23 = vld [vmem:[%s16034_s5 + $0x878] sm:$0xff]  ;;  %v7084_v17 = vld [vmem:[%s16034_s5 + $0x8e8] sm:$0xff] }
 0xb06   :  { %6988 = vmatmul.msk.f32.gmra.mxu2 %vm17775_vm10, %v15284_v18  ;;  %6483 = vmatpush.msra.mxu3 %v7049_v38  ;;  %v7069_v38 = vld [vmem:[%s16034_s5 + $0x870] sm:$0xff]  ;;  %vm6154_vm10 = vcmask 647680  }
 0xb07   :  { %6440 = vmatpush.msra.mxu2 %v7014_v58  ;;  %6417 = vmatpush.msrb.mxu0 %v6998_v16 }
 0xb08   :  { %6461 = vmatpush.msra.mxu1 %v7032_v19  ;;  %6484 = vmatpush.msra.mxu3 %v7048_v61  ;;  %v7083_v61 = vld [vmem:[%s16034_s5 + $0x8e0] sm:$0xff] }
 0xb09   :  { %6441 = vmatpush.msra.mxu2 %v7013_v55  ;;  %6418 = vmatpush.msrb.mxu0 %v6997_v12  ;;  %v5506_v20 = vpop.permute.xlu0 %5505 }
 0xb0a   :  { %6462 = vmatpush.msra.mxu1 %v7031_v9  ;;  %6485 = vmatpush.msra.mxu3 %v7047_v45  ;;  %v5546_v2 = vsel %vm17776_vm12, %v7410_v13, %v5506_v20  ;;  %v7088_v13 = vld [vmem:[%s16034_s5 + $0x908] sm:$0xff]  ;;  %v7082_v9 = vld [vmem:[%s16034_s5 + $0x8d8] sm:$0xff]  ;;  %vm6164_vm12 = vcmask 778880  }
 0xb0b   :  { %6442 = vmatpush.msra.mxu2 %v7012_v46  ;;  %6419 = vmatpush.msrb.mxu0 %v6996_v21  ;;  %v15340_v15 = vmax.f32 %v14391_v60, %v5546_v2  ;;  %v7028_v60 = vld [vmem:[%s16034_s5 + $0x728] sm:$0xff]  ;;  %v7106_v46 = vld [vmem:[%s16034_s5 + $0x998] sm:$0xff] }
 0xb0c   :  { %6463 = vmatpush.msra.mxu1 %v7030_v26  ;;  %6486 = vmatpush.msra.mxu3 %v7046_v11  ;;  %v7122_v11 = vld [vmem:[%s16034_s5 + $0xa18] sm:$0xff] }
 0xb0d   :  { %6443 = vmatpush.msra.mxu2 %v7011_v50  ;;  %6420 = vmatpush.msrb.mxu0 %v6995_v53  ;;  %v7105_v50 = vld [vmem:[%s16034_s5 + $0x990] sm:$0xff]  ;;  %v7080_v53 = vld [vmem:[%s16034_s5 + $0x8c8] sm:$0xff] }
 0xb0e   :  { %6464 = vmatpush.msra.mxu1 %v7029_v4  ;;  %6444 = vmatmul.f32.vlgmr.msra.gmra.mxu2 %v14768_v51  ;;  %v7027_v51 = vld [vmem:[%s16034_s5 + $0x720] sm:$0xff]  ;;  %v7066_v4 = vld [vmem:[%s16034_s5 + $0x858] sm:$0xff] }
 0xb0f   :  { %6520 = vmatpush.msrb.mxu2 %v7090_v7  ;;  %6044 = vmatmul.f32.vlgmr.msra.gmra.mxu0 %v15340_v15 }
 0xb10   :  { %6497 = vmatpush.msra.mxu0 %v7074_v31  ;;  %6487 = vmatpush.msra.mxu3 %v7045_v54  ;;  %v7103_v54 = vld [vmem:[%s16034_s5 + $0x980] sm:$0xff] }
 0xb11   :  { %6521 = vmatpush.msrb.mxu2 %v7089_v28  ;;  %6465 = vmatpush.msra.mxu1 %v7028_v60  ;;  %v7120_v28 = vld [vmem:[%s16034_s5 + $0xa08] sm:$0xff]  ;;  %v7065_v60 = vld [vmem:[%s16034_s5 + $0x850] sm:$0xff] }
 0xb12   :  { %6498 = vmatpush.msra.mxu0 %v7073_v41  ;;  %6488 = vmatpush.msra.mxu3 %v7044_v30  ;;  %v7118_v41 = vld [vmem:[%s16034_s5 + $0x9f8] sm:$0xff]  ;;  %v7064_v30 = vld [vmem:[%s16034_s5 + $0x848] sm:$0xff] }
 0xb13   :  { %6522 = vmatpush.msrb.mxu2 %v7088_v13  ;;  %6466 = vmatpush.msra.mxu1 %v7027_v51  ;;  %v7078_v13 = vld [vmem:[%s16034_s5 + $0x8b8] sm:$0xff]  ;;  %v7101_v51 = vld [vmem:[%s16034_s5 + $0x970] sm:$0xff] }
 0xb14   :  { %6499 = vmatpush.msra.mxu0 %v7072_v42  ;;  %6489 = vmatpush.msra.mxu3 %v7043_v6  ;;  %v7077_v42 = vld [vmem:[%s16034_s5 + $0x8b0] sm:$0xff] }
 0xb15   :  { %6523 = vmatpush.msrb.mxu2 %v7087_v22 }
 0xb16   :  { %6500 = vmatpush.msra.mxu0 %v7071_v33  ;;  %6447 = vmatmul.f32.gmra.mxu2 %v14861_v52  ;;  %v7068_v52 = vld [vmem:[%s16034_s5 + $0x868] sm:$0xff]  ;;  %v7117_v33 = vld [vmem:[%s16034_s5 + $0x9f0] sm:$0xff] }
 0xb17   :  { %6524 = vmatpush.msrb.mxu2 %v7086_v47  ;;  %v7423_v58 = vpop.permute.xlu1 %7422 }
 0xb18   :  { %6501 = vmatpush.msra.mxu0 %v7070_v23  ;;  %v7425_v16 = vunpack.i.h.bf16 %v7423_v58  ;;  %v7424_v19 = vunpack.i.l.bf16 %v7423_v58  ;;  %v7100_v23 = vld [vmem:[%s16034_s5 + $0x968] sm:$0xff] }
 0xb19   :  { %6525 = vmatpush.msrb.mxu2 %v7085_v8  ;;  %v7063_v8 = vld [vmem:[%s16034_s5 + $0x840] sm:$0xff] }
 0xb1a   :  { %6502 = vmatpush.msra.mxu0 %v7069_v38  ;;  %v5547_v55 = vsel %vm17777_vm15, %v5506_v20, %v7424_v19  ;;  %v5548_v12 = vsel %vm17778_vm4, %v7424_v19, %v7425_v16  ;;  %v7104_v20 = vld [vmem:[%s16034_s5 + $0x988] sm:$0xff]  ;;  %v7099_v19 = vld [vmem:[%s16034_s5 + $0x960] sm:$0xff]  ;;  %vm6172_vm15 = vcmask 910080   ;;  %vm6182_vm4 = vcmask 1041280  }
 0xb1b   :  { %6526 = vmatpush.msrb.mxu2 %v7084_v17  ;;  %v15408_v45 = vmax.f32 %v14614_v34, %v5547_v55  ;;  %v5591_v21 = vsel %vm17779_vm2, %v5548_v12, %v15200_v43  ;;  %v7081_v34 = vld [vmem:[%s16034_s5 + $0x8d0] sm:$0xff]  ;;  %v7076_v17 = vld [vmem:[%s16034_s5 + $0x8a8] sm:$0xff]  ;;  %v7115_v55 = vld [vmem:[%s16034_s5 + $0x9e0] sm:$0xff]  ;;  %vm17787_vm2 = vcmask 982016  }
 0xb1c   :  { %6503 = vmatpush.msra.mxu0 %v7068_v52  ;;  %v15416_v26 = vmax.f32 %v14696_v29, %v5591_v21  ;;  %v7067_v29 = vld [vmem:[%s16034_s5 + $0x860] sm:$0xff]  ;;  %v7121_v43 = vld [vmem:[%s16034_s5 + $0xa10] sm:$0xff]  ;;  %v7116_v38 = vld [vmem:[%s16034_s5 + $0x9e8] sm:$0xff] }
 0xb1d   :  { %6527 = vmatpush.msrb.mxu2 %v7083_v61  ;;  %6067 = vmatmul.f32.vlgmr.msrb.gmra.mxu1 %v15408_v45  ;;  %v7062_v61 = vld [vmem:[%s16034_s5 + $0x838] sm:$0xff]  ;;  %v7075_v52 = vld [vmem:[%s16034_s5 + $0x8a0] sm:$0xff] }
 0xb1e   :  { %6543 = vmatpush.msrb.mxu1 %v7106_v46  ;;  %6090 = vmatmul.f32.vlgmr.msrb.gmra.mxu3 %v15416_v26  ;;  %v7154_v21 = vld [vmem:[%s16034_s5 + $0xb18] sm:$0xff] }
 0xb1f   :  { %6528 = vmatpush.msrb.mxu2 %v7082_v9  ;;  %6566 = vmatpush.msrb.mxu3 %v7122_v11  ;;  %v5532_v7 = vpop.permute.xlu1 %5531  ;;  %v7098_v9 = vld [vmem:[%s16034_s5 + $0x958] sm:$0xff] }
 0xb20   :  { %v5558_v2 = vsel %vm17780_vm6, %v7420_v0, %v5532_v7  ;;  %6544 = vmatpush.msrb.mxu1 %v7105_v50  ;;  %6504 = vmatpush.msra.mxu0 %v7067_v29  ;;  %v7119_v0 = vld [vmem:[%s16034_s5 + $0xa00] sm:$0xff]  ;;  %v7060_v50 = vld [vmem:[%s16034_s5 + $0x828] sm:$0xff]  ;;  %vm17788_vm6 = vcmask 490496  }
 0xb21   :  { %6529 = vmatpush.msrb.mxu2 %v7081_v34  ;;  %6567 = vmatpush.msrb.mxu3 %v7121_v43  ;;  %v15451_v31 = vmax.f32 %v14425_v39, %v5558_v2  ;;  %v7102_v39 = vld [vmem:[%s16034_s5 + $0x978] sm:$0xff]  ;;  %v7153_v34 = vld [vmem:[%s16034_s5 + $0xb10] sm:$0xff]  ;;  %v7152_v29 = vld [vmem:[%s16034_s5 + $0xb08] sm:$0xff] }
 0xb22   :  { %6545 = vmatpush.msrb.mxu1 %v7104_v20  ;;  %6505 = vmatpush.msra.mxu0 %v7066_v4  ;;  %v7059_v43 = vld [vmem:[%s16034_s5 + $0x820] sm:$0xff]  ;;  %v7138_v20 = vld [vmem:[%s16034_s5 + $0xa98] sm:$0xff] }
 0xb23   :  { %6530 = vmatpush.msrb.mxu2 %v7080_v53  ;;  %6568 = vmatpush.msrb.mxu3 %v7120_v28  ;;  %v7112_v53 = vld [vmem:[%s16034_s5 + $0x9c8] sm:$0xff]  ;;  %v7151_v4 = vld [vmem:[%s16034_s5 + $0xb00] sm:$0xff]  ;;  %v7094_v28 = vld [vmem:[%s16034_s5 + $0x938] sm:$0xff] }
 0xb24   :  { %6047 = vmatmul.f32.gmra.mxu0 %v15451_v31  ;;  %6546 = vmatpush.msrb.mxu1 %v7103_v54  ;;  %v7111_v2 = vld [vmem:[%s16034_s5 + $0x9c0] sm:$0xff]  ;;  %v7137_v54 = vld [vmem:[%s16034_s5 + $0xa90] sm:$0xff] }
 0xb25   :  { %6531 = vmatpush.msrb.mxu2 %v7079_v25  ;;  %6569 = vmatpush.msrb.mxu3 %v7119_v0  ;;  %v7150_v25 = vld [vmem:[%s16034_s5 + $0xaf8] sm:$0xff]  ;;  %v7093_v0 = vld [vmem:[%s16034_s5 + $0x930] sm:$0xff] }
 0xb26   :  { %6506 = vmatpush.msra.mxu0 %v7065_v60  ;;  %v7428_v22 = vpop.permute.xlu0 %7427  ;;  %6547 = vmatpush.msrb.mxu1 %v7102_v39  ;;  %v7136_v60 = vld [vmem:[%s16034_s5 + $0xa88] sm:$0xff]  ;;  %v7149_v39 = vld [vmem:[%s16034_s5 + $0xaf0] sm:$0xff] }
 0xb27   :  { %6532 = vmatpush.msrb.mxu2 %v7078_v13  ;;  %v7430_v6 = vunpack.i.h.bf16 %v7428_v22  ;;  %v7429_v47 = vunpack.i.l.bf16 %v7428_v22  ;;  %6570 = vmatpush.msrb.mxu3 %v7118_v41  ;;  %v7092_v13 = vld [vmem:[%s16034_s5 + $0x928] sm:$0xff]  ;;  %v7135_v41 = vld [vmem:[%s16034_s5 + $0xa80] sm:$0xff] }
 0xb28   :  { %6507 = vmatpush.msra.mxu0 %v7064_v30  ;;  %6548 = vmatpush.msrb.mxu1 %v7101_v51  ;;  %v7108_v30 = vld [vmem:[%s16034_s5 + $0x9a8] sm:$0xff]  ;;  %v7134_v51 = vld [vmem:[%s16034_s5 + $0xa78] sm:$0xff]  ;;  %v7147_v22 = vld [vmem:[%s16034_s5 + $0xae0] sm:$0xff] }
 0xb29   :  { %6533 = vmatpush.msrb.mxu2 %v7077_v42  ;;  %v5559_v58 = vsel %vm17781_vm14, %v5532_v7, %v7429_v47  ;;  %v5560_v16 = vsel %vm17782_vm13, %v7429_v47, %v7430_v6  ;;  %6571 = vmatpush.msrb.mxu3 %v7117_v33  ;;  %v7095_v7 = vld [vmem:[%s16034_s5 + $0x940] sm:$0xff]  ;;  %v7170_v6 = vld [vmem:[%s16034_s5 + $0xb98] sm:$0xff]  ;;  %v7133_v47 = vld [vmem:[%s16034_s5 + $0xa70] sm:$0xff]  ;;  %vm6943_vm14 = vcmask 74752  }
 0xb2a   :  { %6508 = vmatpush.msra.mxu0 %v7063_v8  ;;  %6549 = vmatpush.msrb.mxu1 %v7100_v23  ;;  %v5592_v12 = vsel %vm17783_vm1, %v5560_v16, %v15265_v40  ;;  %v15520_v46 = vmax.f32 %v14765_v49, %v5559_v58  ;;  %v7061_v40 = vld [vmem:[%s16034_s5 + $0x830] sm:$0xff]  ;;  %v7107_v42 = vld [vmem:[%s16034_s5 + $0x9a0] sm:$0xff]  ;;  %v7146_v33 = vld [vmem:[%s16034_s5 + $0xad8] sm:$0xff] }
 0xb2b   :  { %6534 = vmatpush.msrb.mxu2 %v7076_v17  ;;  %6572 = vmatpush.msrb.mxu3 %v7116_v38  ;;  %v15532_v11 = vmax.f32 %v14823_v10, %v5592_v12  ;;  %v7097_v49 = vld [vmem:[%s16034_s5 + $0x950] sm:$0xff]  ;;  %v7186_v8 = vld [vmem:[%s16034_s5 + $0xc18] sm:$0xff]  ;;  %v7132_v23 = vld [vmem:[%s16034_s5 + $0xa68] sm:$0xff] }
 0xb2c   :  { %6421 = vmatmul.f32.vlgmr.msrb.gmra.mxu0 %v14634_v59  ;;  %6550 = vmatpush.msrb.mxu1 %v7099_v19  ;;  %v7114_v59 = vld [vmem:[%s16034_s5 + $0x9d8] sm:$0xff]  ;;  %v7113_v10 = vld [vmem:[%s16034_s5 + $0x9d0] sm:$0xff]  ;;  %v7168_v58 = vld [vmem:[%s16034_s5 + $0xb88] sm:$0xff] }
 0xb2d   :  { %6509 = vmatpush.msra.mxu0 %v7062_v61  ;;  %6535 = vmatpush.msrb.mxu2 %v7075_v52  ;;  %v7145_v17 = vld [vmem:[%s16034_s5 + $0xad0] sm:$0xff]  ;;  %v7131_v16 = vld [vmem:[%s16034_s5 + $0xa60] sm:$0xff]  ;;  %v7144_v19 = vld [vmem:[%s16034_s5 + $0xac8] sm:$0xff] }
 0xb2e   :  { %6573 = vmatpush.msrb.mxu3 %v7115_v55  ;;  %6536 = vmatmul.f32.vlgmr.msrb.gmra.mxu2 %v15103_v62  ;;  %v7096_v62 = vld [vmem:[%s16034_s5 + $0x948] sm:$0xff]  ;;  %v7185_v38 = vld [vmem:[%s16034_s5 + $0xc10] sm:$0xff]  ;;  %v7130_v61 = vld [vmem:[%s16034_s5 + $0xa58] sm:$0xff] }
 0xb2f   :  { %6551 = vmatpush.msrb.mxu1 %v7098_v9  ;;  %6612 = vmatpush.msra.mxu2 %v7154_v21  ;;  %v7143_v52 = vld [vmem:[%s16034_s5 + $0xac0] sm:$0xff]  ;;  %v7166_v12 = vld [vmem:[%s16034_s5 + $0xb78] sm:$0xff]  ;;  %v7129_v9 = vld [vmem:[%s16034_s5 + $0xa50] sm:$0xff] }
 0xb30   :  { %6070 = vmatmul.f32.gmra.mxu1 %v15520_v46  ;;  %6510 = vmatpush.msra.mxu0 %v7061_v40  ;;  %v7183_v55 = vld [vmem:[%s16034_s5 + $0xc00] sm:$0xff]  ;;  %v7142_v21 = vld [vmem:[%s16034_s5 + $0xab8] sm:$0xff] }
 0xb31   :  { %6574 = vmatpush.msrb.mxu3 %v7114_v59  ;;  %6552 = vmatpush.msrb.mxu1 %v7097_v49  ;;  %v7182_v40 = vld [vmem:[%s16034_s5 + $0xbf8] sm:$0xff]  ;;  %v7128_v59 = vld [vmem:[%s16034_s5 + $0xa48] sm:$0xff]  ;;  %v7141_v49 = vld [vmem:[%s16034_s5 + $0xab0] sm:$0xff] }
 0xb32   :  { %6093 = vmatmul.f32.gmra.mxu3 %v15532_v11  ;;  %6613 = vmatpush.msra.mxu2 %v7153_v34  ;;  %v7181_v34 = vld [vmem:[%s16034_s5 + $0xbf0] sm:$0xff] }
 0xb33   :  { %6511 = vmatpush.msra.mxu0 %v7060_v50  ;;  %6575 = vmatpush.msrb.mxu3 %v7113_v10  ;;  %v7164_v50 = vld [vmem:[%s16034_s5 + $0xb68] sm:$0xff]  ;;  %v7127_v10 = vld [vmem:[%s16034_s5 + $0xa40] sm:$0xff] }
 0xb34   :  { %6553 = vmatpush.msrb.mxu1 %v7096_v62  ;;  %6614 = vmatpush.msra.mxu2 %v7152_v29  ;;  %v7140_v62 = vld [vmem:[%s16034_s5 + $0xaa8] sm:$0xff]  ;;  %v7163_v29 = vld [vmem:[%s16034_s5 + $0xb60] sm:$0xff] }
 0xb35   :  { %6512 = vmatpush.msra.mxu0 %v7059_v43  ;;  %6576 = vmatpush.msrb.mxu3 %v7112_v53  ;;  %v7139_v43 = vld [vmem:[%s16034_s5 + $0xaa0] sm:$0xff] }
 0xb36   :  { %6424 = vmatmul.f32.gmra.mxu0 %v14678_v1  ;;  %6554 = vmatpush.msrb.mxu1 %v7095_v7  ;;  %v7110_v1 = vld [vmem:[%s16034_s5 + $0x9b8] sm:$0xff]  ;;  %v7179_v53 = vld [vmem:[%s16034_s5 + $0xbe0] sm:$0xff] }
 0xb37   :  { %6589 = vmatpush.msrb.mxu0 %v7138_v20  ;;  %6615 = vmatpush.msra.mxu2 %v7151_v4  ;;  %v7162_v7 = vld [vmem:[%s16034_s5 + $0xb58] sm:$0xff]  ;;  %v7125_v20 = vld [vmem:[%s16034_s5 + $0xa30] sm:$0xff] }
 0xb38   :  { %6577 = vmatpush.msrb.mxu3 %v7111_v2  ;;  %6539 = vmatmul.f32.gmra.mxu2 %v15167_v5  ;;  %v7109_v5 = vld [vmem:[%s16034_s5 + $0x9b0] sm:$0xff]  ;;  %v7178_v4 = vld [vmem:[%s16034_s5 + $0xbd8] sm:$0xff] }
 0xb39   :  { %6555 = vmatpush.msrb.mxu1 %v7094_v28  ;;  %6590 = vmatpush.msrb.mxu0 %v7137_v54  ;;  %v7161_v2 = vld [vmem:[%s16034_s5 + $0xb50] sm:$0xff]  ;;  %v7124_v28 = vld [vmem:[%s16034_s5 + $0xa28] sm:$0xff] }
 0xb3a   :  { %6616 = vmatpush.msra.mxu2 %v7150_v25  ;;  %6467 = vmatmul.f32.vlgmr.msra.gmra.mxu1 %v14784_v36  ;;  %v7148_v36 = vld [vmem:[%s16034_s5 + $0xae8] sm:$0xff]  ;;  %v7177_v54 = vld [vmem:[%s16034_s5 + $0xbd0] sm:$0xff]  ;;  %v7123_v25 = vld [vmem:[%s16034_s5 + $0xa20] sm:$0xff] }
 0xb3b   :  { %6578 = vmatpush.msrb.mxu3 %v7110_v1  ;;  %6556 = vmatpush.msrb.mxu1 %v7093_v0  ;;  %v7176_v1 = vld [vmem:[%s16034_s5 + $0xbc8] sm:$0xff]  ;;  %v7175_v0 = vld [vmem:[%s16034_s5 + $0xbc0] sm:$0xff] }
 0xb3c   :  { %6490 = vmatmul.f32.vlgmr.msra.gmra.mxu3 %v14787_v44  ;;  %6591 = vmatpush.msrb.mxu0 %v7136_v60  ;;  %v7091_v44 = vld [vmem:[%s16034_s5 + $0x920] sm:$0xff]  ;;  %v7190_v60 = vld [vmem:[%s16034_s5 + $0xc38] sm:$0xff] }
 0xb3d   :  { %6617 = vmatpush.msra.mxu2 %v7149_v39  ;;  %6579 = vmatpush.msrb.mxu3 %v7109_v5  ;;  %v7174_v39 = vld [vmem:[%s16034_s5 + $0xbb8] sm:$0xff]  ;;  %v7157_v5 = vld [vmem:[%s16034_s5 + $0xb30] sm:$0xff] }
 0xb3e   :  { %6557 = vmatpush.msrb.mxu1 %v7092_v13  ;;  %6592 = vmatpush.msrb.mxu0 %v7135_v41  ;;  %v7189_v13 = vld [vmem:[%s16034_s5 + $0xc30] sm:$0xff]  ;;  %v7156_v41 = vld [vmem:[%s16034_s5 + $0xb28] sm:$0xff] }
 0xb3f   :  { %6618 = vmatpush.msra.mxu2 %v7148_v36  ;;  %6580 = vmatpush.msrb.mxu3 %v7108_v30  ;;  %v7172_v36 = vld [vmem:[%s16034_s5 + $0xba8] sm:$0xff]  ;;  %v7155_v30 = vld [vmem:[%s16034_s5 + $0xb20] sm:$0xff] }
 0xb40   :  { %6513 = vmatmul.f32.vlgmr.msra.gmra.mxu0 %v14790_v35  ;;  %6558 = vmatpush.msrb.mxu1 %v7091_v44  ;;  %v7169_v35 = vld [vmem:[%s16034_s5 + $0xb90] sm:$0xff]  ;;  %v7171_v44 = vld [vmem:[%s16034_s5 + $0xba0] sm:$0xff] }
 0xb41   :  { %6593 = vmatpush.msrb.mxu0 %v7134_v51  ;;  %6619 = vmatpush.msra.mxu2 %v7147_v22  ;;  %v7187_v51 = vld [vmem:[%s16034_s5 + $0xc20] sm:$0xff]  ;;  %v5838_v22 = vpop.f32.mrf.mxu2 }
 0xb42   :  { %6581 = vmatpush.msrb.mxu3 %v7107_v42  ;;  %6635 = vmatpush.msra.mxu1 %v7170_v6  ;;  %v5884_v6 = vpop.f32.mrf.mxu1 }
 0xb43   :  { %6594 = vmatpush.msrb.mxu0 %v7133_v47  ;;  %6620 = vmatpush.msra.mxu2 %v7146_v33  ;;  %v5907_v47 = vpop.f32.mrf.mxu3 }
 0xb44   :  { %6658 = vmatpush.msra.mxu3 %v7186_v8  ;;  %6470 = vmatmul.f32.gmra.mxu1 %v14864_v27  ;;  %v7184_v27 = vld [vmem:[%s16034_s5 + $0xc08] sm:$0xff] }
 0xb45   :  { %6493 = vmatmul.f32.gmra.mxu3 %v14845_v24  ;;  %6636 = vmatpush.msra.mxu1 %v7169_v35  ;;  %v7167_v24 = vld [vmem:[%s16034_s5 + $0xb80] sm:$0xff] }
 0xb46   :  { %6595 = vmatpush.msrb.mxu0 %v7132_v23  ;;  %6621 = vmatpush.msra.mxu2 %v7145_v17 }
 0xb47   :  { %6659 = vmatpush.msra.mxu3 %v7185_v38  ;;  %6637 = vmatpush.msra.mxu1 %v7168_v58 }
 0xb48   :  { %6596 = vmatpush.msrb.mxu0 %v7131_v16  ;;  %6622 = vmatpush.msra.mxu2 %v7144_v19 }
 0xb49   :  { %6660 = vmatpush.msra.mxu3 %v7184_v27  ;;  %6638 = vmatpush.msra.mxu1 %v7167_v24  ;;  %v5841_v42 = vpop.f32.mrf.mxu2 }
 0xb4a   :  { %6516 = vmatmul.f32.gmra.mxu0 %v14868_v3  ;;  %6623 = vmatpush.msra.mxu2 %v7143_v52  ;;  %v7165_v3 = vld [vmem:[%s16034_s5 + $0xb70] sm:$0xff]  ;;  %v5887_v8 = vpop.f32.mrf.mxu1 }
 0xb4b   :  { %6597 = vmatpush.msrb.mxu0 %v7130_v61  ;;  %6661 = vmatpush.msra.mxu3 %v7183_v55 }
 0xb4c   :  { %6639 = vmatpush.msra.mxu1 %v7166_v12  ;;  %6624 = vmatpush.msra.mxu2 %v7142_v21 }
 0xb4d   :  { %6598 = vmatpush.msrb.mxu0 %v7129_v9  ;;  %6662 = vmatpush.msra.mxu3 %v7182_v40 }
 0xb4e   :  { %6559 = vmatmul.f32.vlgmr.msrb.gmra.mxu1 %v15106_v37  ;;  %6582 = vmatmul.f32.vlgmr.msrb.gmra.mxu3 %v15097_v14  ;;  %v7180_v37 = vld [vmem:[%s16034_s5 + $0xbe8] sm:$0xff]  ;;  %v7126_v14 = vld [vmem:[%s16034_s5 + $0xa38] sm:$0xff] }
 0xb4f   :  { %6640 = vmatpush.msra.mxu1 %v7165_v3  ;;  %6599 = vmatpush.msrb.mxu0 %v7128_v59 }
 0xb50   :  { %6625 = vmatpush.msra.mxu2 %v7141_v49  ;;  %6663 = vmatpush.msra.mxu3 %v7181_v34 }
 0xb51   :  { %6641 = vmatpush.msra.mxu1 %v7164_v50  ;;  %6600 = vmatpush.msrb.mxu0 %v7127_v10 }
 0xb52   :  { %6626 = vmatpush.msra.mxu2 %v7140_v62  ;;  %6664 = vmatpush.msra.mxu3 %v7180_v37 }
 0xb53   :  { %6642 = vmatpush.msra.mxu1 %v7163_v29  ;;  %6601 = vmatpush.msrb.mxu0 %v7126_v14 }
 0xb54   :  { %6627 = vmatpush.msra.mxu2 %v7139_v43  ;;  %6665 = vmatpush.msra.mxu3 %v7179_v53 }
 0xb55   :  { %6628 = vmatmul.f32.vlgmr.msra.gmra.mxu2 %v15340_v15  ;;  %6643 = vmatpush.msra.mxu1 %v7162_v7  ;;  %v7160_v15 = vld [vmem:[%s16034_s5 + $0xb48] sm:$0xff] }
 0xb56   :  { %6602 = vmatpush.msrb.mxu0 %v7125_v20  ;;  %6666 = vmatpush.msra.mxu3 %v7178_v4 }
 0xb57   :  { %6562 = vmatmul.f32.gmra.mxu1 %v15170_v48  ;;  %6585 = vmatmul.f32.gmra.mxu3 %v15176_v57  ;;  %v7159_v48 = vld [vmem:[%s16034_s5 + $0xb40] sm:$0xff]  ;;  %v7158_v57 = vld [vmem:[%s16034_s5 + $0xb38] sm:$0xff] }
 0xb58   :  { %6644 = vmatpush.msra.mxu1 %v7161_v2  ;;  %6603 = vmatpush.msrb.mxu0 %v7124_v28 }
 0xb59   :  { %6667 = vmatpush.msra.mxu3 %v7177_v54 }
 0xb5a   :  { %6645 = vmatpush.msra.mxu1 %v7160_v15  ;;  %6604 = vmatpush.msrb.mxu0 %v7123_v25 }
 0xb5b   :  { %6668 = vmatpush.msra.mxu3 %v7176_v1  ;;  %6605 = vmatmul.f32.vlgmr.msrb.gmra.mxu0 %v15100_v56  ;;  %v7173_v56 = vld [vmem:[%s16034_s5 + $0xbb0] sm:$0xff] }
 0xb5c   :  { %6646 = vmatpush.msra.mxu1 %v7159_v48  ;;  %6693 = vmatpush.msra.mxu0 %v7190_v60 }
 0xb5d   :  { %6669 = vmatpush.msra.mxu3 %v7175_v0  ;;  %6631 = vmatmul.f32.gmra.mxu2 %v15451_v31  ;;  %v7188_v31 = vld [vmem:[%s16034_s5 + $0xc28] sm:$0xff]  ;;  %s17786_s5 = smov 80  }
 0xb5e   :  { %6647 = vmatpush.msra.mxu1 %v7158_v57  ;;  %6694 = vmatpush.msra.mxu0 %v7189_v13 }
 0xb5f   :  { %6670 = vmatpush.msra.mxu3 %v7174_v39 }
 0xb60   :  { %6648 = vmatpush.msra.mxu1 %v7157_v5  ;;  %6695 = vmatpush.msra.mxu0 %v7188_v31 }
 0xb61   :  { %6671 = vmatpush.msra.mxu3 %v7173_v56 }
 0xb62   :  { %6649 = vmatpush.msra.mxu1 %v7156_v41  ;;  %6696 = vmatpush.msra.mxu0 %v7187_v51 }
 0xb63   :  { %6672 = vmatpush.msra.mxu3 %v7172_v36  ;;  %6608 = vmatmul.f32.gmra.mxu0 %v15173_v63  ;;  %v5861_v63 = vpop.f32.mrf.mxu0 }
 0xb64   :  { %6650 = vmatpush.msra.mxu1 %v7155_v30  ;;  %v5862_v23 = vadd.f32 %v5861_v63, %v5838_v22 }
 0xb65   :  { %6651 = vmatmul.f32.vlgmr.msra.gmra.mxu1 %v15408_v45  ;;  %6673 = vmatpush.msra.mxu3 %v7171_v44  ;;  %v5930_v45 = vpop.f32.mrf.mxu2 }
 0xb66   :  { %6674 = vmatmul.f32.vlgmr.msra.gmra.mxu3 %v15416_v26  ;;  %v5910_v26 = vpop.f32.mrf.mxu3  ;;  %v5885_v38 = vadd.f32 %v5884_v6, %v5862_v23 }
 0xb68   :  { %v5908_v58 = vadd.f32 %v5907_v47, %v5885_v38 }
 0xb6b   :  { %7191 = vmatmul.msk.f32.vlgmr.msra.gmra.mxu0 %vm17784_vm8, %v15231_v32  ;;  %v5864_v33 = vpop.f32.mrf.mxu0  ;;  %v5976_v32 = vpop.f32.mrf.mxu1 }
 0xb6c   :  { %v5865_v52 = vadd.f32 %v5864_v33, %v5841_v42 }
 0xb6d   :  { %6654 = vmatmul.f32.gmra.mxu1 %v15520_v46  ;;  %v5933_v35 = vpop.f32.mrf.mxu2 }
 0xb6e   :  { %6677 = vmatmul.f32.gmra.mxu3 %v15532_v11  ;;  %v5931_v11 = vadd.f32 %v5930_v45, %v5908_v58  ;;  %v5888_v40 = vadd.f32 %v5887_v8, %v5865_v52 }
 0xb70   :  { %v5999_v46 = vpop.f32.mrf.mxu3  ;;  %v5911_v49 = vadd.f32 %v5910_v26, %v5888_v40 }
 0xb72   :  { %v5934_v62 = vadd.f32 %v5933_v35, %v5911_v49 }
 0xb73   :  { %7192 = vmatmul.msk.f32.gmra.mxu0 %vm17785_vm7, %v15284_v18  ;;  %v5953_v17 = vpop.f32.mrf.mxu0  ;;  %v5979_v18 = vpop.f32.mrf.mxu1 }
 0xb74   :  { %v5954_v19 = vadd.f32 %v5953_v17, %v5931_v11 }
 0xb75   :  { %v6022_v16 = vpop.f32.mrf.mxu2 }
 0xb76   :  { %v5977_v24 = vadd.f32 %v5976_v32, %v5954_v19 }
 0xb78   :  { %v6000_v61 = vadd.f32 %v5999_v46, %v5977_v24 }
 0xb79   :  { %v6002_v55 = vpop.f32.mrf.mxu3 }
 0xb7a   :  { %v6023_v21 = vadd.f32 %v6022_v16, %v6000_v61 }
 0xb7b   :  { %v5956_v27 = vpop.f32.mrf.mxu0 }
 0xb7c   :  { %v5957_v14 = vadd.f32 %v5956_v27, %v5934_v62 }
 0xb7d   :  { %v6025_v12 = vpop.f32.mrf.mxu2 }
 0xb7e   :  { %v5980_v7 = vadd.f32 %v5979_v18, %v5957_v14 }
 0xb80   :  { %v6003_v20 = vadd.f32 %v6002_v55, %v5980_v7 }
 0xb82   :  { %v6026_v2 = vadd.f32 %v6025_v12, %v6003_v20 }
 0xb85   :  { %v6114_v37 = vpop.f32.mrf.mxu2 }
 0xb8c   :  { %v6045_v9 = vpop.f32.mrf.mxu0 }
 0xb8d   :  { %v6046_v59 = vadd.f32 %v6045_v9, %v6023_v21  ;;  %v6117_v1 = vpop.f32.mrf.mxu2 }
 0xb95   :  { %v6445_v56 = vpop.f32.mrf.mxu2 }
 0xb9a   :  { %v6068_v3 = vpop.f32.mrf.mxu1 }
 0xb9b   :  { %v6069_v34 = vadd.f32 %v6068_v3, %v6046_v59 }
 0xb9d   :  { %v6448_v44 = vpop.f32.mrf.mxu2 }
 0xba1   :  { %v6091_v50 = vpop.f32.mrf.mxu3  ;;  %v6048_v43 = vpop.f32.mrf.mxu0 }
 0xba2   :  { %v6092_v10 = vadd.f32 %v6091_v50, %v6069_v34  ;;  %v6049_v15 = vadd.f32 %v6048_v43, %v6026_v2 }
 0xba4   :  { %v6115_v29 = vadd.f32 %v6114_v37, %v6092_v10 }
 0xba6   :  { %6130 = vst.sshfl [vmem:[#allocation1] sm:$0xff pattern:$0x73625140] %v6115_v29  ;;  %v6989_v53 = vrot.slane %v6115_v29, 9 }
 0xba7   :  { %6121 = vst.msk [vmem:[#allocation3] sm:$0x1] %vm6120_vm5, %v6115_v29 }
 0xba8   :  { %6125 = vrot.lane.b32.xlu1 %v6989_v53, %s7532_s22 }
 0xba9   :  { %v6422_v28 = vpop.f32.mrf.mxu0 }
 0xbaa   :  { %v6446_v63 = vadd.f32 %v6445_v56, %v6422_v28 }
 0xbad   :  { %v6132_v4 = vld [vmem:[#allocation1 + $0x1] ss:$4 sm:$0xff]  ;;  %v6071_v54 = vpop.f32.mrf.mxu1 }
 0xbae   :  { %6138 = vst.sshfl [vmem:[#allocation1] sm:$0xff pattern:$0x73625140] %v6115_v29  ;;  %6133 = vrot.lane.b32.xlu0 %v6132_v4, %s17626_s17  ;;  %v6072_v25 = vadd.f32 %v6071_v54, %v6049_v15 }
 0xbb1   :  { %v6537_v6 = vpop.f32.mrf.mxu2 }
 0xbb3   :  { %v6425_v39 = vpop.f32.mrf.mxu0 }
 0xbb4   :  { %v6449_v23 = vadd.f32 %v6448_v44, %v6425_v39 }
 0xbb5   :  { %v6094_v48 = vpop.f32.mrf.mxu3  ;;  %v15813_v0 = vld [vmem:[#allocation1 + $0x1] ss:$4 sm:$0xff] }
 0xbb6   :  { %v6095_v57 = vadd.f32 %v6094_v48, %v6072_v25  ;;  %6148 = vst.sshfl [vmem:[#allocation1] sm:$0xff pattern:$0x73625140] %v6115_v29  ;;  %v6990_v15 = vrot.slane %v15813_v0, 9 }
 0xbb7   :  { %v6468_v5 = vpop.f32.mrf.mxu1 }
 0xbb8   :  { %v15815_v60 = vadd.f32 %v6117_v1, %v6095_v57  ;;  %v6469_v45 = vadd.f32 %v6468_v5, %v6446_v63 }
 0xbba   :  { %6184 = vst.msk [vmem:[#allocation3 + $0x2] sm:$0x1] %vm6120_vm5, %v15815_v60  ;;  %v6993_v48 = vrot.slane %v15815_v60, 9 }
 0xbbb   :  { %v6540_v58 = vpop.f32.mrf.mxu2 }
 0xbbd   :  { %v15819_v13 = vld [vmem:[#allocation1 + $0x2] ss:$4 sm:$0xff]  ;;  %v6514_v31 = vpop.f32.mrf.mxu0 }
 0xbbe   :  { %6156 = vst.sshfl [vmem:[#allocation1] sm:$0xff pattern:$0x73625140] %v6115_v29 }
 0xbbf   :  { %v6491_v41 = vpop.f32.mrf.mxu3 }
 0xbc0   :  { %v6492_v33 = vadd.f32 %v6491_v41, %v6469_v45 }
 0xbc1   :  { %v6471_v30 = vpop.f32.mrf.mxu1 }
 0xbc2   :  { %v6515_v26 = vadd.f32 %v6514_v31, %v6492_v33  ;;  %v6472_v38 = vadd.f32 %v6471_v30, %v6449_v23  ;;  %v6800_v33 = vld [vmem:[%s16035_s6 + $0x78] sm:$0xff]  ;;  %v6799_v23 = vld [vmem:[%s16035_s6 + $0x70] sm:$0xff] }
 0xbc3   :  { %6820 = vmatpush.msrb.mxu2 %v6800_v33 }
 0xbc4   :  { %v6538_v32 = vadd.f32 %v6537_v6, %v6515_v26 }
 0xbc5   :  { %v15821_v36 = vld [vmem:[#allocation1 + $0x2] ss:$4 sm:$0xff]  ;;  %6821 = vmatpush.msrb.mxu2 %v6799_v23 }
 0xbc6   :  { %6166 = vst.sshfl [vmem:[#allocation1] sm:$0xff pattern:$0x73625140] %v6115_v29  ;;  %v6991_v0 = vrot.slane %v15821_v36, 9  ;;  %v6905_v23 = vld [vmem:[%s16039_s10 + $0x8] sm:$0xff] }
 0xbc7   :  { %v6517_v42 = vpop.f32.mrf.mxu0 }
 0xbc8   :  { %v6494_v51 = vpop.f32.mrf.mxu3 }
 0xbc9   :  { %v6495_v16 = vadd.f32 %v6494_v51, %v6472_v38  ;;  %v6797_v38 = vld [vmem:[%s16035_s6 + $0x60] sm:$0xff] }
 0xbcb   :  { %v6560_v47 = vpop.f32.mrf.mxu1  ;;  %v6518_v19 = vadd.f32 %v6517_v42, %v6495_v16  ;;  %v6796_v16 = vld [vmem:[%s16035_s6 + $0x58] sm:$0xff] }
 0xbcc   :  { %v6561_v27 = vadd.f32 %v6560_v47, %v6538_v32 }
 0xbcd   :  { %v15823_v22 = vld [vmem:[#allocation1 + $0x3] ss:$4 sm:$0xff]  ;;  %v6541_v52 = vadd.f32 %v6540_v58, %v6518_v19 }
 0xbce   :  { %6174 = vst.sshfl [vmem:[#allocation1] sm:$0xff pattern:$0x73625140] %v6115_v29  ;;  %v6794_v19 = vld [vmem:[%s16035_s6 + $0x48] sm:$0xff] }
 0xbd1   :  { %v6583_v35 = vpop.f32.mrf.mxu3 }
 0xbd2   :  { %v6584_v18 = vadd.f32 %v6583_v35, %v6561_v27  ;;  %v6793_v27 = vld [vmem:[%s16035_s6 + $0x40] sm:$0xff] }
 0xbd4   :  { %v6563_v46 = vpop.f32.mrf.mxu1 }
 0xbd5   :  { %v15825_v8 = vld [vmem:[#allocation1 + $0x3] ss:$4 sm:$0xff]  ;;  %v6564_v21 = vadd.f32 %v6563_v46, %v6541_v52 }
 0xbd6   :  { %6192 = vst.sshfl [vmem:[#allocation1] sm:$0xff pattern:$0x73625140] %v15815_v60  ;;  %v6992_v31 = vrot.slane %v15825_v8, 9  ;;  %v6792_v52 = vld [vmem:[%s16035_s6 + $0x38] sm:$0xff] }
 0xbd8   :  { %v6606_v17 = vpop.f32.mrf.mxu0  ;;  %v6629_v12 = vpop.f32.mrf.mxu2 }
 0xbd9   :  { %v6607_v55 = vadd.f32 %v6606_v17, %v6584_v18  ;;  %v6798_v17 = vld [vmem:[%s16035_s6 + $0x68] sm:$0xff] }
 0xbda   :  { %v6586_v24 = vpop.f32.mrf.mxu3  ;;  %6822 = vmatpush.msrb.mxu2 %v6798_v17  ;;  %v6904_v17 = vld [vmem:[%s16039_s10] sm:$0xff] }
 0xbdb   :  { %v6630_v40 = vadd.f32 %v6629_v12, %v6607_v55  ;;  %v6587_v3 = vadd.f32 %v6586_v24, %v6564_v21  ;;  %v6808_v55 = vld [vmem:[%s16035_s6 + $0xb8] sm:$0xff]  ;;  %v6791_v12 = vld [vmem:[%s16035_s6 + $0x30] sm:$0xff] }
 0xbdc   :  { %6823 = vmatpush.msrb.mxu2 %v6797_v38  ;;  %6848 = vmatpush.msrb.mxu1 %v6808_v55  ;;  %v6807_v21 = vld [vmem:[%s16035_s6 + $0xb0] sm:$0xff]  ;;  %v7432_v38 = vld [vmem:[%s16038_s9] ss:$0 sm:$0xff] }
 0xbdd   :  { %v6194_v11 = vld [vmem:[#allocation1 + $0x1] ss:$4 sm:$0xff] }
 0xbde   :  { %6199 = vst.sshfl [vmem:[#allocation1] sm:$0xff pattern:$0x73625140] %v15815_v60  ;;  %6824 = vmatpush.msrb.mxu2 %v6796_v16  ;;  %6849 = vmatpush.msrb.mxu1 %v6807_v21  ;;  %v7433_v16 = vld [vmem:[%s16040_s11] ss:$0 sm:$0xff] }
 0xbe0   :  { %v6609_v61 = vpop.f32.mrf.mxu0  ;;  %v6632_v29 = vpop.f32.mrf.mxu2 }
 0xbe1   :  { %v6610_v50 = vadd.f32 %v6609_v61, %v6587_v3  ;;  %v6806_v3 = vld [vmem:[%s16035_s6 + $0xa8] sm:$0xff] }
 0xbe2   :  { %v6652_v9 = vpop.f32.mrf.mxu1  ;;  %6850 = vmatpush.msrb.mxu1 %v6806_v3 }
 0xbe3   :  { %v6653_v59 = vadd.f32 %v6652_v9, %v6630_v40  ;;  %v6633_v43 = vadd.f32 %v6632_v29, %v6610_v50  ;;  %v6790_v40 = vld [vmem:[%s16035_s6 + $0x28] sm:$0xff]  ;;  %v6804_v50 = vld [vmem:[%s16035_s6 + $0x98] sm:$0xff] }
 0xbe5   :  { %v6201_v62 = vld [vmem:[#allocation1 + $0x1] ss:$4 sm:$0xff] }
 0xbe6   :  { %v6994_v36 = vrot.slane %v6201_v62, 9  ;;  %v6803_v62 = vld [vmem:[%s16035_s6 + $0x90] sm:$0xff] }
 0xbe8   :  { %v6698_v34 = vpop.f32.mrf.mxu0 }
 0xbe9   :  { %v6675_v49 = vpop.f32.mrf.mxu3 }
 0xbea   :  { %v6676_v10 = vadd.f32 %v6675_v49, %v6653_v59  ;;  %v6655_v14 = vpop.f32.mrf.mxu1  ;;  %v6789_v59 = vld [vmem:[%s16035_s6 + $0x20] sm:$0xff] }
 0xbeb   :  { %v6656_v7 = vadd.f32 %v6655_v14, %v6633_v43  ;;  %v6805_v49 = vld [vmem:[%s16035_s6 + $0xa0] sm:$0xff]  ;;  %v6874_v14 = vld [vmem:[%s16037_s8 + $0x68] sm:$0xff] }
 0xbec   :  { %v6699_v37 = vadd.f32 %v6698_v34, %v6676_v10  ;;  %v6788_v34 = vld [vmem:[%s16035_s6 + $0x18] sm:$0xff]  ;;  %6851 = vmatpush.msrb.mxu1 %v6805_v49  ;;  %v6787_v10 = vld [vmem:[%s16035_s6 + $0x10] sm:$0xff]  ;;  %v6786_v43 = vld [vmem:[%s16035_s6 + $0x8] sm:$0xff] }
 0xbee   :  { %v7193_v53 = vrot.slane %v6699_v37, 9  ;;  %6712 = vst.sshfl [vmem:[#allocation1] sm:$0xff pattern:$0x73625140] %v6699_v37  ;;  %6852 = vmatpush.msrb.mxu1 %v6804_v50 }
 0xbef   :  { %6704 = vst.msk [vmem:[#allocation3 + $0x1] sm:$0x1] %vm6120_vm5, %v6699_v37 }
 0xbf0   :  { %6708 = vrot.lane.b32.xlu2 %v7193_v53, %s7532_s22  ;;  %v6701_v2 = vpop.f32.mrf.mxu0  ;;  %v6802_v53 = vld [vmem:[%s16035_s6 + $0x88] sm:$0xff]  ;;  %6853 = vmatpush.msrb.mxu1 %v6803_v62 }
 0xbf1   :  { %v6678_v20 = vpop.f32.mrf.mxu3 }
 0xbf2   :  { %v6679_v4 = vadd.f32 %v6678_v20, %v6656_v7  ;;  %v6873_v7 = vld [vmem:[%s16037_s8 + $0x60] sm:$0xff]  ;;  %6854 = vmatpush.msrb.mxu1 %v6802_v53 }
 0xbf3   :  { %v6785_v20 = vld [vmem:[%s16035_s6] sm:$0xff] }
 0xbf4   :  { %v6702_v28 = vadd.f32 %v6701_v2, %v6679_v4  ;;  %v6801_v4 = vld [vmem:[%s16035_s6 + $0x80] sm:$0xff]  ;;  %v6872_v2 = vld [vmem:[%s16037_s8 + $0x58] sm:$0xff] }
 0xbf5   :  { %v6714_v54 = vld [vmem:[#allocation1 + $0x1] ss:$4 sm:$0xff]  ;;  %6855 = vmatpush.msrb.mxu1 %v6801_v4 }
 0xbf6   :  { %6715 = vrot.lane.b32.xlu1 %v6714_v54, %s17626_s17  ;;  %6719 = vst.sshfl [vmem:[#allocation1] sm:$0xff pattern:$0x73625140] %v6699_v37  ;;  %v6871_v54 = vld [vmem:[%s16037_s8 + $0x50] sm:$0xff] }
 0xbf7   :  { %6760 = vst.msk [vmem:[#allocation3 + $0x3] sm:$0x1] %vm6120_vm5, %v6702_v28 }
 0xbf8   :  { %6143 = vrot.lane.b32.xlu2 %v6990_v15, %s17662_s28 }
 0xbfd   :  { %v6721_v25 = vld [vmem:[#allocation1 + $0x1] ss:$4 sm:$0xff] }
 0xbfe   :  { %6151 = vrot.lane.b32.xlu1 %v15819_v13, %s7558_s30  ;;  %v7194_v1 = vrot.slane %v6721_v25, 9  ;;  %6728 = vst.sshfl [vmem:[#allocation1] sm:$0xff pattern:$0x73625140] %v6699_v37  ;;  %v7197_v13 = vrot.slane %v6702_v28, 9  ;;  %v6870_v25 = vld [vmem:[%s16037_s8 + $0x48] sm:$0xff] }
 0xc00   :  { %6724 = vrot.lane.b32.xlu0 %v7194_v1, %s17662_s28  ;;  %v6869_v1 = vld [vmem:[%s16037_s8 + $0x40] sm:$0xff] }
 0xc05   :  { %v6730_v57 = vld [vmem:[#allocation1 + $0x2] ss:$4 sm:$0xff] }
 0xc06   :  { %6731 = vrot.lane.b32.xlu2 %v6730_v57, %s7558_s30  ;;  %6735 = vst.sshfl [vmem:[#allocation1] sm:$0xff pattern:$0x73625140] %v6699_v37  ;;  %6188 = vrot.lane.b32.xlu1 %v6993_v48, %s7532_s22  ;;  %v6868_v48 = vld [vmem:[%s16037_s8 + $0x38] sm:$0xff]  ;;  %s7569_s30 = smov [#allocation4]  }
 0xc08   :  { %6161 = vrot.lane.b32.xlu0 %v6991_v0, %s17786_s5 }
 0xc0d   :  { %v6737_v39 = vld [vmem:[#allocation1 + $0x2] ss:$4 sm:$0xff] }
 0xc0e   :  { %6169 = vrot.lane.b32.xlu1 %v15823_v22, %s17666_s26  ;;  %v7195_v5 = vrot.slane %v6737_v39, 9  ;;  %6744 = vst.sshfl [vmem:[#allocation1] sm:$0xff pattern:$0x73625140] %v6699_v37 }
 0xc10   :  { %6740 = vrot.lane.b32.xlu2 %v7195_v5, %s17786_s5  ;;  %6764 = vrot.lane.b32.xlu0 %v7197_v13, %s7532_s22  ;;  %v6867_v13 = vld [vmem:[%s16037_s8 + $0x30] sm:$0xff]  ;;  %s6950_s22 = sshll.u32 %s7569_s30, 4  ;;  %s6951_s22 = int_to_ptr.vmem [resolvable:$true] %s6950_s22 }
 0xc15   :  { %v6746_v60 = vld [vmem:[#allocation1 + $0x3] ss:$4 sm:$0xff] }
 0xc16   :  { %6751 = vst.sshfl [vmem:[#allocation1] sm:$0xff pattern:$0x73625140] %v6699_v37  ;;  %v6875_v37 = vld [vmem:[%s16037_s8 + $0x70] sm:$0xff] }
 0xc17   :  { %6884 = vmatpush.msrb.mxu3 %v6875_v37 }
 0xc18   :  { %6195 = vrot.lane.b32.xlu2 %v6194_v11, %s17626_s17  ;;  %6747 = vrot.lane.b32.xlu0 %v6746_v60, %s17666_s26  ;;  %v6795_v11 = vld [vmem:[%s16035_s6 + $0x50] sm:$0xff]  ;;  %v6866_v60 = vld [vmem:[%s16037_s8 + $0x28] sm:$0xff] }
 0xc19   :  { %6825 = vmatpush.msrb.mxu2 %v6795_v11  ;;  %6885 = vmatpush.msrb.mxu3 %v6874_v14 }
 0xc1a   :  { %v6126_v56 = vpop.permute.xlu1 %6125 }
 0xc1b   :  { %6129 = vst.msk [vmem:[#allocation3] sm:$0x1] %vm6128_vm11, %v6126_v56  ;;  %6826 = vmatpush.msrb.mxu2 %v6794_v19  ;;  %6886 = vmatpush.msrb.mxu3 %v6873_v7  ;;  %v6865_v56 = vld [vmem:[%s16037_s8 + $0x20] sm:$0xff] }
 0xc1d   :  { %v6753_v41 = vld [vmem:[#allocation1 + $0x3] ss:$4 sm:$0xff]  ;;  %6827 = vmatpush.msrb.mxu2 %v6793_v27  ;;  %6887 = vmatpush.msrb.mxu3 %v6872_v2 }
 0xc1e   :  { %6768 = vst.sshfl [vmem:[#allocation1] sm:$0xff pattern:$0x73625140] %v6702_v28  ;;  %v7196_v51 = vrot.slane %v6753_v41, 9  ;;  %v6864_v41 = vld [vmem:[%s16037_s8 + $0x18] sm:$0xff] }
 0xc1f   :  { %6828 = vmatpush.msrb.mxu2 %v6792_v52  ;;  %6888 = vmatpush.msrb.mxu3 %v6871_v54 }
 0xc20   :  { %6179 = vrot.lane.b32.xlu2 %v6992_v31, %s7565_s2  ;;  %6204 = vrot.lane.b32.xlu0 %v6994_v36, %s17662_s28  ;;  %v6134_v30 = vpop.permute.xlu0 %6133  ;;  %v6863_v31 = vld [vmem:[%s16037_s8 + $0x10] sm:$0xff]  ;;  %v6862_v36 = vld [vmem:[%s16037_s8 + $0x8] sm:$0xff] }
 0xc21   :  { %6137 = vst.msk [vmem:[#allocation3] sm:$0x1] %vm6136_vm0, %v6134_v30  ;;  %6829 = vmatpush.msrb.mxu2 %v6791_v12  ;;  %6889 = vmatpush.msrb.mxu3 %v6870_v25  ;;  %v6911_v30 = vld [vmem:[%s16039_s10 + $0x38] sm:$0xf] }
 0xc23   :  { %6830 = vmatpush.msrb.mxu2 %v6790_v40  ;;  %6890 = vmatpush.msrb.mxu3 %v6869_v1 }
 0xc25   :  { %v6770_v44 = vld [vmem:[#allocation1 + $0x1] ss:$4 sm:$0xff]  ;;  %6831 = vmatpush.msrb.mxu2 %v6789_v59  ;;  %6891 = vmatpush.msrb.mxu3 %v6868_v48 }
 0xc26   :  { %6771 = vrot.lane.b32.xlu1 %v6770_v44, %s17626_s17  ;;  %6775 = vst.sshfl [vmem:[#allocation1] sm:$0xff pattern:$0x73625140] %v6702_v28  ;;  %v6910_v44 = vld [vmem:[%s16039_s10 + $0x30] sm:$0xff] }
 0xc27   :  { %6832 = vmatpush.msrb.mxu2 %v6788_v34  ;;  %6892 = vmatpush.msrb.mxu3 %v6867_v13 }
 0xc29   :  { %6833 = vmatpush.msrb.mxu2 %v6787_v10  ;;  %6893 = vmatpush.msrb.mxu3 %v6866_v60 }
 0xc2b   :  { %6834 = vmatpush.msrb.mxu2 %v6786_v43  ;;  %6894 = vmatpush.msrb.mxu3 %v6865_v56 }
 0xc2d   :  { %v6777_v22 = vld [vmem:[#allocation1 + $0x1] ss:$4 sm:$0xff]  ;;  %6835 = vmatpush.msrb.mxu2 %v6785_v20  ;;  %6895 = vmatpush.msrb.mxu3 %v6864_v41 }
 0xc2e   :  { %6756 = vrot.lane.b32.xlu1 %v7196_v51, %s7565_s2  ;;  %v7198_v42 = vrot.slane %v6777_v22, 9  ;;  %v6861_v51 = vld [vmem:[%s16037_s8] sm:$0xff]  ;;  %v6909_v22 = vld [vmem:[%s16039_s10 + $0x28] sm:$0xff] }
 0xc2f   :  { %6896 = vmatpush.msrb.mxu3 %v6863_v31 }
 0xc30   :  { %6780 = vrot.lane.b32.xlu2 %v7198_v42, %s17662_s28  ;;  %v6908_v42 = vld [vmem:[%s16039_s10 + $0x20] sm:$0xff] }
 0xc31   :  { %6897 = vmatpush.msrb.mxu3 %v6862_v36 }
 0xc33   :  { %6898 = vmatpush.msrb.mxu3 %v6861_v51 }
 0xc4a   :  { %v6709_v63 = vpop.permute.xlu2 %6708 }
 0xc4b   :  { %6711 = vst.msk [vmem:[#allocation3 + $0x1] sm:$0x1] %vm6128_vm11, %v6709_v63  ;;  %v6907_v63 = vld [vmem:[%s16039_s10 + $0x18] sm:$0xff] }
 0xc52   :  { %v6144_v6 = vpop.permute.xlu2 %6143 }
 0xc53   :  { %6147 = vst.msk [vmem:[#allocation3] sm:$0x1] %vm6146_vm9, %v6144_v6  ;;  %v6906_v6 = vld [vmem:[%s16039_s10 + $0x10] sm:$0xff]  ;;  %s6952_s10 = sshll.u32 %s16041_s12, 4  ;;  %s6953_s10 = int_to_ptr.hbm [resolvable:$true] %s6952_s10 }
 0xc60   :  { %v6732_v47 = vpop.permute.xlu2 %6731 }
 0xc68   :  { %v6716_v45 = vpop.permute.xlu1 %6715 }
 0xc69   :  { %6718 = vst.msk [vmem:[#allocation3 + $0x1] sm:$0x1] %vm6136_vm0, %v6716_v45 }
 0xc6a   :  { %v6741_v8 = vpop.permute.xlu2 %6740 }
 0xc70   :  { %v6152_v26 = vpop.permute.xlu1 %6151 }
 0xc71   :  { %6155 = vst.msk [vmem:[#allocation3] sm:$0x1] %vm6154_vm10, %v6152_v26 }
 0xc72   :  { %v6725_v35 = vpop.permute.xlu0 %6724  ;;  %v6196_v32 = vpop.permute.xlu2 %6195 }
 0xc73   :  { %6727 = vst.msk [vmem:[#allocation3 + $0x1] sm:$0x1] %vm6146_vm9, %v6725_v35 }
 0xc74   :  { %6734 = vst.msk [vmem:[#allocation3 + $0x1] sm:$0x1] %vm6154_vm10, %v6732_v47  ;;  %v7431_v47 = vld [vmem:[%s16036_s7] ss:$0 sm:$0xff] }
 0xc75   :  { %6743 = vst.msk [vmem:[#allocation3 + $0x1] sm:$0x1] %vm6164_vm12, %v6741_v8 }
 0xc78   :  { %v6189_v58 = vpop.permute.xlu1 %6188 }
 0xc79   :  { %6191 = vst.msk [vmem:[#allocation3 + $0x2] sm:$0x1] %vm6128_vm11, %v6189_v58 }
 0xc7a   :  { %6198 = vst.msk [vmem:[#allocation3 + $0x2] sm:$0x1] %vm6136_vm0, %v6196_v32  ;;  %v6162_v46 = vpop.permute.xlu0 %6161  ;;  %v6180_v24 = vpop.permute.xlu2 %6179 }
 0xc7b   :  { %6165 = vst.msk [vmem:[#allocation3] sm:$0x1] %vm6164_vm12, %v6162_v46 }
 0xc80   :  { %v6170_v18 = vpop.permute.xlu1 %6169 }
 0xc81   :  { %6173 = vst.msk [vmem:[#allocation3] sm:$0x1] %vm6172_vm15, %v6170_v18 }
 0xc82   :  { %6183 = vst.msk [vmem:[#allocation3] sm:$0x1] %vm6182_vm4, %v6180_v24  ;;  %v6765_v61 = vpop.permute.xlu0 %6764 }
 0xc83   :  { %6767 = vst.msk [vmem:[#allocation3 + $0x3] sm:$0x1] %vm6128_vm11, %v6765_v61 }
 0xc8a   :  { %v6748_v9 = vpop.permute.xlu0 %6747  ;;  %v6781_v15 = vpop.permute.xlu2 %6780 }
 0xc8b   :  { %6750 = vst.msk [vmem:[#allocation3 + $0x1] sm:$0x1] %vm6172_vm15, %v6748_v9 }
 0xc92   :  { %v6205_v29 = vpop.permute.xlu0 %6204 }
 0xc93   :  { %6207 = vst.msk [vmem:[#allocation3 + $0x2] sm:$0x1] %vm6146_vm9, %v6205_v29 }
 0xc98   :  { %v6772_v28 = vpop.permute.xlu1 %6771 }
 0xc99   :  { %6774 = vst.msk [vmem:[#allocation3 + $0x3] sm:$0x1] %vm6136_vm0, %v6772_v28 }
 0xc9a   :  { %6783 = vst.msk [vmem:[#allocation3 + $0x3] sm:$0x1] %vm6146_vm9, %v6781_v15 }
 0xca0   :  { %v6757_v57 = vpop.permute.xlu1 %6756 }
 0xca1   :  { %6759 = vst.msk [vmem:[#allocation3 + $0x1] sm:$0x1] %vm6182_vm4, %v6757_v57 }
 0xca8   :  { %v6784_v0 = vld [vmem:[#allocation3] sm:$0xf] }
 0xca9   :  { %6814 = vst [vmem:[#allocation1] ss:$4 sm:$0xff] %v6784_v0 }
 0xcb0   :  { %v6815_v39 = vld.sshfl [vmem:[#allocation1] sm:$0xff pattern:$0x73625140]  ;;  %v6816_v5 = vld.sshfl [vmem:[#allocation1 + $0x8] sm:$0xff pattern:$0x73625140] }
 0xcb1   :  { %6836 = vmatmul.f32.vlgmr.msrb.gmra.mxu2 %v6815_v39  ;;  %7199 = vmatmul.msk.f32.vlgmr.msrb.gmra.mxu1 %vm3266_vm3, %v6816_v5  ;;  %vm6919_vm3 = vcmask 1043456  }
 0xcb2   :  { %7201 = vmatpush.msk.msrb.mxu0 %vm6919_vm3, %v6911_v30 }
 0xcb4   :  { %6932 = vmatpush.msrb.mxu0 %v6910_v44 }
 0xcb6   :  { %6933 = vmatpush.msrb.mxu0 %v6909_v22 }
 0xcb8   :  { %6934 = vmatpush.msrb.mxu0 %v6908_v42 }
 0xcba   :  { %6935 = vmatpush.msrb.mxu0 %v6907_v63 }
 0xcbc   :  { %6936 = vmatpush.msrb.mxu0 %v6906_v6 }
 0xcbe   :  { %6937 = vmatpush.msrb.mxu0 %v6905_v23 }
 0xcc0   :  { %6938 = vmatpush.msrb.mxu0 %v6904_v17 }
 0xd2e   :  { %v6857_v8 = vpop.f32.mrf.mxu1 }
 0xd34   :  { %v6837_v45 = vpop.f32.mrf.mxu2 }
 0xd35   :  { %v6838_v33 = vadd.f32 %v7431_v47, %v6837_v45 }
 0xd37   :  { %v6858_v26 = vadd.f32 %v6857_v8, %v6838_v33 }
 0xd39   :  { %v6860_v35 = vmax.f32 %v6858_v26, 0.0 }
 0xd3b   :  { %7200 = vmatmul.msk.f32.vlgmr.msrb.gmra.mxu3 %vm17787_vm2, %v6860_v35 }
 0xdbe   :  { %v6900_v32 = vpop.f32.mrf.mxu3 }
 0xdbf   :  { %v6901_v58 = vadd.f32 %v7432_v38, %v6900_v32 }
 0xdc1   :  { %v6903_v46 = vmax.f32 %v6901_v58, 0.0 }
 0xdc3   :  { %7202 = vmatmul.msk.f32.vlgmr.msrb.gmra.mxu0 %vm17788_vm6, %v6903_v46 }
 0xe40   :  { %v6940_v11 = vpop.f32.mrf.mxu0 }
 0xe41   :  { %v6941_v19 = vadd.f32 %v7433_v16, %v6940_v11 }
 0xe43   :  { %6944 = vst.msk [vmem:[#allocation4] sm:$0x3] %vm6943_vm14, %v6941_v19 }
 0xe44   :  { %6955 = dma.vmem_to_hbm [thread:$0]  %s6951_s22, 32, %s6953_s10, [#allocation5]  }
 0xe45   :  { %7476 = dma.done.wait [#allocation5], 32  }
 0xe46   :  { %7477 = vsyncadd [#allocation5], 4294967264 }
 0xe47   :  { %6960 = vsyncpa [#allocation5], 1 }

</bundles_post_ra>
